<compile_context>
chip_gen: v6e
topology: v6e:2x2x1
jax: 0.10.0
libtpu: 0.0.40
codegen_flags: <defaults>
</compile_context>

<pallas_src>
import jax
import jax.numpy as jnp
import numpy as np
from jax.experimental import pallas as pl
from jax.experimental.pallas import tpu as pltpu

BN_EPS = 1e-5  # PyTorch BatchNorm2d default


def encoder_block_kernel(x_ref, w_ref, gamma_ref, beta_ref, o_ref,
                         sum_sc, sumsq_sc, y_sc):
    phase = pl.program_id(0)   # 0 = accumulate BN stats, 1 = normalize + pool
    tile = pl.program_id(1)    # image index

    Hp, Wp, Cin = x_ref.shape
    H, W = Hp - 2, Wp - 2
    Ho, Wo = H // 2, W // 2
    Cout_p = o_ref.shape[-1]

    def compute_conv():
        # 3x3 conv as 9 shifted matmuls (bf16 operands, f32 MXU accumulation).
        acc = jnp.zeros((H * W, Cout_p), jnp.float32)
        for kh in range(3):
            for kw in range(3):
                xs = x_ref[kh:kh + H, kw:kw + W, :].reshape(H * W, Cin)
                acc = acc + jnp.dot(xs, w_ref[kh * 3 + kw],
                                    preferred_element_type=jnp.float32)
        return acc

    @pl.when((phase == 0) & (tile == 0))
    def _init_stats():
        sum_sc[...] = jnp.zeros(sum_sc.shape, sum_sc.dtype)
        sumsq_sc[...] = jnp.zeros(sumsq_sc.shape, sumsq_sc.dtype)

    @pl.when(phase == 0)
    def _accumulate_stats():
        conv = compute_conv()
        sum_sc[...] += jnp.sum(conv, axis=0, keepdims=True)
        sumsq_sc[...] += jnp.sum(conv * conv, axis=0, keepdims=True)
        # Deterministic placeholder (this block is fully rewritten in phase 1).
        o_ref[...] = jnp.zeros(o_ref.shape, o_ref.dtype)

    @pl.when(phase == 1)
    def _normalize_relu_pool():
        conv = compute_conv()

        # Fused train-mode BatchNorm: single-pass stats, single scale+shift.
        inv_n = 1.0 / (pl.num_programs(1) * H * W)
        mean = sum_sc[...] * inv_n                          # (1, Cout_p)
        var = sumsq_sc[...] * inv_n - mean * mean           # E[x^2] - mean^2
        a = gamma_ref[...] * jax.lax.rsqrt(var + BN_EPS)
        b = beta_ref[...] - mean * a
        y_sc[...] = jnp.maximum(conv * a + b, 0.0)          # BN + ReLU; rows = (h, w)

        # MaxPool2d(2,2), lane (channel) axis untouched:
        #   w-pool: max of even/odd sublane rows (stride-2 loads),
        #   h-pool: max of row blocks offset by Wo (outer-dim split, cheap vreg max).
        yw = jnp.maximum(y_sc[pl.ds(0, H * Wo, 2), :],
                         y_sc[pl.ds(1, H * Wo, 2), :])      # (H*Wo, Cout_p), rows (h, wo)
        yw = yw.reshape(Ho, 2 * Wo, Cout_p)
        yp = jnp.maximum(yw[:, :Wo, :], yw[:, Wo:, :])      # (Ho, Wo, Cout_p)
        o_ref[...] = yp.reshape(Ho * Wo, Cout_p)            # full 128-lane stores


def basic_encoder_block(x_nchw, weight, bias, gamma, beta):
    """x: (N, Cin, H, W) f32; weight: (Cout, Cin, 3, 3). Returns (N, Cout, H//2, W//2) f32."""
    N, Cin, H, W = x_nchw.shape
    Cout = weight.shape[0]
    assert H % 2 == 0 and W % 2 == 0, "MaxPool2d(2,2) path assumes even H, W"
    Ho, Wo = H // 2, W // 2
    Cout_p = ((Cout + 127) // 128) * 128  # lane-dense channel padding (>= 128)

    # NCHW -> NHWC + spatial zero-pad of 1 (the conv padding); bf16 MXU operands.
    x_nhwc = jnp.transpose(x_nchw, (0, 2, 3, 1))
    xp = jnp.pad(x_nhwc, ((0, 0), (1, 1), (1, 1), (0, 0))).astype(jnp.bfloat16)

    # weight (Cout, Cin, 3, 3) -> (9, Cin, Cout_p) with k = kh*3 + kw; zero-pad channels.
    w = jnp.transpose(weight, (2, 3, 1, 0)).reshape(9, Cin, Cout)
    w = jnp.pad(w, ((0, 0), (0, 0), (0, Cout_p - Cout))).astype(jnp.bfloat16)

    gamma_p = jnp.pad(gamma.astype(jnp.float32), (0, Cout_p - Cout)).reshape(1, Cout_p)
    beta_p = jnp.pad(beta.astype(jnp.float32), (0, Cout_p - Cout)).reshape(1, Cout_p)
    # Conv bias is intentionally unused: it is cancelled exactly by train-mode BatchNorm.
    del bias

    out2d = pl.pallas_call(
        encoder_block_kernel,
        grid=(2, N),  # (phase, image tile)
        in_specs=[
            # one padded image per tile; leading n-dim squeezed out of the kernel view
            pl.BlockSpec((None, H + 2, W + 2, Cin), lambda p, t: (t, 0, 0, 0)),
            pl.BlockSpec((9, Cin, Cout_p), lambda p, t: (0, 0, 0)),
            pl.BlockSpec((1, Cout_p), lambda p, t: (0, 0)),
            pl.BlockSpec((1, Cout_p), lambda p, t: (0, 0)),
        ],
        out_specs=pl.BlockSpec((Ho * Wo, Cout_p), lambda p, t: (t, 0)),
        out_shape=jax.ShapeDtypeStruct((N * Ho * Wo, Cout_p), jnp.float32),
        scratch_shapes=[
            pltpu.VMEM((1, Cout_p), jnp.float32),       # per-channel sum
            pltpu.VMEM((1, Cout_p), jnp.float32),       # per-channel sum of squares
            pltpu.VMEM((H * W, Cout_p), jnp.float32),   # BN+ReLU tile for pooling
        ],
        compiler_params=pltpu.CompilerParams(
            dimension_semantics=("arbitrary", "arbitrary"),
            vmem_limit_bytes=32 * 1024 * 1024,
        ),
    )(xp, w, gamma_p, beta_p)

    out = out2d.reshape(N, Ho, Wo, Cout_p)[..., :Cout]
    # TODO(synk): skip this NHWC->NCHW transpose when the consumer accepts NHWC
    # (saves one extra HBM round-trip of the activation).
    return jnp.transpose(out, (0, 3, 1, 2))


def reference_forward(x, weight, bias, gamma, beta):
    """Pure-JAX reference mirroring PyTorch semantics (train-mode BN), with the
    same bf16-operand / f32-accumulate conv precision as the kernel."""
    conv = jax.lax.conv_general_dilated(
        x.astype(jnp.bfloat16), weight.astype(jnp.bfloat16),
        window_strides=(1, 1), padding=[(1, 1), (1, 1)],
        dimension_numbers=('NCHW', 'OIHW', 'NCHW'),
        preferred_element_type=jnp.float32)
    conv = conv + bias.reshape(1, -1, 1, 1)
    mean = jnp.mean(conv, axis=(0, 2, 3), keepdims=True)
    var = jnp.mean((conv - mean) ** 2, axis=(0, 2, 3), keepdims=True)
    y = (conv - mean) * jax.lax.rsqrt(var + BN_EPS)
    y = y * gamma.reshape(1, -1, 1, 1) + beta.reshape(1, -1, 1, 1)
    y = jnp.maximum(y, 0.0)
    N, C, H, W = y.shape
    y = y.reshape(N, C, H // 2, 2, W // 2, 2)
    return jnp.max(jnp.max(y, axis=5), axis=3)


if __name__ == "__main__":
    N, Cin, Cout, H, W = 2, 4, 8, 16, 16

    key = jax.random.PRNGKey(0)
    kx, kw, kb, kg, kbeta = jax.random.split(key, 5)
    x = jax.random.normal(kx, (N, Cin, H, W), dtype=jnp.float32)
    weight = 0.1 * jax.random.normal(kw, (Cout, Cin, 3, 3), dtype=jnp.float32)
    bias = 0.1 * jax.random.normal(kb, (Cout,), dtype=jnp.float32)
    gamma = 1.0 + 0.1 * jax.random.normal(kg, (Cout,), dtype=jnp.float32)
    beta = 0.1 * jax.random.normal(kbeta, (Cout,), dtype=jnp.float32)

    out = jax.block_until_ready(basic_encoder_block(x, weight, bias, gamma, beta))
    ref = jax.block_until_ready(reference_forward(x, weight, bias, gamma, beta))

    assert out.shape == (N, Cout, H // 2, W // 2), out.shape
    np.testing.assert_allclose(np.asarray(out), np.asarray(ref), rtol=1e-3, atol=1e-3)

    print("KERNEL_OK")
</pallas_src>

<mosaic_0001>
module attributes {stable_mosaic.version = 11 : i64} {
  func.func @encoder_block_kernel(%arg0: i32, %arg1: i32, %arg2: memref<1x18x18x4xbf16, #tpu.memory_space<vmem>>, %arg3: memref<9x4x128xbf16, #tpu.memory_space<vmem>>, %arg4: memref<1x128xf32, #tpu.memory_space<vmem>>, %arg5: memref<1x128xf32, #tpu.memory_space<vmem>>, %arg6: memref<64x128xf32, #tpu.memory_space<vmem>>, %arg7: memref<1x128xf32, #tpu.memory_space<vmem>>, %arg8: memref<1x128xf32, #tpu.memory_space<vmem>>, %arg9: memref<256x128xf32, #tpu.memory_space<vmem>>) attributes {dimension_semantics = [#tpu.dimension_semantics<arbitrary>, #tpu.dimension_semantics<arbitrary>], iteration_bounds = array<i64: 2, 2>, scalar_prefetch = 0 : i64, scratch_operands = 3 : i64, tpu.core_type = #tpu.core_type<tc>, window_params = [{transform_indices = @transform_0, window_bounds = array<i64: 1, 18, 18, 4>}, {pipeline_mode = #tpu.pipeline_mode<synchronous>, transform_indices = @transform_1, window_bounds = array<i64: 9, 4, 128>}, {pipeline_mode = #tpu.pipeline_mode<synchronous>, transform_indices = @transform_2, window_bounds = array<i64: 1, 128>}, {pipeline_mode = #tpu.pipeline_mode<synchronous>, transform_indices = @transform_3, window_bounds = array<i64: 1, 128>}, {transform_indices = @transform_4, window_bounds = array<i64: 64, 128>}]} {
    %c0_i32 = arith.constant 0 : i32
    %0 = arith.cmpi eq, %arg0, %c0_i32 : i32
    %c0_i32_0 = arith.constant 0 : i32
    %1 = arith.cmpi eq, %arg1, %c0_i32_0 : i32
    %2 = arith.andi %0, %1 : i1
    %3 = arith.extui %2 : i1 to i32
    %c0_i32_1 = arith.constant 0 : i32
    %4 = arith.cmpi ne, %3, %c0_i32_1 : i32
    scf.if %4 {
      %cst = arith.constant 0.000000e+00 : f32
      %11 = vector.broadcast %cst : f32 to vector<1x128xf32>
      %c0 = arith.constant 0 : index
      %c0_5 = arith.constant 0 : index
      %12 = vector.load %arg7[%c0, %c0_5] : memref<1x128xf32, #tpu.memory_space<vmem>>, vector<1x128xf32>
      tpu.vector_store %arg7[%c0, %c0_5], %11 {strides = array<i32>} : memref<1x128xf32, #tpu.memory_space<vmem>>, vector<1x128xf32>,
      %cst_6 = arith.constant 0.000000e+00 : f32
      %13 = vector.broadcast %cst_6 : f32 to vector<1x128xf32>
      %c0_7 = arith.constant 0 : index
      %c0_8 = arith.constant 0 : index
      %14 = vector.load %arg8[%c0_7, %c0_8] : memref<1x128xf32, #tpu.memory_space<vmem>>, vector<1x128xf32>
      tpu.vector_store %arg8[%c0_7, %c0_8], %13 {strides = array<i32>} : memref<1x128xf32, #tpu.memory_space<vmem>>, vector<1x128xf32>,
    } else {
    }
    %c0_i32_2 = arith.constant 0 : i32
    %5 = arith.cmpi eq, %arg0, %c0_i32_2 : i32
    %6 = arith.extui %5 : i1 to i32
    %c0_i32_3 = arith.constant 0 : i32
    %7 = arith.cmpi ne, %6, %c0_i32_3 : i32
    scf.if %7 {
      %cst = arith.constant 0.000000e+00 : f32
      %11 = vector.broadcast %cst : f32 to vector<256x128xf32>
      %c0 = arith.constant 0 : index
      %c0_5 = arith.constant 0 : index
      %c0_6 = arith.constant 0 : index
      %c0_7 = arith.constant 0 : index
      %12 = vector.load %arg2[%c0, %c0_5, %c0_6, %c0_7] : memref<1x18x18x4xbf16, #tpu.memory_space<vmem>>, vector<1x16x16x4xbf16>
      %13 = vector.shape_cast %12 : vector<1x16x16x4xbf16> to vector<16x16x4xbf16>
      %14 = vector.shape_cast %13 : vector<16x16x4xbf16> to vector<256x4xbf16>
      %c0_8 = arith.constant 0 : index
      %c0_9 = arith.constant 0 : index
      %c0_10 = arith.constant 0 : index
      %15 = vector.load %arg3[%c0_8, %c0_9, %c0_10] : memref<9x4x128xbf16, #tpu.memory_space<vmem>>, vector<1x4x128xbf16>
      %16 = vector.shape_cast %15 : vector<1x4x128xbf16> to vector<4x128xbf16>
      %cst_11 = arith.constant dense<0.000000e+00> : vector<256x128xf32>
      %17 = tpu.matmul %14, %16, %cst_11 {dimension_numbers = #tpu.dot_dimension_numbers<[1], [0], [0], [1], [0, 0, 1, 1], [], []>} : vector<256x4xbf16>, vector<4x128xbf16>, vector<256x128xf32> -> vector<256x128xf32>
      %18 = arith.addf %11, %17 : vector<256x128xf32>
      %c0_12 = arith.constant 0 : index
      %c0_13 = arith.constant 0 : index
      %c1 = arith.constant 1 : index
      %c0_14 = arith.constant 0 : index
      %19 = vector.load %arg2[%c0_12, %c0_13, %c1, %c0_14] : memref<1x18x18x4xbf16, #tpu.memory_space<vmem>>, vector<1x16x16x4xbf16>
      %20 = vector.shape_cast %19 : vector<1x16x16x4xbf16> to vector<16x16x4xbf16>
      %21 = vector.shape_cast %20 : vector<16x16x4xbf16> to vector<256x4xbf16>
      %c1_15 = arith.constant 1 : index
      %c0_16 = arith.constant 0 : index
      %c0_17 = arith.constant 0 : index
      %22 = vector.load %arg3[%c1_15, %c0_16, %c0_17] : memref<9x4x128xbf16, #tpu.memory_space<vmem>>, vector<1x4x128xbf16>
      %23 = vector.shape_cast %22 : vector<1x4x128xbf16> to vector<4x128xbf16>
      %cst_18 = arith.constant dense<0.000000e+00> : vector<256x128xf32>
      %24 = tpu.matmul %21, %23, %cst_18 {dimension_numbers = #tpu.dot_dimension_numbers<[1], [0], [0], [1], [0, 0, 1, 1], [], []>} : vector<256x4xbf16>, vector<4x128xbf16>, vector<256x128xf32> -> vector<256x128xf32>
      %25 = arith.addf %18, %24 : vector<256x128xf32>
      %c0_19 = arith.constant 0 : index
      %c0_20 = arith.constant 0 : index
      %c2 = arith.constant 2 : index
      %c0_21 = arith.constant 0 : index
      %26 = vector.load %arg2[%c0_19, %c0_20, %c2, %c0_21] : memref<1x18x18x4xbf16, #tpu.memory_space<vmem>>, vector<1x16x16x4xbf16>
      %27 = vector.shape_cast %26 : vector<1x16x16x4xbf16> to vector<16x16x4xbf16>
      %28 = vector.shape_cast %27 : vector<16x16x4xbf16> to vector<256x4xbf16>
      %c2_22 = arith.constant 2 : index
      %c0_23 = arith.constant 0 : index
      %c0_24 = arith.constant 0 : index
      %29 = vector.load %arg3[%c2_22, %c0_23, %c0_24] : memref<9x4x128xbf16, #tpu.memory_space<vmem>>, vector<1x4x128xbf16>
      %30 = vector.shape_cast %29 : vector<1x4x128xbf16> to vector<4x128xbf16>
      %cst_25 = arith.constant dense<0.000000e+00> : vector<256x128xf32>
      %31 = tpu.matmul %28, %30, %cst_25 {dimension_numbers = #tpu.dot_dimension_numbers<[1], [0], [0], [1], [0, 0, 1, 1], [], []>} : vector<256x4xbf16>, vector<4x128xbf16>, vector<256x128xf32> -> vector<256x128xf32>
      %32 = arith.addf %25, %31 : vector<256x128xf32>
      %c0_26 = arith.constant 0 : index
      %c1_27 = arith.constant 1 : index
      %c0_28 = arith.constant 0 : index
      %c0_29 = arith.constant 0 : index
      %33 = vector.load %arg2[%c0_26, %c1_27, %c0_28, %c0_29] : memref<1x18x18x4xbf16, #tpu.memory_space<vmem>>, vector<1x16x16x4xbf16>
      %34 = vector.shape_cast %33 : vector<1x16x16x4xbf16> to vector<16x16x4xbf16>
      %35 = vector.shape_cast %34 : vector<16x16x4xbf16> to vector<256x4xbf16>
      %c3 = arith.constant 3 : index
      %c0_30 = arith.constant 0 : index
      %c0_31 = arith.constant 0 : index
      %36 = vector.load %arg3[%c3, %c0_30, %c0_31] : memref<9x4x128xbf16, #tpu.memory_space<vmem>>, vector<1x4x128xbf16>
      %37 = vector.shape_cast %36 : vector<1x4x128xbf16> to vector<4x128xbf16>
      %cst_32 = arith.constant dense<0.000000e+00> : vector<256x128xf32>
      %38 = tpu.matmul %35, %37, %cst_32 {dimension_numbers = #tpu.dot_dimension_numbers<[1], [0], [0], [1], [0, 0, 1, 1], [], []>} : vector<256x4xbf16>, vector<4x128xbf16>, vector<256x128xf32> -> vector<256x128xf32>
      %39 = arith.addf %32, %38 : vector<256x128xf32>
      %c0_33 = arith.constant 0 : index
      %c1_34 = arith.constant 1 : index
      %c1_35 = arith.constant 1 : index
      %c0_36 = arith.constant 0 : index
      %40 = vector.load %arg2[%c0_33, %c1_34, %c1_35, %c0_36] : memref<1x18x18x4xbf16, #tpu.memory_space<vmem>>, vector<1x16x16x4xbf16>
      %41 = vector.shape_cast %40 : vector<1x16x16x4xbf16> to vector<16x16x4xbf16>
      %42 = vector.shape_cast %41 : vector<16x16x4xbf16> to vector<256x4xbf16>
      %c4 = arith.constant 4 : index
      %c0_37 = arith.constant 0 : index
      %c0_38 = arith.constant 0 : index
      %43 = vector.load %arg3[%c4, %c0_37, %c0_38] : memref<9x4x128xbf16, #tpu.memory_space<vmem>>, vector<1x4x128xbf16>
      %44 = vector.shape_cast %43 : vector<1x4x128xbf16> to vector<4x128xbf16>
      %cst_39 = arith.constant dense<0.000000e+00> : vector<256x128xf32>
      %45 = tpu.matmul %42, %44, %cst_39 {dimension_numbers = #tpu.dot_dimension_numbers<[1], [0], [0], [1], [0, 0, 1, 1], [], []>} : vector<256x4xbf16>, vector<4x128xbf16>, vector<256x128xf32> -> vector<256x128xf32>
      %46 = arith.addf %39, %45 : vector<256x128xf32>
      %c0_40 = arith.constant 0 : index
      %c1_41 = arith.constant 1 : index
      %c2_42 = arith.constant 2 : index
      %c0_43 = arith.constant 0 : index
      %47 = vector.load %arg2[%c0_40, %c1_41, %c2_42, %c0_43] : memref<1x18x18x4xbf16, #tpu.memory_space<vmem>>, vector<1x16x16x4xbf16>
      %48 = vector.shape_cast %47 : vector<1x16x16x4xbf16> to vector<16x16x4xbf16>
      %49 = vector.shape_cast %48 : vector<16x16x4xbf16> to vector<256x4xbf16>
      %c5 = arith.constant 5 : index
      %c0_44 = arith.constant 0 : index
      %c0_45 = arith.constant 0 : index
      %50 = vector.load %arg3[%c5, %c0_44, %c0_45] : memref<9x4x128xbf16, #tpu.memory_space<vmem>>, vector<1x4x128xbf16>
      %51 = vector.shape_cast %50 : vector<1x4x128xbf16> to vector<4x128xbf16>
      %cst_46 = arith.constant dense<0.000000e+00> : vector<256x128xf32>
      %52 = tpu.matmul %49, %51, %cst_46 {dimension_numbers = #tpu.dot_dimension_numbers<[1], [0], [0], [1], [0, 0, 1, 1], [], []>} : vector<256x4xbf16>, vector<4x128xbf16>, vector<256x128xf32> -> vector<256x128xf32>
      %53 = arith.addf %46, %52 : vector<256x128xf32>
      %c0_47 = arith.constant 0 : index
      %c2_48 = arith.constant 2 : index
      %c0_49 = arith.constant 0 : index
      %c0_50 = arith.constant 0 : index
      %54 = vector.load %arg2[%c0_47, %c2_48, %c0_49, %c0_50] : memref<1x18x18x4xbf16, #tpu.memory_space<vmem>>, vector<1x16x16x4xbf16>
      %55 = vector.shape_cast %54 : vector<1x16x16x4xbf16> to vector<16x16x4xbf16>
      %56 = vector.shape_cast %55 : vector<16x16x4xbf16> to vector<256x4xbf16>
      %c6 = arith.constant 6 : index
      %c0_51 = arith.constant 0 : index
      %c0_52 = arith.constant 0 : index
      %57 = vector.load %arg3[%c6, %c0_51, %c0_52] : memref<9x4x128xbf16, #tpu.memory_space<vmem>>, vector<1x4x128xbf16>
      %58 = vector.shape_cast %57 : vector<1x4x128xbf16> to vector<4x128xbf16>
      %cst_53 = arith.constant dense<0.000000e+00> : vector<256x128xf32>
      %59 = tpu.matmul %56, %58, %cst_53 {dimension_numbers = #tpu.dot_dimension_numbers<[1], [0], [0], [1], [0, 0, 1, 1], [], []>} : vector<256x4xbf16>, vector<4x128xbf16>, vector<256x128xf32> -> vector<256x128xf32>
      %60 = arith.addf %53, %59 : vector<256x128xf32>
      %c0_54 = arith.constant 0 : index
      %c2_55 = arith.constant 2 : index
      %c1_56 = arith.constant 1 : index
      %c0_57 = arith.constant 0 : index
      %61 = vector.load %arg2[%c0_54, %c2_55, %c1_56, %c0_57] : memref<1x18x18x4xbf16, #tpu.memory_space<vmem>>, vector<1x16x16x4xbf16>
      %62 = vector.shape_cast %61 : vector<1x16x16x4xbf16> to vector<16x16x4xbf16>
      %63 = vector.shape_cast %62 : vector<16x16x4xbf16> to vector<256x4xbf16>
      %c7 = arith.constant 7 : index
      %c0_58 = arith.constant 0 : index
      %c0_59 = arith.constant 0 : index
      %64 = vector.load %arg3[%c7, %c0_58, %c0_59] : memref<9x4x128xbf16, #tpu.memory_space<vmem>>, vector<1x4x128xbf16>
      %65 = vector.shape_cast %64 : vector<1x4x128xbf16> to vector<4x128xbf16>
      %cst_60 = arith.constant dense<0.000000e+00> : vector<256x128xf32>
      %66 = tpu.matmul %63, %65, %cst_60 {dimension_numbers = #tpu.dot_dimension_numbers<[1], [0], [0], [1], [0, 0, 1, 1], [], []>} : vector<256x4xbf16>, vector<4x128xbf16>, vector<256x128xf32> -> vector<256x128xf32>
      %67 = arith.addf %60, %66 : vector<256x128xf32>
      %c0_61 = arith.constant 0 : index
      %c2_62 = arith.constant 2 : index
      %c2_63 = arith.constant 2 : index
      %c0_64 = arith.constant 0 : index
      %68 = vector.load %arg2[%c0_61, %c2_62, %c2_63, %c0_64] : memref<1x18x18x4xbf16, #tpu.memory_space<vmem>>, vector<1x16x16x4xbf16>
      %69 = vector.shape_cast %68 : vector<1x16x16x4xbf16> to vector<16x16x4xbf16>
      %70 = vector.shape_cast %69 : vector<16x16x4xbf16> to vector<256x4xbf16>
      %c8 = arith.constant 8 : index
      %c0_65 = arith.constant 0 : index
      %c0_66 = arith.constant 0 : index
      %71 = vector.load %arg3[%c8, %c0_65, %c0_66] : memref<9x4x128xbf16, #tpu.memory_space<vmem>>, vector<1x4x128xbf16>
      %72 = vector.shape_cast %71 : vector<1x4x128xbf16> to vector<4x128xbf16>
      %cst_67 = arith.constant dense<0.000000e+00> : vector<256x128xf32>
      %73 = tpu.matmul %70, %72, %cst_67 {dimension_numbers = #tpu.dot_dimension_numbers<[1], [0], [0], [1], [0, 0, 1, 1], [], []>} : vector<256x4xbf16>, vector<4x128xbf16>, vector<256x128xf32> -> vector<256x128xf32>
      %74 = arith.addf %67, %73 : vector<256x128xf32>
      %c0_68 = arith.constant 0 : index
      %c0_69 = arith.constant 0 : index
      %75 = vector.load %arg7[%c0_68, %c0_69] : memref<1x128xf32, #tpu.memory_space<vmem>>, vector<1x128xf32>
      %cst_70 = arith.constant dense<0.000000e+00> : vector<128xf32>
      %76 = vector.multi_reduction <add>, %74, %cst_70 [0] : vector<256x128xf32> to vector<128xf32>
      %77 = vector.shape_cast %76 : vector<128xf32> to vector<1x128xf32>
      %78 = arith.addf %75, %77 : vector<1x128xf32>
      %c0_71 = arith.constant 0 : index
      %c0_72 = arith.constant 0 : index
      %79 = vector.load %arg7[%c0_71, %c0_72] : memref<1x128xf32, #tpu.memory_space<vmem>>, vector<1x128xf32>
      tpu.vector_store %arg7[%c0_71, %c0_72], %78 {strides = array<i32>} : memref<1x128xf32, #tpu.memory_space<vmem>>, vector<1x128xf32>,
      %c0_73 = arith.constant 0 : index
      %c0_74 = arith.constant 0 : index
      %80 = vector.load %arg8[%c0_73, %c0_74] : memref<1x128xf32, #tpu.memory_space<vmem>>, vector<1x128xf32>
      %81 = arith.mulf %74, %74 : vector<256x128xf32>
      %cst_75 = arith.constant dense<0.000000e+00> : vector<128xf32>
      %82 = vector.multi_reduction <add>, %81, %cst_75 [0] : vector<256x128xf32> to vector<128xf32>
      %83 = vector.shape_cast %82 : vector<128xf32> to vector<1x128xf32>
      %84 = arith.addf %80, %83 : vector<1x128xf32>
      %c0_76 = arith.constant 0 : index
      %c0_77 = arith.constant 0 : index
      %85 = vector.load %arg8[%c0_76, %c0_77] : memref<1x128xf32, #tpu.memory_space<vmem>>, vector<1x128xf32>
      tpu.vector_store %arg8[%c0_76, %c0_77], %84 {strides = array<i32>} : memref<1x128xf32, #tpu.memory_space<vmem>>, vector<1x128xf32>,
      %cst_78 = arith.constant 0.000000e+00 : f32
      %86 = vector.broadcast %cst_78 : f32 to vector<64x128xf32>
      %c0_79 = arith.constant 0 : index
      %c0_80 = arith.constant 0 : index
      %87 = vector.load %arg6[%c0_79, %c0_80] : memref<64x128xf32, #tpu.memory_space<vmem>>, vector<64x128xf32>
      tpu.vector_store %arg6[%c0_79, %c0_80], %86 {strides = array<i32>} : memref<64x128xf32, #tpu.memory_space<vmem>>, vector<64x128xf32>,
    } else {
    }
    %c1_i32 = arith.constant 1 : i32
    %8 = arith.cmpi eq, %arg0, %c1_i32 : i32
    %9 = arith.extui %8 : i1 to i32
    %c0_i32_4 = arith.constant 0 : i32
    %10 = arith.cmpi ne, %9, %c0_i32_4 : i32
    scf.if %10 {
      %cst = arith.constant 0.000000e+00 : f32
      %11 = vector.broadcast %cst : f32 to vector<256x128xf32>
      %c0 = arith.constant 0 : index
      %c0_5 = arith.constant 0 : index
      %c0_6 = arith.constant 0 : index
      %c0_7 = arith.constant 0 : index
      %12 = vector.load %arg2[%c0, %c0_5, %c0_6, %c0_7] : memref<1x18x18x4xbf16, #tpu.memory_space<vmem>>, vector<1x16x16x4xbf16>
      %13 = vector.shape_cast %12 : vector<1x16x16x4xbf16> to vector<16x16x4xbf16>
      %14 = vector.shape_cast %13 : vector<16x16x4xbf16> to vector<256x4xbf16>
      %c0_8 = arith.constant 0 : index
      %c0_9 = arith.constant 0 : index
      %c0_10 = arith.constant 0 : index
      %15 = vector.load %arg3[%c0_8, %c0_9, %c0_10] : memref<9x4x128xbf16, #tpu.memory_space<vmem>>, vector<1x4x128xbf16>
      %16 = vector.shape_cast %15 : vector<1x4x128xbf16> to vector<4x128xbf16>
      %cst_11 = arith.constant dense<0.000000e+00> : vector<256x128xf32>
      %17 = tpu.matmul %14, %16, %cst_11 {dimension_numbers = #tpu.dot_dimension_numbers<[1], [0], [0], [1], [0, 0, 1, 1], [], []>} : vector<256x4xbf16>, vector<4x128xbf16>, vector<256x128xf32> -> vector<256x128xf32>
      %18 = arith.addf %11, %17 : vector<256x128xf32>
      %c0_12 = arith.constant 0 : index
      %c0_13 = arith.constant 0 : index
      %c1 = arith.constant 1 : index
      %c0_14 = arith.constant 0 : index
      %19 = vector.load %arg2[%c0_12, %c0_13, %c1, %c0_14] : memref<1x18x18x4xbf16, #tpu.memory_space<vmem>>, vector<1x16x16x4xbf16>
      %20 = vector.shape_cast %19 : vector<1x16x16x4xbf16> to vector<16x16x4xbf16>
      %21 = vector.shape_cast %20 : vector<16x16x4xbf16> to vector<256x4xbf16>
      %c1_15 = arith.constant 1 : index
      %c0_16 = arith.constant 0 : index
      %c0_17 = arith.constant 0 : index
      %22 = vector.load %arg3[%c1_15, %c0_16, %c0_17] : memref<9x4x128xbf16, #tpu.memory_space<vmem>>, vector<1x4x128xbf16>
      %23 = vector.shape_cast %22 : vector<1x4x128xbf16> to vector<4x128xbf16>
      %cst_18 = arith.constant dense<0.000000e+00> : vector<256x128xf32>
      %24 = tpu.matmul %21, %23, %cst_18 {dimension_numbers = #tpu.dot_dimension_numbers<[1], [0], [0], [1], [0, 0, 1, 1], [], []>} : vector<256x4xbf16>, vector<4x128xbf16>, vector<256x128xf32> -> vector<256x128xf32>
      %25 = arith.addf %18, %24 : vector<256x128xf32>
      %c0_19 = arith.constant 0 : index
      %c0_20 = arith.constant 0 : index
      %c2 = arith.constant 2 : index
      %c0_21 = arith.constant 0 : index
      %26 = vector.load %arg2[%c0_19, %c0_20, %c2, %c0_21] : memref<1x18x18x4xbf16, #tpu.memory_space<vmem>>, vector<1x16x16x4xbf16>
      %27 = vector.shape_cast %26 : vector<1x16x16x4xbf16> to vector<16x16x4xbf16>
      %28 = vector.shape_cast %27 : vector<16x16x4xbf16> to vector<256x4xbf16>
      %c2_22 = arith.constant 2 : index
      %c0_23 = arith.constant 0 : index
      %c0_24 = arith.constant 0 : index
      %29 = vector.load %arg3[%c2_22, %c0_23, %c0_24] : memref<9x4x128xbf16, #tpu.memory_space<vmem>>, vector<1x4x128xbf16>
      %30 = vector.shape_cast %29 : vector<1x4x128xbf16> to vector<4x128xbf16>
      %cst_25 = arith.constant dense<0.000000e+00> : vector<256x128xf32>
      %31 = tpu.matmul %28, %30, %cst_25 {dimension_numbers = #tpu.dot_dimension_numbers<[1], [0], [0], [1], [0, 0, 1, 1], [], []>} : vector<256x4xbf16>, vector<4x128xbf16>, vector<256x128xf32> -> vector<256x128xf32>
      %32 = arith.addf %25, %31 : vector<256x128xf32>
      %c0_26 = arith.constant 0 : index
      %c1_27 = arith.constant 1 : index
      %c0_28 = arith.constant 0 : index
      %c0_29 = arith.constant 0 : index
      %33 = vector.load %arg2[%c0_26, %c1_27, %c0_28, %c0_29] : memref<1x18x18x4xbf16, #tpu.memory_space<vmem>>, vector<1x16x16x4xbf16>
      %34 = vector.shape_cast %33 : vector<1x16x16x4xbf16> to vector<16x16x4xbf16>
      %35 = vector.shape_cast %34 : vector<16x16x4xbf16> to vector<256x4xbf16>
      %c3 = arith.constant 3 : index
      %c0_30 = arith.constant 0 : index
      %c0_31 = arith.constant 0 : index
      %36 = vector.load %arg3[%c3, %c0_30, %c0_31] : memref<9x4x128xbf16, #tpu.memory_space<vmem>>, vector<1x4x128xbf16>
      %37 = vector.shape_cast %36 : vector<1x4x128xbf16> to vector<4x128xbf16>
      %cst_32 = arith.constant dense<0.000000e+00> : vector<256x128xf32>
      %38 = tpu.matmul %35, %37, %cst_32 {dimension_numbers = #tpu.dot_dimension_numbers<[1], [0], [0], [1], [0, 0, 1, 1], [], []>} : vector<256x4xbf16>, vector<4x128xbf16>, vector<256x128xf32> -> vector<256x128xf32>
      %39 = arith.addf %32, %38 : vector<256x128xf32>
      %c0_33 = arith.constant 0 : index
      %c1_34 = arith.constant 1 : index
      %c1_35 = arith.constant 1 : index
      %c0_36 = arith.constant 0 : index
      %40 = vector.load %arg2[%c0_33, %c1_34, %c1_35, %c0_36] : memref<1x18x18x4xbf16, #tpu.memory_space<vmem>>, vector<1x16x16x4xbf16>
      %41 = vector.shape_cast %40 : vector<1x16x16x4xbf16> to vector<16x16x4xbf16>
      %42 = vector.shape_cast %41 : vector<16x16x4xbf16> to vector<256x4xbf16>
      %c4 = arith.constant 4 : index
      %c0_37 = arith.constant 0 : index
      %c0_38 = arith.constant 0 : index
      %43 = vector.load %arg3[%c4, %c0_37, %c0_38] : memref<9x4x128xbf16, #tpu.memory_space<vmem>>, vector<1x4x128xbf16>
      %44 = vector.shape_cast %43 : vector<1x4x128xbf16> to vector<4x128xbf16>
      %cst_39 = arith.constant dense<0.000000e+00> : vector<256x128xf32>
      %45 = tpu.matmul %42, %44, %cst_39 {dimension_numbers = #tpu.dot_dimension_numbers<[1], [0], [0], [1], [0, 0, 1, 1], [], []>} : vector<256x4xbf16>, vector<4x128xbf16>, vector<256x128xf32> -> vector<256x128xf32>
      %46 = arith.addf %39, %45 : vector<256x128xf32>
      %c0_40 = arith.constant 0 : index
      %c1_41 = arith.constant 1 : index
      %c2_42 = arith.constant 2 : index
      %c0_43 = arith.constant 0 : index
      %47 = vector.load %arg2[%c0_40, %c1_41, %c2_42, %c0_43] : memref<1x18x18x4xbf16, #tpu.memory_space<vmem>>, vector<1x16x16x4xbf16>
      %48 = vector.shape_cast %47 : vector<1x16x16x4xbf16> to vector<16x16x4xbf16>
      %49 = vector.shape_cast %48 : vector<16x16x4xbf16> to vector<256x4xbf16>
      %c5 = arith.constant 5 : index
      %c0_44 = arith.constant 0 : index
      %c0_45 = arith.constant 0 : index
      %50 = vector.load %arg3[%c5, %c0_44, %c0_45] : memref<9x4x128xbf16, #tpu.memory_space<vmem>>, vector<1x4x128xbf16>
      %51 = vector.shape_cast %50 : vector<1x4x128xbf16> to vector<4x128xbf16>
      %cst_46 = arith.constant dense<0.000000e+00> : vector<256x128xf32>
      %52 = tpu.matmul %49, %51, %cst_46 {dimension_numbers = #tpu.dot_dimension_numbers<[1], [0], [0], [1], [0, 0, 1, 1], [], []>} : vector<256x4xbf16>, vector<4x128xbf16>, vector<256x128xf32> -> vector<256x128xf32>
      %53 = arith.addf %46, %52 : vector<256x128xf32>
      %c0_47 = arith.constant 0 : index
      %c2_48 = arith.constant 2 : index
      %c0_49 = arith.constant 0 : index
      %c0_50 = arith.constant 0 : index
      %54 = vector.load %arg2[%c0_47, %c2_48, %c0_49, %c0_50] : memref<1x18x18x4xbf16, #tpu.memory_space<vmem>>, vector<1x16x16x4xbf16>
      %55 = vector.shape_cast %54 : vector<1x16x16x4xbf16> to vector<16x16x4xbf16>
      %56 = vector.shape_cast %55 : vector<16x16x4xbf16> to vector<256x4xbf16>
      %c6 = arith.constant 6 : index
      %c0_51 = arith.constant 0 : index
      %c0_52 = arith.constant 0 : index
      %57 = vector.load %arg3[%c6, %c0_51, %c0_52] : memref<9x4x128xbf16, #tpu.memory_space<vmem>>, vector<1x4x128xbf16>
      %58 = vector.shape_cast %57 : vector<1x4x128xbf16> to vector<4x128xbf16>
      %cst_53 = arith.constant dense<0.000000e+00> : vector<256x128xf32>
      %59 = tpu.matmul %56, %58, %cst_53 {dimension_numbers = #tpu.dot_dimension_numbers<[1], [0], [0], [1], [0, 0, 1, 1], [], []>} : vector<256x4xbf16>, vector<4x128xbf16>, vector<256x128xf32> -> vector<256x128xf32>
      %60 = arith.addf %53, %59 : vector<256x128xf32>
      %c0_54 = arith.constant 0 : index
      %c2_55 = arith.constant 2 : index
      %c1_56 = arith.constant 1 : index
      %c0_57 = arith.constant 0 : index
      %61 = vector.load %arg2[%c0_54, %c2_55, %c1_56, %c0_57] : memref<1x18x18x4xbf16, #tpu.memory_space<vmem>>, vector<1x16x16x4xbf16>
      %62 = vector.shape_cast %61 : vector<1x16x16x4xbf16> to vector<16x16x4xbf16>
      %63 = vector.shape_cast %62 : vector<16x16x4xbf16> to vector<256x4xbf16>
      %c7 = arith.constant 7 : index
      %c0_58 = arith.constant 0 : index
      %c0_59 = arith.constant 0 : index
      %64 = vector.load %arg3[%c7, %c0_58, %c0_59] : memref<9x4x128xbf16, #tpu.memory_space<vmem>>, vector<1x4x128xbf16>
      %65 = vector.shape_cast %64 : vector<1x4x128xbf16> to vector<4x128xbf16>
      %cst_60 = arith.constant dense<0.000000e+00> : vector<256x128xf32>
      %66 = tpu.matmul %63, %65, %cst_60 {dimension_numbers = #tpu.dot_dimension_numbers<[1], [0], [0], [1], [0, 0, 1, 1], [], []>} : vector<256x4xbf16>, vector<4x128xbf16>, vector<256x128xf32> -> vector<256x128xf32>
      %67 = arith.addf %60, %66 : vector<256x128xf32>
      %c0_61 = arith.constant 0 : index
      %c2_62 = arith.constant 2 : index
      %c2_63 = arith.constant 2 : index
      %c0_64 = arith.constant 0 : index
      %68 = vector.load %arg2[%c0_61, %c2_62, %c2_63, %c0_64] : memref<1x18x18x4xbf16, #tpu.memory_space<vmem>>, vector<1x16x16x4xbf16>
      %69 = vector.shape_cast %68 : vector<1x16x16x4xbf16> to vector<16x16x4xbf16>
      %70 = vector.shape_cast %69 : vector<16x16x4xbf16> to vector<256x4xbf16>
      %c8 = arith.constant 8 : index
      %c0_65 = arith.constant 0 : index
      %c0_66 = arith.constant 0 : index
      %71 = vector.load %arg3[%c8, %c0_65, %c0_66] : memref<9x4x128xbf16, #tpu.memory_space<vmem>>, vector<1x4x128xbf16>
      %72 = vector.shape_cast %71 : vector<1x4x128xbf16> to vector<4x128xbf16>
      %cst_67 = arith.constant dense<0.000000e+00> : vector<256x128xf32>
      %73 = tpu.matmul %70, %72, %cst_67 {dimension_numbers = #tpu.dot_dimension_numbers<[1], [0], [0], [1], [0, 0, 1, 1], [], []>} : vector<256x4xbf16>, vector<4x128xbf16>, vector<256x128xf32> -> vector<256x128xf32>
      %74 = arith.addf %67, %73 : vector<256x128xf32>
      %c0_68 = arith.constant 0 : index
      %c0_69 = arith.constant 0 : index
      %75 = vector.load %arg7[%c0_68, %c0_69] : memref<1x128xf32, #tpu.memory_space<vmem>>, vector<1x128xf32>
      %cst_70 = arith.constant 0.001953125 : f32
      %76 = vector.broadcast %cst_70 : f32 to vector<1x128xf32>
      %77 = arith.mulf %75, %76 : vector<1x128xf32>
      %c0_71 = arith.constant 0 : index
      %c0_72 = arith.constant 0 : index
      %78 = vector.load %arg8[%c0_71, %c0_72] : memref<1x128xf32, #tpu.memory_space<vmem>>, vector<1x128xf32>
      %cst_73 = arith.constant 0.001953125 : f32
      %79 = vector.broadcast %cst_73 : f32 to vector<1x128xf32>
      %80 = arith.mulf %78, %79 : vector<1x128xf32>
      %81 = arith.mulf %77, %77 : vector<1x128xf32>
      %82 = arith.subf %80, %81 : vector<1x128xf32>
      %c0_74 = arith.constant 0 : index
      %c0_75 = arith.constant 0 : index
      %83 = vector.load %arg4[%c0_74, %c0_75] : memref<1x128xf32, #tpu.memory_space<vmem>>, vector<1x128xf32>
      %cst_76 = arith.constant 9.99999974E-6 : f32
      %84 = vector.broadcast %cst_76 : f32 to vector<1x128xf32>
      %85 = arith.addf %82, %84 : vector<1x128xf32>
      %86 = math.rsqrt %85 : vector<1x128xf32>
      %87 = arith.mulf %83, %86 : vector<1x128xf32>
      %c0_77 = arith.constant 0 : index
      %c0_78 = arith.constant 0 : index
      %88 = vector.load %arg5[%c0_77, %c0_78] : memref<1x128xf32, #tpu.memory_space<vmem>>, vector<1x128xf32>
      %89 = arith.mulf %77, %87 : vector<1x128xf32>
      %90 = arith.subf %88, %89 : vector<1x128xf32>
      %91 = vector.broadcast %87 : vector<1x128xf32> to vector<256x128xf32>
      %92 = arith.mulf %74, %91 : vector<256x128xf32>
      %93 = vector.broadcast %90 : vector<1x128xf32> to vector<256x128xf32>
      %94 = arith.addf %92, %93 : vector<256x128xf32>
      %cst_79 = arith.constant 0.000000e+00 : f32
      %95 = vector.broadcast %cst_79 : f32 to vector<256x128xf32>
      %96 = arith.maximumf %94, %95 : vector<256x128xf32>
      %c0_80 = arith.constant 0 : index
      %c0_81 = arith.constant 0 : index
      %97 = vector.load %arg9[%c0_80, %c0_81] : memref<256x128xf32, #tpu.memory_space<vmem>>, vector<256x128xf32>
      tpu.vector_store %arg9[%c0_80, %c0_81], %96 {strides = array<i32>} : memref<256x128xf32, #tpu.memory_space<vmem>>, vector<256x128xf32>,
      %c0_82 = arith.constant 0 : index
      %c0_83 = arith.constant 0 : index
      %98 = tpu.strided_load %arg9[%c0_82, %c0_83] {strides = array<i32: 2, 1>} : memref<256x128xf32, #tpu.memory_space<vmem>>, vector<128x128xf32>
      %c1_84 = arith.constant 1 : index
      %c0_85 = arith.constant 0 : index
      %99 = tpu.strided_load %arg9[%c1_84, %c0_85] {strides = array<i32: 2, 1>} : memref<256x128xf32, #tpu.memory_space<vmem>>, vector<128x128xf32>
      %100 = arith.maximumf %98, %99 : vector<128x128xf32>
      %101 = vector.shape_cast %100 : vector<128x128xf32> to vector<8x16x128xf32>
      %102 = vector.extract_strided_slice %101 {offsets = [0, 0, 0], sizes = [8, 8, 128], strides = [1, 1, 1]} : vector<8x16x128xf32> to vector<8x8x128xf32>
      %103 = vector.extract_strided_slice %101 {offsets = [0, 8, 0], sizes = [8, 8, 128], strides = [1, 1, 1]} : vector<8x16x128xf32> to vector<8x8x128xf32>
      %104 = arith.maximumf %102, %103 : vector<8x8x128xf32>
      %105 = vector.shape_cast %104 : vector<8x8x128xf32> to vector<64x128xf32>
      %c0_86 = arith.constant 0 : index
      %c0_87 = arith.constant 0 : index
      %106 = vector.load %arg6[%c0_86, %c0_87] : memref<64x128xf32, #tpu.memory_space<vmem>>, vector<64x128xf32>
      tpu.vector_store %arg6[%c0_86, %c0_87], %105 {strides = array<i32>} : memref<64x128xf32, #tpu.memory_space<vmem>>, vector<64x128xf32>,
    } else {
    }
    return
  }
  func.func @transform_0(%arg0: i32, %arg1: i32) -> (i32, i32, i32, i32) {
    %c0_i32 = arith.constant 0 : i32
    %c0_i32_0 = arith.constant 0 : i32
    %c0_i32_1 = arith.constant 0 : i32
    %c0_i32_2 = arith.constant 0 : i32
    return %arg1, %c0_i32, %c0_i32_0, %c0_i32_1 : i32, i32, i32, i32
  }
  func.func @transform_1(%arg0: i32, %arg1: i32) -> (i32, i32, i32) {
    %c0_i32 = arith.constant 0 : i32
    %c0_i32_0 = arith.constant 0 : i32
    %c0_i32_1 = arith.constant 0 : i32
    %c0_i32_2 = arith.constant 0 : i32
    return %c0_i32, %c0_i32_0, %c0_i32_1 : i32, i32, i32
  }
  func.func @transform_2(%arg0: i32, %arg1: i32) -> (i32, i32) {
    %c0_i32 = arith.constant 0 : i32
    %c0_i32_0 = arith.constant 0 : i32
    %c0_i32_1 = arith.constant 0 : i32
    return %c0_i32, %c0_i32_0 : i32, i32
  }
  func.func @transform_3(%arg0: i32, %arg1: i32) -> (i32, i32) {
    %c0_i32 = arith.constant 0 : i32
    %c0_i32_0 = arith.constant 0 : i32
    %c0_i32_1 = arith.constant 0 : i32
    return %c0_i32, %c0_i32_0 : i32, i32
  }
  func.func @transform_4(%arg0: i32, %arg1: i32) -> (i32, i32) {
    %c0_i32 = arith.constant 0 : i32
    %c0_i32_0 = arith.constant 0 : i32
    return %arg1, %c0_i32 : i32, i32
  }
}

</mosaic_0001>

<bundles_post_ra>
// kernel: tpu_custom_call.1
= control target key start
LH: loop header
LB: loop body
LE: loop exit
PB: predicated region body
PF: predicated region fallthrough
CT: control target
= control target key end

     0   :  { %9 = vsyncpa [#allocation6], 0  ;;  %s17289_s0 = inlined_call_operand.vmem [shape: bf16[2,18,18,4], index: 0, kind: input, shape index: {}]   ;;  %s17290_s1 = inlined_call_operand.vmem [shape: bf16[9,4,128], index: 1, kind: input, shape index: {}]   ;;  %s17291_s2 = inlined_call_operand.vmem [shape: f32[1,128], index: 2, kind: input, shape index: {}]   ;;  %s17292_s3 = inlined_call_operand.vmem [shape: f32[1,128], index: 3, kind: input, shape index: {}]   ;;  %s17293_s4 = inlined_call_operand.hbm [shape: f32[128,128], index: 4, kind: output, shape index: {}]  }
   0x1   :  { %11 = vsyncpa [#allocation6 + $0x1], 0  ;;  %s12127_s15 = smov 0   ;;  %s12129_s16 = smov 0  }
   0x2   :  { %s12131_s17 = smov 0   ;;  %s12133_s18 = smov 0  }
   0x3   :  { %s12135_s19 = smov 0   ;;  %s12137_s20 = smov 0  }
   0x4   :  { %s12139_s21 = smov 0   ;;  %s12141_s22 = smov 0  }
   0x5 LB: > { %s9798_s23 = sadd.s32 4294967295, %s12095_s22   ;;  %s9799_s24 = sadd.s32 4294967294, %s12095_s22   ;;  %s12095_s22 = sphi %s12141_s22, %s17_s22   ;;  %s12091_s21 = sphi %s12139_s21, %s17738_s21   ;;  %s12087_s20 = sphi %s12137_s20, %s17737_s20   ;;  %s12083_s19 = sphi %s12135_s19, %s17736_s19   ;;  %s12079_s18 = sphi %s12133_s18, %s17735_s18   ;;  %s12075_s17 = sphi %s12131_s17, %s17734_s17   ;;  %s12071_s16 = sphi %s12129_s16, %s17733_s16   ;;  %s12067_s15 = sphi %s12127_s15, %s17732_s15  }
   0x6   : > { %s26_s25 = sadd.s32 1, %s12087_s20  ;;  %s29_s26 = sadd.s32 1, %s12091_s21 }
   0x7   : > { %p27_p0 = scmp.ge.s32.totalorder %s26_s25, 2  ;;  %s125_s27 = sadd.s32 1, %s12075_s17 }
   0x8   : > { %p135_p1 = scmp.ne.s32.totalorder %s12075_s17, %s12071_s16  ;;  %p136_p2 = scmp.eq.s32.totalorder %s9798_s23, 3 }
   0x9   : > { %s17740_s25 = smov (%p27_p0, %s26_s25), 0  ;;  %s17742_s26 = smov (!%p27_p0, %s29_s26), %s12091_s21 }
   0xa   : > { %s122_s28 = ssub.s32 %s12087_s20, %s17740_s25  ;;  %p12179_p3 = por %p136_p2, %p135_p1 }
   0xb   : > { %p31_p4 = scmp.ge.s32.totalorder %s17742_s26, 2  ;;  %p123_p5 = scmp.eq.s32.totalorder %s122_s28, 0 }
   0xc   : > { %p141_p6 = scmp.ne.s32.totalorder %s12071_s16, %s12067_s15  ;;  %p142_p7 = scmp.eq.s32.totalorder %s9799_s24, 3 }
   0xd   : > { %s17744_s26 = smov (%p31_p4, %s17742_s26), 0  ;;  %p9802_p9 = scmp.ge.s32.totalorder %s12095_s22, 1 }
   0xe   : > { %s12188_s30 = scalar_select %p123_p5, %s12075_s17, %s125_s27  }
   0xf   : > { %p12190_p8 = por %p142_p7, %p141_p6  ;;  %p177_p10 = scmp.lt.s32.totalorder %s12095_s22, 5 }
  0x11   : > { %p178_p11 = pnand %p9802_p9, %p177_p10 }
  0x12   : > { %s200_s6 = sand.u32 (!%p178_p11), 1, %s12071_s16   ;;  %p203_p12 = scmp.lt.s32.totalorder (!%p178_p11), %s12079_s18, 1 }
  0x13   : > { %181 = sbr.rel (%p178_p11) target bundleno = 1184 (0x4a0), region = 36  ;;  %s9803_s7 = sshll.u32 (!%p178_p11), %s200_s6, 6 }
  0x14   : > { %p210_p13 = scmp.eq.s32.totalorder (!%p178_p11), %s12083_s19, 0  ;;  %p211_p0 = scmp.eq.s32.totalorder (!%p178_p11), %s12079_s18, 0 }
  0x15   : > { %s12208_s13 = scalar_lea.vmem (!%p178_p11), [#allocation5], %s9803_s7 }
  0x16   : > { %p212_p1 = pnand (!%p178_p11), %p211_p0, %p210_p13 }
  0x18   : > { %s204_s8 = scalar_select %p203_p12, %s12079_s18, 1 }
  0x19   : > { %215 = sbr.rel (%p212_p1) target bundleno = 32 (0x20), region = 40 }
  0x1a   : > { %s11827_s9 = smul.u32 216, %s204_s8 }
  0x1c   : > { %s12206_s12 = scalar_lea.vmem %s17289_s0, %s11827_s9 }
  0x1e   : > { %v12097_v0 = vmov 0.0  }
  0x1f   : > { %216 = vst [vmem:[#allocation2] sm:$0x1] %v12097_v0  ;;  %217 = vst [vmem:[#allocation3] sm:$0x1] %v12097_v0 }
  0x20 PF: > { %p9805_p2 = scmp.ne.s32.totalorder %s12083_s19, 0 }
  0x22   : > { %220 = sbr.rel (%p9805_p2) target bundleno = 598 (0x256), region = 44 }
  0x27   : > { %v9806_v1 = vld [vmem:[%s17290_s1 + $0x2] sm:$0x3]  ;;  %vm756_vm0 = vcmask 1041408   ;;  %v12221_v4 = vld [vmem:[%s12206_s12 + $0x4] sm:$0xf]  ;;  %vm707_vm3 = vcmask 31744  }
  0x28   : > { %v12215_v2 = vld [vmem:[%s12206_s12] sm:$0xf]  ;;  %11808 = vmatprep.subr.msk.bf16.mxu1 %vm756_vm0, %v9806_v1  ;;  %11807 = vmatprep.subr.msk.bf16.mxu0 %vm756_vm0, %v9806_v1  ;;  %v758_v3 = vsel %vm756_vm0, %v9806_v1, 0  ;;  %v12224_v5 = vld [vmem:[%s12206_s12 + $0x8] sm:$0x1]  ;;  %v283_v8 = vshll.u32 %v12221_v4, 16 }
  0x29   : > { %v274_v6 = vshrl.u32 %v12215_v2, 16  ;;  %11804 = vmatpush3.bf16.msra.mxu1 %v758_v3  ;;  %11192 = vmatpush3.bf16.msra.mxu0 %v758_v3  ;;  %vm270_vm1 = vsmask.f32 3328  ;;  %vm271_vm2 = vsmask.f32 7440  ;;  %v277_v7 = vshll.u32 %v12215_v2, 16 }
  0x2a   : > { %v287_v10 = vshrl.u32 %v12221_v4, 16  ;;  %v293_v11 = vshll.u32 %v12224_v5, 16  ;;  %v12232_v12 = vld [vmem:[%s12206_s12 + $0x60] sm:$0xf]  ;;  %v285_v14 = vrot.slane %v283_v8, 5  ;;  %vm12255_vm4 = vmor %vm270_vm1, %vm271_vm2  ;;  %vm1261_vm5 = vcmask 1042432  }
  0x2b   : > { %v276_v9 = vrot.slane %v274_v6, 4  ;;  %v279_v13 = vrot.slane %v277_v7, 5  ;;  %v12235_v15 = vld [vmem:[%s12206_s12 + $0x64] sm:$0xf]  ;;  %v12238_v16 = vld [vmem:[%s12206_s12 + $0x68] sm:$0x1] }
  0x2c   : > { %v289_v17 = vrot.slane %v287_v10, 4  ;;  %v466_v19 = vshrl.u32 %v12232_v12, 16  ;;  %v469_v20 = vshll.u32 %v12232_v12, 16  ;;  %v253_v21 = vld [vmem:[%s17290_s1] sm:$0x3]  ;;  %v475_v23 = vshll.u32 %v12235_v15, 16 }
  0x2d   : > { %v280_v22 = vor.u32 %v279_v13, %v276_v9  ;;  %v479_v24 = vshrl.u32 %v12235_v15, 16  ;;  %v485_v25 = vshll.u32 %v12238_v16, 16  ;;  %11809 = vmatprep.subr.msk.bf16.mxu1 %vm756_vm0, %v253_v21  ;;  %v12251_v26 = vld [vmem:[%s12206_s12 + $0xc] sm:$0xf]  ;;  %v295_v29 = vrot.slane %v293_v11, 5 }
  0x2e   : > { %v290_v28 = vor.u32 %v289_v17, %v285_v14  ;;  %v468_v30 = vrot.slane %v466_v19, 4  ;;  %v471_v31 = vrot.slane %v469_v20, 5  ;;  %v12260_v32 = vld [vmem:[%s12206_s12 + $0x10] sm:$0xf]  ;;  %v477_v34 = vrot.slane %v475_v23, 5 }
  0x2f   : > { %v281_v33 = vrot.slane %v280_v22, 4  ;;  %v481_v35 = vrot.slane %v479_v24, 4  ;;  %v487_v36 = vrot.slane %v485_v25, 5  ;;  %v298_v39 = vshrl.u32 %v12251_v26, 16  ;;  %v12267_v43 = vld [vmem:[%s12206_s12 + $0x14] sm:$0x1] }
  0x30   : > { %v291_v37 = vrot.slane %v290_v28, 4  ;;  %v472_v38 = vor.u32 %v471_v31, %v468_v30  ;;  %v301_v40 = vshll.u32 %v12251_v26, 16  ;;  %v307_v44 = vshll.u32 %v12260_v32, 16  ;;  %v12272_v46 = vld [vmem:[%s12206_s12 + $0x6c] sm:$0xf] }
  0x31   : > { %v286_v41 = vsel %vm12255_vm4, %v281_v33, %v285_v14  ;;  %v482_v42 = vor.u32 %v481_v35, %v477_v34  ;;  %v311_v45 = vshrl.u32 %v12260_v32, 16  ;;  %v300_v49 = vrot.slane %v298_v39, 4  ;;  %v9887_v51 = vld [vmem:[%s17290_s1 + $0x4] sm:$0x3]  ;;  %v12285_v60 = vld [vmem:[%s12206_s12 + $0x70] sm:$0xf] }
  0x32   : > { %v296_v47 = vsel %vm12255_vm4, %v291_v37, %v295_v29  ;;  %v473_v48 = vrot.slane %v472_v38, 4  ;;  %v303_v50 = vrot.slane %v301_v40, 5  ;;  %v309_v54 = vrot.slane %v307_v44, 5  ;;  %11810 = vmatprep.subr.msk.bf16.mxu0 %vm756_vm0, %v9887_v51  ;;  %v12292_v0 = vld [vmem:[%s12206_s12 + $0x74] sm:$0x1] }
  0x33   : > { %v9807_v52 = vcombine.low %v286_v41, %v296_v47  ;;  %v483_v53 = vrot.slane %v482_v42, 4  ;;  %v313_v55 = vrot.slane %v311_v45, 4  ;;  %v317_v58 = vshll.u32 %v12267_v43, 16  ;;  %v12297_v9 = vld [vmem:[%s12206_s12 + $0x18] sm:$0xf] }
  0x34   : > { %v478_v56 = vsel %vm12255_vm4, %v473_v48, %v477_v34  ;;  %v304_v57 = vor.u32 %v303_v50, %v300_v49  ;;  %v490_v1 = vshrl.u32 %v12272_v46, 16  ;;  %v493_v8 = vshll.u32 %v12272_v46, 16  ;;  %v12302_v17 = vld [vmem:[%s12206_s12 + $0x1c] sm:$0xf]  ;;  %v12310_v24 = vld [vmem:[%s12206_s12 + $0x20] sm:$0x1] }
  0x35   : > { %11193 = vmatprep.mubr.msk.bf16.mxu0 %vm707_vm3, %v9807_v52  ;;  %v488_v61 = vsel %vm12255_vm4, %v483_v53, %v487_v36  ;;  %v314_v62 = vor.u32 %v313_v55, %v309_v54  ;;  %v319_v7 = vrot.slane %v317_v58, 5  ;;  %v499_v13 = vshll.u32 %v12285_v60, 16  ;;  %v12316_v31 = vld [vmem:[%s12206_s12 + $0x78] sm:$0xf]  ;;  %v12325_v44 = vld [vmem:[%s12206_s12 + $0x7c] sm:$0xf] }
  0x36   : > { %v9815_v3 = vcombine.low %v478_v56, %v488_v61  ;;  %v305_v6 = vrot.slane %v304_v57, 4  ;;  %v492_v11 = vrot.slane %v490_v1, 4  ;;  %v503_v14 = vshrl.u32 %v12285_v60, 16  ;;  %v12335_v56 = vld [vmem:[%s12206_s12 + $0x24] sm:$0xf] }
  0x37   : > { %v315_v10 = vrot.slane %v314_v62, 4  ;;  %v495_v20 = vrot.slane %v493_v8, 5  ;;  %v509_v22 = vshll.u32 %v12292_v0, 16  ;;  %v1050_v23 = vsel %vm756_vm0, %v253_v21, 0  ;;  %v12343_v8 = vld [vmem:[%s12206_s12 + $0x28] sm:$0xf] }
  0x38   : > { %11209 = vmatprep.mubr.msk.bf16.mxu1 %vm707_vm3, %v9815_v3  ;;  %v310_v19 = vsel %vm12255_vm4, %v305_v6, %v309_v54  ;;  %v501_v28 = vrot.slane %v499_v13, 5  ;;  %v505_v29 = vrot.slane %v503_v14, 4  ;;  %v1475_v30 = vsel %vm756_vm0, %v9887_v51, 0  ;;  %v12329_v51 = vld [vmem:[%s12206_s12 + $0x80] sm:$0x1] }
  0x39   : > { %v320_v25 = vsel %vm12255_vm4, %v315_v10, %v319_v7  ;;  %v496_v34 = vor.u32 %v495_v20, %v492_v11  ;;  %v511_v35 = vrot.slane %v509_v22, 5  ;;  %v322_v36 = vshrl.u32 %v12297_v9, 16  ;;  %17350 = vst [vmem:[#allocation8_spill] sm:$0xff] %v12329_v51  ;;  %v12346_v14 = vld [vmem:[%s12206_s12 + $0x2c] sm:$0x1] }
  0x3a   : > { %v9808_v33 = vcombine.low %v310_v19, %v320_v25  ;;  %v506_v37 = vor.u32 %v505_v29, %v501_v28  ;;  %v325_v21 = vshll.u32 %v12297_v9, 16  ;;  %v331_v38 = vshll.u32 %v12302_v17, 16  ;;  %v12352_v29 = vld [vmem:[%s12206_s12 + $0x84] sm:$0xf]  ;;  %v12484_v59 = vld [vmem:[%s12206_s12 + $0xa8] sm:$0xf] }
  0x3b   : > { %v335_v39 = vshrl.u32 %v12302_v17, 16  ;;  %v497_v40 = vrot.slane %v496_v34, 4  ;;  %v324_v41 = vrot.slane %v322_v36, 4  ;;  %v341_v42 = vshll.u32 %v12310_v24, 16  ;;  %17357 = vst [vmem:[#allocation15_spill] sm:$0xff] %v12484_v59 }
  0x3c   : > { %11194 = vmatmul.mubr.msk.bf16.vlgmr.msra.gmra.mxu0 %vm707_vm3, %v9808_v33  ;;  %v514_v45 = vshrl.u32 %v12316_v31, 16  ;;  %v507_v47 = vrot.slane %v506_v37, 4  ;;  %v327_v48 = vrot.slane %v325_v21, 5  ;;  %v333_v49 = vrot.slane %v331_v38, 5 }
  0x3d   : > { %11260 = vmatpush3.bf16.msra.mxu0 %v1475_v30  ;;  %v337_v50 = vrot.slane %v335_v39, 4  ;;  %v502_v52 = vsel %vm12255_vm4, %v497_v40, %v501_v28  ;;  %v343_v53 = vrot.slane %v341_v42, 5  ;;  %v517_v55 = vshll.u32 %v12316_v31, 16  ;;  %v12360_v39 = vld [vmem:[%s12206_s12 + $0x88] sm:$0xf] }
  0x3e   : > { %v516_v54 = vrot.slane %v514_v45, 4  ;;  %v512_v57 = vsel %vm12255_vm4, %v507_v47, %v511_v35  ;;  %v328_v58 = vor.u32 %v327_v48, %v324_v41  ;;  %v523_v62 = vshll.u32 %v12325_v44, 16 }
  0x3f   : > { %v338_v61 = vor.u32 %v337_v50, %v333_v49  ;;  %v9816_v1 = vcombine.low %v502_v52, %v512_v57  ;;  %v519_v3 = vrot.slane %v517_v55, 5  ;;  %v527_v6 = vshrl.u32 %v12325_v44, 16  ;;  %v12374_v57 = vld [vmem:[%s12206_s12 + $0x30] sm:$0xf] }
  0x40   : > { %v533_v7 = vshll.u32 %v12329_v51, 16  ;;  %v329_v10 = vrot.slane %v328_v58, 4  ;;  %v525_v13 = vrot.slane %v523_v62, 5  ;;  %v346_v19 = vshrl.u32 %v12335_v56, 16 }
  0x41   : > { %v339_v11 = vrot.slane %v338_v61, 4  ;;  %11210 = vmatmul.mubr.msk.bf16.vlgmr.msra.gmra.mxu1 %vm707_vm3, %v9816_v1  ;;  %v520_v20 = vor.u32 %v519_v3, %v516_v54  ;;  %v529_v22 = vrot.slane %v527_v6, 4  ;;  %v349_v28 = vshll.u32 %v12335_v56, 16  ;;  %v12380_v3 = vld [vmem:[%s12206_s12 + $0x34] sm:$0xf] }
  0x42   : > { %v535_v25 = vrot.slane %v533_v7, 5  ;;  %11226 = vmatpush3.bf16.msra.mxu1 %v1050_v23  ;;  %v334_v30 = vsel %vm12255_vm4, %v329_v10, %v333_v49  ;;  %v348_v34 = vrot.slane %v346_v19, 4  ;;  %v355_v35 = vshll.u32 %v12343_v8, 16  ;;  %v12369_v49 = vld [vmem:[%s12206_s12 + $0x8c] sm:$0x1] }
  0x43   : > { %v344_v33 = vsel %vm12255_vm4, %v339_v11, %v343_v53  ;;  %v521_v37 = vrot.slane %v520_v20, 4  ;;  %v530_v21 = vor.u32 %v529_v22, %v525_v13  ;;  %v351_v38 = vrot.slane %v349_v28, 5  ;;  %v12386_v22 = vld [vmem:[%s12206_s12 + $0x38] sm:$0x1] }
  0x44   : > { %v9809_v36 = vcombine.low %v334_v30, %v344_v33  ;;  %v357_v40 = vrot.slane %v355_v35, 5  ;;  %v359_v23 = vshrl.u32 %v12343_v8, 16  ;;  %v365_v41 = vshll.u32 %v12346_v14, 16 }
  0x45   : > { %v538_v42 = vshrl.u32 %v12352_v29, 16  ;;  %v526_v45 = vsel %vm12255_vm4, %v521_v37, %v525_v13  ;;  %v531_v47 = vrot.slane %v530_v21, 4  ;;  %v352_v48 = vor.u32 %v351_v38, %v348_v34  ;;  %v12394_v38 = vld [vmem:[%s12206_s12 + $0x90] sm:$0xf] }
  0x46   : > { %11197 = vmatprep.mubr.msk.bf16.mxu0 %vm707_vm3, %v9809_v36  ;;  %v541_v50 = vshll.u32 %v12352_v29, 16  ;;  %v361_v52 = vrot.slane %v359_v23, 4  ;;  %v367_v53 = vrot.slane %v365_v41, 5  ;;  %v547_v55 = vshll.u32 %v12360_v39, 16  ;;  %17351 = vst [vmem:[#allocation9_spill] sm:$0xff] %v12394_v38 }
  0x47   : > { %v540_v54 = vrot.slane %v538_v42, 4  ;;  %v536_v58 = vsel %vm12255_vm4, %v531_v47, %v535_v25  ;;  %v353_v61 = vrot.slane %v352_v48, 4  ;;  %v551_v1 = vshrl.u32 %v12360_v39, 16 }
  0x48   : > { %v543_v62 = vrot.slane %v541_v50, 5  ;;  %v9817_v6 = vcombine.low %v526_v45, %v536_v58  ;;  %v362_v7 = vor.u32 %v361_v52, %v357_v40  ;;  %v549_v10 = vrot.slane %v547_v55, 5  ;;  %v12400_v45 = vld [vmem:[%s12206_s12 + $0x94] sm:$0xf]  ;;  %v12410_v58 = vld [vmem:[%s12206_s12 + $0x98] sm:$0x1] }
  0x49   : > { %v557_v11 = vshll.u32 %v12369_v49, 16  ;;  %v358_v13 = vsel %vm12255_vm4, %v353_v61, %v357_v40  ;;  %v553_v20 = vrot.slane %v551_v1, 4  ;;  %v370_v25 = vshrl.u32 %v12374_v57, 16  ;;  %17352 = vst [vmem:[#allocation10_spill] sm:$0xff] %v12400_v45  ;;  %17353 = vst [vmem:[#allocation11_spill] sm:$0xff] %v12410_v58 }
  0x4a   : > { %v544_v19 = vor.u32 %v543_v62, %v540_v54  ;;  %11213 = vmatprep.mubr.msk.bf16.mxu1 %vm707_vm3, %v9817_v6  ;;  %v363_v28 = vrot.slane %v362_v7, 4  ;;  %v373_v33 = vshll.u32 %v12374_v57, 16  ;;  %v379_v34 = vshll.u32 %v12380_v3, 16  ;;  %v12407_v54 = vld [vmem:[%s17290_s1 + $0x6] sm:$0x3] }
  0x4b   : > { %v559_v30 = vrot.slane %v557_v11, 5  ;;  %v554_v36 = vor.u32 %v553_v20, %v549_v10  ;;  %v372_v37 = vrot.slane %v370_v25, 4  ;;  %v383_v21 = vshrl.u32 %v12380_v3, 16  ;;  %11811 = vmatprep.subr.msk.bf16.mxu1 %vm756_vm0, %v12407_v54  ;;  %v12422_v11 = vld [vmem:[%s12206_s12 + $0x3c] sm:$0xf] }
  0x4c   : > { %v545_v35 = vrot.slane %v544_v19, 4  ;;  %v368_v40 = vsel %vm12255_vm4, %v363_v28, %v367_v53  ;;  %v375_v23 = vrot.slane %v373_v33, 5  ;;  %v381_v41 = vrot.slane %v379_v34, 5  ;;  %v12430_v33 = vld [vmem:[%s12206_s12 + $0x40] sm:$0xf] }
  0x4d   : > { %v389_v42 = vshll.u32 %v12386_v22, 16  ;;  %v9810_v47 = vcombine.low %v358_v13, %v368_v40  ;;  %v555_v50 = vrot.slane %v554_v36, 4  ;;  %v385_v52 = vrot.slane %v383_v21, 4  ;;  %v12427_v13 = vld [vmem:[%s17290_s1 + $0x8] sm:$0x3] }
  0x4e   : > { %v550_v48 = vsel %vm12255_vm4, %v545_v35, %v549_v10  ;;  %v376_v55 = vor.u32 %v375_v23, %v372_v37  ;;  %v562_v61 = vshrl.u32 %v12394_v38, 16  ;;  %v565_v62 = vshll.u32 %v12394_v38, 16  ;;  %11812 = vmatprep.subr.msk.bf16.mxu0 %vm756_vm0, %v12427_v13  ;;  %v12439_v40 = vld [vmem:[%s12206_s12 + $0x44] sm:$0x1] }
  0x4f   : > { %v391_v53 = vrot.slane %v389_v42, 5  ;;  %11198 = vmatmul.mubr.msk.bf16.gmra.mxu0 %vm707_vm3, %v9810_v47  ;;  %v560_v1 = vsel %vm12255_vm4, %v555_v50, %v559_v30  ;;  %v386_v6 = vor.u32 %v385_v52, %v381_v41  ;;  %v571_v7 = vshll.u32 %v12400_v45, 16 }
  0x50   : > { %v575_v10 = vshrl.u32 %v12400_v45, 16  ;;  %v9818_v19 = vcombine.low %v550_v48, %v560_v1  ;;  %v377_v20 = vrot.slane %v376_v55, 4  ;;  %v564_v25 = vrot.slane %v562_v61, 4  ;;  %v12447_v55 = vld [vmem:[%s12206_s12 + $0x9c] sm:$0xf] }
  0x51   : > { %v567_v28 = vrot.slane %v565_v62, 5  ;;  %v387_v30 = vrot.slane %v386_v6, 4  ;;  %v573_v34 = vrot.slane %v571_v7, 5  ;;  %v581_v36 = vshll.u32 %v12410_v58, 16  ;;  %17354 = vst [vmem:[#allocation12_spill] sm:$0xff] %v12447_v55 }
  0x52   : > { %v577_v35 = vrot.slane %v575_v10, 4  ;;  %11214 = vmatmul.mubr.msk.bf16.gmra.mxu1 %vm707_vm3, %v9818_v19  ;;  %v382_v37 = vsel %vm12255_vm4, %v377_v20, %v381_v41  ;;  %v394_v23 = vshrl.u32 %v12422_v11, 16  ;;  %v397_v42 = vshll.u32 %v12422_v11, 16  ;;  %v12450_v6 = vld [vmem:[%s12206_s12 + $0xa0] sm:$0xf] }
  0x53   : > { %v568_v21 = vor.u32 %v567_v28, %v564_v25  ;;  %v392_v47 = vsel %vm12255_vm4, %v387_v30, %v391_v53  ;;  %v583_v50 = vrot.slane %v581_v36, 5  ;;  %v403_v52 = vshll.u32 %v12430_v33, 16  ;;  %17355 = vst [vmem:[#allocation13_spill] sm:$0xff] %v12450_v6  ;;  %v12458_v28 = vld [vmem:[%s12206_s12 + $0xa4] sm:$0x1] }
  0x54   : > { %v578_v48 = vor.u32 %v577_v35, %v573_v34  ;;  %v9811_v61 = vcombine.low %v382_v37, %v392_v47  ;;  %v396_v41 = vrot.slane %v394_v23, 4  ;;  %v399_v1 = vrot.slane %v397_v42, 5  ;;  %17356 = vst [vmem:[#allocation14_spill] sm:$0xff] %v12458_v28  ;;  %v12466_v42 = vld [vmem:[%s12206_s12 + $0x48] sm:$0xf] }
  0x55   : > { %v569_v62 = vrot.slane %v568_v21, 4  ;;  %v405_v10 = vrot.slane %v403_v52, 5  ;;  %v407_v19 = vshrl.u32 %v12430_v33, 16  ;;  %v413_v53 = vshll.u32 %v12439_v40, 16 }
  0x56   : > { %v579_v7 = vrot.slane %v578_v48, 4  ;;  %11201 = vmatprep.mubr.msk.bf16.mxu0 %vm707_vm3, %v9811_v61  ;;  %v400_v25 = vor.u32 %v399_v1, %v396_v41  ;;  %v586_v30 = vshrl.u32 %v12447_v55, 16  ;;  %v589_v35 = vshll.u32 %v12447_v55, 16  ;;  %v12469_v61 = vld [vmem:[%s12206_s12 + $0x4c] sm:$0xf] }
  0x57   : > { %v574_v20 = vsel %vm12255_vm4, %v569_v62, %v573_v34  ;;  %v409_v37 = vrot.slane %v407_v19, 4  ;;  %v415_v21 = vrot.slane %v413_v53, 5  ;;  %v595_v23 = vshll.u32 %v12450_v6, 16 }
  0x58   : > { %v584_v36 = vsel %vm12255_vm4, %v579_v7, %v583_v50  ;;  %v401_v48 = vrot.slane %v400_v25, 4  ;;  %v588_v34 = vrot.slane %v586_v30, 4  ;;  %v591_v52 = vrot.slane %v589_v35, 5  ;;  %v12474_v50 = vld [vmem:[%s12206_s12 + $0x50] sm:$0x1] }
  0x59   : > { %v9819_v47 = vcombine.low %v574_v20, %v584_v36  ;;  %v410_v62 = vor.u32 %v409_v37, %v405_v10  ;;  %v597_v41 = vrot.slane %v595_v23, 5  ;;  %v599_v1 = vshrl.u32 %v12450_v6, 16 }
  0x5a   : > { %v605_v18 = vshll.u32 %v12458_v28, 16  ;;  %v406_v7 = vsel %vm12255_vm4, %v401_v48, %v405_v10  ;;  %v592_v19 = vor.u32 %v591_v52, %v588_v34  ;;  %v418_v53 = vshrl.u32 %v12466_v42, 16 }
  0x5b   : > { %11217 = vmatprep.mubr.msk.bf16.mxu1 %vm707_vm3, %v9819_v47  ;;  %v421_v20 = vshll.u32 %v12466_v42, 16  ;;  %v411_v25 = vrot.slane %v410_v62, 4  ;;  %v601_v30 = vrot.slane %v599_v1, 4  ;;  %v427_v36 = vshll.u32 %v12469_v61, 16  ;;  %v12490_v62 = vld [vmem:[%s12206_s12 + $0xac] sm:$0xf] }
  0x5c   : > { %v607_v35 = vrot.slane %v605_v18, 5  ;;  %v593_v37 = vrot.slane %v592_v19, 4  ;;  %v420_v23 = vrot.slane %v418_v53, 4  ;;  %v431_v47 = vshrl.u32 %v12469_v61, 16  ;;  %17358 = vst [vmem:[#allocation16_spill] sm:$0xff] %v12490_v62 }
  0x5d   : > { %v423_v63 = vrot.slane %v421_v20, 5  ;;  %v416_v10 = vsel %vm12255_vm4, %v411_v25, %v415_v21  ;;  %v602_v48 = vor.u32 %v601_v30, %v597_v41  ;;  %v429_v34 = vrot.slane %v427_v36, 5  ;;  %v12493_v18 = vld [vmem:[%s12206_s12 + $0xb0] sm:$0x1] }
  0x5e   : > { %v437_v52 = vshll.u32 %v12474_v50, 16  ;;  %17359 = vst [vmem:[#allocation17_spill] sm:$0xff] %v12493_v18  ;;  %v9812_v1 = vcombine.low %v406_v7, %v416_v10  ;;  %v598_v19 = vsel %vm12255_vm4, %v593_v37, %v597_v41  ;;  %v433_v20 = vrot.slane %v431_v47, 4  ;;  %v12503_v10 = vld [vmem:[%s12206_s12 + $0x54] sm:$0xf] }
  0x5f   : > { %v424_v53 = vor.u32 %v423_v63, %v420_v23  ;;  %v603_v51 = vrot.slane %v602_v48, 4  ;;  %v610_v21 = vshrl.u32 %v12484_v59, 16  ;;  %v613_v25 = vshll.u32 %v12484_v59, 16  ;;  %v12509_v47 = vld [vmem:[%s12206_s12 + $0x58] sm:$0xf] }
  0x60   : > { %v439_v28 = vrot.slane %v437_v52, 5  ;;  %11202 = vmatmul.mubr.msk.bf16.gmra.mxu0 %vm707_vm3, %v9812_v1  ;;  %v434_v36 = vor.u32 %v433_v20, %v429_v34  ;;  %v619_v55 = vshll.u32 %v12490_v62, 16  ;;  %v623_v7 = vshrl.u32 %v12490_v62, 16  ;;  %v12514_v20 = vld [vmem:[%s12206_s12 + $0x5c] sm:$0x1] }
  0x61   : > { %v425_v30 = vrot.slane %v424_v53, 4  ;;  %v608_v63 = vsel %vm12255_vm4, %v603_v51, %v607_v35  ;;  %v612_v41 = vrot.slane %v610_v21, 4  ;;  %v615_v37 = vrot.slane %v613_v25, 5 }
  0x62   : > { %v629_v23 = vshll.u32 %v12493_v18, 16  ;;  %v9820_v48 = vcombine.low %v598_v19, %v608_v63  ;;  %v435_v1 = vrot.slane %v434_v36, 4  ;;  %v621_v53 = vrot.slane %v619_v55, 5  ;;  %v12524_v55 = vld [vmem:[%s12206_s12 + $0xb4] sm:$0xf] }
  0x63   : > { %v430_v52 = vsel %vm12255_vm4, %v425_v30, %v429_v34  ;;  %v616_v59 = vor.u32 %v615_v37, %v612_v41  ;;  %v625_v62 = vrot.slane %v623_v7, 4  ;;  %v442_v51 = vshrl.u32 %v12503_v10, 16  ;;  %v12527_v63 = vld [vmem:[%s12206_s12 + $0xb8] sm:$0xf]  ;;  %v12536_v18 = vld [vmem:[%s12206_s12 + $0xbc] sm:$0x1] }
  0x64   : > { %v631_v6 = vrot.slane %v629_v23, 5  ;;  %11218 = vmatmul.mubr.msk.bf16.gmra.mxu1 %vm707_vm3, %v9820_v48  ;;  %v440_v35 = vsel %vm12255_vm4, %v435_v1, %v439_v28  ;;  %v445_v19 = vshll.u32 %v12503_v10, 16  ;;  %v451_v21 = vshll.u32 %v12509_v47, 16 }
  0x65   : > { %v455_v34 = vshrl.u32 %v12509_v47, 16  ;;  %v9813_v25 = vcombine.low %v430_v52, %v440_v35  ;;  %v617_v30 = vrot.slane %v616_v59, 4  ;;  %v626_v36 = vor.u32 %v625_v62, %v621_v53 }
  0x66   : > { %v444_v7 = vrot.slane %v442_v51, 4  ;;  %v447_v41 = vrot.slane %v445_v19, 5  ;;  %v453_v37 = vrot.slane %v451_v21, 5  ;;  %v461_v28 = vshll.u32 %v12514_v20, 16  ;;  %v1213_v21 = vld [vmem:[%s12206_s12] sm:$0xe] }
  0x67   : > { %v457_v23 = vrot.slane %v455_v34, 4  ;;  %11205 = vmatprep.mubr.msk.bf16.mxu0 %vm707_vm3, %v9813_v25  ;;  %v622_v48 = vsel %vm12255_vm4, %v617_v30, %v621_v53  ;;  %v627_v1 = vrot.slane %v626_v36, 4  ;;  %v634_v59 = vshrl.u32 %v12524_v55, 16  ;;  %v1214_v30 = vld [vmem:[%s12206_s12 + $0xc] sm:$0xe] }
  0x68   : > { %v637_v62 = vshll.u32 %v12524_v55, 16  ;;  %v448_v52 = vor.u32 %v447_v41, %v444_v7  ;;  %v463_v35 = vrot.slane %v461_v28, 5  ;;  %v643_v19 = vshll.u32 %v12527_v63, 16 }
  0x69   : > { %v458_v51 = vor.u32 %v457_v23, %v453_v37  ;;  %v632_v34 = vsel %vm12255_vm4, %v627_v1, %v631_v6  ;;  %v636_v25 = vrot.slane %v634_v59, 4  ;;  %v647_v53 = vshrl.u32 %v12527_v63, 16 }
  0x6a   : > { %v639_v58 = vrot.slane %v637_v62, 5  ;;  %v9821_v36 = vcombine.low %v622_v48, %v632_v34  ;;  %v449_v38 = vrot.slane %v448_v52, 4  ;;  %v645_v7 = vrot.slane %v643_v19, 5  ;;  %v1215_v19 = vld [vmem:[%s12206_s12 + $0x18] sm:$0xe] }
  0x6b   : > { %v459_v45 = vrot.slane %v458_v51, 4  ;;  %v649_v23 = vrot.slane %v647_v53, 4  ;;  %v653_v28 = vshll.u32 %v12536_v18, 16  ;;  %vm1262_vm6 = vcmask 1046532  }
  0x6c   : > { %v640_v41 = vor.u32 %v639_v58, %v636_v25  ;;  %11221 = vmatprep.mubr.msk.bf16.mxu1 %vm707_vm3, %v9821_v36  ;;  %v454_v6 = vsel %vm12255_vm4, %v449_v38, %v453_v37  ;;  %v9871_v59 = vrot.slane %v1213_v21, 9  ;;  %vm12550_vm7 = vmor %vm1261_vm5, %vm1262_vm6  ;;  %v1266_v34 = vrot.slane %v12221_v4, 5 }
  0x6d   : > { %v464_v1 = vsel %vm12255_vm4, %v459_v45, %v463_v35  ;;  %v650_v52 = vor.u32 %v649_v23, %v645_v7  ;;  %v655_v51 = vrot.slane %v653_v28, 5  ;;  %v9840_v38 = vcombine.low %v12251_v26, %v12260_v32  ;;  %v1216_v28 = vld [vmem:[%s12206_s12 + $0x24] sm:$0xe] }
  0x6e   : > { %v9814_v48 = vcombine.low %v454_v6, %v464_v1  ;;  %v641_v62 = vrot.slane %v640_v41, 4  ;;  %v9872_v37 = vrot.slane %v1214_v30, 9  ;;  %v17362_v45 = vrot.slane %v12260_v32, 5 }
  0x6f   : > { %v651_v25 = vrot.slane %v650_v52, 4  ;;  %v1267_v53 = vsel %vm12550_vm7, %v9871_v59, %v1266_v34  ;;  %v1268_v36 = vrot.slane %v1266_v34, 4  ;;  %v17364_v30 = vrot.slane %v12267_v43, 5  ;;  %v1217_v34 = vld [vmem:[%s12206_s12 + $0x30] sm:$0xe] }
  0x70   : > { %v1275_v35 = vrot.slane %v17362_v45, 4  ;;  %11206 = vmatmul.mubr.msk.bf16.gmra.mxu0 %vm707_vm3, %v9814_v48  ;;  %v646_v21 = vsel %vm12255_vm4, %v641_v62, %v645_v7  ;;  %v17363_v41 = vmov %v17362_v45  ;;  %v9839_v7 = vcombine.low %v12215_v2, %v12221_v4 }
  0x71   : > { %v1274_v26 = vsel %vm12550_vm7, %v9872_v37, %v17363_v41  ;;  %v656_v6 = vsel %vm12255_vm4, %v651_v25, %v655_v51  ;;  %v9841_v1 = vcombine.low %v12297_v9, %v12302_v17  ;;  %v9873_v59 = vrot.slane %v1215_v19, 9  ;;  %v1219_v41 = vld [vmem:[%s12206_s12 + $0x48] sm:$0xe] }
  0x72   : > { %v1277_v23 = vsel %vm12550_vm7, %v1275_v35, %v17364_v30  ;;  %v9822_v32 = vcombine.low %v646_v21, %v656_v6  ;;  %v17365_v48 = vrot.slane %v12224_v5, 5  ;;  %v1280_v62 = vrot.slane %v12302_v17, 5  ;;  %v1218_v21 = vld [vmem:[%s12206_s12 + $0x3c] sm:$0xe] }
  0x73   : > { %v1283_v52 = vrot.slane %v12310_v24, 5  ;;  %v9889_v37 = vcombine.low %v1274_v26, %v1277_v23  ;;  %v1287_v2 = vrot.slane %v12343_v8, 5  ;;  %v9874_v5 = vrot.slane %v1216_v28, 9 }
  0x74   : > { %v1270_v43 = vsel %vm12550_vm7, %v1268_v36, %v17365_v48  ;;  %11222 = vmatmul.mubr.msk.bf16.gmra.mxu1 %vm707_vm3, %v9822_v32  ;;  %v1281_v4 = vsel %vm12550_vm7, %v9873_v59, %v1280_v62  ;;  %v1282_v9 = vrot.slane %v1280_v62, 4  ;;  %v1290_v19 = vrot.slane %v12346_v14, 5  ;;  %v12604_v14 = vld [vmem:[%s17290_s1 + $0xc] sm:$0x3]  ;;  %v1220_v59 = vld [vmem:[%s12206_s12 + $0x54] sm:$0xe] }
  0x75   : > { %v9888_v51 = vcombine.low %v1267_v53, %v1270_v43  ;;  %11227 = vmatprep.mubr.msk.bf16.mxu1 %vm707_vm3, %v9839_v7  ;;  %v2560_v17 = vsel %vm756_vm0, %v12427_v13, 0  ;;  %v1289_v24 = vrot.slane %v1287_v2, 4  ;;  %v9875_v45 = vrot.slane %v1217_v34, 9 }
  0x76   : > { %v1294_v35 = vrot.slane %v12380_v3, 5  ;;  %v1284_v25 = vsel %vm12550_vm7, %v1282_v9, %v1283_v52  ;;  %v1297_v53 = vrot.slane %v12386_v22, 5  ;;  %v1834_v26 = vsel %vm756_vm0, %v12407_v54, 0  ;;  %v1221_v9 = vld [vmem:[%s12206_s12 + $0x60] sm:$0xe] }
  0x77   : > { %11261 = vmatprep.mubr.msk.bf16.mxu0 %vm707_vm3, %v9888_v51  ;;  %v9890_v36 = vcombine.low %v1281_v4, %v1284_v25  ;;  %v1288_v30 = vsel %vm12550_vm7, %v9874_v5, %v1287_v2  ;;  %v1291_v22 = vsel %vm12550_vm7, %v1289_v24, %v1290_v19  ;;  %v1301_v23 = vrot.slane %v12430_v33, 5 }
  0x78   : > { %11262 = vmatmul.mubr.msk.bf16.vlgmr.msra.gmra.mxu0 %vm707_vm3, %v9889_v37  ;;  %v1296_v13 = vrot.slane %v1294_v35, 4  ;;  %v1295_v28 = vsel %vm12550_vm7, %v9875_v45, %v1294_v35  ;;  %v9876_v7 = vrot.slane %v1218_v21, 9  ;;  %v1308_v54 = vrot.slane %v12469_v61, 5  ;;  %v12630_v37 = vld [vmem:[%s17290_s1 + $0xa] sm:$0x3] }
  0x79   : > { %11328 = vmatpush3.bf16.msra.mxu0 %v2560_v17  ;;  %11265 = vmatprep.mubr.msk.bf16.mxu0 %vm707_vm3, %v9890_v36  ;;  %v1303_v32 = vrot.slane %v1301_v23, 4  ;;  %v1304_v48 = vrot.slane %v12439_v40, 5  ;;  %v9877_v43 = vrot.slane %v1219_v41, 9  ;;  %v1311_v62 = vrot.slane %v12474_v50, 5  ;;  %v1224_v45 = vld [vmem:[%s12206_s12 + $0x84] sm:$0xe] }
  0x7a   : > { %v1298_v6 = vsel %vm12550_vm7, %v1296_v13, %v1297_v53  ;;  %11814 = vmatprep.subr.msk.bf16.mxu0 %vm756_vm0, %v12604_v14  ;;  %v9891_v52 = vcombine.low %v1288_v30, %v1291_v22  ;;  %v1310_v34 = vrot.slane %v1308_v54, 4  ;;  %v1315_v51 = vrot.slane %v12509_v47, 5  ;;  %v1225_v30 = vld [vmem:[%s12206_s12 + $0x90] sm:$0xe] }
  0x7b   : > { %v9892_v2 = vcombine.low %v1295_v28, %v1298_v6  ;;  %v9878_v4 = vrot.slane %v1220_v59, 9  ;;  %v1318_v40 = vrot.slane %v12514_v20, 5  ;;  %v1325_v50 = vrot.slane %v12238_v16, 5 }
  0x7c   : > { %11228 = vmatmul.mubr.msk.bf16.vlgmr.msra.gmra.mxu1 %vm707_vm3, %v9840_v38  ;;  %v9842_v5 = vcombine.low %v12335_v56, %v12343_v8  ;;  %v9843_v19 = vcombine.low %v12374_v57, %v12380_v3  ;;  %v1317_v17 = vrot.slane %v1315_v51, 4  ;;  %v1302_v38 = vsel %vm12550_vm7, %v9876_v7, %v1301_v23  ;;  %v1228_v23 = vld [vmem:[%s12206_s12 + $0xb4] sm:$0xe] }
  0x7d   : > { %11294 = vmatpush3.bf16.msra.mxu1 %v1834_v26  ;;  %11231 = vmatprep.mubr.msk.bf16.mxu1 %vm707_vm3, %v9841_v1  ;;  %v1305_v24 = vsel %vm12550_vm7, %v1303_v32, %v1304_v48  ;;  %v1309_v20 = vsel %vm12550_vm7, %v9877_v43, %v1308_v54  ;;  %v1312_v16 = vsel %vm12550_vm7, %v1310_v34, %v1311_v62  ;;  %v1222_v1 = vld [vmem:[%s12206_s12 + $0x6c] sm:$0xe]  ;;  %v9879_v3 = vrot.slane %v1221_v9, 9  ;;  %v1226_v48 = vld [vmem:[%s12206_s12 + $0x9c] sm:$0xe] }
  0x7e   : > { %11813 = vmatprep.subr.msk.bf16.mxu1 %vm756_vm0, %v12630_v37  ;;  %v9844_v56 = vcombine.low %v12422_v11, %v12430_v33  ;;  %v9845_v8 = vcombine.low %v12466_v42, %v12469_v61  ;;  %v9846_v57 = vcombine.low %v12503_v10, %v12509_v47  ;;  %v12663_v35 = vsel %vm12550_vm7, %v9878_v4, %v1315_v51  ;;  %v17367_v4 = vld [vmem:[#allocation9_spill] sm:$0xff] }
  0x7f   : > { %v12667_v21 = vsel %vm12550_vm7, %v1317_v17, %v1318_v40  ;;  %v9847_v25 = vcombine.low %v12232_v12, %v12235_v15  ;;  %v1322_v53 = vrot.slane %v12235_v15, 5  ;;  %v9893_v36 = vcombine.low %v1302_v38, %v1305_v24  ;;  %v1223_v17 = vld [vmem:[%s12206_s12 + $0x78] sm:$0xe]  ;;  %v12824_v10 = vld [vmem:[%s12206_s12 + $0x2c] sm:$0x1] }
  0x80   : > { %11266 = vmatmul.mubr.msk.bf16.gmra.mxu0 %vm707_vm3, %v9891_v52  ;;  %v9894_v13 = vcombine.low %v1309_v20, %v1312_v16  ;;  %v9880_v41 = vrot.slane %v1222_v1, 9  ;;  %v1329_v26 = vrot.slane %v12285_v60, 5  ;;  %v9882_v28 = vrot.slane %v1224_v45, 9  ;;  %v17368_v24 = vld [vmem:[#allocation11_spill] sm:$0xff]  ;;  %v17370_v16 = vld [vmem:[#allocation12_spill] sm:$0xff] }
  0x81   : > { %11269 = vmatprep.mubr.msk.bf16.mxu0 %vm707_vm3, %v9892_v2  ;;  %v1343_v6 = vrot.slane %v12360_v39, 5  ;;  %v9895_v7 = vcombine.low %v12663_v35, %v12667_v21  ;;  %v12683_v54 = vsel %vm12550_vm7, %v9879_v3, %v1322_v53  ;;  %v1332_v59 = vrot.slane %v12292_v0, 5  ;;  %v17366_v2 = vld [vmem:[#allocation10_spill] sm:$0xff]  ;;  %v12792_v1 = vld [vmem:[%s12206_s12 + $0x28] sm:$0xf] }
  0x82   : > { %v1324_v43 = vrot.slane %v1322_v53, 4  ;;  %v1346_v34 = vrot.slane %v12369_v49, 5  ;;  %v1331_v51 = vrot.slane %v1329_v26, 4  ;;  %v9883_v40 = vrot.slane %v1225_v30, 9  ;;  %v17369_v49 = vld [vmem:[#allocation13_spill] sm:$0xff] }
  0x83   : > { %v12692_v62 = vsel %vm12550_vm7, %v9882_v28, %v1343_v6  ;;  %v1345_v52 = vrot.slane %v1343_v6, 4  ;;  %v1350_v9 = vrot.slane %v17366_v2, 5  ;;  %v1353_v20 = vrot.slane %v17368_v24, 5  ;;  %v17371_v6 = vld [vmem:[#allocation14_spill] sm:$0xff] }
  0x84   : > { %11232 = vmatmul.mubr.msk.bf16.gmra.mxu1 %vm707_vm3, %v9842_v5  ;;  %v1336_v5 = vrot.slane %v12325_v44, 5  ;;  %v9884_v53 = vrot.slane %v1226_v48, 9  ;;  %v1326_v30 = vsel %vm12550_vm7, %v1324_v43, %v1325_v50  ;;  %v1357_v28 = vrot.slane %v17369_v49, 5  ;;  %v9985_v48 = vld [vmem:[%s12206_s12 + $0xc] sm:$0xf]  ;;  %v17374_v50 = vld [vmem:[#allocation8_spill] sm:$0xff] }
  0x85   : > { %11235 = vmatprep.mubr.msk.bf16.mxu1 %vm707_vm3, %v9843_v19  ;;  %v12703_v38 = vsel %vm12550_vm7, %v1345_v52, %v1346_v34  ;;  %v12713_v45 = vsel %vm12550_vm7, %v9883_v40, %v1350_v9  ;;  %v1352_v3 = vrot.slane %v1350_v9, 4  ;;  %v1360_v52 = vrot.slane %v17371_v6, 5  ;;  %v17373_v34 = vld [vmem:[#allocation15_spill] sm:$0xff]  ;;  %v1227_v19 = vld [vmem:[%s12206_s12 + $0xa8] sm:$0xe] }
  0x86   : > { %v12725_v40 = vsel %vm12550_vm7, %v9880_v41, %v1329_v26  ;;  %v9881_v9 = vrot.slane %v1223_v17, 9  ;;  %v12735_v43 = vld [vmem:[%s12206_s12 + $0x10] sm:$0xf]  ;;  %v12739_v6 = vsel %vm12550_vm7, %v1331_v51, %v1332_v59  ;;  %v12745_v26 = vsel %vm12550_vm7, %v9884_v53, %v1357_v28 }
  0x87   : > { %v1359_v17 = vrot.slane %v1357_v28, 4  ;;  %v1339_v24 = vrot.slane %v17374_v50, 5  ;;  %v2078_v51 = vshrl.u32 %v9985_v48, 16  ;;  %v2081_v53 = vshll.u32 %v9985_v48, 16  ;;  %v12775_v50 = vld [vmem:[%s12206_s12 + $0x1c] sm:$0xf] }
  0x88   : > { %11270 = vmatmul.mubr.msk.bf16.gmra.mxu0 %vm707_vm3, %v9893_v36  ;;  %v17372_v36 = vld [vmem:[#allocation16_spill] sm:$0xff]  ;;  %v9897_v11 = vcombine.low %v12725_v40, %v12739_v6  ;;  %v1337_v33 = vsel %vm12550_vm7, %v9881_v9, %v1336_v5  ;;  %v9885_v28 = vrot.slane %v1227_v19, 9  ;;  %v17375_v48 = vld [vmem:[#allocation17_spill] sm:$0xff]  ;;  %v1371_v61 = vrot.slane %v12527_v63, 5  ;;  %v9990_v9 = vld [vmem:[%s12206_s12 + $0x20] sm:$0x1] }
  0x89   : > { %11273 = vmatprep.mubr.msk.bf16.mxu0 %vm707_vm3, %v9894_v13  ;;  %v12729_v13 = vsel %vm12550_vm7, %v1352_v3, %v1353_v20  ;;  %v9896_v20 = vcombine.low %v12683_v54, %v1326_v30  ;;  %v1338_v3 = vrot.slane %v1336_v5, 4  ;;  %v1364_v0 = vrot.slane %v17372_v36, 5  ;;  %v9988_v30 = vld [vmem:[%s12206_s12 + $0x18] sm:$0xf]  ;;  %v9994_v15 = vld [vmem:[%s12206_s12 + $0x30] sm:$0xf] }
  0x8a   : > { %v12757_v59 = vsel %vm12550_vm7, %v1359_v17, %v1360_v52  ;;  %v2087_v54 = vshll.u32 %v12735_v43, 16  ;;  %v12772_v52 = vld [vmem:[%s12206_s12 + $0x14] sm:$0x1]  ;;  %v1367_v42 = vrot.slane %v17375_v48, 5  ;;  %v2083_v17 = vrot.slane %v2081_v53, 5 }
  0x8b   : > { %v1366_v5 = vrot.slane %v1364_v0, 4  ;;  %v9886_v40 = vrot.slane %v1228_v23, 9  ;;  %v2091_v19 = vshrl.u32 %v12735_v43, 16  ;;  %v2102_v6 = vshrl.u32 %v9988_v30, 16  ;;  %v9991_v53 = vld [vmem:[%s12206_s12 + $0x24] sm:$0xf] }
  0x8c   : > { %11236 = vmatmul.mubr.msk.bf16.gmra.mxu1 %vm707_vm3, %v9844_v56  ;;  %v1340_v48 = vsel %vm12550_vm7, %v1338_v3, %v1339_v24  ;;  %v12788_v41 = vrot.slane %v2087_v54, 5  ;;  %v1374_v35 = vrot.slane %v12536_v18, 5  ;;  %v2111_v23 = vshll.u32 %v12775_v50, 16 }
  0x8d   : > { %11239 = vmatprep.mubr.msk.bf16.mxu1 %vm707_vm3, %v9845_v8  ;;  %v2080_v8 = vrot.slane %v2078_v51, 4  ;;  %v2105_v51 = vshll.u32 %v9988_v30, 16  ;;  %v2093_v21 = vrot.slane %v2091_v19, 4  ;;  %v1373_v32 = vrot.slane %v1371_v61, 4 }
  0x8e   : > { %v2104_v22 = vrot.slane %v2102_v6, 4  ;;  %v9898_v3 = vcombine.low %v1337_v33, %v1340_v48  ;;  %v12800_v54 = vsel %vm12550_vm7, %v9885_v28, %v1364_v0  ;;  %v12804_v30 = vsel %vm12550_vm7, %v1366_v5, %v1367_v42  ;;  %v9997_v48 = vld [vmem:[%s12206_s12 + $0x3c] sm:$0xf] }
  0x8f   : > { %v2084_v56 = vor.u32 %v2083_v17, %v2080_v8  ;;  %v2107_v24 = vrot.slane %v2105_v51, 5  ;;  %v12808_v18 = vsel %vm12550_vm7, %v9886_v40, %v1371_v61  ;;  %v2094_v0 = vor.u32 %v2093_v21, %v12788_v41 }
  0x90   : > { %11274 = vmatmul.mubr.msk.bf16.gmra.mxu0 %vm707_vm3, %v9895_v7  ;;  %v2115_v7 = vshrl.u32 %v12775_v50, 16  ;;  %v2121_v28 = vshll.u32 %v9990_v9, 16  ;;  %v2126_v8 = vshrl.u32 %v9991_v53, 16  ;;  %v12821_v42 = vrot.slane %v2111_v23, 5 }
  0x91   : > { %11277 = vmatprep.mubr.msk.bf16.mxu0 %vm707_vm3, %v9896_v20  ;;  %v2097_v20 = vshll.u32 %v12772_v52, 16  ;;  %v12814_v33 = vrot.slane %v2084_v56, 4  ;;  %v2129_v47 = vshll.u32 %v9991_v53, 16  ;;  %v12829_v56 = vsel %vm12550_vm7, %v1373_v32, %v1374_v35  ;;  %v12846_v32 = vld [vmem:[%s12206_s12 + $0x38] sm:$0x1] }
  0x92   : > { %v2117_v61 = vrot.slane %v2115_v7, 4  ;;  %v2108_v5 = vor.u32 %v2107_v24, %v2104_v22  ;;  %v2139_v12 = vshrl.u32 %v12792_v1, 16  ;;  %v12841_v40 = vsel %vm756_vm0, %v12630_v37, 0 }
  0x93   : > { %v12831_v17 = vrot.slane %v2097_v20, 5  ;;  %v2128_v19 = vrot.slane %v2126_v8, 4  ;;  %v2131_v9 = vrot.slane %v2129_v47, 5  ;;  %v2095_v22 = vrot.slane %v2094_v0, 4 }
  0x94   : > { %11240 = vmatmul.mubr.msk.bf16.gmra.mxu1 %vm707_vm3, %v9846_v57  ;;  %v2135_v57 = vshll.u32 %v12792_v1, 16  ;;  %v12850_v51 = vrot.slane %v2121_v28, 5  ;;  %v2141_v53 = vrot.slane %v2139_v12, 4  ;;  %v2090_v37 = vsel %vm12255_vm4, %v12814_v33, %v12788_v41  ;;  %v12868_v41 = vld [vmem:[%s12206_s12 + $0x40] sm:$0xf] }
  0x95   : > { %11243 = vmatprep.mubr.msk.bf16.mxu1 %vm707_vm3, %v9847_v25  ;;  %v12836_v25 = vld [vmem:[%s12206_s12 + $0x34] sm:$0xf]  ;;  %v2118_v35 = vor.u32 %v2117_v61, %v12821_v42  ;;  %v2150_v21 = vshrl.u32 %v9994_v15, 16  ;;  %v2153_v23 = vshll.u32 %v9994_v15, 16  ;;  %v12861_v7 = vrot.slane %v2108_v5, 4 }
  0x96   : > { %v12843_v6 = vrot.slane %v2135_v57, 5  ;;  %v2145_v20 = vshll.u32 %v12824_v10, 16  ;;  %v2159_v24 = vshll.u32 %v12836_v25, 16  ;;  %v17376_v33 = vcombine.low %v12272_v46, %v12285_v60  ;;  %v10000_v12 = vld [vmem:[%s12206_s12 + $0x48] sm:$0xf] }
  0x97   : > { %v2152_v28 = vrot.slane %v2150_v21, 4  ;;  %v2155_v8 = vrot.slane %v2153_v23, 5  ;;  %v2169_v57 = vshll.u32 %v12846_v32, 16  ;;  %v2174_v5 = vshrl.u32 %v9997_v48, 16 }
  0x98   : > { %11278 = vmatmul.mubr.msk.bf16.gmra.mxu0 %vm707_vm3, %v9897_v11  ;;  %v12854_v11 = vsel %vm756_vm0, %v12604_v14, 0  ;;  %v2163_v14 = vshrl.u32 %v12836_v25, 16  ;;  %v2142_v0 = vor.u32 %v2141_v53, %v12843_v6  ;;  %v12874_v61 = vrot.slane %v2159_v24, 5 }
  0x99   : > { %11281 = vmatprep.mubr.msk.bf16.mxu0 %vm707_vm3, %v9898_v3  ;;  %v2132_v3 = vor.u32 %v2131_v9, %v2128_v19  ;;  %v17377_v15 = vcombine.low %v12316_v31, %v12325_v44  ;;  %v2100_v19 = vsel %vm12255_vm4, %v2095_v22, %v12831_v17  ;;  %v2119_v46 = vrot.slane %v2118_v35, 4  ;;  %v12886_v9 = vld [vmem:[%s12206_s12 + $0x44] sm:$0x1] }
  0x9a   : > { %v2165_v47 = vrot.slane %v2163_v14, 4  ;;  %v2156_v60 = vor.u32 %v2155_v8, %v2152_v28  ;;  %v2177_v53 = vshll.u32 %v9997_v48, 16  ;;  %v2147_v21 = vrot.slane %v2145_v20, 5 }
  0x9b   : > { %v2176_v24 = vrot.slane %v2174_v5, 4  ;;  %v2183_v14 = vshll.u32 %v12868_v41, 16  ;;  %v17378_v31 = vcombine.low %v12692_v62, %v12703_v38  ;;  %v2133_v44 = vrot.slane %v2132_v3, 4  ;;  %v10003_v5 = vld [vmem:[%s12206_s12 + $0x54] sm:$0xf] }
  0x9c   : > { %11244 = vmatmul.mubr.msk.bf16.gmra.mxu1 %vm707_vm3, %v17376_v33  ;;  %v2166_v23 = vor.u32 %v2165_v47, %v12874_v61  ;;  %v12891_v33 = vld [vmem:[%s12206_s12 + $0x4c] sm:$0xf]  ;;  %v2143_v17 = vrot.slane %v2142_v0, 4  ;;  %v2179_v22 = vrot.slane %v2177_v53, 5  ;;  %v2187_v48 = vshrl.u32 %v12868_v41, 16 }
  0x9d   : > { %11247 = vmatprep.mubr.msk.bf16.mxu1 %vm707_vm3, %v17377_v15  ;;  %v17379_v35 = vcombine.low %v12713_v45, %v12729_v13  ;;  %v2157_v20 = vrot.slane %v2156_v60, 4  ;;  %v2171_v28 = vrot.slane %v2169_v57, 5  ;;  %v12902_v8 = vrot.slane %v2183_v14, 5  ;;  %v12911_v60 = vld [vmem:[%s12206_s12 + $0x50] sm:$0x1] }
  0x9e   : > { %v2198_v47 = vshrl.u32 %v10000_v12, 16  ;;  %v9902_v62 = vcombine.low %v12800_v54, %v12804_v30  ;;  %v9903_v38 = vcombine.low %v12808_v18, %v12829_v56  ;;  %v2189_v3 = vrot.slane %v2187_v48, 4  ;;  %v11919_v56 = vld [vmem:[%s12206_s12 + $0xc] sm:$0xff]  }
  0x9f   : > { %v2201_v0 = vshll.u32 %v10000_v12, 16  ;;  %v2167_v15 = vrot.slane %v2166_v23, 4  ;;  %v2180_v45 = vor.u32 %v2179_v22, %v2176_v24  ;;  %v2193_v13 = vshll.u32 %v12886_v9, 16  ;;  %v12930_v23 = vld [vmem:[%s12206_s12 + $0x58] sm:$0xf] }
  0xa0   : > { %11282 = vmatmul.mubr.msk.bf16.gmra.mxu0 %vm707_vm3, %v17378_v31  ;;  %v2200_v57 = vrot.slane %v2198_v47, 4  ;;  %v12913_v53 = vcombine.low %v2090_v37, %v2100_v19  ;;  %v2190_v14 = vor.u32 %v2189_v3, %v12902_v8  ;;  %v2207_v54 = vshll.u32 %v12891_v33, 16  ;;  %v10006_v22 = vld [vmem:[%s12206_s12 + $0x60] sm:$0xf]  ;;  %v12946_v3 = vld [vmem:[%s12206_s12 + $0x5c] sm:$0x1] }
  0xa1   : > { %11285 = vmatprep.mubr.msk.bf16.mxu0 %vm707_vm3, %v17379_v35  ;;  %v2203_v31 = vrot.slane %v2201_v0, 5  ;;  %v17380_v30 = vcombine.low %v12352_v29, %v12360_v39  ;;  %v2114_v12 = vsel %vm12255_vm4, %v12861_v7, %v12821_v42  ;;  %v2124_v37 = vsel %vm12255_vm4, %v2119_v46, %v12850_v51 }
  0xa2   : > { %v2211_v19 = vshrl.u32 %v12891_v33, 16  ;;  %v2222_v24 = vshrl.u32 %v10003_v5, 16  ;;  %v17381_v29 = vcombine.low %v17367_v4, %v17366_v2  ;;  %v2138_v39 = vsel %vm12255_vm4, %v2133_v44, %v12843_v6  ;;  %v12949_v2 = vld [vmem:[%s12206_s12 + $0x64] sm:$0xf] }
  0xa3   : > { %v2148_v42 = vsel %vm12255_vm4, %v2143_v17, %v2147_v21  ;;  %v2204_v7 = vor.u32 %v2203_v31, %v2200_v57  ;;  %v2225_v51 = vshll.u32 %v10003_v5, 16  ;;  %v2162_v46 = vsel %vm12255_vm4, %v2157_v20, %v12874_v61 }
  0xa4   : > { %11248 = vmatmul.mubr.msk.bf16.gmra.mxu1 %vm707_vm3, %v17380_v30  ;;  %v2181_v48 = vrot.slane %v2180_v45, 4  ;;  %v2191_v35 = vrot.slane %v2190_v14, 4  ;;  %v2195_v47 = vrot.slane %v2193_v13, 5  ;;  %v17382_v4 = vcombine.low %v12745_v26, %v12757_v59 }
  0xa5   : > { %11251 = vmatprep.mubr.msk.bf16.mxu1 %vm707_vm3, %v17381_v29  ;;  %v2172_v6 = vsel %vm12255_vm4, %v2167_v15, %v2171_v28  ;;  %v12957_v21 = vrot.slane %v2207_v54, 5  ;;  %v2213_v44 = vrot.slane %v2211_v19, 4  ;;  %v2217_v61 = vshll.u32 %v12911_v60, 16 }
  0xa6   : > { %v2224_v17 = vrot.slane %v2222_v24, 4  ;;  %v2227_v20 = vrot.slane %v2225_v51, 5  ;;  %v2231_v5 = vshll.u32 %v12930_v23, 16  ;;  %v2235_v26 = vshrl.u32 %v12930_v23, 16 }
  0xa7   : > { %v12963_v59 = vcombine.low %v2114_v12, %v2124_v37  ;;  %v12965_v0 = vcombine.low %v2138_v39, %v2148_v42  ;;  %v12967_v28 = vrot.slane %v2204_v7, 4  ;;  %v2246_v15 = vshrl.u32 %v10006_v22, 16  ;;  %v10009_v12 = vld [vmem:[%s12206_s12 + $0x6c] sm:$0xf]  ;;  %v12982_v37 = vld [vmem:[%s12206_s12 + $0x70] sm:$0xf] }
  0xa8   : > { %11286 = vmatmul.mubr.msk.bf16.gmra.mxu0 %vm707_vm3, %v17382_v4  ;;  %v2196_v45 = vsel %vm12255_vm4, %v2191_v35, %v2195_v47  ;;  %v2249_v13 = vshll.u32 %v10006_v22, 16  ;;  %v2255_v57 = vshll.u32 %v12949_v2, 16  ;;  %v12975_v14 = vcombine.low %v2162_v46, %v2172_v6  ;;  %v12993_v39 = vld [vmem:[%s12206_s12 + $0x68] sm:$0x1]  ;;  %v13006_v46 = vld [vmem:[%s12206_s12 + $0x74] sm:$0x1] }
  0xa9   : > { %11289 = vmatprep.mubr.msk.bf16.mxu0 %vm707_vm3, %v9902_v62  ;;  %v2186_v62 = vsel %vm12255_vm4, %v2181_v48, %v12902_v8  ;;  %v2214_v31 = vor.u32 %v2213_v44, %v12957_v21  ;;  %v2241_v54 = vshll.u32 %v12946_v3, 16  ;;  %v2259_v30 = vshrl.u32 %v12949_v2, 16  ;;  %v10012_v48 = vld [vmem:[%s12206_s12 + $0x78] sm:$0xf] }
  0xaa   : > { %v17383_v8 = vcombine.low %v17370_v16, %v17369_v49  ;;  %v12988_v19 = vrot.slane %v2217_v61, 5  ;;  %v2228_v24 = vor.u32 %v2227_v20, %v2224_v17  ;;  %v12990_v22 = vrot.slane %v2231_v5, 5 }
  0xab   : > { %v2237_v29 = vrot.slane %v2235_v26, 4  ;;  %v17384_v42 = vcombine.low %v17373_v34, %v17372_v36  ;;  %v12999_v7 = vcombine.low %v2186_v62, %v2196_v45  ;;  %v2210_v49 = vsel %vm12255_vm4, %v12967_v28, %v12957_v21  ;;  %v13012_v34 = vld [vmem:[%s12206_s12 + $0x7c] sm:$0xf] }
  0xac   : > { %11252 = vmatmul.mubr.msk.bf16.gmra.mxu1 %vm707_vm3, %v17383_v8  ;;  %v2248_v16 = vrot.slane %v2246_v15, 4  ;;  %v2251_v51 = vrot.slane %v2249_v13, 5  ;;  %v13009_v35 = vrot.slane %v2255_v57, 5  ;;  %v2261_v47 = vrot.slane %v2259_v30, 4 }
  0xad   : > { %11255 = vmatprep.mubr.msk.bf16.mxu1 %vm707_vm3, %v17384_v42  ;;  %v2270_v4 = vshrl.u32 %v10009_v12, 16  ;;  %v2273_v36 = vshll.u32 %v10009_v12, 16  ;;  %v13018_v6 = vrot.slane %v2214_v31, 4  ;;  %v13020_v44 = vrot.slane %v2241_v54, 5  ;;  %v13081_v42 = vld [vmem:[%s12206_s12 + $0x94] sm:$0xf] }
  0xae   : > { %v2279_v61 = vshll.u32 %v12982_v37, 16  ;;  %v2283_v17 = vshrl.u32 %v12982_v37, 16  ;;  %v13026_v20 = vrot.slane %v2228_v24, 4  ;;  %v2238_v5 = vor.u32 %v2237_v29, %v12990_v22  ;;  %v10015_v24 = vld [vmem:[%s12206_s12 + $0x84] sm:$0xf]  ;;  %17387 = vst [vmem:[#allocation9_spill] sm:$0xff] %v13081_v42 }
  0xaf   : > { %v2272_v26 = vrot.slane %v2270_v4, 4  ;;  %v2275_v18 = vrot.slane %v2273_v36, 5  ;;  %v2265_v15 = vshll.u32 %v12993_v39, 16  ;;  %v2262_v13 = vor.u32 %v2261_v47, %v13009_v35  ;;  %v13053_v47 = vld [vmem:[%s12206_s12 + $0x88] sm:$0xf] }
  0xb0   : > { %11290 = vmatmul.mubr.msk.bf16.gmra.mxu0 %vm707_vm3, %v9903_v38  ;;  %v2252_v38 = vor.u32 %v2251_v51, %v2248_v16  ;;  %v13031_v62 = vrot.slane %v2279_v61, 5  ;;  %v2285_v45 = vrot.slane %v2283_v17, 4  ;;  %v2289_v57 = vshll.u32 %v13006_v46, 16 }
  0xb1   : > { %11329 = vmatprep.mubr.msk.bf16.mxu0 %vm707_vm3, %v12913_v53  ;;  %v2294_v53 = vshrl.u32 %v10012_v48, 16  ;;  %v2297_v31 = vshll.u32 %v10012_v48, 16  ;;  %v2220_v54 = vsel %vm12255_vm4, %v13018_v6, %v12988_v19  ;;  %v2276_v30 = vor.u32 %v2275_v18, %v2272_v26 }
  0xb2   : > { %v2286_v12 = vor.u32 %v2285_v45, %v13031_v62  ;;  %v2303_v8 = vshll.u32 %v13012_v34, 16  ;;  %v17385_v29 = vcombine.low %v12524_v55, %v12527_v63  ;;  %v13050_v16 = vrot.slane %v2238_v5, 4  ;;  %v13061_v63 = vld [vmem:[%s12206_s12 + $0x80] sm:$0x1] }
  0xb3   : > { %v2296_v51 = vrot.slane %v2294_v53, 4  ;;  %v2299_v48 = vrot.slane %v2297_v31, 5  ;;  %v13056_v4 = vrot.slane %v2252_v38, 4  ;;  %v13058_v55 = vrot.slane %v2265_v15, 5 }
  0xb4   : > { %11256 = vmatmul.mubr.msk.bf16.gmra.mxu1 %vm707_vm3, %v17385_v29  ;;  %v13063_v36 = vrot.slane %v2303_v8, 5  ;;  %v2307_v61 = vshrl.u32 %v13012_v34, 16  ;;  %v2263_v17 = vrot.slane %v2262_v13, 4  ;;  %v2291_v5 = vrot.slane %v2289_v57, 5  ;;  %v10018_v13 = vld [vmem:[%s12206_s12 + $0x90] sm:$0xf] }
  0xb5   : > { %11295 = vmatprep.mubr.msk.bf16.mxu1 %vm707_vm3, %v11919_v56  ;;  %v2318_v26 = vshrl.u32 %v10015_v24, 16  ;;  %v2321_v18 = vshll.u32 %v10015_v24, 16  ;;  %v13069_v56 = vld [vmem:[%s17290_s1 + $0x10] sm:$0x3]  ;;  %v2277_v38 = vrot.slane %v2276_v30, 4  ;;  %v2287_v15 = vrot.slane %v2286_v12, 4 }
  0xb6   : > { %17386 = vst [vmem:[#allocation10_spill] sm:$0xff] %v13069_v56  ;;  %v2309_v45 = vrot.slane %v2307_v61, 4  ;;  %v2327_v53 = vshll.u32 %v13053_v47, 16  ;;  %v11920_v57 = vld [vmem:[%s12206_s12 + $0x18] sm:$0xff]   ;;  %v2300_v31 = vor.u32 %v2299_v48, %v2296_v51  ;;  %v2313_v8 = vshll.u32 %v13061_v63, 16 }
  0xb7   : > { %v2320_v24 = vrot.slane %v2318_v26, 4  ;;  %v2323_v29 = vrot.slane %v2321_v18, 5  ;;  %v2244_v30 = vsel %vm12255_vm4, %v13050_v16, %v13020_v44  ;;  %v2331_v12 = vshrl.u32 %v13053_v47, 16  ;;  %v13097_v51 = vld [vmem:[%s12206_s12 + $0x8c] sm:$0x1] }
  0xb8   : > { %11330 = vmatmul.mubr.msk.bf16.vlgmr.msra.gmra.mxu0 %vm707_vm3, %v12963_v59  ;;  %v11921_v59 = vld [vmem:[%s12206_s12 + $0x24] sm:$0xff]   ;;  %17388 = vst [vmem:[#allocation11_spill] sm:$0xff] %v13097_v51  ;;  %v13099_v61 = vrot.slane %v2327_v53, 5  ;;  %v2342_v26 = vshrl.u32 %v10018_v13, 16  ;;  %v2345_v44 = vshll.u32 %v10018_v13, 16  ;;  %v2268_v16 = vsel %vm12255_vm4, %v2263_v17, %v13058_v55 }
  0xb9   : > { %11396 = vmatpush3.bf16.msra.mxu0 %v12854_v11  ;;  %11333 = vmatprep.mubr.msk.bf16.mxu0 %vm707_vm3, %v12965_v0  ;;  %v2258_v11 = vsel %vm12255_vm4, %v13056_v4, %v13009_v35  ;;  %v2310_v0 = vor.u32 %v2309_v45, %v13063_v36  ;;  %v2324_v48 = vor.u32 %v2323_v29, %v2320_v24  ;;  %v2333_v4 = vrot.slane %v2331_v12, 4  ;;  %v13111_v45 = vld [vmem:[%s17290_s1 + $0xe] sm:$0x3]  ;;  %v13128_v12 = vld [vmem:[%s12206_s12 + $0xa0] sm:$0xf] }
  0xba   : > { %11816 = vmatprep.subr.msk.bf16.mxu0 %vm756_vm0, %v13069_v56  ;;  %v2282_v35 = vsel %vm12255_vm4, %v2277_v38, %v13031_v62  ;;  %v2351_v18 = vshll.u32 %v13081_v42, 16  ;;  %17389 = vst [vmem:[#allocation13_spill] sm:$0xff] %v13111_v45  ;;  %v2292_v53 = vsel %vm12255_vm4, %v2287_v15, %v2291_v5  ;;  %v13116_v55 = vrot.slane %v2300_v31, 4  ;;  %v10021_v38 = vld [vmem:[%s12206_s12 + $0x9c] sm:$0xf]  ;;  %17390 = vst [vmem:[#allocation12_spill] sm:$0xff] %v13128_v12 }
  0xbb   : > { %v13118_v17 = vrot.slane %v2313_v8, 5  ;;  %v2355_v62 = vshrl.u32 %v13081_v42, 16  ;;  %v13124_v13 = vrot.slane %v2310_v0, 4  ;;  %v2337_v24 = vshll.u32 %v13097_v51, 16  ;;  %v13134_v31 = vld [vmem:[%s12206_s12 + $0x98] sm:$0x1] }
  0xbc   : > { %11296 = vmatmul.mubr.msk.bf16.vlgmr.msra.gmra.mxu1 %vm707_vm3, %v11920_v57  ;;  %v2344_v57 = vrot.slane %v2342_v26, 4  ;;  %v2347_v29 = vrot.slane %v2345_v44, 5  ;;  %v13130_v5 = vrot.slane %v2324_v48, 4  ;;  %v2334_v15 = vor.u32 %v2333_v4, %v13099_v61  ;;  %17391 = vst [vmem:[#allocation14_spill] sm:$0xff] %v13134_v31  ;;  %v11922_v44 = vld [vmem:[%s12206_s12 + $0x30] sm:$0xff]  }
  0xbd   : > { %11362 = vmatpush3.bf16.msra.mxu1 %v12841_v40  ;;  %11299 = vmatprep.mubr.msk.bf16.mxu1 %vm707_vm3, %v11921_v59  ;;  %v13136_v40 = vrot.slane %v2351_v18, 5  ;;  %v2357_v8 = vrot.slane %v2355_v62, 4  ;;  %v10039_v59 = vcombine.low %v2210_v49, %v2220_v54  ;;  %v17392_v0 = vsel %vm12255_vm4, %v13026_v20, %v12990_v22  ;;  %v10024_v49 = vld [vmem:[%s12206_s12 + $0xa8] sm:$0xf]  ;;  %v11923_v22 = vld [vmem:[%s12206_s12 + $0x3c] sm:$0xff]  }
  0xbe   : > { %11815 = vmatprep.subr.msk.bf16.mxu1 %vm756_vm0, %v13111_v45  ;;  %v10040_v48 = vcombine.low %v17392_v0, %v2244_v30  ;;  %v2366_v26 = vshrl.u32 %v10021_v38, 16  ;;  %v13160_v19 = vcombine.low %v2258_v11, %v2268_v16  ;;  %v13162_v6 = vcombine.low %v2282_v35, %v2292_v53  ;;  %v13176_v11 = vld [vmem:[%s12206_s12 + $0xac] sm:$0xf]  ;;  %v13190_v53 = vld [vmem:[%s12206_s12 + $0xa4] sm:$0x1] }
  0xbf   : > { %v2375_v21 = vshll.u32 %v13128_v12, 16  ;;  %v2379_v28 = vshrl.u32 %v13128_v12, 16  ;;  %v13172_v54 = vrot.slane %v2337_v24, 5  ;;  %v2361_v30 = vshll.u32 %v13134_v31, 16  ;;  %17393 = vst [vmem:[#allocation16_spill] sm:$0xff] %v13176_v11  ;;  %17394 = vst [vmem:[#allocation15_spill] sm:$0xff] %v13190_v53 }
  0xc0   : > { %11334 = vmatmul.mubr.msk.bf16.gmra.mxu0 %vm707_vm3, %v12975_v14  ;;  %v2369_v14 = vshll.u32 %v10021_v38, 16  ;;  %v13186_v4 = vrot.slane %v2334_v15, 4  ;;  %v2358_v18 = vor.u32 %v2357_v8, %v13136_v40  ;;  %v2368_v62 = vrot.slane %v2366_v26, 4  ;;  %v10027_v8 = vld [vmem:[%s12206_s12 + $0xb4] sm:$0xf] }
  0xc1   : > { %11337 = vmatprep.mubr.msk.bf16.mxu0 %vm707_vm3, %v12999_v7  ;;  %v2348_v7 = vor.u32 %v2347_v29, %v2344_v57  ;;  %v13192_v24 = vrot.slane %v2375_v21, 5  ;;  %v13195_v57 = vld [vmem:[%s12206_s12 + $0xb0] sm:$0x1]  ;;  %v2390_v29 = vshrl.u32 %v10024_v49, 16  ;;  %v2381_v0 = vrot.slane %v2379_v28, 4  ;;  %v11925_v12 = vld [vmem:[%s12206_s12 + $0x54] sm:$0xff]  }
  0xc2   : > { %v2371_v38 = vrot.slane %v2369_v14, 5  ;;  %17395 = vst [vmem:[#allocation8_spill] sm:$0xff] %v13195_v57  ;;  %v2393_v20 = vshll.u32 %v10024_v49, 16  ;;  %v2399_v15 = vshll.u32 %v13176_v11, 16  ;;  %v2403_v35 = vshrl.u32 %v13176_v11, 16  ;;  %v11924_v11 = vld [vmem:[%s12206_s12 + $0x48] sm:$0xff]  }
  0xc3   : > { %v13202_v26 = vrot.slane %v2348_v7, 4  ;;  %v13204_v14 = vrot.slane %v2361_v30, 5  ;;  %v2385_v21 = vshll.u32 %v13190_v53, 16  ;;  %v2392_v16 = vrot.slane %v2390_v29, 4  ;;  %v13208_v45 = vld [vmem:[%s12206_s12 + $0xb8] sm:$0xf] }
  0xc4   : > { %11300 = vmatmul.mubr.msk.bf16.gmra.mxu1 %vm707_vm3, %v11922_v44  ;;  %17396 = vst [vmem:[#allocation17_spill] sm:$0xff] %v13208_v45  ;;  %v13210_v44 = vrot.slane %v2358_v18, 4  ;;  %v2395_v28 = vrot.slane %v2393_v20, 5  ;;  %v13212_v49 = vrot.slane %v2399_v15, 5  ;;  %v2405_v56 = vrot.slane %v2403_v35, 4 }
  0xc5   : > { %11303 = vmatprep.mubr.msk.bf16.mxu1 %vm707_vm3, %v11923_v22  ;;  %v2340_v22 = vsel %vm12255_vm4, %v13186_v4, %v13172_v54  ;;  %v2372_v7 = vor.u32 %v2371_v38, %v2368_v62  ;;  %v2414_v30 = vshrl.u32 %v10027_v8, 16  ;;  %v2417_v29 = vshll.u32 %v10027_v8, 16  ;;  %v13224_v35 = vld [vmem:[%s12206_s12 + $0xbc] sm:$0x1]  ;;  %v10030_v53 = vld [vmem:[%s12206_s12 + $0xc0] sm:$0xf] }
  0xc6   : > { %v2382_v20 = vor.u32 %v2381_v0, %v13192_v24  ;;  %v2396_v18 = vor.u32 %v2395_v28, %v2392_v16  ;;  %v2409_v15 = vshll.u32 %v13195_v57, 16  ;;  %v2406_v31 = vor.u32 %v2405_v56, %v13212_v49  ;;  %v13232_v38 = vld [vmem:[%s12206_s12 + $0xc4] sm:$0xf]  ;;  %v13245_v42 = vld [vmem:[%s12206_s12 + $0xc8] sm:$0x1] }
  0xc7   : > { %v2416_v54 = vrot.slane %v2414_v30, 4  ;;  %v2419_v4 = vrot.slane %v2417_v29, 5  ;;  %v2427_v62 = vshrl.u32 %v13208_v45, 16  ;;  %v2364_v16 = vsel %vm12255_vm4, %v13210_v44, %v13204_v14 }
  0xc8   : > { %11338 = vmatmul.mubr.msk.bf16.gmra.mxu0 %vm707_vm3, %v10039_v59  ;;  %v2423_v59 = vshll.u32 %v13208_v45, 16  ;;  %v2387_v0 = vrot.slane %v2385_v21, 5  ;;  %v2433_v30 = vshll.u32 %v13224_v35, 16  ;;  %v2438_v29 = vshrl.u32 %v10030_v53, 16 }
  0xc9   : > { %11341 = vmatprep.mubr.msk.bf16.mxu0 %vm707_vm3, %v10040_v48  ;;  %v2354_v48 = vsel %vm12255_vm4, %v13202_v26, %v13136_v40  ;;  %v2420_v56 = vor.u32 %v2419_v4, %v2416_v54  ;;  %v2429_v28 = vrot.slane %v2427_v62, 4  ;;  %v2373_v45 = vrot.slane %v2372_v7, 4 }
  0xca   : > { %v2425_v8 = vrot.slane %v2423_v59, 5  ;;  %v2383_v57 = vrot.slane %v2382_v20, 4  ;;  %v2441_v51 = vshll.u32 %v10030_v53, 16  ;;  %v2447_v40 = vshll.u32 %v13232_v38, 16 }
  0xcb   : > { %v2397_v26 = vrot.slane %v2396_v18, 4  ;;  %v2407_v14 = vrot.slane %v2406_v31, 4  ;;  %v2411_v21 = vrot.slane %v2409_v15, 5  ;;  %v2440_v59 = vrot.slane %v2438_v29, 4  ;;  %v11927_v15 = vld [vmem:[%s12206_s12 + $0x6c] sm:$0xff]  }
  0xcc   : > { %11304 = vmatmul.mubr.msk.bf16.gmra.mxu1 %vm707_vm3, %v11924_v11  ;;  %v2430_v44 = vor.u32 %v2429_v28, %v2425_v8  ;;  %v2443_v54 = vrot.slane %v2441_v51, 5  ;;  %v2449_v4 = vrot.slane %v2447_v40, 5  ;;  %v2451_v11 = vshrl.u32 %v13232_v38, 16  ;;  %v10068_v29 = vld [vmem:[%s12206_s12 + $0x24] sm:$0xe] }
  0xcd   : > { %11307 = vmatprep.mubr.msk.bf16.mxu1 %vm707_vm3, %v11925_v12  ;;  %v2421_v53 = vrot.slane %v2420_v56, 4  ;;  %v2435_v20 = vrot.slane %v2433_v30, 5  ;;  %v2457_v62 = vshll.u32 %v13245_v42, 16  ;;  %v11926_v12 = vld [vmem:[%s12206_s12 + $0x60] sm:$0xff]   ;;  %v2378_v51 = vsel %vm12255_vm4, %v2373_v45, %v13192_v24 }
  0xce   : > { %v2431_v7 = vrot.slane %v2430_v44, 4  ;;  %v2388_v31 = vsel %vm12255_vm4, %v2383_v57, %v2387_v0  ;;  %v2444_v18 = vor.u32 %v2443_v54, %v2440_v59  ;;  %v17397_v56 = vsel %vm12255_vm4, %v13124_v13, %v13118_v17  ;;  %v13283_v17 = vld [vmem:[%s12206_s12 + $0xc] sm:$0xe]  ;;  %v10070_v54 = vld [vmem:[%s12206_s12 + $0x3c] sm:$0xe] }
  0xcf   : > { %v17399_v45 = vsel %vm12255_vm4, %v13130_v5, %v13099_v61  ;;  %v2402_v57 = vsel %vm12255_vm4, %v2397_v26, %v13212_v49  ;;  %v2412_v0 = vsel %vm12255_vm4, %v2407_v14, %v2411_v21  ;;  %v13287_v40 = vcombine.low %v2354_v48, %v2364_v16  ;;  %v10069_v16 = vld [vmem:[%s12206_s12 + $0x30] sm:$0xe] }
  0xd0   : > { %11342 = vmatmul.mubr.msk.bf16.gmra.mxu0 %vm707_vm3, %v13160_v19  ;;  %v2453_v19 = vrot.slane %v2451_v11, 4  ;;  %v10044_v24 = vcombine.low %v17399_v45, %v2340_v22  ;;  %v2445_v13 = vrot.slane %v2444_v18, 4  ;;  %v13289_v61 = vcombine.low %v2378_v51, %v2388_v31  ;;  %v11928_v31 = vld [vmem:[%s12206_s12 + $0x78] sm:$0xff]  }
  0xd1   : > { %11345 = vmatprep.mubr.msk.bf16.mxu0 %vm707_vm3, %v13162_v6  ;;  %v17398_v6 = vsel %vm12255_vm4, %v13116_v55, %v13063_v36  ;;  %v2459_v36 = vrot.slane %v2457_v62, 5  ;;  %v2821_v55 = vrot.slane %v12735_v43, 5  ;;  %v2426_v5 = vsel %vm12255_vm4, %v2421_v53, %v2425_v8 }
  0xd2   : > { %v10043_v28 = vcombine.low %v17398_v6, %v17397_v56  ;;  %v2454_v30 = vor.u32 %v2453_v19, %v2449_v4  ;;  %v2436_v49 = vsel %vm12255_vm4, %v2431_v7, %v2435_v20  ;;  %v13296_v22 = vcombine.low %v2402_v57, %v2412_v0  ;;  %v10071_v20 = vld [vmem:[%s12206_s12 + $0x48] sm:$0xe]  ;;  %v10072_v0 = vld [vmem:[%s12206_s12 + $0x54] sm:$0xe] }
  0xd3   : > { %v2450_v26 = vsel %vm12255_vm4, %v2445_v13, %v2449_v4  ;;  %v10082_v48 = vrot.slane %v13283_v17, 9  ;;  %v2824_v8 = vrot.slane %v12772_v52, 5  ;;  %v2828_v21 = vrot.slane %v12775_v50, 5  ;;  %v11929_v56 = vld [vmem:[%s12206_s12 + $0x84] sm:$0xff]   ;;  %v10073_v13 = vld [vmem:[%s12206_s12 + $0x60] sm:$0xe] }
  0xd4   : > { %11308 = vmatmul.mubr.msk.bf16.gmra.mxu1 %vm707_vm3, %v11926_v12  ;;  %v2455_v14 = vrot.slane %v2454_v30, 4  ;;  %v10084_v44 = vrot.slane %v10068_v29, 9  ;;  %v2835_v59 = vrot.slane %v12792_v1, 5  ;;  %v13307_v11 = vcombine.low %v2426_v5, %v2436_v49 }
  0xd5   : > { %11311 = vmatprep.mubr.msk.bf16.mxu1 %vm707_vm3, %v11927_v15  ;;  %v13313_v53 = vrot.slane %v2821_v55, 4  ;;  %v2838_v7 = vrot.slane %v12824_v10, 5  ;;  %v10085_v51 = vrot.slane %v10069_v16, 9  ;;  %v2842_v18 = vrot.slane %v12836_v25, 5 }
  0xd6   : > { %v2460_v4 = vsel %vm12255_vm4, %v2455_v14, %v2459_v36  ;;  %v13322_v1 = vsel %vm12550_vm7, %v10084_v44, %v2835_v59  ;;  %v2837_v12 = vrot.slane %v2835_v59, 4  ;;  %v2845_v10 = vrot.slane %v12846_v32, 5  ;;  %v10074_v14 = vld [vmem:[%s12206_s12 + $0x6c] sm:$0xe] }
  0xd7   : > { %v13318_v62 = vcombine.low %v2450_v26, %v2460_v4  ;;  %v10086_v19 = vrot.slane %v10070_v54, 9  ;;  %v2849_v15 = vrot.slane %v12868_v41, 5  ;;  %v10087_v45 = vrot.slane %v10071_v20, 9  ;;  %v10075_v54 = vld [vmem:[%s12206_s12 + $0x78] sm:$0xe] }
  0xd8   : > { %11346 = vmatmul.mubr.msk.bf16.gmra.mxu0 %vm707_vm3, %v10043_v28  ;;  %v13332_v6 = vsel %vm12550_vm7, %v2837_v12, %v2838_v7  ;;  %v2852_v28 = vrot.slane %v12886_v9, 5  ;;  %v2856_v57 = vrot.slane %v12891_v33, 5  ;;  %v13341_v32 = vsel %vm12550_vm7, %v10085_v51, %v2842_v18 }
  0xd9   : > { %11349 = vmatprep.mubr.msk.bf16.mxu0 %vm707_vm3, %v10044_v24  ;;  %v10101_v25 = vcombine.low %v13322_v1, %v13332_v6  ;;  %v2844_v41 = vrot.slane %v2842_v18, 4  ;;  %v13345_v24 = vsel %vm12550_vm7, %v10086_v19, %v2849_v15  ;;  %v2851_v9 = vrot.slane %v2849_v15, 4  ;;  %v11930_v18 = vld [vmem:[%s12206_s12 + $0x90] sm:$0xff]  }
  0xda   : > { %v13350_v33 = vsel %vm12550_vm7, %v10087_v45, %v2856_v57  ;;  %v2858_v30 = vrot.slane %v2856_v57, 4  ;;  %v2859_v36 = vrot.slane %v12911_v60, 5  ;;  %v10088_v5 = vrot.slane %v10072_v0, 9 }
  0xdb   : > { %v13356_v29 = vsel %vm12550_vm7, %v2844_v41, %v2845_v10  ;;  %v2863_v49 = vrot.slane %v12930_v23, 5  ;;  %v2866_v26 = vrot.slane %v12946_v3, 5  ;;  %v13366_v60 = vsel %vm12550_vm7, %v2851_v9, %v2852_v28 }
  0xdc   : > { %11312 = vmatmul.mubr.msk.bf16.gmra.mxu1 %vm707_vm3, %v11928_v31  ;;  %v10102_v16 = vcombine.low %v13341_v32, %v13356_v29  ;;  %v13370_v44 = vsel %vm12550_vm7, %v2858_v30, %v2859_v36  ;;  %v10089_v59 = vrot.slane %v10073_v13, 9  ;;  %v10103_v23 = vcombine.low %v13345_v24, %v13366_v60  ;;  %v17400_v30 = vld [vmem:[#allocation11_spill] sm:$0xff]  ;;  %v10278_v29 = vld [vmem:[%s12206_s12 + $0x24] sm:$0xe] }
  0xdd   : > { %11315 = vmatprep.mubr.msk.bf16.mxu1 %vm707_vm3, %v11929_v56  ;;  %v10104_v3 = vcombine.low %v13350_v33, %v13370_v44  ;;  %v13379_v4 = vsel %vm12550_vm7, %v10088_v5, %v2863_v49  ;;  %v2865_v7 = vrot.slane %v2863_v49, 4  ;;  %v2870_v20 = vrot.slane %v12949_v2, 5  ;;  %v10076_v2 = vld [vmem:[%s12206_s12 + $0x84] sm:$0xe]  ;;  %v11931_v56 = vld [vmem:[%s12206_s12 + $0x9c] sm:$0xff]  }
  0xde   : > { %v2873_v12 = vrot.slane %v12993_v39, 5  ;;  %v10090_v51 = vrot.slane %v10074_v14, 9  ;;  %v2877_v31 = vrot.slane %v12982_v37, 5  ;;  %v2880_v19 = vrot.slane %v13006_v46, 5  ;;  %v10077_v46 = vld [vmem:[%s12206_s12 + $0x90] sm:$0xe] }
  0xdf   : > { %v13391_v10 = vsel %vm12550_vm7, %v2865_v7, %v2866_v26  ;;  %v10091_v15 = vrot.slane %v10075_v54, 9  ;;  %v13401_v37 = vsel %vm12550_vm7, %v10089_v59, %v2870_v20  ;;  %v2887_v0 = vrot.slane %v13061_v63, 5  ;;  %v10078_v5 = vld [vmem:[%s12206_s12 + $0x9c] sm:$0xe]  ;;  %v10079_v59 = vld [vmem:[%s12206_s12 + $0xa8] sm:$0xe] }
  0xe0   : > { %11350 = vmatmul.mubr.msk.bf16.gmra.mxu0 %vm707_vm3, %v13287_v40  ;;  %v2884_v40 = vrot.slane %v13012_v34, 5  ;;  %v10105_v39 = vcombine.low %v13379_v4, %v13391_v10  ;;  %v13405_v28 = vsel %vm12550_vm7, %v10090_v51, %v2877_v31  ;;  %v2879_v45 = vrot.slane %v2877_v31, 4  ;;  %v17402_v31 = vld [vmem:[#allocation14_spill] sm:$0xff] }
  0xe1   : > { %11353 = vmatprep.mubr.msk.bf16.mxu0 %vm707_vm3, %v13289_v61  ;;  %v2872_v61 = vrot.slane %v2870_v20, 4  ;;  %v10092_v13 = vrot.slane %v10076_v2, 9  ;;  %v2891_v9 = vrot.slane %v13053_v47, 5  ;;  %v2894_v36 = vrot.slane %v17400_v30, 5 }
  0xe2   : > { %v13410_v34 = vsel %vm12550_vm7, %v10091_v15, %v2884_v40  ;;  %v2886_v57 = vrot.slane %v2884_v40, 4  ;;  %v13425_v26 = vsel %vm12550_vm7, %v2879_v45, %v2880_v19  ;;  %v10093_v14 = vrot.slane %v10077_v46, 9  ;;  %v17403_v15 = vld [vmem:[#allocation12_spill] sm:$0xff] }
  0xe3   : > { %v13415_v41 = vsel %vm12550_vm7, %v2872_v61, %v2873_v12  ;;  %v13439_v7 = vsel %vm12550_vm7, %v10092_v13, %v2891_v9  ;;  %v2893_v20 = vrot.slane %v2891_v9, 4  ;;  %v17401_v12 = vld [vmem:[#allocation9_spill] sm:$0xff]  ;;  %v10094_v19 = vrot.slane %v10078_v5, 9  ;;  %v17405_v45 = vld [vmem:[#allocation16_spill] sm:$0xff] }
  0xe4   : > { %11316 = vmatmul.mubr.msk.bf16.gmra.mxu1 %vm707_vm3, %v11930_v18  ;;  %v13429_v63 = vsel %vm12550_vm7, %v2886_v57, %v2887_v0  ;;  %v2898_v51 = vrot.slane %v17401_v12, 5  ;;  %v2901_v18 = vrot.slane %v17402_v31, 5  ;;  %v2905_v40 = vrot.slane %v17403_v15, 5  ;;  %v10080_v0 = vld [vmem:[%s12206_s12 + $0xb4] sm:$0xe]  ;;  %v11932_v13 = vld [vmem:[%s12206_s12 + $0xa8] sm:$0xff]  }
  0xe5   : > { %11319 = vmatprep.mubr.msk.bf16.mxu1 %vm707_vm3, %v11931_v56  ;;  %v13448_v2 = vsel %vm12550_vm7, %v2893_v20, %v2894_v36  ;;  %v17404_v56 = vld [vmem:[#allocation15_spill] sm:$0xff]  ;;  %v10095_v46 = vrot.slane %v10079_v59, 9  ;;  %v2912_v57 = vrot.slane %v17405_v45, 5  ;;  %v17406_v31 = vld [vmem:[#allocation8_spill] sm:$0xff]  ;;  %v2922_v45 = vrot.slane %v13224_v35, 5 }
  0xe6   : > { %v2908_v61 = vrot.slane %v17404_v56, 5  ;;  %v2900_v30 = vrot.slane %v2898_v51, 4  ;;  %v13464_v36 = vsel %vm12550_vm7, %v10094_v19, %v2905_v40  ;;  %v10081_v5 = vld [vmem:[%s12206_s12 + $0xc0] sm:$0xe]  ;;  %v11933_v59 = vld [vmem:[%s12206_s12 + $0xb4] sm:$0xff]   ;;  %v2907_v20 = vrot.slane %v2905_v40, 4 }
  0xe7   : > { %v13470_v12 = vsel %vm12550_vm7, %v10095_v46, %v2912_v57  ;;  %v2915_v15 = vrot.slane %v17406_v31, 5  ;;  %v17407_v56 = vld [vmem:[#allocation17_spill] sm:$0xff]  ;;  %v10097_v31 = vrot.slane %v10081_v5, 9  ;;  %v2926_v5 = vrot.slane %v13232_v38, 5  ;;  %v11934_v38 = vld [vmem:[%s12206_s12 + $0xc0] sm:$0xff]  }
  0xe8   : > { %11354 = vmatmul.mubr.msk.bf16.gmra.mxu0 %vm707_vm3, %v13296_v22  ;;  %v13460_v22 = vsel %vm12550_vm7, %v10093_v14, %v2898_v51  ;;  %v13475_v14 = vsel %vm12550_vm7, %v2900_v30, %v2901_v18  ;;  %v10096_v51 = vrot.slane %v10080_v0, 9  ;;  %v2919_v19 = vrot.slane %v17407_v56, 5  ;;  %v11935_v18 = vld [vmem:[%s12206_s12 + $0x18] sm:$0xff]   ;;  %v11936_v56 = vld [vmem:[%s12206_s12 + $0x24] sm:$0xff]  }
  0xe9   : > { %11357 = vmatprep.mubr.msk.bf16.mxu0 %vm707_vm3, %v13307_v11  ;;  %v2914_v11 = vrot.slane %v2912_v57, 4  ;;  %v13483_v46 = vsel %vm12550_vm7, %v2907_v20, %v2908_v61  ;;  %v10067_v20 = vld [vmem:[%s12206_s12 + $0x18] sm:$0xe]  ;;  %v2928_v52 = vrot.slane %v2926_v5, 4 }
  0xea   : > { %v13497_v30 = vsel %vm12550_vm7, %v10096_v51, %v2919_v19  ;;  %v2921_v61 = vrot.slane %v2919_v19, 4  ;;  %v10083_v17 = vrot.slane %v10067_v20, 9  ;;  %v10196_v20 = vld [vmem:[%s12206_s12 + $0x18] sm:$0xf] }
  0xeb   : > { %v13487_v57 = vsel %vm12550_vm7, %v2914_v11, %v2915_v15  ;;  %v2822_v11 = vsel %vm12550_vm7, %v10082_v48, %v2821_v55  ;;  %v2825_v15 = vsel %vm12550_vm7, %v13313_v53, %v2824_v8  ;;  %v2830_v55 = vrot.slane %v2828_v21, 4  ;;  %v11951_v48 = vld [vmem:[%s12206_s12 + $0x20] sm:$0x1] }
  0xec   : > { %11320 = vmatmul.mubr.msk.bf16.gmra.mxu1 %vm707_vm3, %v11932_v13  ;;  %v2929_v13 = vrot.slane %v13245_v42, 5  ;;  %v13524_v42 = vsel %vm12550_vm7, %v10097_v31, %v2926_v5  ;;  %v2831_v8 = vrot.slane %v11951_v48, 5  ;;  %v10099_v53 = vcombine.low %v2822_v11, %v2825_v15  ;;  %v11937_v31 = vld [vmem:[%s12206_s12 + $0x30] sm:$0xff]   ;;  %v13551_v5 = vld [vmem:[%s12206_s12 + $0x1c] sm:$0xf] }
  0xed   : > { %11323 = vmatprep.mubr.msk.bf16.mxu1 %vm707_vm3, %v11933_v59  ;;  %v13516_v59 = vsel %vm12550_vm7, %v2921_v61, %v2922_v45  ;;  %v2829_v19 = vsel %vm12550_vm7, %v10083_v17, %v2828_v21  ;;  %v3633_v21 = vshrl.u32 %v10196_v20, 16  ;;  %v3642_v11 = vshll.u32 %v13551_v5, 16  ;;  %v10199_v17 = vld [vmem:[%s12206_s12 + $0x24] sm:$0xf]  ;;  %v11938_v48 = vld [vmem:[%s12206_s12 + $0x3c] sm:$0xff]  }
  0xee   : > { %v2832_v45 = vsel %vm12550_vm7, %v2830_v55, %v2831_v8  ;;  %v3646_v15 = vshrl.u32 %v13551_v5, 16  ;;  %v13561_v55 = vld [vmem:[%s12206_s12 + $0x28] sm:$0xf] }
  0xef   : > { %v10100_v50 = vcombine.low %v2829_v19, %v2832_v45  ;;  %v11939_v8 = vld [vmem:[%s12206_s12 + $0x48] sm:$0xff]   ;;  %v13566_v19 = vrot.slane %v3642_v11, 5  ;;  %v10202_v11 = vld [vmem:[%s12206_s12 + $0x30] sm:$0xf] }
  0xf0   : > { %11358 = vmatmul.mubr.msk.bf16.gmra.mxu0 %vm707_vm3, %v13318_v62  ;;  %v13533_v62 = vsel %vm12550_vm7, %v2928_v52, %v2929_v13  ;;  %v3636_v13 = vshll.u32 %v10196_v20, 16  ;;  %v17409_v52 = vld [vmem:[#allocation13_spill] sm:$0xff]  ;;  %v3648_v45 = vrot.slane %v3646_v15, 4  ;;  %v3666_v20 = vshll.u32 %v13561_v55, 16 }
  0xf1   : > { %11397 = vmatprep.mubr.msk.bf16.mxu0 %vm707_vm3, %v11935_v18  ;;  %v17408_v18 = vld [vmem:[#allocation10_spill] sm:$0xff]  ;;  %v3681_v35 = vshrl.u32 %v10202_v11, 16  ;;  %v3684_v0 = vshll.u32 %v10202_v11, 16 }
  0xf2   : > { %v4585_v61 = vsel %vm756_vm0, %v17408_v18, 0  ;;  %v3657_v18 = vshrl.u32 %v10199_v17, 16  ;;  %v13589_v51 = vrot.slane %v3666_v20, 5 }
  0xf3   : > { %v3683_v54 = vrot.slane %v3681_v35, 4  ;;  %v3686_v47 = vrot.slane %v3684_v0, 5 }
  0xf4   : > { %11324 = vmatmul.mubr.msk.bf16.gmra.mxu1 %vm707_vm3, %v11934_v38  ;;  %v4115_v38 = vsel %vm756_vm0, %v17409_v52, 0  ;;  %v13584_v52 = vld [vmem:[%s12206_s12 + $0x34] sm:$0xf] }
  0xf5   : > { %11363 = vmatprep.mubr.msk.bf16.mxu1 %vm707_vm3, %v10099_v53  ;;  %v3635_v53 = vrot.slane %v3633_v21, 4  ;;  %v10277_v21 = vld [vmem:[%s12206_s12 + $0x18] sm:$0xe] }
  0xf6   : > { %v10293_v43 = vrot.slane %v10277_v21, 9 }
  0xf8   : > { %11398 = vmatmul.mubr.msk.bf16.vlgmr.msra.gmra.mxu0 %vm707_vm3, %v11936_v56  ;;  %v3638_v56 = vrot.slane %v3636_v13, 5  ;;  %v4376_v13 = vrot.slane %v13551_v5, 5 }
  0xf9   : > { %11464 = vmatpush3.bf16.msra.mxu0 %v4585_v61  ;;  %11401 = vmatprep.mubr.msk.bf16.mxu0 %vm707_vm3, %v11937_v31  ;;  %v10198_v31 = vld [vmem:[%s12206_s12 + $0x20] sm:$0x1]  ;;  %v3660_v61 = vshll.u32 %v10199_v17, 16  ;;  %v3659_v17 = vrot.slane %v3657_v18, 4 }
  0xfa   : > { %v3639_v6 = vor.u32 %v3638_v56, %v3635_v53  ;;  %v3652_v15 = vshll.u32 %v10198_v31, 16  ;;  %v4378_v40 = vrot.slane %v4376_v13, 4  ;;  %v4379_v53 = vrot.slane %v10198_v31, 5  ;;  %v11941_v18 = vld [vmem:[%s12206_s12 + $0x60] sm:$0xff]  }
  0xfb   : > { %v3690_v56 = vshll.u32 %v13584_v52, 16 }
  0xfc   : > { %11364 = vmatmul.mubr.msk.bf16.vlgmr.msra.gmra.mxu1 %vm707_vm3, %v10100_v50  ;;  %v3670_v50 = vshrl.u32 %v13561_v55, 16  ;;  %v13580_v1 = vpop.f32.mrf.mxu0  ;;  %v3654_v11 = vrot.slane %v3652_v15, 5  ;;  %v13618_v24 = vsel %vm12550_vm7, %v4378_v40, %v4379_v53  ;;  %v10205_v15 = vld [vmem:[%s12206_s12 + $0x3c] sm:$0xf]  ;;  %v13636_v53 = vld [vmem:[%s12206_s12 + $0x40] sm:$0xf] }
  0xfd   : > { %11430 = vmatpush3.bf16.msra.mxu1 %v4115_v38  ;;  %11367 = vmatprep.mubr.msk.bf16.mxu1 %vm707_vm3, %v10101_v25  ;;  %v3649_v25 = vor.u32 %v3648_v45, %v13566_v19  ;;  %v13587_v38 = vld [vmem:[%s12206_s12 + $0x2c] sm:$0x1]  ;;  %v3694_v45 = vshrl.u32 %v13584_v52, 16  ;;  %v13620_v60 = vrot.slane %v3690_v56, 5  ;;  %v3687_v56 = vor.u32 %v3686_v47, %v3683_v54 }
  0xfe   : > { %v3672_v5 = vrot.slane %v3670_v50, 4  ;;  %v13601_v20 = vpop.f32.mrf.mxu0  ;;  %v3640_v50 = vrot.slane %v3639_v6, 4  ;;  %v3676_v9 = vshll.u32 %v13587_v38, 16  ;;  %v13614_v6 = vsel %vm12550_vm7, %v10293_v43, %v4376_v13 }
  0xff   : > { %v3650_v21 = vrot.slane %v3649_v25, 4  ;;  %v10294_v13 = vrot.slane %v10278_v29, 9  ;;  %v10204_v25 = vld [vmem:[%s12206_s12 + $0x38] sm:$0x1]  ;;  %v3718_v29 = vshrl.u32 %v13636_v53, 16 }
 0x100   : > { %11402 = vmatmul.mubr.msk.bf16.gmra.mxu0 %vm707_vm3, %v11938_v48  ;;  %v3662_v48 = vrot.slane %v3660_v61, 5  ;;  %v3673_v32 = vor.u32 %v3672_v5, %v13589_v51  ;;  %v13625_v0 = vpop.f32.mrf.mxu0  ;;  %v3645_v35 = vsel %vm12255_vm4, %v3640_v50, %v13566_v19  ;;  %v3678_v43 = vrot.slane %v3676_v9, 5  ;;  %v11942_v19 = vld [vmem:[%s12206_s12 + $0x6c] sm:$0xff]  }
 0x101   : > { %11405 = vmatprep.mubr.msk.bf16.mxu0 %vm707_vm3, %v11939_v8  ;;  %v11940_v8 = vld [vmem:[%s12206_s12 + $0x54] sm:$0xff]   ;;  %v13599_v61 = vpop.f32.mrf.mxu1  ;;  %17412 = vst [vmem:[#allocation14_spill] sm:$0xff] %v13625_v0  ;;  %v3655_v40 = vsel %vm12255_vm4, %v3650_v21, %v3654_v11  ;;  %v3700_v50 = vshll.u32 %v10204_v25, 16  ;;  %v10279_v21 = vld [vmem:[%s12206_s12 + $0x30] sm:$0xe]  ;;  %v3705_v9 = vshrl.u32 %v10205_v15, 16 }
 0x102   : > { %17410 = vst [vmem:[#allocation11_spill] sm:$0xff] %v13599_v61  ;;  %v3663_v31 = vor.u32 %v3662_v48, %v3659_v17  ;;  %v3674_v48 = vrot.slane %v3673_v32, 4  ;;  %v3708_v11 = vshll.u32 %v10205_v15, 16  ;;  %v13649_v47 = vpop.f32.mrf.mxu0  ;;  %v13651_v54 = vcombine.low %v3645_v35, %v3655_v40  ;;  %v10208_v35 = vld [vmem:[%s12206_s12 + $0x48] sm:$0xf] }
 0x103   : > { %17414 = vst [vmem:[#allocation15_spill] sm:$0xff] %v13649_v47  ;;  %v3714_v32 = vshll.u32 %v13636_v53, 16  ;;  %v3688_v40 = vrot.slane %v3687_v56, 4  ;;  %v10295_v4 = vrot.slane %v10279_v21, 9  ;;  %v13676_v15 = vld [vmem:[%s12206_s12 + $0x4c] sm:$0xf] }
 0x104   : > { %11368 = vmatmul.mubr.msk.bf16.gmra.mxu1 %vm707_vm3, %v10102_v16  ;;  %v4383_v16 = vrot.slane %v13561_v55, 5  ;;  %v13623_v55 = vpop.f32.mrf.mxu1  ;;  %v3664_v17 = vrot.slane %v3663_v31, 4  ;;  %v11943_v31 = vld [vmem:[%s12206_s12 + $0x78] sm:$0xff]   ;;  %v3679_v44 = vsel %vm12255_vm4, %v3674_v48, %v3678_v43  ;;  %v3702_v43 = vrot.slane %v3700_v50, 5  ;;  %v10211_v50 = vld [vmem:[%s12206_s12 + $0x54] sm:$0xf] }
 0x105   : > { %11371 = vmatprep.mubr.msk.bf16.mxu1 %vm707_vm3, %v10103_v23  ;;  %v3696_v23 = vrot.slane %v3694_v45, 4  ;;  %17411 = vst [vmem:[#allocation9_spill] sm:$0xff] %v13623_v55  ;;  %v4390_v45 = vrot.slane %v13584_v52, 5  ;;  %v13691_v56 = vrot.slane %v3714_v32, 5  ;;  %v3729_v21 = vshrl.u32 %v10208_v35, 16 }
 0x106   : > { %v4385_v5 = vrot.slane %v4383_v16, 4  ;;  %v3669_v33 = vsel %vm12255_vm4, %v3664_v17, %v13589_v51  ;;  %v13680_v17 = vld [vmem:[%s12206_s12 + $0x44] sm:$0x1]  ;;  %v13698_v52 = vld [vmem:[%s12206_s12 + $0x58] sm:$0xf] }
 0x107   : > { %v4392_v10 = vrot.slane %v4390_v45, 4  ;;  %v13705_v32 = vsel %vm12550_vm7, %v10295_v4, %v4390_v45  ;;  %v11945_v45 = vld [vmem:[%s12206_s12 + $0x90] sm:$0xff]   ;;  %v3762_v55 = vshll.u32 %v13698_v52, 16 }
 0x108   : > { %11406 = vmatmul.mubr.msk.bf16.gmra.mxu0 %vm707_vm3, %v11940_v8  ;;  %v4386_v8 = vrot.slane %v13587_v38, 5  ;;  %v13647_v38 = vpop.f32.mrf.mxu1 }
 0x109   : > { %11409 = vmatprep.mubr.msk.bf16.mxu0 %vm707_vm3, %v11941_v18  ;;  %v3697_v18 = vor.u32 %v3696_v23, %v13620_v60  ;;  %17413 = vst [vmem:[#allocation12_spill] sm:$0xff] %v13647_v38  ;;  %v3756_v38 = vshll.u32 %v10211_v50, 16 }
 0x10a   : > { %v13672_v23 = vsel %vm12550_vm7, %v4385_v5, %v4386_v8  ;;  %v13683_v48 = vpop.f32.mrf.mxu1 }
 0x10b   : > { %v3698_v51 = vrot.slane %v3697_v18, 4  ;;  %17415 = vst [vmem:[#allocation16_spill] sm:$0xff] %v13683_v48  ;;  %v10280_v18 = vld [vmem:[%s12206_s12 + $0x3c] sm:$0xe]  ;;  %v3753_v48 = vshrl.u32 %v10211_v50, 16 }
 0x10c   : > { %11372 = vmatmul.mubr.msk.bf16.gmra.mxu1 %vm707_vm3, %v10104_v3  ;;  %v13668_v3 = vsel %vm12550_vm7, %v10294_v13, %v4383_v16  ;;  %v3707_v16 = vrot.slane %v3705_v9, 4  ;;  %v3710_v13 = vrot.slane %v3708_v11, 5  ;;  %v3732_v9 = vshll.u32 %v10208_v35, 16  ;;  %v11944_v35 = vld [vmem:[%s12206_s12 + $0x84] sm:$0xff]  }
 0x10d   : > { %11375 = vmatprep.mubr.msk.bf16.mxu1 %vm707_vm3, %v10105_v39  ;;  %v4393_v39 = vrot.slane %v10204_v25, 5  ;;  %v13687_v25 = vcombine.low %v3669_v33, %v3679_v44  ;;  %v3738_v11 = vshll.u32 %v13676_v15, 16  ;;  %v3693_v33 = vsel %vm12255_vm4, %v3688_v40, %v13620_v60 }
 0x10e   : > { %v3724_v44 = vshll.u32 %v13680_v17, 16  ;;  %v3703_v8 = vsel %vm12255_vm4, %v3698_v51, %v3702_v43  ;;  %v3711_v49 = vor.u32 %v3710_v13, %v3707_v16  ;;  %v17417_v60 = vcombine.low %v13401_v37, %v13415_v41  ;;  %v13732_v37 = vld [vmem:[%s12206_s12 + $0x50] sm:$0x1] }
 0x10f   : > { %v13685_v5 = vpop.f32.mrf.mxu0  ;;  %v3766_v51 = vshrl.u32 %v13698_v52, 16  ;;  %v17420_v43 = vcombine.low %v13405_v28, %v13425_v26  ;;  %v3731_v41 = vrot.slane %v3729_v21, 4  ;;  %v3734_v16 = vrot.slane %v3732_v9, 5  ;;  %v10214_v28 = vld [vmem:[%s12206_s12 + $0x60] sm:$0xf] }
 0x110   : > { %11410 = vmatmul.mubr.msk.bf16.gmra.mxu0 %vm707_vm3, %v11942_v19  ;;  %17416 = vst [vmem:[#allocation8_spill] sm:$0xff] %v13685_v5  ;;  %v3720_v19 = vrot.slane %v3718_v29, 4  ;;  %v13709_v29 = vsel %vm12550_vm7, %v4392_v10, %v4393_v39  ;;  %v10296_v39 = vrot.slane %v10280_v18, 9  ;;  %v13734_v13 = vrot.slane %v3738_v11, 5 }
 0x111   : > { %11413 = vmatprep.mubr.msk.bf16.mxu0 %vm707_vm3, %v11943_v31  ;;  %v3742_v31 = vshrl.u32 %v13676_v15, 16  ;;  %v13722_v4 = vpop.f32.mrf.mxu0  ;;  %v13740_v18 = vrot.slane %v3724_v44, 5  ;;  %v13745_v26 = vrot.slane %v3711_v49, 4  ;;  %v4400_v21 = vrot.slane %v13680_v17, 5 }
 0x112   : > { %v13720_v40 = vpop.f32.mrf.mxu1  ;;  %17419 = vst [vmem:[#allocation10_spill] sm:$0xff] %v13722_v4  ;;  %v3721_v10 = vor.u32 %v3720_v19, %v13691_v56  ;;  %v3755_v9 = vrot.slane %v3753_v48, 4  ;;  %v3758_v11 = vrot.slane %v3756_v38, 5  ;;  %v3748_v44 = vshll.u32 %v13732_v37, 16  ;;  %v10213_v19 = vld [vmem:[%s12206_s12 + $0x5c] sm:$0x1] }
 0x113   : > { %17418 = vst [vmem:[#allocation17_spill] sm:$0xff] %v13720_v40  ;;  %v3744_v50 = vrot.slane %v3742_v31, 4  ;;  %v4397_v40 = vrot.slane %v13636_v53, 5  ;;  %v13759_v49 = vrot.slane %v3762_v55, 5  ;;  %v3735_v38 = vor.u32 %v3734_v16, %v3731_v41  ;;  %v11947_v4 = vld [vmem:[%s12206_s12 + $0xa8] sm:$0xff]  }
 0x114   : > { %11376 = vmatmul.mubr.msk.bf16.gmra.mxu1 %vm707_vm3, %v17417_v60  ;;  %v13736_v60 = vcombine.low %v3693_v33, %v3703_v8  ;;  %v13749_v8 = vld [vmem:[%s12206_s12 + $0x64] sm:$0xf]  ;;  %v13752_v31 = vpop.f32.mrf.mxu1  ;;  %v13754_v33 = vpop.f32.mrf.mxu0  ;;  %v13756_v53 = vrot.slane %v3721_v10, 4  ;;  %v3780_v10 = vshll.u32 %v10214_v28, 16  ;;  %v3759_v16 = vor.u32 %v3758_v11, %v3755_v9 }
 0x115   : > { %11379 = vmatprep.mubr.msk.bf16.mxu1 %vm707_vm3, %v17420_v43  ;;  %17421 = vst [vmem:[#allocation13_spill] sm:$0xff] %v13752_v31  ;;  %17422 = vst [vmem:[#allocation18_spill] sm:$0xff] %v13754_v33  ;;  %v13763_v17 = vsel %vm12550_vm7, %v10296_v39, %v4397_v40  ;;  %v3745_v48 = vor.u32 %v3744_v50, %v13734_v13  ;;  %v4404_v43 = vrot.slane %v13676_v15, 5  ;;  %v3777_v31 = vshrl.u32 %v10214_v28, 16 }
 0x116   : > { %v3786_v61 = vshll.u32 %v13749_v8, 16  ;;  %v3790_v55 = vshrl.u32 %v13749_v8, 16  ;;  %v3717_v39 = vsel %vm12255_vm4, %v13745_v26, %v13691_v56  ;;  %v4399_v41 = vrot.slane %v4397_v40, 4  ;;  %v13781_v28 = vpop.f32.mrf.mxu1  ;;  %v13783_v33 = vpop.f32.mrf.mxu0  ;;  %v10282_v26 = vld [vmem:[%s12206_s12 + $0x54] sm:$0xe] }
 0x117   : > { %v4411_v50 = vrot.slane %v13698_v52, 5  ;;  %v17423_v15 = vcombine.low %v13410_v34, %v13429_v63  ;;  %17424 = vst [vmem:[#allocation19_spill] sm:$0xff] %v13781_v28  ;;  %17425 = vst [vmem:[#allocation20_spill] sm:$0xff] %v13783_v33  ;;  %v13786_v5 = vrot.slane %v3748_v44, 5  ;;  %v3772_v40 = vshll.u32 %v10213_v19, 16 }
 0x118   : > { %11414 = vmatmul.mubr.msk.bf16.gmra.mxu0 %vm707_vm3, %v11944_v35  ;;  %v3768_v35 = vrot.slane %v3766_v51, 4  ;;  %v11946_v51 = vld [vmem:[%s12206_s12 + $0x9c] sm:$0xff]   ;;  %v17426_v52 = vcombine.low %v13439_v7, %v13448_v2  ;;  %v3736_v34 = vrot.slane %v3735_v38, 4  ;;  %v3746_v63 = vrot.slane %v3745_v48, 4  ;;  %v10217_v38 = vld [vmem:[%s12206_s12 + $0x6c] sm:$0xf]  ;;  %v13802_v48 = vpop.f32.mrf.mxu1 }
 0x119   : > { %11417 = vmatprep.mubr.msk.bf16.mxu0 %vm707_vm3, %v11945_v45  ;;  %v10281_v45 = vld [vmem:[%s12206_s12 + $0x48] sm:$0xe]  ;;  %v4406_v9 = vrot.slane %v4404_v43, 4  ;;  %v4407_v11 = vrot.slane %v13732_v37, 5  ;;  %v3779_v44 = vrot.slane %v3777_v31, 4  ;;  %v3782_v28 = vrot.slane %v3780_v10, 5 }
 0x11a   : > { %v10297_v47 = vrot.slane %v10281_v45, 9  ;;  %v3769_v56 = vor.u32 %v3768_v35, %v13759_v49  ;;  %v13798_v45 = vrot.slane %v3786_v61, 5  ;;  %v3792_v35 = vrot.slane %v3790_v55, 4  ;;  %17427 = vst [vmem:[#allocation21_spill] sm:$0xff] %v13802_v48 }
 0x11b   : > { %v3760_v33 = vrot.slane %v3759_v16, 4  ;;  %v10298_v7 = vrot.slane %v10282_v26, 9  ;;  %v4413_v2 = vrot.slane %v4411_v50, 4  ;;  %v4414_v0 = vrot.slane %v10213_v19, 5  ;;  %v10283_v16 = vld [vmem:[%s12206_s12 + $0x60] sm:$0xe] }
 0x11c   : > { %11380 = vmatmul.mubr.msk.bf16.gmra.mxu1 %vm707_vm3, %v17423_v15  ;;  %v13796_v15 = vld [vmem:[%s12206_s12 + $0x68] sm:$0x1]  ;;  %v3727_v61 = vsel %vm12255_vm4, %v13756_v53, %v13740_v18  ;;  %v13813_v31 = vsel %vm12550_vm7, %v4399_v41, %v4400_v21  ;;  %v3770_v10 = vrot.slane %v3769_v56, 4  ;;  %v3774_v19 = vrot.slane %v3772_v40, 5  ;;  %v13827_v53 = vld [vmem:[%s12206_s12 + $0x70] sm:$0xf] }
 0x11d   : > { %11383 = vmatprep.mubr.msk.bf16.mxu1 %vm707_vm3, %v17426_v52  ;;  %v3741_v55 = vsel %vm12255_vm4, %v3736_v34, %v13734_v13  ;;  %v3796_v18 = vshll.u32 %v13796_v15, 16  ;;  %v3783_v21 = vor.u32 %v3782_v28, %v3779_v44  ;;  %v3793_v41 = vor.u32 %v3792_v35, %v13798_v45  ;;  %v11948_v13 = vld [vmem:[%s12206_s12 + $0xb4] sm:$0xff]  }
 0x11e   : > { %v3801_v56 = vshrl.u32 %v10217_v38, 16  ;;  %v3804_v40 = vshll.u32 %v10217_v38, 16  ;;  %v13847_v28 = vsel %vm12550_vm7, %v4413_v2, %v4414_v0  ;;  %v17428_v52 = vcombine.low %v13460_v22, %v13475_v14  ;;  %v10220_v35 = vld [vmem:[%s12206_s12 + $0x78] sm:$0xf] }
 0x11f   : > { %v17430_v0 = vcombine.low %v13464_v36, %v13483_v46  ;;  %v13865_v22 = vcombine.low %v3717_v39, %v3727_v61  ;;  %v10299_v44 = vrot.slane %v10283_v16, 9 }
 0x120   : > { %11418 = vmatmul.mubr.msk.bf16.gmra.mxu0 %vm707_vm3, %v11946_v51  ;;  %v13805_v37 = vpop.f32.mrf.mxu0  ;;  %v13823_v51 = vsel %vm12550_vm7, %v10297_v47, %v4404_v43  ;;  %v3765_v47 = vsel %vm12255_vm4, %v3760_v33, %v13759_v49  ;;  %v13843_v43 = vsel %vm12550_vm7, %v10298_v7, %v4411_v50  ;;  %v3775_v33 = vsel %vm12255_vm4, %v3770_v10, %v3774_v19  ;;  %v13871_v10 = vld [vmem:[%s12206_s12 + $0x7c] sm:$0xf] }
 0x121   : > { %11421 = vmatprep.mubr.msk.bf16.mxu0 %vm707_vm3, %v11947_v4  ;;  %v3751_v4 = vsel %vm12255_vm4, %v3746_v63, %v13786_v5  ;;  %v13836_v5 = vsel %vm12550_vm7, %v4406_v9, %v4407_v11  ;;  %v11949_v63 = vld [vmem:[%s12206_s12 + $0xc0] sm:$0xff]   ;;  %v4418_v49 = vrot.slane %v13749_v8, 5  ;;  %v3810_v50 = vshll.u32 %v13827_v53, 16 }
 0x122   : > { %v13832_v26 = vpop.f32.mrf.mxu0  ;;  %v3814_v9 = vshrl.u32 %v13827_v53, 16  ;;  %v3798_v11 = vrot.slane %v3796_v18, 5  ;;  %v3784_v8 = vrot.slane %v3783_v21, 4  ;;  %v3794_v7 = vrot.slane %v3793_v41, 4  ;;  %v13885_v18 = vld [vmem:[%s12206_s12 + $0x74] sm:$0x1] }
 0x123   : > { %v3803_v2 = vrot.slane %v3801_v56, 4  ;;  %v3806_v38 = vrot.slane %v3804_v40, 5  ;;  %v13876_v46 = vcombine.low %v3741_v55, %v3751_v4  ;;  %v13880_v61 = vcombine.low %v3765_v47, %v3775_v33  ;;  %v10223_v21 = vld [vmem:[%s12206_s12 + $0x84] sm:$0xf]  ;;  %v13895_v40 = vld [vmem:[%s12206_s12 + $0x88] sm:$0xf] }
 0x124   : > { %11384 = vmatmul.mubr.msk.bf16.gmra.mxu1 %vm707_vm3, %v17428_v52  ;;  %v13853_v34 = vpop.f32.mrf.mxu1  ;;  %v13874_v36 = vpop.f32.mrf.mxu0  ;;  %v4420_v16 = vrot.slane %v4418_v49, 4  ;;  %v4421_v55 = vrot.slane %v13796_v15, 5  ;;  %v13892_v4 = vrot.slane %v3810_v50, 5  ;;  %v3816_v56 = vrot.slane %v3814_v9, 4 }
 0x125   : > { %17429 = vst [vmem:[#allocation22_spill] sm:$0xff] %v13853_v34  ;;  %11387 = vmatprep.mubr.msk.bf16.mxu1 %vm707_vm3, %v17430_v0  ;;  %v3825_v47 = vshrl.u32 %v10220_v35, 16  ;;  %v3828_v52 = vshll.u32 %v10220_v35, 16  ;;  %v3834_v33 = vshll.u32 %v13871_v10, 16  ;;  %v3838_v0 = vshrl.u32 %v13871_v10, 16  ;;  %v11950_v35 = vld [vmem:[%s12206_s12 + $0xcc] sm:$0xff]  }
 0x126   : > { %v13888_v41 = vpop.f32.mrf.mxu1  ;;  %v3799_v19 = vsel %vm12255_vm4, %v3794_v7, %v3798_v11  ;;  %v13907_v15 = vsel %vm12550_vm7, %v10299_v44, %v4418_v49  ;;  %v3807_v50 = vor.u32 %v3806_v38, %v3803_v2  ;;  %v13909_v9 = vpop.f32.mrf.mxu0  ;;  %v3849_v39 = vshrl.u32 %v10223_v21, 16 }
 0x127   : > { %17431 = vst [vmem:[#allocation23_spill] sm:$0xff] %v13888_v41  ;;  %v3852_v14 = vshll.u32 %v10223_v21, 16  ;;  %v3858_v41 = vshll.u32 %v13895_v40, 16  ;;  %v3862_v34 = vshrl.u32 %v13895_v40, 16  ;;  %v13922_v49 = vsel %vm12550_vm7, %v4420_v16, %v4421_v55 }
 0x128   : > { %11422 = vmatmul.mubr.msk.bf16.gmra.mxu0 %vm707_vm3, %v11948_v13  ;;  %v10284_v13 = vld [vmem:[%s12206_s12 + $0x6c] sm:$0xe]  ;;  %v13918_v11 = vpop.f32.mrf.mxu1  ;;  %v3817_v44 = vor.u32 %v3816_v56, %v13892_v4  ;;  %v17434_v2 = vcombine.low %v13497_v30, %v13516_v59  ;;  %v3830_v38 = vrot.slane %v3828_v52, 5  ;;  %v13931_v21 = vrot.slane %v3834_v33, 5  ;;  %v10285_v30 = vld [vmem:[%s12206_s12 + $0x78] sm:$0xe] }
 0x129   : > { %11425 = vmatprep.mubr.msk.bf16.mxu0 %vm707_vm3, %v11949_v63  ;;  %v3789_v63 = vsel %vm12255_vm4, %v3784_v8, %v13798_v45  ;;  %v17432_v45 = vcombine.low %v13470_v12, %v13487_v57  ;;  %17433 = vst [vmem:[#allocation24_spill] sm:$0xff] %v13918_v11  ;;  %v3820_v8 = vshll.u32 %v13885_v18, 16  ;;  %v10300_v7 = vrot.slane %v10284_v13, 9  ;;  %v10222_v12 = vld [vmem:[%s12206_s12 + $0x80] sm:$0x1] }
 0x12a   : > { %v3827_v57 = vrot.slane %v3825_v47, 4  ;;  %v13933_v11 = vcombine.low %v3789_v63, %v3799_v19  ;;  %v13935_v16 = vrot.slane %v3807_v50, 4  ;;  %v4425_v55 = vrot.slane %v13827_v53, 5  ;;  %v13945_v19 = vpop.f32.mrf.mxu1  ;;  %v13955_v50 = vld [vmem:[%s12206_s12 + $0x8c] sm:$0x1] }
 0x12b   : > { %v4432_v56 = vrot.slane %v13871_v10, 5  ;;  %v3851_v59 = vrot.slane %v3849_v39, 4  ;;  %v3854_v47 = vrot.slane %v3852_v14, 5  ;;  %v13943_v52 = vrot.slane %v3858_v41, 5  ;;  %17436 = vst [vmem:[#allocation26_spill] sm:$0xff] %v13945_v19 }
 0x12c   : > { %11388 = vmatmul.mubr.msk.bf16.gmra.mxu1 %vm707_vm3, %v17432_v45  ;;  %v3840_v45 = vrot.slane %v3838_v0, 4  ;;  %v3864_v33 = vrot.slane %v3862_v34, 4  ;;  %v17437_v0 = vcombine.low %v13614_v6, %v13618_v24  ;;  %v3822_v10 = vrot.slane %v3820_v8, 5  ;;  %v17467_v58 = vld [vmem:[#allocation22_spill] sm:$0xff] }
 0x12d   : > { %11391 = vmatprep.mubr.msk.bf16.mxu1 %vm707_vm3, %v17434_v2  ;;  %v4428_v63 = vrot.slane %v13885_v18, 5  ;;  %v3844_v39 = vshll.u32 %v10222_v12, 16  ;;  %v3818_v34 = vrot.slane %v3817_v44, 4  ;;  %v13961_v41 = vsel %vm12550_vm7, %v10300_v7, %v4425_v55  ;;  %v13966_v18 = vld [vmem:[%s12206_s12 + $0x94] sm:$0xf] }
 0x12e   : > { %v3831_v6 = vor.u32 %v3830_v38, %v3827_v57  ;;  %v3841_v24 = vor.u32 %v3840_v45, %v13931_v21  ;;  %v4427_v2 = vrot.slane %v4425_v55, 4  ;;  %v4434_v8 = vrot.slane %v4432_v56, 4 }
 0x12f   : > { %v4435_v53 = vrot.slane %v10222_v12, 5  ;;  %v3813_v44 = vsel %vm12255_vm4, %v13935_v16, %v13892_v4  ;;  %v3855_v7 = vor.u32 %v3854_v47, %v3851_v59  ;;  %v3865_v57 = vor.u32 %v3864_v33, %v13943_v52 }
 0x130   : > { %v13939_v13 = vpop.f32.mrf.mxu0  ;;  %11426 = vmatmul.mubr.msk.bf16.gmra.mxu0 %vm707_vm3, %v11950_v35  ;;  %v10226_v35 = vld [vmem:[%s12206_s12 + $0x90] sm:$0xf]  ;;  %v3868_v38 = vshll.u32 %v13955_v50, 16  ;;  %v17440_v55 = vcombine.low %v13524_v42, %v13533_v62  ;;  %v3846_v12 = vrot.slane %v3844_v39, 5  ;;  %v4439_v48 = vrot.slane %v13895_v40, 5 }
 0x131   : > { %17435 = vst [vmem:[#allocation25_spill] sm:$0xff] %v13939_v13  ;;  %11465 = vmatprep.mubr.msk.bf16.mxu0 %vm707_vm3, %v17437_v0  ;;  %v10301_v0 = vrot.slane %v10285_v30, 9  ;;  %v10286_v30 = vld [vmem:[%s12206_s12 + $0x84] sm:$0xe]  ;;  %v3832_v4 = vrot.slane %v3831_v6, 4  ;;  %v3842_v16 = vrot.slane %v3841_v24, 4  ;;  %v3823_v47 = vsel %vm12255_vm4, %v3818_v34, %v3822_v10 }
 0x132   : > { %v13957_v14 = vpop.f32.mrf.mxu0  ;;  %v3882_v59 = vshll.u32 %v13966_v18, 16  ;;  %v3886_v42 = vshrl.u32 %v13966_v18, 16  ;;  %v13996_v40 = vsel %vm12550_vm7, %v4427_v2, %v4428_v63  ;;  %v14004_v33 = vsel %vm12550_vm7, %v4434_v8, %v4435_v53  ;;  %v10229_v8 = vld [vmem:[%s12206_s12 + $0x9c] sm:$0xf]  ;;  %v17470_v27 = vld [vmem:[#allocation26_spill] sm:$0xff] }
 0x133   : > { %17438 = vst [vmem:[#allocation27_spill] sm:$0xff] %v13957_v14  ;;  %v3876_v14 = vshll.u32 %v10226_v35, 16  ;;  %v17441_v6 = vcombine.low %v13668_v3, %v13672_v23  ;;  %v3856_v10 = vrot.slane %v3855_v7, 4  ;;  %v3866_v34 = vrot.slane %v3865_v57, 4 }
 0x134   : > { %v13968_v19 = vpop.f32.mrf.mxu0  ;;  %v13976_v45 = vpop.f32.mrf.mxu1  ;;  %11392 = vmatmul.mubr.msk.bf16.gmra.mxu1 %vm707_vm3, %v17440_v55  ;;  %v3870_v24 = vrot.slane %v3868_v38, 5  ;;  %v10302_v63 = vrot.slane %v10286_v30, 9  ;;  %v4441_v53 = vrot.slane %v4439_v48, 4  ;;  %v3837_v57 = vsel %vm12255_vm4, %v3832_v4, %v13931_v21 }
 0x135   : > { %17439 = vst [vmem:[#allocation28_spill] sm:$0xff] %v13968_v19  ;;  %v3873_v19 = vshrl.u32 %v10226_v35, 16  ;;  %11431 = vmatprep.mubr.msk.bf16.mxu1 %vm707_vm3, %v13651_v54  ;;  %v14000_v54 = vsel %vm12550_vm7, %v10301_v0, %v4432_v56  ;;  %v14011_v35 = vld [vmem:[%s12206_s12 + $0x98] sm:$0x1]  ;;  %v17442_v56 = vcombine.low %v13705_v32, %v13709_v29  ;;  %v4442_v0 = vrot.slane %v13955_v50, 5 }
 0x136   : > { %v13984_v13 = vpop.f32.mrf.mxu0  ;;  %v13990_v62 = vpop.f32.mrf.mxu1  ;;  %v3878_v23 = vrot.slane %v3876_v14, 5  ;;  %v3847_v38 = vsel %vm12255_vm4, %v3842_v16, %v3846_v12  ;;  %v14026_v55 = vrot.slane %v3882_v59, 5  ;;  %v3888_v32 = vrot.slane %v3886_v42, 4 }
 0x137   : > { %v3875_v3 = vrot.slane %v3873_v19, 4  ;;  %v14030_v30 = vcombine.low %v3813_v44, %v3823_v47  ;;  %v3892_v14 = vshll.u32 %v14011_v35, 16  ;;  %v3861_v12 = vsel %vm12255_vm4, %v3856_v10, %v13943_v52  ;;  %v14044_v44 = vld [vmem:[%s12206_s12 + $0xa0] sm:$0xf] }
 0x138   : > { %v11263_v39 = vpop.f32.mrf.mxu0  ;;  %11466 = vmatmul.mubr.msk.bf16.vlgmr.msra.gmra.mxu0 %vm707_vm3, %v17441_v6  ;;  %v14013_v2 = vpop.f32.mrf.mxu1  ;;  %v10287_v6 = vld [vmem:[%s12206_s12 + $0x90] sm:$0xe]  ;;  %v3871_v4 = vsel %vm12255_vm4, %v3866_v34, %v3870_v24  ;;  %v3897_v16 = vshrl.u32 %v10229_v8, 16  ;;  %v3900_v59 = vshll.u32 %v10229_v8, 16  ;;  %v14048_v47 = vcombine.low %v3837_v57, %v3847_v38  ;;  %v10232_v38 = vld [vmem:[%s12206_s12 + $0xa8] sm:$0xf] }
 0x139   : > { %11469 = vmatprep.mubr.msk.bf16.mxu0 %vm707_vm3, %v17442_v56  ;;  %v14052_v56 = vsel %vm12550_vm7, %v10302_v63, %v4439_v48  ;;  %v14056_v52 = vsel %vm12550_vm7, %v4441_v53, %v4442_v0  ;;  %v3879_v10 = vor.u32 %v3878_v23, %v3875_v3  ;;  %v10303_v8 = vrot.slane %v10287_v6, 9  ;;  %v14078_v6 = vld [vmem:[%s12206_s12 + $0xac] sm:$0xf] }
 0x13a   : > { %v1511_v7 = vpop.f32.mrf.mxu0  ;;  %v14028_v29 = vpop.f32.mrf.mxu1  ;;  %v4446_v57 = vrot.slane %v13966_v18, 5  ;;  %v14064_v63 = vcombine.low %v3861_v12, %v3871_v4  ;;  %v14066_v50 = vrot.slane %v3892_v14, 5  ;;  %v3906_v53 = vshll.u32 %v14044_v44, 16 }
 0x13b   : > { %v17443_v23 = vcombine.low %v13763_v17, %v13813_v31  ;;  %v3899_v18 = vrot.slane %v3897_v16, 4  ;;  %v17444_v12 = vcombine.low %v13823_v51, %v13836_v5  ;;  %v4449_v4 = vrot.slane %v14011_v35, 5  ;;  %v17445_v17 = vld [vmem:[#allocation14_spill] sm:$0xff] }
 0x13c   : > { %v11264_v21 = vpop.f32.mrf.mxu0  ;;  %v11229_v42 = vpop.f32.mrf.mxu1  ;;  %11432 = vmatmul.mubr.msk.bf16.vlgmr.msra.gmra.mxu1 %vm707_vm3, %v13687_v25  ;;  %v3889_v25 = vor.u32 %v3888_v32, %v14026_v55  ;;  %v3902_v32 = vrot.slane %v3900_v59, 5  ;;  %v14088_v19 = vrot.slane %v3906_v53, 5  ;;  %v3930_v5 = vshll.u32 %v14078_v6, 16 }
 0x13d   : > { %v1095_v34 = vadd.f32 %v11229_v42, %v13580_v1  ;;  %11435 = vmatprep.mubr.msk.bf16.mxu1 %vm707_vm3, %v13736_v60  ;;  %v3910_v1 = vshrl.u32 %v14044_v44, 16  ;;  %v3924_v42 = vshll.u32 %v10232_v38, 16 }
 0x13e   : > { %v1514_v24 = vpop.f32.mrf.mxu0  ;;  %v1086_v48 = vpop.f32.mrf.mxu1  ;;  %v3890_v59 = vrot.slane %v3889_v25, 4  ;;  %v10231_v25 = vld [vmem:[%s12206_s12 + $0xa4] sm:$0x1] }
 0x13f   : > { %v14070_v0 = vadd.f32 %v11263_v39, %v1095_v34  ;;  %v1087_v60 = vadd.f32 %v1086_v48, %v13601_v20  ;;  %v3880_v39 = vrot.slane %v3879_v10, 4  ;;  %v3921_v20 = vshrl.u32 %v10232_v38, 16 }
 0x140   : > { %v11267_v3 = vpop.f32.mrf.mxu0  ;;  %11470 = vmatmul.mubr.msk.bf16.gmra.mxu0 %vm707_vm3, %v17443_v23  ;;  %v11230_v14 = vpop.f32.mrf.mxu1  ;;  %v4448_v48 = vrot.slane %v4446_v57, 4  ;;  %v3912_v51 = vrot.slane %v3910_v1, 4  ;;  %v3934_v10 = vshrl.u32 %v14078_v6, 16  ;;  %v10288_v1 = vld [vmem:[%s12206_s12 + $0x9c] sm:$0xe] }
 0x141   : > { %11473 = vmatprep.mubr.msk.bf16.mxu0 %vm707_vm3, %v17444_v12  ;;  %v14085_v34 = vadd.f32 %v1511_v7, %v1087_v60  ;;  %v1098_v31 = vadd.f32 %v11230_v14, %v17445_v17  ;;  %v17447_v12 = vld [vmem:[#allocation15_spill] sm:$0xff]  ;;  %v14097_v60 = vsel %vm12550_vm7, %v10303_v8, %v4446_v57  ;;  %v3903_v14 = vor.u32 %v3902_v32, %v3899_v18 }
 0x142   : > { %v1527_v16 = vpop.f32.mrf.mxu0  ;;  %v1089_v23 = vpop.f32.mrf.mxu1  ;;  %v3885_v53 = vsel %vm12255_vm4, %v3880_v39, %v14026_v55  ;;  %v14117_v55 = vsel %vm12550_vm7, %v4448_v48, %v4449_v4  ;;  %v3913_v18 = vor.u32 %v3912_v51, %v14088_v19  ;;  %v14120_v32 = vrot.slane %v3930_v5, 5 }
 0x143   : > { %v14092_v35 = vadd.f32 %v11264_v21, %v1098_v31  ;;  %v1090_v38 = vadd.f32 %v1089_v23, %v17447_v12  ;;  %v4453_v21 = vrot.slane %v14044_v44, 5  ;;  %v3923_v31 = vrot.slane %v3921_v20, 4 }
 0x144   : > { %v11268_v7 = vpop.f32.mrf.mxu0  ;;  %v11233_v17 = vpop.f32.mrf.mxu1  ;;  %11436 = vmatmul.mubr.msk.bf16.gmra.mxu1 %vm707_vm3, %v13865_v22  ;;  %v3926_v23 = vrot.slane %v3924_v42, 5  ;;  %v3895_v22 = vsel %vm12255_vm4, %v3890_v59, %v14066_v50  ;;  %v3936_v39 = vrot.slane %v3934_v10, 4  ;;  %v17449_v42 = vld [vmem:[#allocation10_spill] sm:$0xff]  ;;  %v14129_v50 = vrot.slane %v3903_v14, 4  ;;  %v14132_v59 = vld [vmem:[%s12206_s12 + $0xb0] sm:$0x1] }
 0x145   : > { %17446 = vst [vmem:[#allocation14_spill] sm:$0xff] %v14092_v35  ;;  %v14107_v12 = vadd.f32 %v1514_v24, %v1090_v38  ;;  %v17448_v35 = vld [vmem:[#allocation8_spill] sm:$0xff]  ;;  %11439 = vmatprep.mubr.msk.bf16.mxu1 %vm707_vm3, %v13876_v46  ;;  %v3916_v24 = vshll.u32 %v10231_v25, 16  ;;  %v17450_v38 = vcombine.low %v13843_v43, %v13847_v28  ;;  %v10304_v4 = vrot.slane %v10288_v1, 9  ;;  %v17452_v14 = vld [vmem:[#allocation18_spill] sm:$0xff] }
 0x146   : > { %v1111_v8 = vadd.f32 %v11233_v17, %v17448_v35  ;;  %v1530_v57 = vpop.f32.mrf.mxu0  ;;  %v1102_v44 = vpop.f32.mrf.mxu1  ;;  %v17451_v51 = vcombine.low %v13907_v15, %v13922_v49  ;;  %v4455_v5 = vrot.slane %v4453_v21, 4  ;;  %v4456_v43 = vrot.slane %v10231_v25, 5  ;;  %v10235_v15 = vld [vmem:[%s12206_s12 + $0xb4] sm:$0xf] }
 0x147   : > { %v1103_v35 = vadd.f32 %v1102_v44, %v17449_v42  ;;  %v3927_v28 = vor.u32 %v3926_v23, %v3923_v31  ;;  %v10320_v44 = vcombine.low %v14097_v60, %v14117_v55  ;;  %v3914_v42 = vrot.slane %v3913_v18, 4  ;;  %v14151_v31 = vld [vmem:[%s12206_s12 + $0xb8] sm:$0xf]  ;;  %v17453_v23 = vld [vmem:[#allocation20_spill] sm:$0xff]  ;;  %v10241_v55 = vld [vmem:[%s12206_s12 + $0xcc] sm:$0xf] }
 0x148   : > { %v14122_v20 = vadd.f32 %v11267_v3, %v1111_v8  ;;  %v11271_v46 = vpop.f32.mrf.mxu0  ;;  %11474 = vmatmul.mubr.msk.bf16.gmra.mxu0 %vm707_vm3, %v17450_v38  ;;  %v11234_v48 = vpop.f32.mrf.mxu1  ;;  %v10319_v3 = vcombine.low %v14052_v56, %v14056_v52  ;;  %v14143_v8 = vcombine.low %v3885_v53, %v3895_v22  ;;  %v3918_v38 = vrot.slane %v3916_v24, 5  ;;  %v10291_v52 = vld [vmem:[%s12206_s12 + $0xc0] sm:$0xe] }
 0x149   : > { %11477 = vmatprep.mubr.msk.bf16.mxu0 %vm707_vm3, %v17451_v51  ;;  %v14140_v10 = vadd.f32 %v1527_v16, %v1103_v35  ;;  %v1114_v17 = vadd.f32 %v11234_v48, %v17452_v14  ;;  %v3937_v51 = vor.u32 %v3936_v39, %v14120_v32  ;;  %v3940_v25 = vshll.u32 %v14132_v59, 16  ;;  %v10289_v48 = vld [vmem:[%s12206_s12 + $0xa8] sm:$0xe] }
 0x14a   : > { %v1543_v1 = vpop.f32.mrf.mxu0  ;;  %v1105_v49 = vpop.f32.mrf.mxu1  ;;  %v3909_v22 = vsel %vm12255_vm4, %v14129_v50, %v14088_v19  ;;  %v14162_v18 = vsel %vm12550_vm7, %v10304_v4, %v4453_v21  ;;  %v3928_v39 = vrot.slane %v3927_v28, 4  ;;  %v4460_v14 = vrot.slane %v14078_v6, 5 }
 0x14b   : > { %v14153_v16 = vadd.f32 %v11268_v7, %v1114_v17  ;;  %v1106_v35 = vadd.f32 %v1105_v49, %v17453_v23  ;;  %v14168_v7 = vsel %vm12550_vm7, %v4455_v5, %v4456_v43  ;;  %v3945_v17 = vshrl.u32 %v10235_v15, 16 }
 0x14c   : > { %v11272_v53 = vpop.f32.mrf.mxu0  ;;  %v11237_v24 = vpop.f32.mrf.mxu1  ;;  %11440 = vmatmul.mubr.msk.bf16.gmra.mxu1 %vm707_vm3, %v13880_v61  ;;  %v3948_v50 = vshll.u32 %v10235_v15, 16  ;;  %v3954_v61 = vshll.u32 %v14151_v31, 16  ;;  %v3919_v5 = vsel %vm12255_vm4, %v3914_v42, %v3918_v38  ;;  %v3938_v43 = vrot.slane %v3937_v51, 4  ;;  %v10238_v38 = vld [vmem:[%s12206_s12 + $0xc0] sm:$0xf] }
 0x14d   : > { %v14172_v49 = vadd.f32 %v1530_v57, %v1106_v35  ;;  %v1127_v19 = vadd.f32 %v11237_v24, %v13805_v37  ;;  %11443 = vmatprep.mubr.msk.bf16.mxu1 %vm707_vm3, %v13933_v11  ;;  %v3942_v6 = vrot.slane %v3940_v25, 5  ;;  %v3958_v57 = vshrl.u32 %v14151_v31, 16  ;;  %v14200_v35 = vld [vmem:[%s12206_s12 + $0xc4] sm:$0xf] }
 0x14e   : > { %v1546_v21 = vpop.f32.mrf.mxu0  ;;  %v1118_v4 = vpop.f32.mrf.mxu1  ;;  %v17454_v11 = vcombine.low %v13961_v41, %v13996_v40  ;;  %v10321_v15 = vcombine.low %v14162_v18, %v14168_v7  ;;  %v10305_v42 = vrot.slane %v10289_v48, 9  ;;  %v17455_v25 = vcombine.low %v14000_v54, %v14004_v33  ;;  %v17461_v18 = vld [vmem:[#allocation12_spill] sm:$0xff] }
 0x14f   : > { %v14181_v28 = vadd.f32 %v11271_v46, %v1127_v19  ;;  %v1119_v37 = vadd.f32 %v1118_v4, %v13832_v26  ;;  %v3933_v26 = vsel %vm12255_vm4, %v3928_v39, %v14120_v32  ;;  %v4462_v46 = vrot.slane %v4460_v14, 4  ;;  %v14206_v4 = vld [vmem:[%s12206_s12 + $0xbc] sm:$0x1] }
 0x150   : > { %v11275_v23 = vpop.f32.mrf.mxu0  ;;  %11478 = vmatmul.mubr.msk.bf16.gmra.mxu0 %vm707_vm3, %v17454_v11  ;;  %v11238_v51 = vpop.f32.mrf.mxu1  ;;  %v4463_v41 = vrot.slane %v14132_v59, 5  ;;  %v3947_v40 = vrot.slane %v3945_v17, 4  ;;  %v3950_v54 = vrot.slane %v3948_v50, 5  ;;  %v14208_v33 = vrot.slane %v3954_v61, 5 }
 0x151   : > { %11481 = vmatprep.mubr.msk.bf16.mxu0 %vm707_vm3, %v17455_v25  ;;  %v14202_v24 = vadd.f32 %v1543_v1, %v1119_v37  ;;  %v1130_v48 = vadd.f32 %v11238_v51, %v13874_v36  ;;  %v3943_v32 = vsel %vm12255_vm4, %v3938_v43, %v3942_v6  ;;  %v3960_v39 = vrot.slane %v3958_v57, 4  ;;  %v17456_v57 = vld [vmem:[#allocation25_spill] sm:$0xff] }
 0x152   : > { %v1559_v19 = vpop.f32.mrf.mxu0  ;;  %v1121_v11 = vpop.f32.mrf.mxu1  ;;  %v3969_v25 = vshrl.u32 %v10238_v38, 16  ;;  %v3972_v59 = vshll.u32 %v10238_v38, 16  ;;  %v3978_v36 = vshll.u32 %v14200_v35, 16  ;;  %v3982_v51 = vshrl.u32 %v14200_v35, 16 }
 0x153   : > { %v14212_v17 = vadd.f32 %v11272_v53, %v1130_v48  ;;  %v1122_v1 = vadd.f32 %v1121_v11, %v13909_v9  ;;  %v14219_v61 = vcombine.low %v3909_v22, %v3919_v5  ;;  %v14223_v43 = vsel %vm12550_vm7, %v10305_v42, %v4460_v14  ;;  %v10290_v14 = vld [vmem:[%s12206_s12 + $0xb4] sm:$0xe] }
 0x154   : > { %v11276_v37 = vpop.f32.mrf.mxu0  ;;  %v11241_v50 = vpop.f32.mrf.mxu1  ;;  %11444 = vmatmul.mubr.msk.bf16.gmra.mxu1 %vm707_vm3, %v14030_v30  ;;  %v14227_v53 = vsel %vm12550_vm7, %v4462_v46, %v4463_v41  ;;  %v3964_v9 = vshll.u32 %v14206_v4, 16  ;;  %v14235_v30 = vcombine.low %v3933_v26, %v3943_v32  ;;  %v3951_v22 = vor.u32 %v3950_v54, %v3947_v40 }
 0x155   : > { %v14230_v6 = vadd.f32 %v1546_v21, %v1122_v1  ;;  %v1143_v38 = vadd.f32 %v11241_v50, %v17456_v57  ;;  %11447 = vmatprep.mubr.msk.bf16.mxu1 %vm707_vm3, %v14048_v47  ;;  %v3961_v42 = vor.u32 %v3960_v39, %v14208_v33  ;;  %v4467_v46 = vrot.slane %v14151_v31, 5  ;;  %v17457_v1 = vld [vmem:[#allocation27_spill] sm:$0xff]  ;;  %v10240_v47 = vld [vmem:[%s12206_s12 + $0xc8] sm:$0x1] }
 0x156   : > { %v1562_v48 = vpop.f32.mrf.mxu0  ;;  %v1134_v5 = vpop.f32.mrf.mxu1  ;;  %v3971_v41 = vrot.slane %v3969_v25, 4  ;;  %v3974_v21 = vrot.slane %v3972_v59, 5  ;;  %v14248_v26 = vrot.slane %v3978_v36, 5  ;;  %v3984_v40 = vrot.slane %v3982_v51, 4  ;;  %v17458_v39 = vld [vmem:[#allocation28_spill] sm:$0xff] }
 0x157   : > { %v14240_v11 = vadd.f32 %v11275_v23, %v1143_v38  ;;  %v1135_v50 = vadd.f32 %v1134_v5, %v17457_v1  ;;  %v10322_v31 = vcombine.low %v14223_v43, %v14227_v53  ;;  %v14256_v23 = vrot.slane %v3964_v9, 5  ;;  %v14270_v38 = vld [vmem:[%s12206_s12 + $0xd0] sm:$0xf] }
 0x158   : > { %v11279_v57 = vpop.f32.mrf.mxu0  ;;  %11482 = vmatmul.mubr.msk.bf16.gmra.mxu0 %vm707_vm3, %v10319_v3  ;;  %v11242_v54 = vpop.f32.mrf.mxu1  ;;  %v10306_v56 = vrot.slane %v10290_v14, 9  ;;  %v4474_v3 = vrot.slane %v14200_v35, 5  ;;  %v14263_v36 = vrot.slane %v3951_v22, 4  ;;  %v4470_v60 = vrot.slane %v14206_v4, 5 }
 0x159   : > { %11485 = vmatprep.mubr.msk.bf16.mxu0 %vm707_vm3, %v10320_v44  ;;  %v14260_v32 = vadd.f32 %v1559_v19, %v1135_v50  ;;  %v1146_v25 = vadd.f32 %v11242_v54, %v17458_v39  ;;  %v14267_v51 = vrot.slane %v3961_v42, 4  ;;  %v4469_v43 = vrot.slane %v4467_v46, 4 }
 0x15a   : > { %v1575_v59 = vpop.f32.mrf.mxu0  ;;  %v1137_v44 = vpop.f32.mrf.mxu1  ;;  %v3975_v53 = vor.u32 %v3974_v21, %v3971_v41  ;;  %v3988_v9 = vshll.u32 %v10240_v47, 16  ;;  %v3985_v5 = vor.u32 %v3984_v40, %v14248_v26  ;;  %v10307_v22 = vrot.slane %v10291_v52, 9  ;;  %v17459_v21 = vld [vmem:[#allocation11_spill] sm:$0xff] }
 0x15b   : > { %v14272_v14 = vadd.f32 %v11276_v37, %v1146_v25  ;;  %v1138_v35 = vadd.f32 %v1137_v44, %v13984_v13  ;;  %v4476_v4 = vrot.slane %v4474_v3, 4  ;;  %v4477_v42 = vrot.slane %v10240_v47, 5  ;;  %v17460_v44 = vld [vmem:[#allocation9_spill] sm:$0xff] }
 0x15c   : > { %v11280_v19 = vpop.f32.mrf.mxu0  ;;  %v11245_v1 = vpop.f32.mrf.mxu1  ;;  %11448 = vmatmul.mubr.msk.bf16.gmra.mxu1 %vm707_vm3, %v14064_v63  ;;  %v3993_v50 = vshrl.u32 %v10241_v55, 16  ;;  %v3996_v54 = vshll.u32 %v10241_v55, 16  ;;  %v4002_v13 = vshll.u32 %v14270_v38, 16  ;;  %v4006_v40 = vshrl.u32 %v14270_v38, 16 }
 0x15d   : > { %v14278_v41 = vadd.f32 %v1562_v48, %v1138_v35  ;;  %v1159_v39 = vadd.f32 %v11245_v1, %v17459_v21  ;;  %11451 = vmatprep.mubr.msk.bf16.mxu1 %vm707_vm3, %v14143_v8  ;;  %v4468_v63 = vsel %vm12550_vm7, %v10306_v56, %v4467_v46  ;;  %v4471_v47 = vsel %vm12550_vm7, %v4469_v43, %v4470_v60 }
 0x15e   : > { %v1578_v37 = vpop.f32.mrf.mxu0  ;;  %v1150_v52 = vpop.f32.mrf.mxu1  ;;  %v3976_v25 = vrot.slane %v3975_v53, 4  ;;  %v3990_v48 = vrot.slane %v3988_v9, 5  ;;  %v3986_v8 = vrot.slane %v3985_v5, 4  ;;  %v4475_v46 = vsel %vm12550_vm7, %v10307_v22, %v4474_v3 }
 0x15f   : > { %v14289_v55 = vadd.f32 %v11279_v57, %v1159_v39  ;;  %v1151_v35 = vadd.f32 %v1150_v52, %v17460_v44  ;;  %v4478_v57 = vsel %vm12550_vm7, %v4476_v4, %v4477_v42  ;;  %v3995_v60 = vrot.slane %v3993_v50, 4  ;;  %v10292_v52 = vld [vmem:[%s12206_s12 + $0xcc] sm:$0xe]  ;;  %v17462_v42 = vld [vmem:[#allocation16_spill] sm:$0xff] }
 0x160   : > { %v11283_v1 = vpop.f32.mrf.mxu0  ;;  %11486 = vmatmul.mubr.msk.bf16.gmra.mxu0 %vm707_vm3, %v10321_v15  ;;  %v11246_v56 = vpop.f32.mrf.mxu1  ;;  %v3998_v43 = vrot.slane %v3996_v54, 5  ;;  %v4481_v53 = vrot.slane %v14270_v38, 5  ;;  %v10243_v15 = vld [vmem:[%s12206_s12 + $0xd4] sm:$0x1]  ;;  %v4004_v5 = vrot.slane %v4002_v13, 5  ;;  %v4008_v39 = vrot.slane %v4006_v40, 4 }
 0x161   : > { %11489 = vmatprep.mubr.msk.bf16.mxu0 %vm707_vm3, %v10322_v31  ;;  %v14302_v9 = vadd.f32 %v1575_v59, %v1151_v35  ;;  %v1162_v7 = vadd.f32 %v11246_v56, %v17461_v18  ;;  %v3957_v31 = vsel %vm12255_vm4, %v14263_v36, %v14208_v33  ;;  %v3967_v38 = vsel %vm12255_vm4, %v14267_v51, %v14256_v23 }
 0x162   : > { %v1591_v21 = vpop.f32.mrf.mxu0  ;;  %v1153_v3 = vpop.f32.mrf.mxu1  ;;  %v10323_v59 = vcombine.low %v4468_v63, %v4471_v47  ;;  %v3981_v22 = vsel %vm12255_vm4, %v3976_v25, %v14248_v26  ;;  %v3991_v13 = vsel %vm12255_vm4, %v3986_v8, %v3990_v48  ;;  %v10324_v40 = vcombine.low %v4475_v46, %v4478_v57  ;;  %v17463_v26 = vld [vmem:[#allocation17_spill] sm:$0xff] }
 0x163   : > { %v14318_v4 = vadd.f32 %v11280_v19, %v1162_v7  ;;  %v1154_v50 = vadd.f32 %v1153_v3, %v17462_v42  ;;  %v4012_v36 = vshll.u32 %v10243_v15, 16  ;;  %v10308_v23 = vrot.slane %v10292_v52, 9  ;;  %v17464_v46 = vld [vmem:[#allocation13_spill] sm:$0xff] }
 0x164   : > { %v11284_v54 = vpop.f32.mrf.mxu0  ;;  %v11249_v33 = vpop.f32.mrf.mxu1  ;;  %11452 = vmatmul.mubr.msk.bf16.gmra.mxu1 %vm707_vm3, %v14219_v61  ;;  %v4483_v51 = vrot.slane %v4481_v53, 4  ;;  %v4484_v63 = vrot.slane %v10243_v15, 5  ;;  %v3999_v44 = vor.u32 %v3998_v43, %v3995_v60  ;;  %v4009_v35 = vor.u32 %v4008_v39, %v4004_v5 }
 0x165   : > { %v14325_v47 = vadd.f32 %v1578_v37, %v1154_v50  ;;  %v1175_v19 = vadd.f32 %v11249_v33, %v17463_v26  ;;  %11455 = vmatprep.mubr.msk.bf16.mxu1 %vm707_vm3, %v14235_v30  ;;  %v10258_v57 = vcombine.low %v3957_v31, %v3967_v38  ;;  %v10259_v37 = vcombine.low %v3981_v22, %v3991_v13 }
 0x166   : > { %v1594_v25 = vpop.f32.mrf.mxu0  ;;  %v1166_v48 = vpop.f32.mrf.mxu1  ;;  %v4014_v7 = vrot.slane %v4012_v36, 5  ;;  %v4482_v15 = vsel %vm12550_vm7, %v10308_v23, %v4481_v53  ;;  %v4485_v30 = vsel %vm12550_vm7, %v4483_v51, %v4484_v63  ;;  %v4000_v52 = vrot.slane %v3999_v44, 4  ;;  %v17468_v51 = vld [vmem:[#allocation23_spill] sm:$0xff] }
 0x167   : > { %v14330_v8 = vadd.f32 %v11283_v1, %v1175_v19  ;;  %v1167_v56 = vadd.f32 %v1166_v48, %v17464_v46  ;;  %v17465_v1 = vld [vmem:[#allocation19_spill] sm:$0xff]  ;;  %v4010_v3 = vrot.slane %v4009_v35, 4  ;;  %v10325_v50 = vcombine.low %v4482_v15, %v4485_v30  ;;  %v17469_v35 = vld [vmem:[#allocation24_spill] sm:$0xff] }
 0x168   : > { %v11287_v61 = vpop.f32.mrf.mxu0  ;;  %11490 = vmatmul.mubr.msk.bf16.gmra.mxu0 %vm707_vm3, %v10323_v59  ;;  %v11250_v18 = vpop.f32.mrf.mxu1  ;;  %v17466_v59 = vld [vmem:[#allocation21_spill] sm:$0xff]  ;;  %v4005_v33 = vsel %vm12255_vm4, %v4000_v52, %v4004_v5 }
 0x169   : > { %11493 = vmatprep.mubr.msk.bf16.mxu0 %vm707_vm3, %v10324_v40  ;;  %v14339_v60 = vadd.f32 %v1591_v21, %v1167_v56  ;;  %v1178_v43 = vadd.f32 %v11250_v18, %v17465_v1 }
 0x16a   : > { %v1607_v39 = vpop.f32.mrf.mxu0  ;;  %v1169_v31 = vpop.f32.mrf.mxu1 }
 0x16b   : > { %v14342_v38 = vadd.f32 %v11284_v54, %v1178_v43  ;;  %v1170_v22 = vadd.f32 %v1169_v31, %v17466_v59  ;;  %v4015_v54 = vsel %vm12255_vm4, %v4010_v3, %v4014_v7 }
 0x16c   : > { %v11288_v42 = vpop.f32.mrf.mxu0  ;;  %v11253_v13 = vpop.f32.mrf.mxu1  ;;  %11456 = vmatmul.mubr.msk.bf16.gmra.mxu1 %vm707_vm3, %v10258_v57 }
 0x16d   : > { %v14346_v53 = vadd.f32 %v1594_v25, %v1170_v22  ;;  %v1191_v21 = vadd.f32 %v11253_v13, %v17467_v58  ;;  %11459 = vmatprep.mubr.msk.bf16.mxu1 %vm707_vm3, %v10259_v37  ;;  %v10260_v25 = vcombine.low %v4005_v33, %v4015_v54 }
 0x16e   : > { %v1610_v40 = vpop.f32.mrf.mxu0  ;;  %v1182_v36 = vpop.f32.mrf.mxu1 }
 0x16f   : > { %v14354_v23 = vadd.f32 %v11287_v61, %v1191_v21  ;;  %v1183_v63 = vadd.f32 %v1182_v36, %v17468_v51 }
 0x170   : > { %v11291_v26 = vpop.f32.mrf.mxu0  ;;  %11494 = vmatmul.mubr.msk.bf16.gmra.mxu0 %vm707_vm3, %v10325_v50  ;;  %v11254_v19 = vpop.f32.mrf.mxu1 }
 0x171   : > { %v14358_v44 = vadd.f32 %v1607_v39, %v1183_v63  ;;  %v1194_v48 = vadd.f32 %v11254_v19, %v17469_v35  ;;  %v17471_v63 = vld [vmem:[#allocation14_spill] sm:$0xff] }
 0x172   : > { %v1623_v46 = vpop.f32.mrf.mxu0  ;;  %v1185_v56 = vpop.f32.mrf.mxu1 }
 0x173   : > { %v14361_v5 = vadd.f32 %v11288_v42, %v1194_v48  ;;  %v1186_v57 = vadd.f32 %v1185_v56, %v17470_v27 }
 0x174   : > { %v11292_v18 = vpop.f32.mrf.mxu0  ;;  %v11257_v61 = vpop.f32.mrf.mxu1  ;;  %11460 = vmatmul.mubr.msk.bf16.gmra.mxu1 %vm707_vm3, %v10260_v25 }
 0x175   : > { %v14365_v37 = vadd.f32 %v1610_v40, %v1186_v57  ;;  %v1207_v7 = vadd.f32 %v11257_v61, %v13976_v45 }
 0x176   : > { %v1626_v15 = vpop.f32.mrf.mxu0  ;;  %v1198_v30 = vpop.f32.mrf.mxu1 }
 0x177   : > { %v14368_v1 = vadd.f32 %v11291_v26, %v1207_v7  ;;  %v1199_v43 = vadd.f32 %v1198_v30, %v13990_v62 }
 0x178   : > { %v11331_v39 = vpop.f32.mrf.mxu0  ;;  %v11258_v52 = vpop.f32.mrf.mxu1 }
 0x179   : > { %v14371_v3 = vadd.f32 %v1623_v46, %v1199_v43  ;;  %v1210_v31 = vadd.f32 %v11258_v52, %v14013_v2 }
 0x17a   : > { %v2596_v59 = vpop.f32.mrf.mxu0  ;;  %v1201_v22 = vpop.f32.mrf.mxu1 }
 0x17b   : > { %v14374_v42 = vadd.f32 %v11292_v18, %v1210_v31  ;;  %v1202_v50 = vadd.f32 %v1201_v22, %v14028_v29 }
 0x17c   : > { %v11332_v13 = vpop.f32.mrf.mxu0  ;;  %v11297_v45 = vpop.f32.mrf.mxu1 }
 0x17d   : > { %v14377_v58 = vadd.f32 %v1626_v15, %v1202_v50  ;;  %v1999_v21 = vadd.f32 %v11297_v45, %v14070_v0 }
 0x17e   : > { %v2599_v40 = vpop.f32.mrf.mxu0  ;;  %v1870_v62 = vpop.f32.mrf.mxu1 }
 0x17f   : > { %v14380_v33 = vadd.f32 %v11331_v39, %v1999_v21  ;;  %v1997_v54 = vadd.f32 %v1870_v62, %v14085_v34 }
 0x180   : > { %v11335_v36 = vpop.f32.mrf.mxu0  ;;  %v11298_v2 = vpop.f32.mrf.mxu1 }
 0x181   : > { %v14383_v51 = vadd.f32 %v2596_v59, %v1997_v54  ;;  %v2000_v26 = vadd.f32 %v11298_v2, %v17471_v63 }
 0x182   : > { %v2612_v19 = vpop.f32.mrf.mxu0  ;;  %v1873_v29 = vpop.f32.mrf.mxu1 }
 0x183   : > { %v14386_v25 = vadd.f32 %v11332_v13, %v2000_v26  ;;  %v1998_v35 = vadd.f32 %v1873_v29, %v14107_v12 }
 0x184   : > { %v11336_v48 = vpop.f32.mrf.mxu0  ;;  %v11301_v0 = vpop.f32.mrf.mxu1 }
 0x185   : > { %v14389_v46 = vadd.f32 %v2599_v40, %v1998_v35  ;;  %v2003_v56 = vadd.f32 %v11301_v0, %v14122_v20 }
 0x186   : > { %v2615_v27 = vpop.f32.mrf.mxu0  ;;  %v1886_v34 = vpop.f32.mrf.mxu1 }
 0x187   : > { %v14392_v57 = vadd.f32 %v11335_v36, %v2003_v56  ;;  %v2001_v18 = vadd.f32 %v1886_v34, %v14140_v10 }
 0x188   : > { %v11339_v61 = vpop.f32.mrf.mxu0  ;;  %v11302_v7 = vpop.f32.mrf.mxu1 }
 0x189   : > { %v14395_v15 = vadd.f32 %v2612_v19, %v2001_v18  ;;  %v2004_v30 = vadd.f32 %v11302_v7, %v14153_v16 }
 0x18a   : > { %v2628_v43 = vpop.f32.mrf.mxu0  ;;  %v1889_v12 = vpop.f32.mrf.mxu1 }
 0x18b   : > { %v14398_v39 = vadd.f32 %v11336_v48, %v2004_v30  ;;  %v2002_v52 = vadd.f32 %v1889_v12, %v14172_v49 }
 0x18c   : > { %v11340_v31 = vpop.f32.mrf.mxu0  ;;  %v11305_v20 = vpop.f32.mrf.mxu1 }
 0x18d   : > { %v14401_v59 = vadd.f32 %v2615_v27, %v2002_v52  ;;  %v2007_v22 = vadd.f32 %v11305_v20, %v14181_v28 }
 0x18e   : > { %v2631_v50 = vpop.f32.mrf.mxu0  ;;  %v1902_v10 = vpop.f32.mrf.mxu1 }
 0x18f   : > { %v14404_v13 = vadd.f32 %v11339_v61, %v2007_v22  ;;  %v2005_v45 = vadd.f32 %v1902_v10, %v14202_v24 }
 0x190   : > { %v11343_v21 = vpop.f32.mrf.mxu0  ;;  %v11306_v16 = vpop.f32.mrf.mxu1 }
 0x191   : > { %v14407_v40 = vadd.f32 %v2628_v43, %v2005_v45  ;;  %v2008_v62 = vadd.f32 %v11306_v16, %v14212_v17 }
 0x192   : > { %v2644_v54 = vpop.f32.mrf.mxu0  ;;  %v1905_v49 = vpop.f32.mrf.mxu1 }
 0x193   : > { %v14410_v36 = vadd.f32 %v11340_v31, %v2008_v62  ;;  %v2006_v2 = vadd.f32 %v1905_v49, %v14230_v6 }
 0x194   : > { %v11344_v63 = vpop.f32.mrf.mxu0  ;;  %v11309_v28 = vpop.f32.mrf.mxu1 }
 0x195   : > { %v14413_v26 = vadd.f32 %v2631_v50, %v2006_v2  ;;  %v2011_v19 = vadd.f32 %v11309_v28, %v14240_v11 }
 0x196   : > { %v2647_v29 = vpop.f32.mrf.mxu0  ;;  %v1918_v24 = vpop.f32.mrf.mxu1 }
 0x197   : > { %v14416_v35 = vadd.f32 %v11343_v21, %v2011_v19  ;;  %v2009_v48 = vadd.f32 %v1918_v24, %v14260_v32 }
 0x198   : > { %v11347_v0 = vpop.f32.mrf.mxu0  ;;  %v11310_v17 = vpop.f32.mrf.mxu1 }
 0x199   : > { %v14419_v56 = vadd.f32 %v2644_v54, %v2009_v48  ;;  %v2012_v27 = vadd.f32 %v11310_v17, %v14272_v14 }
 0x19a   : > { %v2660_v34 = vpop.f32.mrf.mxu0  ;;  %v1921_v6 = vpop.f32.mrf.mxu1 }
 0x19b   : > { %v14422_v18 = vadd.f32 %v11344_v63, %v2012_v27  ;;  %v2010_v61 = vadd.f32 %v1921_v6, %v14278_v41 }
 0x19c   : > { %v11348_v7 = vpop.f32.mrf.mxu0  ;;  %v11313_v11 = vpop.f32.mrf.mxu1 }
 0x19d   : > { %v14425_v30 = vadd.f32 %v2647_v29, %v2010_v61  ;;  %v2015_v43 = vadd.f32 %v11313_v11, %v14289_v55 }
 0x19e   : > { %v2663_v12 = vpop.f32.mrf.mxu0  ;;  %v1934_v32 = vpop.f32.mrf.mxu1 }
 0x19f   : > { %v14428_v52 = vadd.f32 %v11347_v0, %v2015_v43  ;;  %v2013_v31 = vadd.f32 %v1934_v32, %v14302_v9 }
 0x1a0   : > { %v11351_v20 = vpop.f32.mrf.mxu0  ;;  %v11314_v14 = vpop.f32.mrf.mxu1 }
 0x1a1   : > { %v14431_v22 = vadd.f32 %v2660_v34, %v2013_v31  ;;  %v2016_v50 = vadd.f32 %v11314_v14, %v14318_v4 }
 0x1a2   : > { %v2676_v10 = vpop.f32.mrf.mxu0  ;;  %v1937_v41 = vpop.f32.mrf.mxu1 }
 0x1a3   : > { %v14434_v45 = vadd.f32 %v11348_v7, %v2016_v50  ;;  %v2014_v21 = vadd.f32 %v1937_v41, %v14325_v47 }
 0x1a4   : > { %v11352_v16 = vpop.f32.mrf.mxu0  ;;  %v11317_v55 = vpop.f32.mrf.mxu1 }
 0x1a5   : > { %v14437_v62 = vadd.f32 %v2663_v12, %v2014_v21  ;;  %v2019_v54 = vadd.f32 %v11317_v55, %v14330_v8 }
 0x1a6   : > { %v2679_v49 = vpop.f32.mrf.mxu0  ;;  %v1950_v9 = vpop.f32.mrf.mxu1 }
 0x1a7   : > { %v14440_v2 = vadd.f32 %v11351_v20, %v2019_v54  ;;  %v2017_v63 = vadd.f32 %v1950_v9, %v14339_v60 }
 0x1a8   : > { %v11355_v28 = vpop.f32.mrf.mxu0  ;;  %v11318_v4 = vpop.f32.mrf.mxu1 }
 0x1a9   : > { %v14443_v19 = vadd.f32 %v2676_v10, %v2017_v63  ;;  %v2020_v29 = vadd.f32 %v11318_v4, %v14342_v38 }
 0x1aa   : > { %v2692_v24 = vpop.f32.mrf.mxu0  ;;  %v1953_v47 = vpop.f32.mrf.mxu1 }
 0x1ab   : > { %v14446_v48 = vadd.f32 %v11352_v16, %v2020_v29  ;;  %v2018_v0 = vadd.f32 %v1953_v47, %v14346_v53 }
 0x1ac   : > { %v11356_v17 = vpop.f32.mrf.mxu0  ;;  %v11321_v8 = vpop.f32.mrf.mxu1 }
 0x1ad   : > { %v14449_v27 = vadd.f32 %v2679_v49, %v2018_v0  ;;  %v2023_v34 = vadd.f32 %v11321_v8, %v14354_v23 }
 0x1ae   : > { %v2695_v6 = vpop.f32.mrf.mxu0  ;;  %v1966_v60 = vpop.f32.mrf.mxu1 }
 0x1af   : > { %v14452_v61 = vadd.f32 %v11355_v28, %v2023_v34  ;;  %v2021_v7 = vadd.f32 %v1966_v60, %v14358_v44 }
 0x1b0   : > { %v11359_v11 = vpop.f32.mrf.mxu0  ;;  %v11322_v38 = vpop.f32.mrf.mxu1 }
 0x1b1   : > { %v14455_v43 = vadd.f32 %v2692_v24, %v2021_v7  ;;  %v2024_v12 = vadd.f32 %v11322_v38, %v14361_v5 }
 0x1b2   : > { %v2708_v32 = vpop.f32.mrf.mxu0  ;;  %v1969_v53 = vpop.f32.mrf.mxu1 }
 0x1b3   : > { %17472 = vst [vmem:[#allocation15_spill] sm:$0xff] %v14455_v43  ;;  %v14458_v31 = vadd.f32 %v11356_v17, %v2024_v12  ;;  %v2022_v20 = vadd.f32 %v1969_v53, %v14365_v37 }
 0x1b4   : > { %v11360_v14 = vpop.f32.mrf.mxu0  ;;  %v11325_v23 = vpop.f32.mrf.mxu1 }
 0x1b5   : > { %v14461_v50 = vadd.f32 %v2695_v6, %v2022_v20  ;;  %v2027_v10 = vadd.f32 %v11325_v23, %v14368_v1 }
 0x1b6   : > { %v2711_v41 = vpop.f32.mrf.mxu0  ;;  %v1982_v44 = vpop.f32.mrf.mxu1 }
 0x1b7   : > { %17473 = vst [vmem:[#allocation8_spill] sm:$0xff] %v14461_v50  ;;  %v14464_v21 = vadd.f32 %v11359_v11, %v2027_v10  ;;  %v2025_v16 = vadd.f32 %v1982_v44, %v14371_v3 }
 0x1b8   : > { %v11399_v55 = vpop.f32.mrf.mxu0  ;;  %v11326_v5 = vpop.f32.mrf.mxu1 }
 0x1b9   : > { %v14467_v54 = vadd.f32 %v2708_v32, %v2025_v16  ;;  %v2028_v49 = vadd.f32 %v11326_v5, %v14374_v42 }
 0x1ba   : > { %v3425_v9 = vpop.f32.mrf.mxu0  ;;  %v1985_v37 = vpop.f32.mrf.mxu1 }
 0x1bb   : > { %17474 = vst [vmem:[#allocation10_spill] sm:$0xff] %v14467_v54  ;;  %v14470_v63 = vadd.f32 %v11360_v14, %v2028_v49  ;;  %v2026_v28 = vadd.f32 %v1985_v37, %v14377_v58 }
 0x1bc   : > { %v11400_v4 = vpop.f32.mrf.mxu0  ;;  %v11365_v1 = vpop.f32.mrf.mxu1 }
 0x1bd   : > { %v14473_v29 = vadd.f32 %v2711_v41, %v2026_v28  ;;  %v3195_v24 = vadd.f32 %v11365_v1, %v14380_v33 }
 0x1be   : > { %v14476_v47 = vpop.f32.mrf.mxu0  ;;  %v3066_v3 = vpop.f32.mrf.mxu1 }
 0x1bf   : > { %17475 = vst [vmem:[#allocation18_spill] sm:$0xff] %v14473_v29  ;;  %v14478_v0 = vadd.f32 %v11399_v55, %v3195_v24  ;;  %v3193_v17 = vadd.f32 %v3066_v3, %v14383_v51 }
 0x1c0   : > { %v11403_v42 = vpop.f32.mrf.mxu0  ;;  %v11366_v8 = vpop.f32.mrf.mxu1 }
 0x1c1   : > { %v14481_v34 = vadd.f32 %v3425_v9, %v3193_v17  ;;  %v3196_v6 = vadd.f32 %v11366_v8, %v14386_v25 }
 0x1c2   : > { %v14484_v58 = vpop.f32.mrf.mxu0  ;;  %v14486_v60 = vpop.f32.mrf.mxu1 }
 0x1c3   : > { %v14488_v7 = vadd.f32 %v11400_v4, %v3196_v6 }
 0x1c4   : > { %v11404_v33 = vpop.f32.mrf.mxu0  ;;  %v11369_v11 = vpop.f32.mrf.mxu1 }
 0x1c5   : > { %v3199_v38 = vadd.f32 %v11369_v11, %v14392_v57 }
 0x1c6   : > { %v14491_v12 = vpop.f32.mrf.mxu0  ;;  %v14493_v32 = vpop.f32.mrf.mxu1 }
 0x1c7   : > { %v14495_v51 = vadd.f32 %v11403_v42, %v3199_v38  ;;  %v12098_v42 = vmov 0.0  }
 0x1c8   : > { %v11407_v53 = vpop.f32.mrf.mxu0  ;;  %v11370_v20 = vpop.f32.mrf.mxu1  ;;  %4892 = vst [vmem:[%s12208_s13] sm:$0xff] %v12098_v42  ;;  %4893 = vst [vmem:[%s12208_s13 + $0x8] sm:$0xff] %v12098_v42 }
 0x1c9   : > { %v3200_v25 = vadd.f32 %v11370_v20, %v14398_v39  ;;  %4894 = vst [vmem:[%s12208_s13 + $0x10] sm:$0xff] %v12098_v42  ;;  %4895 = vst [vmem:[%s12208_s13 + $0x18] sm:$0xff] %v12098_v42 }
 0x1ca   : > { %v14498_v14 = vpop.f32.mrf.mxu0  ;;  %v14500_v23 = vpop.f32.mrf.mxu1  ;;  %4896 = vst [vmem:[%s12208_s13 + $0x20] sm:$0xff] %v12098_v42  ;;  %4897 = vst [vmem:[%s12208_s13 + $0x28] sm:$0xff] %v12098_v42 }
 0x1cb   : > { %v14502_v10 = vadd.f32 %v11404_v33, %v3200_v25  ;;  %4898 = vst [vmem:[%s12208_s13 + $0x30] sm:$0xff] %v12098_v42  ;;  %4899 = vst [vmem:[%s12208_s13 + $0x38] sm:$0xff] %v12098_v42 }
 0x1cc   : > { %v11408_v41 = vpop.f32.mrf.mxu0  ;;  %v11373_v44 = vpop.f32.mrf.mxu1 }
 0x1cd   : > { %v3203_v57 = vadd.f32 %v11373_v44, %v14404_v13 }
 0x1ce   : > { %v14505_v16 = vpop.f32.mrf.mxu0  ;;  %v14507_v55 = vpop.f32.mrf.mxu1 }
 0x1cf   : > { %v14509_v5 = vadd.f32 %v11407_v53, %v3203_v57 }
 0x1d0   : > { %v11411_v39 = vpop.f32.mrf.mxu0  ;;  %v11374_v49 = vpop.f32.mrf.mxu1 }
 0x1d1   : > { %v3204_v9 = vadd.f32 %v11374_v49, %v14410_v36 }
 0x1d2   : > { %v14512_v37 = vpop.f32.mrf.mxu0  ;;  %v14514_v13 = vpop.f32.mrf.mxu1 }
 0x1d3   : > { %v14516_v28 = vadd.f32 %v11408_v41, %v3204_v9 }
 0x1d4   : > { %v11412_v4 = vpop.f32.mrf.mxu0  ;;  %v11377_v1 = vpop.f32.mrf.mxu1 }
 0x1d5   : > { %v3207_v24 = vadd.f32 %v11377_v1, %v14416_v35 }
 0x1d6   : > { %v14519_v3 = vpop.f32.mrf.mxu0  ;;  %v14521_v17 = vpop.f32.mrf.mxu1 }
 0x1d7   : > { %v14531_v36 = vadd.f32 %v11411_v39, %v3207_v24 }
 0x1d8   : > { %v11415_v8 = vpop.f32.mrf.mxu0  ;;  %v11378_v6 = vpop.f32.mrf.mxu1 }
 0x1d9   : > { %v3208_v33 = vadd.f32 %v11378_v6, %v14422_v18 }
 0x1da   : > { %v14534_v35 = vpop.f32.mrf.mxu0  ;;  %v14536_v11 = vpop.f32.mrf.mxu1 }
 0x1db   : > { %v14538_v38 = vadd.f32 %v11412_v4, %v3208_v33 }
 0x1dc   : > { %v11416_v53 = vpop.f32.mrf.mxu0  ;;  %v11381_v20 = vpop.f32.mrf.mxu1 }
 0x1dd   : > { %v3211_v25 = vadd.f32 %v11381_v20, %v14428_v52 }
 0x1de   : > { %v14541_v41 = vpop.f32.mrf.mxu0  ;;  %v14543_v44 = vpop.f32.mrf.mxu1 }
 0x1df   : > { %v14545_v57 = vadd.f32 %v11415_v8, %v3211_v25 }
 0x1e0   : > { %v11419_v39 = vpop.f32.mrf.mxu0  ;;  %v11382_v49 = vpop.f32.mrf.mxu1 }
 0x1e1   : > { %v3212_v18 = vadd.f32 %v11382_v49, %v14434_v45 }
 0x1e2   : > { %v14548_v9 = vpop.f32.mrf.mxu0  ;;  %v14550_v1 = vpop.f32.mrf.mxu1 }
 0x1e3   : > { %v14552_v4 = vadd.f32 %v11416_v53, %v3212_v18 }
 0x1e4   : > { %v11420_v24 = vpop.f32.mrf.mxu0  ;;  %v11385_v42 = vpop.f32.mrf.mxu1 }
 0x1e5   : > { %v3215_v52 = vadd.f32 %v11385_v42, %v14440_v2 }
 0x1e6   : > { %v14555_v6 = vpop.f32.mrf.mxu0  ;;  %v14557_v33 = vpop.f32.mrf.mxu1 }
 0x1e7   : > { %17476 = vst [vmem:[#allocation20_spill] sm:$0xff] %v14555_v6  ;;  %v14559_v8 = vadd.f32 %v11419_v39, %v3215_v52 }
 0x1e8   : > { %v11423_v20 = vpop.f32.mrf.mxu0  ;;  %v11386_v25 = vpop.f32.mrf.mxu1 }
 0x1e9   : > { %17477 = vst [vmem:[#allocation25_spill] sm:$0xff] %v14559_v8  ;;  %v3216_v45 = vadd.f32 %v11386_v25, %v14446_v48 }
 0x1ea   : > { %v14562_v49 = vpop.f32.mrf.mxu0  ;;  %v14564_v29 = vpop.f32.mrf.mxu1 }
 0x1eb   : > { %17478 = vst [vmem:[#allocation27_spill] sm:$0xff] %v14562_v49  ;;  %v14566_v53 = vadd.f32 %v11420_v24, %v3216_v45 }
 0x1ec   : > { %v11424_v18 = vpop.f32.mrf.mxu0  ;;  %v11389_v54 = vpop.f32.mrf.mxu1 }
 0x1ed   : > { %17479 = vst [vmem:[#allocation28_spill] sm:$0xff] %v14566_v53  ;;  %v3219_v2 = vadd.f32 %v11389_v54, %v14452_v61 }
 0x1ee   : > { %v14569_v42 = vpop.f32.mrf.mxu0  ;;  %v14571_v50 = vpop.f32.mrf.mxu1 }
 0x1ef   : > { %17480 = vst [vmem:[#allocation11_spill] sm:$0xff] %v14569_v42  ;;  %17481 = vst [vmem:[#allocation9_spill] sm:$0xff] %v14571_v50  ;;  %v14573_v39 = vadd.f32 %v11423_v20, %v3219_v2 }
 0x1f0   : > { %v11427_v52 = vpop.f32.mrf.mxu0  ;;  %v11390_v8 = vpop.f32.mrf.mxu1 }
 0x1f1   : > { %17482 = vst [vmem:[#allocation12_spill] sm:$0xff] %v14573_v39  ;;  %v3220_v48 = vadd.f32 %v11390_v8, %v14458_v31 }
 0x1f2   : > { %v14576_v25 = vpop.f32.mrf.mxu0  ;;  %v14578_v49 = vpop.f32.mrf.mxu1 }
 0x1f3   : > { %17483 = vst [vmem:[#allocation16_spill] sm:$0xff] %v14576_v25  ;;  %17484 = vst [vmem:[#allocation17_spill] sm:$0xff] %v14578_v49  ;;  %v14580_v24 = vadd.f32 %v11424_v18, %v3220_v48 }
 0x1f4   : > { %v11428_v45 = vpop.f32.mrf.mxu0  ;;  %v11393_v53 = vpop.f32.mrf.mxu1 }
 0x1f5   : > { %17485 = vst [vmem:[#allocation13_spill] sm:$0xff] %v14580_v24  ;;  %v3223_v61 = vadd.f32 %v11393_v53, %v14464_v21  ;;  %v3194_v21 = vadd.f32 %v14486_v60, %v14389_v46  ;;  %v3198_v60 = vadd.f32 %v14500_v23, %v14401_v59 }
 0x1f6   : > { %v14583_v54 = vpop.f32.mrf.mxu0  ;;  %v14585_v42 = vpop.f32.mrf.mxu1 }
 0x1f7   : > { %17486 = vst [vmem:[#allocation19_spill] sm:$0xff] %v14583_v54  ;;  %17487 = vst [vmem:[#allocation21_spill] sm:$0xff] %v14585_v42  ;;  %v14587_v20 = vadd.f32 %v11427_v52, %v3223_v61 }
 0x1f8   : > { %v11467_v2 = vpop.f32.mrf.mxu0  ;;  %v11394_v39 = vpop.f32.mrf.mxu1 }
 0x1f9   : > { %17488 = vst [vmem:[#allocation22_spill] sm:$0xff] %v14587_v20  ;;  %v3224_v31 = vadd.f32 %v11394_v39, %v14470_v63  ;;  %v3553_v20 = vadd.f32 %v14476_v47, %v3194_v21  ;;  %v3197_v63 = vadd.f32 %v14493_v32, %v14395_v15 }
 0x1fa   : > { %v4621_v8 = vpop.f32.mrf.mxu0  ;;  %v14590_v25 = vpop.f32.mrf.mxu1 }
 0x1fb   : > { %17489 = vst [vmem:[#allocation23_spill] sm:$0xff] %v14590_v25  ;;  %v14592_v49 = vadd.f32 %v11428_v45, %v3224_v31 }
 0x1fc   : > { %v11468_v18 = vpop.f32.mrf.mxu0  ;;  %v11433_v48 = vpop.f32.mrf.mxu1 }
 0x1fd   : > { %17490 = vst [vmem:[#allocation24_spill] sm:$0xff] %v14592_v49  ;;  %v4280_v39 = vadd.f32 %v11433_v48, %v14478_v0 }
 0x1fe   : > { %v4624_v53 = vpop.f32.mrf.mxu0  ;;  %v4151_v54 = vpop.f32.mrf.mxu1 }
 0x1ff   : > { %v4278_v24 = vadd.f32 %v4151_v54, %v14481_v34  ;;  %v3556_v54 = vadd.f32 %v14484_v58, %v3197_v63  ;;  %v4750_v50 = vadd.f32 %v11467_v2, %v4280_v39 }
 0x200   : > { %v11471_v52 = vpop.f32.mrf.mxu0  ;;  %v11434_v61 = vpop.f32.mrf.mxu1 }
 0x201   : > { %v4281_v31 = vadd.f32 %v11434_v61, %v14488_v7  ;;  %v4748_v25 = vadd.f32 %v4621_v8, %v4278_v24  ;;  %v3557_v24 = vadd.f32 %v14491_v12, %v3198_v60  ;;  %v4823_v8 = vmul.f32 %v4750_v50, %v4750_v50 }
 0x202   : > { %v4637_v45 = vpop.f32.mrf.mxu0  ;;  %v4154_v49 = vpop.f32.mrf.mxu1  ;;  %v3202_v12 = vadd.f32 %v14514_v13, %v14413_v26 }
 0x203   : > { %v4279_v42 = vadd.f32 %v4154_v49, %v3553_v20  ;;  %v4751_v43 = vadd.f32 %v11468_v18, %v4281_v31  ;;  %v4821_v32 = vmul.f32 %v4748_v25, %v4748_v25 }
 0x204   : > { %v11472_v46 = vpop.f32.mrf.mxu0  ;;  %v11437_v34 = vpop.f32.mrf.mxu1 }
 0x205   : > { %v4749_v47 = vadd.f32 %v4624_v53, %v4279_v42  ;;  %v4284_v49 = vadd.f32 %v11437_v34, %v14495_v51  ;;  %v3201_v42 = vadd.f32 %v14507_v55, %v14407_v40  ;;  %v4824_v2 = vmul.f32 %v4751_v43, %v4751_v43 }
 0x206   : > { %v4640_v21 = vpop.f32.mrf.mxu0  ;;  %v4167_v15 = vpop.f32.mrf.mxu1 }
 0x207   : > { %v4781_v0 = vadd.f32 %v4749_v47, %v4748_v25  ;;  %v4822_v48 = vmul.f32 %v4749_v47, %v4749_v47  ;;  %v4282_v6 = vadd.f32 %v4167_v15, %v3556_v54  ;;  %v4754_v51 = vadd.f32 %v11471_v52, %v4284_v49 }
 0x208   : > { %v11475_v7 = vpop.f32.mrf.mxu0  ;;  %v11438_v20 = vpop.f32.mrf.mxu1  ;;  %v3560_v40 = vadd.f32 %v14498_v14, %v3201_v42 }
 0x209   : > { %v4782_v59 = vadd.f32 %v4781_v0, %v4750_v50  ;;  %v4853_v23 = vadd.f32 %v4822_v48, %v4821_v32  ;;  %v4752_v61 = vadd.f32 %v4637_v45, %v4282_v6  ;;  %v4285_v63 = vadd.f32 %v11438_v20, %v14502_v10 }
 0x20a   : > { %v4653_v58 = vpop.f32.mrf.mxu0  ;;  %v4170_v18 = vpop.f32.mrf.mxu1  ;;  %v3205_v0 = vadd.f32 %v14521_v17, %v14419_v56  ;;  %v3561_v48 = vadd.f32 %v14505_v16, %v3202_v12 }
 0x20b   : > { %v4854_v53 = vadd.f32 %v4853_v23, %v4823_v8  ;;  %v4783_v25 = vadd.f32 %v4782_v59, %v4751_v43  ;;  %v4283_v39 = vadd.f32 %v4170_v18, %v3557_v24  ;;  %v4825_v34 = vmul.f32 %v4752_v61, %v4752_v61 }
 0x20c   : > { %v11476_v31 = vpop.f32.mrf.mxu0  ;;  %v11441_v60 = vpop.f32.mrf.mxu1  ;;  %v4755_v15 = vadd.f32 %v11472_v46, %v4285_v63  ;;  %v4827_v24 = vmul.f32 %v4754_v51, %v4754_v51  ;;  %v3564_v56 = vadd.f32 %v14512_v37, %v3205_v0  ;;  %v3209_v37 = vadd.f32 %v14543_v44, %v14431_v22 }
 0x20d   : > { %v4784_v50 = vadd.f32 %v4783_v25, %v4752_v61  ;;  %v4855_v6 = vadd.f32 %v4854_v53, %v4824_v2  ;;  %v4753_v45 = vadd.f32 %v4640_v21, %v4283_v39  ;;  %v4288_v26 = vadd.f32 %v11441_v60, %v14509_v5 }
 0x20e   : > { %v4656_v54 = vpop.f32.mrf.mxu0  ;;  %v4183_v55 = vpop.f32.mrf.mxu1  ;;  %v4828_v59 = vmul.f32 %v4755_v15, %v4755_v15  ;;  %v3568_v0 = vadd.f32 %v14534_v35, %v3209_v37 }
 0x20f   : > { %v4856_v47 = vadd.f32 %v4855_v6, %v4825_v34  ;;  %v4785_v43 = vadd.f32 %v4784_v50, %v4753_v45  ;;  %v4826_v32 = vmul.f32 %v4753_v45, %v4753_v45  ;;  %v4286_v13 = vadd.f32 %v4183_v55, %v3560_v40 }
 0x210   : > { %v11479_v10 = vpop.f32.mrf.mxu0  ;;  %v11442_v52 = vpop.f32.mrf.mxu1  ;;  %v4758_v5 = vadd.f32 %v11475_v7, %v4288_v26 }
 0x211   : > { %v4786_v21 = vadd.f32 %v4785_v43, %v4754_v51  ;;  %v4857_v49 = vadd.f32 %v4856_v47, %v4826_v32  ;;  %v4756_v14 = vadd.f32 %v4653_v58, %v4286_v13  ;;  %v4289_v8 = vadd.f32 %v11442_v52, %v14516_v28 }
 0x212   : > { %v4669_v20 = vpop.f32.mrf.mxu0  ;;  %v4186_v46 = vpop.f32.mrf.mxu1  ;;  %v3206_v58 = vadd.f32 %v14536_v11, %v14425_v30  ;;  %v4831_v6 = vmul.f32 %v4758_v5, %v4758_v5  ;;  %v3210_v13 = vadd.f32 %v14550_v1, %v14437_v62 }
 0x213   : > { %v4858_v23 = vadd.f32 %v4857_v49, %v4827_v24  ;;  %v4787_v61 = vadd.f32 %v4786_v21, %v4755_v15  ;;  %v4287_v42 = vadd.f32 %v4186_v46, %v3561_v48  ;;  %v4829_v53 = vmul.f32 %v4756_v14, %v4756_v14 }
 0x214   : > { %v11480_v2 = vpop.f32.mrf.mxu0  ;;  %v11445_v17 = vpop.f32.mrf.mxu1  ;;  %v4759_v39 = vadd.f32 %v11476_v31, %v4289_v8  ;;  %v3565_v47 = vadd.f32 %v14519_v3, %v3206_v58 }
 0x215   : > { %v4788_v18 = vadd.f32 %v4787_v61, %v4756_v14  ;;  %v4859_v16 = vadd.f32 %v4858_v23, %v4828_v59  ;;  %v4757_v25 = vadd.f32 %v4656_v54, %v4287_v42  ;;  %v4292_v30 = vadd.f32 %v11445_v17, %v14531_v36 }
 0x216   : > { %v4672_v63 = vpop.f32.mrf.mxu0  ;;  %v4199_v28 = vpop.f32.mrf.mxu1  ;;  %v4832_v31 = vmul.f32 %v4759_v39, %v4759_v39  ;;  %v3213_v61 = vadd.f32 %v14557_v33, %v14443_v19  ;;  %v3214_v19 = vadd.f32 %v14564_v29, %v14449_v27 }
 0x217   : > { %v4860_v12 = vadd.f32 %v4859_v16, %v4829_v53  ;;  %v4789_v51 = vadd.f32 %v4788_v18, %v4757_v25  ;;  %v4830_v60 = vmul.f32 %v4757_v25, %v4757_v25  ;;  %v4290_v50 = vadd.f32 %v4199_v28, %v3564_v56 }
 0x218   : > { %v11483_v34 = vpop.f32.mrf.mxu0  ;;  %v11446_v7 = vpop.f32.mrf.mxu1  ;;  %v4762_v21 = vadd.f32 %v11479_v10, %v4292_v30 }
 0x219   : > { %v4790_v45 = vadd.f32 %v4789_v51, %v4758_v5  ;;  %v4861_v40 = vadd.f32 %v4860_v12, %v4830_v60  ;;  %v4760_v55 = vadd.f32 %v4669_v20, %v4290_v50  ;;  %v4293_v26 = vadd.f32 %v11446_v7, %v14538_v38 }
 0x21a   : > { %v4685_v54 = vpop.f32.mrf.mxu0  ;;  %v4202_v11 = vpop.f32.mrf.mxu1  ;;  %v3569_v38 = vadd.f32 %v14541_v41, %v3210_v13  ;;  %v4835_v42 = vmul.f32 %v4762_v21, %v4762_v21  ;;  %v3572_v41 = vadd.f32 %v14548_v9, %v3213_v61  ;;  %v17492_v9 = vld [vmem:[#allocation15_spill] sm:$0xff] }
 0x21b   : > { %v4862_v15 = vadd.f32 %v4861_v40, %v4831_v6  ;;  %v4791_v43 = vadd.f32 %v4790_v45, %v4759_v39  ;;  %v4291_v22 = vadd.f32 %v4202_v11, %v3565_v47  ;;  %v4833_v48 = vmul.f32 %v4760_v55, %v4760_v55  ;;  %v17493_v47 = vld [vmem:[#allocation9_spill] sm:$0xff] }
 0x21c   : > { %v11484_v32 = vpop.f32.mrf.mxu0  ;;  %v11449_v44 = vpop.f32.mrf.mxu1  ;;  %v4763_v46 = vadd.f32 %v11480_v2, %v4293_v26  ;;  %v3217_v30 = vadd.f32 %v17493_v47, %v17492_v9 }
 0x21d   : > { %v4792_v52 = vadd.f32 %v4791_v43, %v4760_v55  ;;  %v4863_v24 = vadd.f32 %v4862_v15, %v4832_v31  ;;  %v4761_v36 = vadd.f32 %v4672_v63, %v4291_v22  ;;  %v4296_v62 = vadd.f32 %v11449_v44, %v14545_v57  ;;  %v17491_v55 = vld [vmem:[#allocation20_spill] sm:$0xff]  ;;  %v17494_v31 = vld [vmem:[#allocation25_spill] sm:$0xff] }
 0x21e   : > { %v4688_v3 = vpop.f32.mrf.mxu0  ;;  %v4215_v49 = vpop.f32.mrf.mxu1  ;;  %v4836_v16 = vmul.f32 %v4763_v46, %v4763_v46 }
 0x21f   : > { %v4864_v20 = vadd.f32 %v4863_v24, %v4833_v48  ;;  %v4294_v14 = vadd.f32 %v4215_v49, %v3568_v0  ;;  %v4793_v59 = vadd.f32 %v4792_v52, %v4761_v36  ;;  %v4834_v35 = vmul.f32 %v4761_v36, %v4761_v36  ;;  %v17495_v52 = vld [vmem:[#allocation28_spill] sm:$0xff]  ;;  %v17498_v49 = vld [vmem:[#allocation17_spill] sm:$0xff] }
 0x220   : > { %v11487_v8 = vpop.f32.mrf.mxu0  ;;  %v11450_v23 = vpop.f32.mrf.mxu1  ;;  %v4766_v57 = vadd.f32 %v11483_v34, %v4296_v62  ;;  %v17497_v36 = vld [vmem:[#allocation8_spill] sm:$0xff] }
 0x221   : > { %v4794_v56 = vadd.f32 %v4793_v59, %v4762_v21  ;;  %v4865_v10 = vadd.f32 %v4864_v20, %v4834_v35  ;;  %v4764_v5 = vadd.f32 %v4685_v54, %v4294_v14  ;;  %v4297_v63 = vadd.f32 %v11450_v23, %v14552_v4 }
 0x222   : > { %v4701_v1 = vpop.f32.mrf.mxu0  ;;  %v4218_v17 = vpop.f32.mrf.mxu1  ;;  %v3573_v54 = vadd.f32 %v17491_v55, %v3214_v19  ;;  %v4839_v27 = vmul.f32 %v4766_v57, %v4766_v57  ;;  %v3218_v20 = vadd.f32 %v17498_v49, %v17497_v36  ;;  %v17506_v55 = vld [vmem:[#allocation23_spill] sm:$0xff] }
 0x223   : > { %v4295_v18 = vadd.f32 %v4218_v17, %v3569_v38  ;;  %v4866_v2 = vadd.f32 %v4865_v10, %v4835_v42  ;;  %v4795_v25 = vadd.f32 %v4794_v56, %v4763_v46  ;;  %v4837_v12 = vmul.f32 %v4764_v5, %v4764_v5 }
 0x224   : > { %v11488_v53 = vpop.f32.mrf.mxu0  ;;  %v11453_v58 = vpop.f32.mrf.mxu1  ;;  %v4767_v45 = vadd.f32 %v11484_v32, %v4297_v63 }
 0x225   : > { %v4765_v33 = vadd.f32 %v4688_v3, %v4295_v18  ;;  %v4796_v28 = vadd.f32 %v4795_v25, %v4764_v5  ;;  %v4867_v51 = vadd.f32 %v4866_v2, %v4836_v16  ;;  %v4300_v15 = vadd.f32 %v11453_v58, %v17494_v31  ;;  %v17496_v3 = vld [vmem:[#allocation27_spill] sm:$0xff]  ;;  %v17500_v2 = vld [vmem:[#allocation10_spill] sm:$0xff]  ;;  %v17501_v25 = vld [vmem:[#allocation21_spill] sm:$0xff] }
 0x226   : > { %v4704_v39 = vpop.f32.mrf.mxu0  ;;  %v4231_v60 = vpop.f32.mrf.mxu1  ;;  %v4840_v44 = vmul.f32 %v4767_v45, %v4767_v45  ;;  %v3576_v21 = vadd.f32 %v17496_v3, %v3217_v30  ;;  %v17499_v18 = vld [vmem:[#allocation11_spill] sm:$0xff]  ;;  %v3221_v63 = vadd.f32 %v17501_v25, %v17500_v2  ;;  %v17502_v58 = vld [vmem:[#allocation12_spill] sm:$0xff]  ;;  %v17508_v3 = vld [vmem:[#allocation22_spill] sm:$0xff] }
 0x227   : > { %v4838_v50 = vmul.f32 %v4765_v33, %v4765_v33  ;;  %v4298_v37 = vadd.f32 %v4231_v60, %v3572_v41  ;;  %v4868_v6 = vadd.f32 %v4867_v51, %v4837_v12  ;;  %v4797_v40 = vadd.f32 %v4796_v28, %v4765_v33 }
 0x228   : > { %v11491_v7 = vpop.f32.mrf.mxu0  ;;  %v11454_v4 = vpop.f32.mrf.mxu1  ;;  %v4770_v59 = vadd.f32 %v11487_v8, %v4300_v15  ;;  %v3577_v16 = vadd.f32 %v17499_v18, %v3218_v20 }
 0x229   : > { %v4798_v34 = vadd.f32 %v4797_v40, %v4766_v57  ;;  %v4869_v11 = vadd.f32 %v4868_v6, %v4838_v50  ;;  %v4768_v43 = vadd.f32 %v4701_v1, %v4298_v37  ;;  %v4301_v48 = vadd.f32 %v11454_v4, %v17495_v52  ;;  %v17505_v4 = vld [vmem:[#allocation18_spill] sm:$0xff] }
 0x22a   : > { %v4717_v29 = vpop.f32.mrf.mxu0  ;;  %v4234_v0 = vpop.f32.mrf.mxu1  ;;  %v4843_v19 = vmul.f32 %v4770_v59, %v4770_v59 }
 0x22b   : > { %v4299_v26 = vadd.f32 %v4234_v0, %v3573_v54  ;;  %v4870_v13 = vadd.f32 %v4869_v11, %v4839_v27  ;;  %v4799_v32 = vadd.f32 %v4798_v34, %v4767_v45  ;;  %v4841_v23 = vmul.f32 %v4768_v43, %v4768_v43  ;;  %v17504_v45 = vld [vmem:[#allocation16_spill] sm:$0xff] }
 0x22c   : > { %v11492_v22 = vpop.f32.mrf.mxu0  ;;  %v11457_v24 = vpop.f32.mrf.mxu1  ;;  %v4771_v56 = vadd.f32 %v11488_v53, %v4301_v48  ;;  %v17503_v53 = vld [vmem:[#allocation13_spill] sm:$0xff]  ;;  %v3580_v40 = vadd.f32 %v17504_v45, %v3221_v63  ;;  %v3222_v54 = vadd.f32 %v17506_v55, %v17505_v4 }
 0x22d   : > { %v4769_v14 = vadd.f32 %v4704_v39, %v4299_v26  ;;  %v4800_v35 = vadd.f32 %v4799_v32, %v4768_v43  ;;  %v4871_v38 = vadd.f32 %v4870_v13, %v4840_v44  ;;  %v4304_v41 = vadd.f32 %v11457_v24, %v17502_v58  ;;  %v17507_v13 = vld [vmem:[#allocation19_spill] sm:$0xff] }
 0x22e   : > { %v4720_v46 = vpop.f32.mrf.mxu0  ;;  %v4247_v61 = vpop.f32.mrf.mxu1  ;;  %v4844_v12 = vmul.f32 %v4771_v56, %v4771_v56  ;;  %v3581_v32 = vadd.f32 %v17507_v13, %v3222_v54 }
 0x22f   : > { %v4842_v62 = vmul.f32 %v4769_v14, %v4769_v14  ;;  %v4302_v1 = vadd.f32 %v4247_v61, %v3576_v21  ;;  %v4872_v42 = vadd.f32 %v4871_v38, %v4841_v23  ;;  %v4801_v10 = vadd.f32 %v4800_v35, %v4769_v14 }
 0x230   : > { %v11458_v5 = vpop.f32.mrf.mxu1  ;;  %v11495_v17 = vpop.f32.mrf.mxu0  ;;  %v4774_v9 = vadd.f32 %v11491_v7, %v4304_v41 }
 0x231   : > { %v4802_v8 = vadd.f32 %v4801_v10, %v4770_v59  ;;  %v4873_v57 = vadd.f32 %v4872_v42, %v4842_v62  ;;  %v4772_v33 = vadd.f32 %v4717_v29, %v4302_v1  ;;  %v4305_v50 = vadd.f32 %v11458_v5, %v17503_v53  ;;  %v17509_v59 = vld [vmem:[#allocation24_spill] sm:$0xff] }
 0x232   : > { %v4250_v39 = vpop.f32.mrf.mxu1  ;;  %v4733_v6 = vpop.f32.mrf.mxu0  ;;  %v4847_v52 = vmul.f32 %v4774_v9, %v4774_v9 }
 0x233   : > { %v4303_v28 = vadd.f32 %v4250_v39, %v3577_v16  ;;  %v4874_v51 = vadd.f32 %v4873_v57, %v4843_v19  ;;  %v4803_v60 = vadd.f32 %v4802_v8, %v4771_v56  ;;  %v4845_v27 = vmul.f32 %v4772_v33, %v4772_v33 }
 0x234   : > { %v11461_v37 = vpop.f32.mrf.mxu1  ;;  %v4775_v43 = vadd.f32 %v11492_v22, %v4305_v50  ;;  %v11496_v44 = vpop.f32.mrf.mxu0 }
 0x235   : > { %v4773_v47 = vadd.f32 %v4720_v46, %v4303_v28  ;;  %v4804_v30 = vadd.f32 %v4803_v60, %v4772_v33  ;;  %v4875_v34 = vadd.f32 %v4874_v51, %v4844_v12  ;;  %v4308_v21 = vadd.f32 %v11461_v37, %v17508_v3  ;;  %v4780_v60 = vld [vmem:[#allocation2] sm:$0x1]  ;;  %v4820_v37 = vld [vmem:[#allocation3] sm:$0x1] }
 0x236   : > { %v4263_v29 = vpop.f32.mrf.mxu1  ;;  %v4848_v20 = vmul.f32 %v4775_v43, %v4775_v43  ;;  %v4736_v23 = vpop.f32.mrf.mxu0 }
 0x237   : > { %v4846_v11 = vmul.f32 %v4773_v47, %v4773_v47  ;;  %v4306_v31 = vadd.f32 %v4263_v29, %v3580_v40  ;;  %v4876_v15 = vadd.f32 %v4875_v34, %v4845_v27  ;;  %v4805_v0 = vadd.f32 %v4804_v30, %v4773_v47 }
 0x238   : > { %v11462_v26 = vpop.f32.mrf.mxu1  ;;  %v4778_v38 = vadd.f32 %v11495_v17, %v4308_v21 }
 0x239   : > { %v4806_v48 = vadd.f32 %v4805_v0, %v4774_v9  ;;  %v4877_v24 = vadd.f32 %v4876_v15, %v4846_v11  ;;  %v4776_v7 = vadd.f32 %v4733_v6, %v4306_v31  ;;  %v4309_v35 = vadd.f32 %v11462_v26, %v17509_v59 }
 0x23a   : > { %v4266_v36 = vpop.f32.mrf.mxu1  ;;  %v4851_v18 = vmul.f32 %v4778_v38, %v4778_v38 }
 0x23b   : > { %v4307_v49 = vadd.f32 %v4266_v36, %v3581_v32  ;;  %v4878_v14 = vadd.f32 %v4877_v24, %v4847_v52  ;;  %v4807_v46 = vadd.f32 %v4806_v48, %v4775_v43  ;;  %v4849_v62 = vmul.f32 %v4776_v7, %v4776_v7 }
 0x23c   : > { %v4779_v10 = vadd.f32 %v11496_v44, %v4309_v35 }
 0x23d   : > { %v4777_v22 = vadd.f32 %v4736_v23, %v4307_v49  ;;  %v4808_v61 = vadd.f32 %v4807_v46, %v4776_v7  ;;  %v4879_v1 = vadd.f32 %v4878_v14, %v4848_v20 }
 0x23e   : > { %v4852_v25 = vmul.f32 %v4779_v10, %v4779_v10 }
 0x23f   : > { %v4850_v42 = vmul.f32 %v4777_v22, %v4777_v22  ;;  %v4880_v56 = vadd.f32 %v4879_v1, %v4849_v62  ;;  %v4809_v5 = vadd.f32 %v4808_v61, %v4777_v22 }
 0x241   : > { %v4810_v16 = vadd.f32 %v4809_v5, %v4778_v38  ;;  %v4881_v2 = vadd.f32 %v4880_v56, %v4850_v42 }
 0x243   : > { %v4811_v63 = vadd.f32 %v4810_v16, %v4779_v10  ;;  %v4882_v58 = vadd.f32 %v4881_v2, %v4851_v18 }
 0x245   : > { %v4812_v41 = vrot.slane %v4811_v63, 4  ;;  %v4883_v19 = vadd.f32 %v4882_v58, %v4852_v25 }
 0x247   : > { %v4813_v8 = vadd.f32 %v4812_v41, %v4811_v63  ;;  %v4884_v57 = vrot.slane %v4883_v19, 4 }
 0x249   : > { %v4814_v33 = vrot.slane %v4813_v8, 2  ;;  %v4885_v39 = vadd.f32 %v4884_v57, %v4883_v19 }
 0x24b   : > { %v4815_v17 = vadd.f32 %v4814_v33, %v4813_v8  ;;  %v4886_v28 = vrot.slane %v4885_v39, 2 }
 0x24d   : > { %v4816_v12 = vrot.slane %v4815_v17, 1  ;;  %v4887_v51 = vadd.f32 %v4886_v28, %v4885_v39 }
 0x24f   : > { %v4817_v53 = vadd.f32 %v4816_v12, %v4815_v17  ;;  %v4888_v50 = vrot.slane %v4887_v51, 1 }
 0x251   : > { %v4818_v6 = vadd.f32 %v4817_v53, %v4780_v60  ;;  %v4889_v45 = vadd.f32 %v4888_v50, %v4887_v51 }
 0x253   : > { %4819 = vst [vmem:[#allocation2] sm:$0x1] %v4818_v6  ;;  %v4890_v40 = vadd.f32 %v4889_v45, %v4820_v37 }
 0x255   : > { %4891 = vst [vmem:[#allocation3] sm:$0x1] %v4890_v40 }
 0x256 PF: > { %p10342_p4 = scmp.ne.s32.totalorder %s12083_s19, 1 }
 0x258   : > { %4903 = sbr.rel (%p10342_p4) target bundleno = 1160 (0x488), region = 48 }
 0x25d   : > { %v10343_v4 = vld [vmem:[%s17290_s1 + $0x2] sm:$0x3]  ;;  %vm5439_vm8 = vcmask 1041408   ;;  %v14667_v9 = vld [vmem:[%s12206_s12 + $0x4] sm:$0xf]  ;;  %vm5390_vm11 = vcmask 31744  }
 0x25e   : > { %v14661_v55 = vld [vmem:[%s12206_s12] sm:$0xf]  ;;  %11818 = vmatprep.subr.msk.bf16.mxu1 %vm5439_vm8, %v10343_v4  ;;  %11817 = vmatprep.subr.msk.bf16.mxu0 %vm5439_vm8, %v10343_v4  ;;  %v5441_v54 = vsel %vm5439_vm8, %v10343_v4, 0  ;;  %v14670_v47 = vld [vmem:[%s12206_s12 + $0x8] sm:$0x1]  ;;  %v4966_v34 = vshll.u32 %v14667_v9, 16 }
 0x25f   : > { %v4957_v30 = vshrl.u32 %v14661_v55, 16  ;;  %11806 = vmatpush3.bf16.msra.mxu1 %v5441_v54  ;;  %11498 = vmatpush3.bf16.msra.mxu0 %v5441_v54  ;;  %vm4953_vm9 = vsmask.f32 3328  ;;  %vm4954_vm10 = vsmask.f32 7440  ;;  %v4960_v27 = vshll.u32 %v14661_v55, 16 }
 0x260   : > { %v4970_v11 = vshrl.u32 %v14667_v9, 16  ;;  %v4976_v31 = vshll.u32 %v14670_v47, 16  ;;  %v14678_v15 = vld [vmem:[%s12206_s12 + $0x60] sm:$0xf]  ;;  %v4968_v0 = vrot.slane %v4966_v34, 5  ;;  %vm14701_vm12 = vmor %vm4953_vm9, %vm4954_vm10  ;;  %vm5944_vm13 = vcmask 1042432  }
 0x261   : > { %v4959_v29 = vrot.slane %v4957_v30, 4  ;;  %v4962_v43 = vrot.slane %v4960_v27, 5  ;;  %v14681_v26 = vld [vmem:[%s12206_s12 + $0x64] sm:$0xf]  ;;  %v14684_v44 = vld [vmem:[%s12206_s12 + $0x68] sm:$0x1] }
 0x262   : > { %v4972_v13 = vrot.slane %v4970_v11, 4  ;;  %v5149_v52 = vshrl.u32 %v14678_v15, 16  ;;  %v5152_v48 = vshll.u32 %v14678_v15, 16  ;;  %v4936_v24 = vld [vmem:[%s17290_s1] sm:$0x3]  ;;  %v5158_v21 = vshll.u32 %v14681_v26, 16 }
 0x263   : > { %v4963_v3 = vor.u32 %v4962_v43, %v4959_v29  ;;  %v5162_v7 = vshrl.u32 %v14681_v26, 16  ;;  %v5168_v36 = vshll.u32 %v14684_v44, 16  ;;  %11819 = vmatprep.subr.msk.bf16.mxu1 %vm5439_vm8, %v4936_v24  ;;  %v14697_v49 = vld [vmem:[%s12206_s12 + $0xc] sm:$0xf]  ;;  %v4978_v46 = vrot.slane %v4976_v31, 5 }
 0x264   : > { %v4973_v14 = vor.u32 %v4972_v13, %v4968_v0  ;;  %v5151_v59 = vrot.slane %v5149_v52, 4  ;;  %v5154_v35 = vrot.slane %v5152_v48, 5  ;;  %v14706_v23 = vld [vmem:[%s12206_s12 + $0x10] sm:$0xf]  ;;  %v5160_v38 = vrot.slane %v5158_v21, 5 }
 0x265   : > { %v4964_v22 = vrot.slane %v4963_v3, 4  ;;  %v5164_v61 = vrot.slane %v5162_v7, 4  ;;  %v5170_v62 = vrot.slane %v5168_v36, 5  ;;  %v4981_v56 = vshrl.u32 %v14697_v49, 16  ;;  %v14713_v16 = vld [vmem:[%s12206_s12 + $0x14] sm:$0x1] }
 0x266   : > { %v4974_v1 = vrot.slane %v4973_v14, 4  ;;  %v5155_v42 = vor.u32 %v5154_v35, %v5151_v59  ;;  %v4984_v10 = vshll.u32 %v14697_v49, 16  ;;  %v4990_v2 = vshll.u32 %v14706_v23, 16  ;;  %v14718_v63 = vld [vmem:[%s12206_s12 + $0x6c] sm:$0xf] }
 0x267   : > { %v4969_v5 = vsel %vm14701_vm12, %v4964_v22, %v4968_v0  ;;  %v5165_v18 = vor.u32 %v5164_v61, %v5160_v38  ;;  %v4994_v25 = vshrl.u32 %v14706_v23, 16  ;;  %v4983_v19 = vrot.slane %v4981_v56, 4  ;;  %v10424_v57 = vld [vmem:[%s17290_s1 + $0x4] sm:$0x3]  ;;  %v14731_v50 = vld [vmem:[%s12206_s12 + $0x70] sm:$0xf] }
 0x268   : > { %v4979_v58 = vsel %vm14701_vm12, %v4974_v1, %v4978_v46  ;;  %v5156_v41 = vrot.slane %v5155_v42, 4  ;;  %v4986_v8 = vrot.slane %v4984_v10, 5  ;;  %v4992_v17 = vrot.slane %v4990_v2, 5  ;;  %11820 = vmatprep.subr.msk.bf16.mxu0 %vm5439_vm8, %v10424_v57  ;;  %v14738_v40 = vld [vmem:[%s12206_s12 + $0x74] sm:$0x1] }
 0x269   : > { %v10344_v33 = vcombine.low %v4969_v5, %v4979_v58  ;;  %v5166_v39 = vrot.slane %v5165_v18, 4  ;;  %v4996_v28 = vrot.slane %v4994_v25, 4  ;;  %v5000_v60 = vshll.u32 %v14713_v16, 16  ;;  %v14743_v29 = vld [vmem:[%s12206_s12 + $0x18] sm:$0xf] }
 0x26a   : > { %v5161_v12 = vsel %vm14701_vm12, %v5156_v41, %v5160_v38  ;;  %v4987_v51 = vor.u32 %v4986_v8, %v4983_v19  ;;  %v5173_v4 = vshrl.u32 %v14718_v63, 16  ;;  %v5176_v34 = vshll.u32 %v14718_v63, 16  ;;  %v14748_v13 = vld [vmem:[%s12206_s12 + $0x1c] sm:$0xf]  ;;  %v14756_v7 = vld [vmem:[%s12206_s12 + $0x20] sm:$0x1] }
 0x26b   : > { %11499 = vmatprep.mubr.msk.bf16.mxu0 %vm5390_vm11, %v10344_v33  ;;  %v5171_v37 = vsel %vm14701_vm12, %v5166_v39, %v5170_v62  ;;  %v4997_v6 = vor.u32 %v4996_v28, %v4992_v17  ;;  %v5002_v27 = vrot.slane %v5000_v60, 5  ;;  %v5182_v43 = vshll.u32 %v14731_v50, 16  ;;  %v14762_v35 = vld [vmem:[%s12206_s12 + $0x78] sm:$0xf]  ;;  %v14771_v2 = vld [vmem:[%s12206_s12 + $0x7c] sm:$0xf] }
 0x26c   : > { %v10352_v54 = vcombine.low %v5161_v12, %v5171_v37  ;;  %v4988_v30 = vrot.slane %v4987_v51, 4  ;;  %v5175_v31 = vrot.slane %v5173_v4, 4  ;;  %v5186_v0 = vshrl.u32 %v14731_v50, 16  ;;  %v14781_v12 = vld [vmem:[%s12206_s12 + $0x24] sm:$0xf] }
 0x26d   : > { %v4998_v11 = vrot.slane %v4997_v6, 4  ;;  %v5178_v48 = vrot.slane %v5176_v34, 5  ;;  %v5192_v3 = vshll.u32 %v14738_v40, 16  ;;  %v5733_v21 = vsel %vm5439_vm8, %v4936_v24, 0  ;;  %v14789_v34 = vld [vmem:[%s12206_s12 + $0x28] sm:$0xf] }
 0x26e   : > { %11515 = vmatprep.mubr.msk.bf16.mxu1 %vm5390_vm11, %v10352_v54  ;;  %v4993_v52 = vsel %vm14701_vm12, %v4988_v30, %v4992_v17  ;;  %v5184_v14 = vrot.slane %v5182_v43, 5  ;;  %v5188_v46 = vrot.slane %v5186_v0, 4  ;;  %v6158_v59 = vsel %vm5439_vm8, %v10424_v57, 0  ;;  %v14775_v57 = vld [vmem:[%s12206_s12 + $0x80] sm:$0x1] }
 0x26f   : > { %v5003_v36 = vsel %vm14701_vm12, %v4998_v11, %v5002_v27  ;;  %v5179_v38 = vor.u32 %v5178_v48, %v5175_v31  ;;  %v5194_v61 = vrot.slane %v5192_v3, 5  ;;  %v5005_v62 = vshrl.u32 %v14743_v29, 16  ;;  %17512 = vst [vmem:[#allocation29_spill] sm:$0xff] %v14775_v57  ;;  %v14792_v0 = vld [vmem:[%s12206_s12 + $0x2c] sm:$0x1] }
 0x270   : > { %v10345_v22 = vcombine.low %v4993_v52, %v5003_v36  ;;  %v5189_v1 = vor.u32 %v5188_v46, %v5184_v14  ;;  %v5008_v24 = vshll.u32 %v14743_v29, 16  ;;  %v5014_v42 = vshll.u32 %v14748_v13, 16  ;;  %v14798_v46 = vld [vmem:[%s12206_s12 + $0x84] sm:$0xf]  ;;  %v14930_v53 = vld [vmem:[%s12206_s12 + $0xa8] sm:$0xf] }
 0x271   : > { %v5018_v56 = vshrl.u32 %v14748_v13, 16  ;;  %v5180_v10 = vrot.slane %v5179_v38, 4  ;;  %v5007_v5 = vrot.slane %v5005_v62, 4  ;;  %v5024_v18 = vshll.u32 %v14756_v7, 16  ;;  %17519 = vst [vmem:[#allocation36_spill] sm:$0xff] %v14930_v53 }
 0x272   : > { %11500 = vmatmul.mubr.msk.bf16.vlgmr.msra.gmra.mxu0 %vm5390_vm11, %v10345_v22  ;;  %v5197_v25 = vshrl.u32 %v14762_v35, 16  ;;  %v5190_v58 = vrot.slane %v5189_v1, 4  ;;  %v5010_v41 = vrot.slane %v5008_v24, 5  ;;  %v5016_v19 = vrot.slane %v5014_v42, 5 }
 0x273   : > { %11566 = vmatpush3.bf16.msra.mxu0 %v6158_v59  ;;  %v5020_v8 = vrot.slane %v5018_v56, 4  ;;  %v5185_v33 = vsel %vm14701_vm12, %v5180_v10, %v5184_v14  ;;  %v5026_v39 = vrot.slane %v5024_v18, 5  ;;  %v5200_v28 = vshll.u32 %v14762_v35, 16  ;;  %v14806_v56 = vld [vmem:[%s12206_s12 + $0x88] sm:$0xf] }
 0x274   : > { %v5199_v17 = vrot.slane %v5197_v25, 4  ;;  %v5195_v51 = vsel %vm14701_vm12, %v5190_v58, %v5194_v61  ;;  %v5011_v60 = vor.u32 %v5010_v41, %v5007_v5  ;;  %v5206_v6 = vshll.u32 %v14771_v2, 16 }
 0x275   : > { %v5021_v37 = vor.u32 %v5020_v8, %v5016_v19  ;;  %v10353_v4 = vcombine.low %v5185_v33, %v5195_v51  ;;  %v5202_v54 = vrot.slane %v5200_v28, 5  ;;  %v5210_v30 = vshrl.u32 %v14771_v2, 16  ;;  %v14820_v51 = vld [vmem:[%s12206_s12 + $0x30] sm:$0xf] }
 0x276   : > { %v5216_v27 = vshll.u32 %v14775_v57, 16  ;;  %v5012_v11 = vrot.slane %v5011_v60, 4  ;;  %v5208_v43 = vrot.slane %v5206_v6, 5  ;;  %v5029_v52 = vshrl.u32 %v14781_v12, 16 }
 0x277   : > { %v5022_v31 = vrot.slane %v5021_v37, 4  ;;  %11516 = vmatmul.mubr.msk.bf16.vlgmr.msra.gmra.mxu1 %vm5390_vm11, %v10353_v4  ;;  %v5203_v48 = vor.u32 %v5202_v54, %v5199_v17  ;;  %v5212_v3 = vrot.slane %v5210_v30, 4  ;;  %v5032_v14 = vshll.u32 %v14781_v12, 16  ;;  %v14826_v54 = vld [vmem:[%s12206_s12 + $0x34] sm:$0xf] }
 0x278   : > { %v5218_v36 = vrot.slane %v5216_v27, 5  ;;  %11532 = vmatpush3.bf16.msra.mxu1 %v5733_v21  ;;  %v5017_v59 = vsel %vm14701_vm12, %v5012_v11, %v5016_v19  ;;  %v5031_v38 = vrot.slane %v5029_v52, 4  ;;  %v5038_v61 = vshll.u32 %v14789_v34, 16  ;;  %v14815_v19 = vld [vmem:[%s12206_s12 + $0x8c] sm:$0x1] }
 0x279   : > { %v5027_v22 = vsel %vm14701_vm12, %v5022_v31, %v5026_v39  ;;  %v5204_v1 = vrot.slane %v5203_v48, 4  ;;  %v5213_v24 = vor.u32 %v5212_v3, %v5208_v43  ;;  %v5034_v42 = vrot.slane %v5032_v14, 5  ;;  %v14832_v3 = vld [vmem:[%s12206_s12 + $0x38] sm:$0x1] }
 0x27a   : > { %v10346_v62 = vcombine.low %v5017_v59, %v5027_v22  ;;  %v5040_v10 = vrot.slane %v5038_v61, 5  ;;  %v5042_v21 = vshrl.u32 %v14789_v34, 16  ;;  %v5048_v5 = vshll.u32 %v14792_v0, 16 }
 0x27b   : > { %v5221_v18 = vshrl.u32 %v14798_v46, 16  ;;  %v5209_v25 = vsel %vm14701_vm12, %v5204_v1, %v5208_v43  ;;  %v5214_v58 = vrot.slane %v5213_v24, 4  ;;  %v5035_v41 = vor.u32 %v5034_v42, %v5031_v38  ;;  %v14840_v42 = vld [vmem:[%s12206_s12 + $0x90] sm:$0xf] }
 0x27c   : > { %11503 = vmatprep.mubr.msk.bf16.mxu0 %vm5390_vm11, %v10346_v62  ;;  %v5224_v8 = vshll.u32 %v14798_v46, 16  ;;  %v5044_v33 = vrot.slane %v5042_v21, 4  ;;  %v5050_v39 = vrot.slane %v5048_v5, 5  ;;  %v5230_v28 = vshll.u32 %v14806_v56, 16  ;;  %17513 = vst [vmem:[#allocation30_spill] sm:$0xff] %v14840_v42 }
 0x27d   : > { %v5223_v17 = vrot.slane %v5221_v18, 4  ;;  %v5219_v60 = vsel %vm14701_vm12, %v5214_v58, %v5218_v36  ;;  %v5036_v37 = vrot.slane %v5035_v41, 4  ;;  %v5234_v4 = vshrl.u32 %v14806_v56, 16 }
 0x27e   : > { %v5226_v6 = vrot.slane %v5224_v8, 5  ;;  %v10354_v30 = vcombine.low %v5209_v25, %v5219_v60  ;;  %v5045_v27 = vor.u32 %v5044_v33, %v5040_v10  ;;  %v5232_v11 = vrot.slane %v5230_v28, 5  ;;  %v14846_v25 = vld [vmem:[%s12206_s12 + $0x94] sm:$0xf]  ;;  %v14856_v60 = vld [vmem:[%s12206_s12 + $0x98] sm:$0x1] }
 0x27f   : > { %v5240_v31 = vshll.u32 %v14815_v19, 16  ;;  %v5041_v43 = vsel %vm14701_vm12, %v5036_v37, %v5040_v10  ;;  %v5236_v48 = vrot.slane %v5234_v4, 4  ;;  %v5053_v36 = vshrl.u32 %v14820_v51, 16  ;;  %17514 = vst [vmem:[#allocation31_spill] sm:$0xff] %v14846_v25  ;;  %17515 = vst [vmem:[#allocation32_spill] sm:$0xff] %v14856_v60 }
 0x280   : > { %v5227_v52 = vor.u32 %v5226_v6, %v5223_v17  ;;  %11519 = vmatprep.mubr.msk.bf16.mxu1 %vm5390_vm11, %v10354_v30  ;;  %v5046_v14 = vrot.slane %v5045_v27, 4  ;;  %v5056_v22 = vshll.u32 %v14820_v51, 16  ;;  %v5062_v38 = vshll.u32 %v14826_v54, 16  ;;  %v14853_v17 = vld [vmem:[%s17290_s1 + $0x6] sm:$0x3] }
 0x281   : > { %v5242_v59 = vrot.slane %v5240_v31, 5  ;;  %v5237_v62 = vor.u32 %v5236_v48, %v5232_v11  ;;  %v5055_v1 = vrot.slane %v5053_v36, 4  ;;  %v5066_v24 = vshrl.u32 %v14826_v54, 16  ;;  %11821 = vmatprep.subr.msk.bf16.mxu1 %vm5439_vm8, %v14853_v17  ;;  %v14868_v31 = vld [vmem:[%s12206_s12 + $0x3c] sm:$0xf] }
 0x282   : > { %v5228_v61 = vrot.slane %v5227_v52, 4  ;;  %v5051_v10 = vsel %vm14701_vm12, %v5046_v14, %v5050_v39  ;;  %v5058_v21 = vrot.slane %v5056_v22, 5  ;;  %v5064_v5 = vrot.slane %v5062_v38, 5  ;;  %v14876_v22 = vld [vmem:[%s12206_s12 + $0x40] sm:$0xf] }
 0x283   : > { %v5072_v18 = vshll.u32 %v14832_v3, 16  ;;  %v10347_v58 = vcombine.low %v5041_v43, %v5051_v10  ;;  %v5238_v8 = vrot.slane %v5237_v62, 4  ;;  %v5068_v33 = vrot.slane %v5066_v24, 4  ;;  %v14873_v43 = vld [vmem:[%s17290_s1 + $0x8] sm:$0x3] }
 0x284   : > { %v5233_v41 = vsel %vm14701_vm12, %v5228_v61, %v5232_v11  ;;  %v5059_v28 = vor.u32 %v5058_v21, %v5055_v1  ;;  %v5245_v37 = vshrl.u32 %v14840_v42, 16  ;;  %v5248_v6 = vshll.u32 %v14840_v42, 16  ;;  %11822 = vmatprep.subr.msk.bf16.mxu0 %vm5439_vm8, %v14873_v43  ;;  %v14885_v10 = vld [vmem:[%s12206_s12 + $0x44] sm:$0x1] }
 0x285   : > { %v5074_v39 = vrot.slane %v5072_v18, 5  ;;  %11504 = vmatmul.mubr.msk.bf16.gmra.mxu0 %vm5390_vm11, %v10347_v58  ;;  %v5243_v4 = vsel %vm14701_vm12, %v5238_v8, %v5242_v59  ;;  %v5069_v30 = vor.u32 %v5068_v33, %v5064_v5  ;;  %v5254_v27 = vshll.u32 %v14846_v25, 16 }
 0x286   : > { %v5258_v11 = vshrl.u32 %v14846_v25, 16  ;;  %v10355_v52 = vcombine.low %v5233_v41, %v5243_v4  ;;  %v5060_v48 = vrot.slane %v5059_v28, 4  ;;  %v5247_v36 = vrot.slane %v5245_v37, 4  ;;  %v14893_v28 = vld [vmem:[%s12206_s12 + $0x9c] sm:$0xf] }
 0x287   : > { %v5250_v14 = vrot.slane %v5248_v6, 5  ;;  %v5070_v59 = vrot.slane %v5069_v30, 4  ;;  %v5256_v38 = vrot.slane %v5254_v27, 5  ;;  %v5264_v62 = vshll.u32 %v14856_v60, 16  ;;  %17516 = vst [vmem:[#allocation33_spill] sm:$0xff] %v14893_v28 }
 0x288   : > { %v5260_v61 = vrot.slane %v5258_v11, 4  ;;  %11520 = vmatmul.mubr.msk.bf16.gmra.mxu1 %vm5390_vm11, %v10355_v52  ;;  %v5065_v1 = vsel %vm14701_vm12, %v5060_v48, %v5064_v5  ;;  %v5077_v21 = vshrl.u32 %v14868_v31, 16  ;;  %v5080_v18 = vshll.u32 %v14868_v31, 16  ;;  %v14896_v30 = vld [vmem:[%s12206_s12 + $0xa0] sm:$0xf] }
 0x289   : > { %v5251_v24 = vor.u32 %v5250_v14, %v5247_v36  ;;  %v5075_v58 = vsel %vm14701_vm12, %v5070_v59, %v5074_v39  ;;  %v5266_v8 = vrot.slane %v5264_v62, 5  ;;  %v5086_v33 = vshll.u32 %v14876_v22, 16  ;;  %17517 = vst [vmem:[#allocation34_spill] sm:$0xff] %v14896_v30  ;;  %v14904_v14 = vld [vmem:[%s12206_s12 + $0xa4] sm:$0x1] }
 0x28a   : > { %v5261_v41 = vor.u32 %v5260_v61, %v5256_v38  ;;  %v10348_v37 = vcombine.low %v5065_v1, %v5075_v58  ;;  %v5079_v5 = vrot.slane %v5077_v21, 4  ;;  %v5082_v4 = vrot.slane %v5080_v18, 5  ;;  %17518 = vst [vmem:[#allocation35_spill] sm:$0xff] %v14904_v14  ;;  %v14912_v18 = vld [vmem:[%s12206_s12 + $0x48] sm:$0xf] }
 0x28b   : > { %v5252_v6 = vrot.slane %v5251_v24, 4  ;;  %v5088_v11 = vrot.slane %v5086_v33, 5  ;;  %v5090_v52 = vshrl.u32 %v14876_v22, 16  ;;  %v5096_v39 = vshll.u32 %v14885_v10, 16 }
 0x28c   : > { %v5262_v27 = vrot.slane %v5261_v41, 4  ;;  %11507 = vmatprep.mubr.msk.bf16.mxu0 %vm5390_vm11, %v10348_v37  ;;  %v5083_v36 = vor.u32 %v5082_v4, %v5079_v5  ;;  %v5269_v59 = vshrl.u32 %v14893_v28, 16  ;;  %v5272_v61 = vshll.u32 %v14893_v28, 16  ;;  %v14915_v37 = vld [vmem:[%s12206_s12 + $0x4c] sm:$0xf] }
 0x28d   : > { %v5257_v48 = vsel %vm14701_vm12, %v5252_v6, %v5256_v38  ;;  %v5092_v1 = vrot.slane %v5090_v52, 4  ;;  %v5098_v24 = vrot.slane %v5096_v39, 5  ;;  %v5278_v21 = vshll.u32 %v14896_v30, 16 }
 0x28e   : > { %v5267_v62 = vsel %vm14701_vm12, %v5262_v27, %v5266_v8  ;;  %v5084_v41 = vrot.slane %v5083_v36, 4  ;;  %v5271_v38 = vrot.slane %v5269_v59, 4  ;;  %v5274_v33 = vrot.slane %v5272_v61, 5  ;;  %v14920_v8 = vld [vmem:[%s12206_s12 + $0x50] sm:$0x1] }
 0x28f   : > { %v10356_v58 = vcombine.low %v5257_v48, %v5267_v62  ;;  %v5093_v6 = vor.u32 %v5092_v1, %v5088_v11  ;;  %v5280_v5 = vrot.slane %v5278_v21, 5  ;;  %v5282_v4 = vshrl.u32 %v14896_v30, 16 }
 0x290   : > { %v5288_v32 = vshll.u32 %v14904_v14, 16  ;;  %v5089_v27 = vsel %vm14701_vm12, %v5084_v41, %v5088_v11  ;;  %v5275_v52 = vor.u32 %v5274_v33, %v5271_v38  ;;  %v5101_v39 = vshrl.u32 %v14912_v18, 16 }
 0x291   : > { %11523 = vmatprep.mubr.msk.bf16.mxu1 %vm5390_vm11, %v10356_v58  ;;  %v5104_v48 = vshll.u32 %v14912_v18, 16  ;;  %v5094_v36 = vrot.slane %v5093_v6, 4  ;;  %v5284_v59 = vrot.slane %v5282_v4, 4  ;;  %v5110_v62 = vshll.u32 %v14915_v37, 16  ;;  %v14936_v6 = vld [vmem:[%s12206_s12 + $0xac] sm:$0xf] }
 0x292   : > { %v5290_v61 = vrot.slane %v5288_v32, 5  ;;  %v5276_v1 = vrot.slane %v5275_v52, 4  ;;  %v5103_v21 = vrot.slane %v5101_v39, 4  ;;  %v5114_v58 = vshrl.u32 %v14915_v37, 16  ;;  %17520 = vst [vmem:[#allocation37_spill] sm:$0xff] %v14936_v6 }
 0x293   : > { %v5106_v45 = vrot.slane %v5104_v48, 5  ;;  %v5099_v11 = vsel %vm14701_vm12, %v5094_v36, %v5098_v24  ;;  %v5285_v41 = vor.u32 %v5284_v59, %v5280_v5  ;;  %v5112_v38 = vrot.slane %v5110_v62, 5  ;;  %v14939_v32 = vld [vmem:[%s12206_s12 + $0xb0] sm:$0x1] }
 0x294   : > { %v5120_v33 = vshll.u32 %v14920_v8, 16  ;;  %17521 = vst [vmem:[#allocation38_spill] sm:$0xff] %v14939_v32  ;;  %v10349_v4 = vcombine.low %v5089_v27, %v5099_v11  ;;  %v5281_v52 = vsel %vm14701_vm12, %v5276_v1, %v5280_v5  ;;  %v5116_v48 = vrot.slane %v5114_v58, 4  ;;  %v14949_v11 = vld [vmem:[%s12206_s12 + $0x54] sm:$0xf] }
 0x295   : > { %v5107_v39 = vor.u32 %v5106_v45, %v5103_v21  ;;  %v5286_v57 = vrot.slane %v5285_v41, 4  ;;  %v5293_v24 = vshrl.u32 %v14930_v53, 16  ;;  %v5296_v36 = vshll.u32 %v14930_v53, 16  ;;  %v14955_v58 = vld [vmem:[%s12206_s12 + $0x58] sm:$0xf] }
 0x296   : > { %v5122_v14 = vrot.slane %v5120_v33, 5  ;;  %11508 = vmatmul.mubr.msk.bf16.gmra.mxu0 %vm5390_vm11, %v10349_v4  ;;  %v5117_v62 = vor.u32 %v5116_v48, %v5112_v38  ;;  %v5302_v28 = vshll.u32 %v14936_v6, 16  ;;  %v5306_v27 = vshrl.u32 %v14936_v6, 16  ;;  %v14960_v48 = vld [vmem:[%s12206_s12 + $0x5c] sm:$0x1] }
 0x297   : > { %v5108_v59 = vrot.slane %v5107_v39, 4  ;;  %v5291_v45 = vsel %vm14701_vm12, %v5286_v57, %v5290_v61  ;;  %v5295_v5 = vrot.slane %v5293_v24, 4  ;;  %v5298_v1 = vrot.slane %v5296_v36, 5 }
 0x298   : > { %v5312_v21 = vshll.u32 %v14939_v32, 16  ;;  %v10357_v41 = vcombine.low %v5281_v52, %v5291_v45  ;;  %v5118_v4 = vrot.slane %v5117_v62, 4  ;;  %v5304_v39 = vrot.slane %v5302_v28, 5  ;;  %v14970_v28 = vld [vmem:[%s12206_s12 + $0xb4] sm:$0xf] }
 0x299   : > { %v5113_v33 = vsel %vm14701_vm12, %v5108_v59, %v5112_v38  ;;  %v5299_v53 = vor.u32 %v5298_v1, %v5295_v5  ;;  %v5308_v6 = vrot.slane %v5306_v27, 4  ;;  %v5125_v57 = vshrl.u32 %v14949_v11, 16  ;;  %v14973_v45 = vld [vmem:[%s12206_s12 + $0xb8] sm:$0xf]  ;;  %v14982_v32 = vld [vmem:[%s12206_s12 + $0xbc] sm:$0x1] }
 0x29a   : > { %v5314_v30 = vrot.slane %v5312_v21, 5  ;;  %11524 = vmatmul.mubr.msk.bf16.gmra.mxu1 %vm5390_vm11, %v10357_v41  ;;  %v5123_v61 = vsel %vm14701_vm12, %v5118_v4, %v5122_v14  ;;  %v5128_v52 = vshll.u32 %v14949_v11, 16  ;;  %v5134_v24 = vshll.u32 %v14955_v58, 16 }
 0x29b   : > { %v5138_v38 = vshrl.u32 %v14955_v58, 16  ;;  %v10350_v36 = vcombine.low %v5113_v33, %v5123_v61  ;;  %v5300_v59 = vrot.slane %v5299_v53, 4  ;;  %v5309_v62 = vor.u32 %v5308_v6, %v5304_v39 }
 0x29c   : > { %v5127_v27 = vrot.slane %v5125_v57, 4  ;;  %v5130_v5 = vrot.slane %v5128_v52, 5  ;;  %v5136_v1 = vrot.slane %v5134_v24, 5  ;;  %v5144_v14 = vshll.u32 %v14960_v48, 16  ;;  %v5896_v24 = vld [vmem:[%s12206_s12] sm:$0xe] }
 0x29d   : > { %v5140_v21 = vrot.slane %v5138_v38, 4  ;;  %11511 = vmatprep.mubr.msk.bf16.mxu0 %vm5390_vm11, %v10350_v36  ;;  %v5305_v41 = vsel %vm14701_vm12, %v5300_v59, %v5304_v39  ;;  %v5310_v4 = vrot.slane %v5309_v62, 4  ;;  %v5317_v53 = vshrl.u32 %v14970_v28, 16  ;;  %v5897_v59 = vld [vmem:[%s12206_s12 + $0xc] sm:$0xe] }
 0x29e   : > { %v5320_v6 = vshll.u32 %v14970_v28, 16  ;;  %v5131_v33 = vor.u32 %v5130_v5, %v5127_v27  ;;  %v5146_v61 = vrot.slane %v5144_v14, 5  ;;  %v5326_v52 = vshll.u32 %v14973_v45, 16 }
 0x29f   : > { %v5141_v57 = vor.u32 %v5140_v21, %v5136_v1  ;;  %v5315_v38 = vsel %vm14701_vm12, %v5310_v4, %v5314_v30  ;;  %v5319_v36 = vrot.slane %v5317_v53, 4  ;;  %v5330_v39 = vshrl.u32 %v14973_v45, 16 }
 0x2a0   : > { %v5322_v60 = vrot.slane %v5320_v6, 5  ;;  %v10358_v62 = vcombine.low %v5305_v41, %v5315_v38  ;;  %v5132_v42 = vrot.slane %v5131_v33, 4  ;;  %v5328_v27 = vrot.slane %v5326_v52, 5  ;;  %v5898_v52 = vld [vmem:[%s12206_s12 + $0x18] sm:$0xe] }
 0x2a1   : > { %v5142_v25 = vrot.slane %v5141_v57, 4  ;;  %v5332_v21 = vrot.slane %v5330_v39, 4  ;;  %v5336_v14 = vshll.u32 %v14982_v32, 16  ;;  %vm5945_vm14 = vcmask 1046532  }
 0x2a2   : > { %v5323_v5 = vor.u32 %v5322_v60, %v5319_v36  ;;  %11527 = vmatprep.mubr.msk.bf16.mxu1 %vm5390_vm11, %v10358_v62  ;;  %v5137_v30 = vsel %vm14701_vm12, %v5132_v42, %v5136_v1  ;;  %v10408_v53 = vrot.slane %v5896_v24, 9  ;;  %vm14996_vm15 = vmor %vm5944_vm13, %vm5945_vm14  ;;  %v5949_v38 = vrot.slane %v14667_v9, 5 }
 0x2a3   : > { %v5147_v4 = vsel %vm14701_vm12, %v5142_v25, %v5146_v61  ;;  %v5333_v33 = vor.u32 %v5332_v21, %v5328_v27  ;;  %v5338_v57 = vrot.slane %v5336_v14, 5  ;;  %v10377_v42 = vcombine.low %v14697_v49, %v14706_v23  ;;  %v5899_v14 = vld [vmem:[%s12206_s12 + $0x24] sm:$0xe] }
 0x2a4   : > { %v10351_v41 = vcombine.low %v5137_v30, %v5147_v4  ;;  %v5324_v6 = vrot.slane %v5323_v5, 4  ;;  %v10409_v1 = vrot.slane %v5897_v59, 9  ;;  %v17524_v25 = vrot.slane %v14706_v23, 5 }
 0x2a5   : > { %v5334_v36 = vrot.slane %v5333_v33, 4  ;;  %v5950_v39 = vsel %vm14996_vm15, %v10408_v53, %v5949_v38  ;;  %v5951_v62 = vrot.slane %v5949_v38, 4  ;;  %v17526_v59 = vrot.slane %v14713_v16, 5  ;;  %v5900_v38 = vld [vmem:[%s12206_s12 + $0x30] sm:$0xe] }
 0x2a6   : > { %v5958_v61 = vrot.slane %v17524_v25, 4  ;;  %11512 = vmatmul.mubr.msk.bf16.gmra.mxu0 %vm5390_vm11, %v10351_v41  ;;  %v5329_v24 = vsel %vm14701_vm12, %v5324_v6, %v5328_v27  ;;  %v17525_v5 = vmov %v17524_v25  ;;  %v10376_v27 = vcombine.low %v14661_v55, %v14667_v9 }
 0x2a7   : > { %v5957_v49 = vsel %vm14996_vm15, %v10409_v1, %v17525_v5  ;;  %v5339_v30 = vsel %vm14701_vm12, %v5334_v36, %v5338_v57  ;;  %v10378_v4 = vcombine.low %v14743_v29, %v14748_v13  ;;  %v10410_v53 = vrot.slane %v5898_v52, 9  ;;  %v5902_v5 = vld [vmem:[%s12206_s12 + $0x48] sm:$0xe] }
 0x2a8   : > { %v5960_v21 = vsel %vm14996_vm15, %v5958_v61, %v17526_v59  ;;  %v10359_v23 = vcombine.low %v5329_v24, %v5339_v30  ;;  %v17527_v41 = vrot.slane %v14670_v47, 5  ;;  %v5963_v6 = vrot.slane %v14748_v13, 5  ;;  %v5901_v24 = vld [vmem:[%s12206_s12 + $0x3c] sm:$0xe] }
 0x2a9   : > { %v5966_v33 = vrot.slane %v14756_v7, 5  ;;  %v10426_v1 = vcombine.low %v5957_v49, %v5960_v21  ;;  %v5970_v55 = vrot.slane %v14789_v34, 5  ;;  %v10411_v47 = vrot.slane %v5899_v14, 9 }
 0x2aa   : > { %v5953_v16 = vsel %vm14996_vm15, %v5951_v62, %v17527_v41  ;;  %11528 = vmatmul.mubr.msk.bf16.gmra.mxu1 %vm5390_vm11, %v10359_v23  ;;  %v5964_v9 = vsel %vm14996_vm15, %v10410_v53, %v5963_v6  ;;  %v5965_v29 = vrot.slane %v5963_v6, 4  ;;  %v5973_v52 = vrot.slane %v14792_v0, 5  ;;  %v15050_v0 = vld [vmem:[%s17290_s1 + $0xc] sm:$0x3]  ;;  %v5903_v53 = vld [vmem:[%s12206_s12 + $0x54] sm:$0xe] }
 0x2ab   : > { %v10425_v57 = vcombine.low %v5950_v39, %v5953_v16  ;;  %11533 = vmatprep.mubr.msk.bf16.mxu1 %vm5390_vm11, %v10376_v27  ;;  %v7243_v13 = vsel %vm5439_vm8, %v14873_v43, 0  ;;  %v5972_v7 = vrot.slane %v5970_v55, 4  ;;  %v10412_v25 = vrot.slane %v5900_v38, 9 }
 0x2ac   : > { %v5977_v61 = vrot.slane %v14826_v54, 5  ;;  %v5967_v36 = vsel %vm14996_vm15, %v5965_v29, %v5966_v33  ;;  %v5980_v39 = vrot.slane %v14832_v3, 5  ;;  %v6517_v49 = vsel %vm5439_vm8, %v14853_v17, 0  ;;  %v5904_v29 = vld [vmem:[%s12206_s12 + $0x60] sm:$0xe] }
 0x2ad   : > { %11567 = vmatprep.mubr.msk.bf16.mxu0 %vm5390_vm11, %v10425_v57  ;;  %v10427_v62 = vcombine.low %v5964_v9, %v5967_v36  ;;  %v5971_v59 = vsel %vm14996_vm15, %v10411_v47, %v5970_v55  ;;  %v5974_v3 = vsel %vm14996_vm15, %v5972_v7, %v5973_v52  ;;  %v5984_v21 = vrot.slane %v14876_v22, 5 }
 0x2ae   : > { %11568 = vmatmul.mubr.msk.bf16.vlgmr.msra.gmra.mxu0 %vm5390_vm11, %v10426_v1  ;;  %v5979_v43 = vrot.slane %v5977_v61, 4  ;;  %v5978_v14 = vsel %vm14996_vm15, %v10412_v25, %v5977_v61  ;;  %v10413_v27 = vrot.slane %v5901_v24, 9  ;;  %v5991_v17 = vrot.slane %v14915_v37, 5  ;;  %v15076_v1 = vld [vmem:[%s17290_s1 + $0xa] sm:$0x3] }
 0x2af   : > { %11634 = vmatpush3.bf16.msra.mxu0 %v7243_v13  ;;  %11571 = vmatprep.mubr.msk.bf16.mxu0 %vm5390_vm11, %v10427_v62  ;;  %v5986_v23 = vrot.slane %v5984_v21, 4  ;;  %v5987_v41 = vrot.slane %v14885_v10, 5  ;;  %v10414_v16 = vrot.slane %v5902_v5, 9  ;;  %v5994_v6 = vrot.slane %v14920_v8, 5  ;;  %v5907_v25 = vld [vmem:[%s12206_s12 + $0x84] sm:$0xe] }
 0x2b0   : > { %v5981_v30 = vsel %vm14996_vm15, %v5979_v43, %v5980_v39  ;;  %11824 = vmatprep.subr.msk.bf16.mxu0 %vm5439_vm8, %v15050_v0  ;;  %v10428_v33 = vcombine.low %v5971_v59, %v5974_v3  ;;  %v5993_v38 = vrot.slane %v5991_v17, 4  ;;  %v5998_v57 = vrot.slane %v14955_v58, 5  ;;  %v5908_v59 = vld [vmem:[%s12206_s12 + $0x90] sm:$0xe] }
 0x2b1   : > { %v10429_v55 = vcombine.low %v5978_v14, %v5981_v30  ;;  %v10415_v9 = vrot.slane %v5903_v53, 9  ;;  %v6001_v10 = vrot.slane %v14960_v48, 5  ;;  %v6008_v8 = vrot.slane %v14684_v44, 5 }
 0x2b2   : > { %11534 = vmatmul.mubr.msk.bf16.vlgmr.msra.gmra.mxu1 %vm5390_vm11, %v10377_v42  ;;  %v10379_v47 = vcombine.low %v14781_v12, %v14789_v34  ;;  %v10380_v52 = vcombine.low %v14820_v51, %v14826_v54  ;;  %v6000_v13 = vrot.slane %v5998_v57, 4  ;;  %v5985_v42 = vsel %vm14996_vm15, %v10413_v27, %v5984_v21  ;;  %v5911_v21 = vld [vmem:[%s12206_s12 + $0xb4] sm:$0xe] }
 0x2b3   : > { %11600 = vmatpush3.bf16.msra.mxu1 %v6517_v49  ;;  %11537 = vmatprep.mubr.msk.bf16.mxu1 %vm5390_vm11, %v10378_v4  ;;  %v5988_v7 = vsel %vm14996_vm15, %v5986_v23, %v5987_v41  ;;  %v5992_v48 = vsel %vm14996_vm15, %v10414_v16, %v5991_v17  ;;  %v5995_v44 = vsel %vm14996_vm15, %v5993_v38, %v5994_v6  ;;  %v5905_v4 = vld [vmem:[%s12206_s12 + $0x6c] sm:$0xe]  ;;  %v10416_v54 = vrot.slane %v5904_v29, 9  ;;  %v5909_v41 = vld [vmem:[%s12206_s12 + $0x9c] sm:$0xe] }
 0x2b4   : > { %11823 = vmatprep.subr.msk.bf16.mxu1 %vm5439_vm8, %v15076_v1  ;;  %v10381_v12 = vcombine.low %v14868_v31, %v14876_v22  ;;  %v10382_v34 = vcombine.low %v14912_v18, %v14915_v37  ;;  %v10383_v51 = vcombine.low %v14949_v11, %v14955_v58  ;;  %v15109_v61 = vsel %vm14996_vm15, %v10415_v9, %v5998_v57  ;;  %v17529_v9 = vld [vmem:[#allocation30_spill] sm:$0xff] }
 0x2b5   : > { %v15113_v24 = vsel %vm14996_vm15, %v6000_v13, %v6001_v10  ;;  %v10384_v36 = vcombine.low %v14678_v15, %v14681_v26  ;;  %v6005_v39 = vrot.slane %v14681_v26, 5  ;;  %v10430_v62 = vcombine.low %v5985_v42, %v5988_v7  ;;  %v5906_v13 = vld [vmem:[%s12206_s12 + $0x78] sm:$0xe]  ;;  %v15270_v11 = vld [vmem:[%s12206_s12 + $0x2c] sm:$0x1] }
 0x2b6   : > { %11572 = vmatmul.mubr.msk.bf16.gmra.mxu0 %vm5390_vm11, %v10428_v33  ;;  %v10431_v43 = vcombine.low %v5992_v48, %v5995_v44  ;;  %v10417_v5 = vrot.slane %v5905_v4, 9  ;;  %v6012_v49 = vrot.slane %v14731_v50, 5  ;;  %v10419_v14 = vrot.slane %v5907_v25, 9  ;;  %v17530_v7 = vld [vmem:[#allocation32_spill] sm:$0xff]  ;;  %v17532_v44 = vld [vmem:[#allocation33_spill] sm:$0xff] }
 0x2b7   : > { %11575 = vmatprep.mubr.msk.bf16.mxu0 %vm5390_vm11, %v10429_v55  ;;  %v6026_v30 = vrot.slane %v14806_v56, 5  ;;  %v10432_v27 = vcombine.low %v15109_v61, %v15113_v24  ;;  %v15129_v17 = vsel %vm14996_vm15, %v10416_v54, %v6005_v39  ;;  %v6015_v53 = vrot.slane %v14738_v40, 5  ;;  %v17528_v55 = vld [vmem:[#allocation31_spill] sm:$0xff]  ;;  %v15238_v4 = vld [vmem:[%s12206_s12 + $0x28] sm:$0xf] }
 0x2b8   : > { %v6007_v16 = vrot.slane %v6005_v39, 4  ;;  %v6029_v38 = vrot.slane %v14815_v19, 5  ;;  %v6014_v57 = vrot.slane %v6012_v49, 4  ;;  %v10420_v10 = vrot.slane %v5908_v59, 9  ;;  %v17531_v19 = vld [vmem:[#allocation34_spill] sm:$0xff] }
 0x2b9   : > { %v15138_v6 = vsel %vm14996_vm15, %v10419_v14, %v6026_v30  ;;  %v6028_v33 = vrot.slane %v6026_v30, 4  ;;  %v6033_v29 = vrot.slane %v17528_v55, 5  ;;  %v6036_v48 = vrot.slane %v17530_v7, 5  ;;  %v17533_v30 = vld [vmem:[#allocation35_spill] sm:$0xff] }
 0x2ba   : > { %11538 = vmatmul.mubr.msk.bf16.gmra.mxu1 %vm5390_vm11, %v10379_v47  ;;  %v6019_v47 = vrot.slane %v14771_v2, 5  ;;  %v10421_v39 = vrot.slane %v5909_v41, 9  ;;  %v6009_v59 = vsel %vm14996_vm15, %v6007_v16, %v6008_v8  ;;  %v6040_v14 = vrot.slane %v17531_v19, 5  ;;  %v10522_v41 = vld [vmem:[%s12206_s12 + $0xc] sm:$0xf]  ;;  %v17536_v8 = vld [vmem:[#allocation29_spill] sm:$0xff] }
 0x2bb   : > { %11541 = vmatprep.mubr.msk.bf16.mxu1 %vm5390_vm11, %v10380_v52  ;;  %v15149_v42 = vsel %vm14996_vm15, %v6028_v33, %v6029_v38  ;;  %v15159_v25 = vsel %vm14996_vm15, %v10420_v10, %v6033_v29  ;;  %v6035_v54 = vrot.slane %v6033_v29, 4  ;;  %v6043_v33 = vrot.slane %v17533_v30, 5  ;;  %v17535_v38 = vld [vmem:[#allocation36_spill] sm:$0xff]  ;;  %v5910_v52 = vld [vmem:[%s12206_s12 + $0xa8] sm:$0xe] }
 0x2bc   : > { %v15171_v10 = vsel %vm14996_vm15, %v10417_v5, %v6012_v49  ;;  %v10418_v29 = vrot.slane %v5906_v13, 9  ;;  %v15181_v16 = vld [vmem:[%s12206_s12 + $0x10] sm:$0xf]  ;;  %v15185_v30 = vsel %vm14996_vm15, %v6014_v57, %v6015_v53  ;;  %v15191_v49 = vsel %vm14996_vm15, %v10421_v39, %v6040_v14 }
 0x2bd   : > { %v6042_v13 = vrot.slane %v6040_v14, 4  ;;  %v6022_v7 = vrot.slane %v17536_v8, 5  ;;  %v6761_v57 = vshrl.u32 %v10522_v41, 16  ;;  %v6764_v39 = vshll.u32 %v10522_v41, 16  ;;  %v15221_v8 = vld [vmem:[%s12206_s12 + $0x1c] sm:$0xf] }
 0x2be   : > { %11576 = vmatmul.mubr.msk.bf16.gmra.mxu0 %vm5390_vm11, %v10430_v62  ;;  %v17534_v62 = vld [vmem:[#allocation37_spill] sm:$0xff]  ;;  %v10434_v31 = vcombine.low %v15171_v10, %v15185_v30  ;;  %v6020_v22 = vsel %vm14996_vm15, %v10418_v29, %v6019_v47  ;;  %v10422_v14 = vrot.slane %v5910_v52, 9  ;;  %v17537_v41 = vld [vmem:[#allocation38_spill] sm:$0xff]  ;;  %v6054_v37 = vrot.slane %v14973_v45, 5  ;;  %v10527_v29 = vld [vmem:[%s12206_s12 + $0x20] sm:$0x1] }
 0x2bf   : > { %11579 = vmatprep.mubr.msk.bf16.mxu0 %vm5390_vm11, %v10431_v43  ;;  %v15175_v43 = vsel %vm14996_vm15, %v6035_v54, %v6036_v48  ;;  %v10433_v48 = vcombine.low %v15129_v17, %v6009_v59  ;;  %v6021_v54 = vrot.slane %v6019_v47, 4  ;;  %v6047_v40 = vrot.slane %v17534_v62, 5  ;;  %v10525_v59 = vld [vmem:[%s12206_s12 + $0x18] sm:$0xf]  ;;  %v10531_v26 = vld [vmem:[%s12206_s12 + $0x30] sm:$0xf] }
 0x2c0   : > { %v15203_v53 = vsel %vm14996_vm15, %v6042_v13, %v6043_v33  ;;  %v6770_v17 = vshll.u32 %v15181_v16, 16  ;;  %v15218_v33 = vld [vmem:[%s12206_s12 + $0x14] sm:$0x1]  ;;  %v6050_v18 = vrot.slane %v17537_v41, 5  ;;  %v6766_v13 = vrot.slane %v6764_v39, 5 }
 0x2c1   : > { %v6049_v47 = vrot.slane %v6047_v40, 4  ;;  %v10423_v10 = vrot.slane %v5911_v21, 9  ;;  %v6774_v52 = vshrl.u32 %v15181_v16, 16  ;;  %v6785_v30 = vshrl.u32 %v10525_v59, 16  ;;  %v10528_v39 = vld [vmem:[%s12206_s12 + $0x24] sm:$0xf] }
 0x2c2   : > { %11542 = vmatmul.mubr.msk.bf16.gmra.mxu1 %vm5390_vm11, %v10381_v12  ;;  %v6023_v41 = vsel %vm14996_vm15, %v6021_v54, %v6022_v7  ;;  %v15234_v5 = vrot.slane %v6770_v17, 5  ;;  %v6057_v61 = vrot.slane %v14982_v32, 5  ;;  %v6794_v21 = vshll.u32 %v15221_v8, 16 }
 0x2c3   : > { %11545 = vmatprep.mubr.msk.bf16.mxu1 %vm5390_vm11, %v10382_v34  ;;  %v6763_v34 = vrot.slane %v6761_v57, 4  ;;  %v6788_v57 = vshll.u32 %v10525_v59, 16  ;;  %v6776_v24 = vrot.slane %v6774_v52, 4  ;;  %v6056_v23 = vrot.slane %v6054_v37, 4 }
 0x2c4   : > { %v6787_v3 = vrot.slane %v6785_v30, 4  ;;  %v10435_v54 = vcombine.low %v6020_v22, %v6023_v41  ;;  %v15246_v17 = vsel %vm14996_vm15, %v10422_v14, %v6047_v40  ;;  %v15250_v59 = vsel %vm14996_vm15, %v6049_v47, %v6050_v18  ;;  %v10534_v41 = vld [vmem:[%s12206_s12 + $0x3c] sm:$0xf] }
 0x2c5   : > { %v6767_v12 = vor.u32 %v6766_v13, %v6763_v34  ;;  %v6790_v7 = vrot.slane %v6788_v57, 5  ;;  %v15254_v32 = vsel %vm14996_vm15, %v10423_v10, %v6054_v37  ;;  %v6777_v40 = vor.u32 %v6776_v24, %v15234_v5 }
 0x2c6   : > { %11580 = vmatmul.mubr.msk.bf16.gmra.mxu0 %vm5390_vm11, %v10432_v27  ;;  %v6798_v27 = vshrl.u32 %v15221_v8, 16  ;;  %v6804_v14 = vshll.u32 %v10527_v29, 16  ;;  %v6809_v34 = vshrl.u32 %v10528_v39, 16  ;;  %v15267_v18 = vrot.slane %v6794_v21, 5 }
 0x2c7   : > { %11583 = vmatprep.mubr.msk.bf16.mxu0 %vm5390_vm11, %v10433_v48  ;;  %v6780_v48 = vshll.u32 %v15218_v33, 16  ;;  %v15260_v22 = vrot.slane %v6767_v12, 4  ;;  %v6812_v58 = vshll.u32 %v10528_v39, 16  ;;  %v15275_v12 = vsel %vm14996_vm15, %v6056_v23, %v6057_v61  ;;  %v15292_v23 = vld [vmem:[%s12206_s12 + $0x38] sm:$0x1] }
 0x2c8   : > { %v6800_v37 = vrot.slane %v6798_v27, 4  ;;  %v6791_v47 = vor.u32 %v6790_v7, %v6787_v3  ;;  %v6822_v15 = vshrl.u32 %v15238_v4, 16  ;;  %v15287_v10 = vsel %vm5439_vm8, %v15076_v1, 0 }
 0x2c9   : > { %v15277_v13 = vrot.slane %v6780_v48, 5  ;;  %v6811_v52 = vrot.slane %v6809_v34, 4  ;;  %v6814_v29 = vrot.slane %v6812_v58, 5  ;;  %v6778_v3 = vrot.slane %v6777_v40, 4 }
 0x2ca   : > { %11546 = vmatmul.mubr.msk.bf16.gmra.mxu1 %vm5390_vm11, %v10383_v51  ;;  %v6818_v51 = vshll.u32 %v15238_v4, 16  ;;  %v15296_v57 = vrot.slane %v6804_v14, 5  ;;  %v6824_v39 = vrot.slane %v6822_v15, 4  ;;  %v6773_v1 = vsel %vm14701_vm12, %v15260_v22, %v15234_v5  ;;  %v15314_v5 = vld [vmem:[%s12206_s12 + $0x40] sm:$0xf] }
 0x2cb   : > { %11549 = vmatprep.mubr.msk.bf16.mxu1 %vm5390_vm11, %v10384_v36  ;;  %v15282_v36 = vld [vmem:[%s12206_s12 + $0x34] sm:$0xf]  ;;  %v6801_v61 = vor.u32 %v6800_v37, %v15267_v18  ;;  %v6833_v24 = vshrl.u32 %v10531_v26, 16  ;;  %v6836_v21 = vshll.u32 %v10531_v26, 16  ;;  %v15307_v27 = vrot.slane %v6791_v47, 4 }
 0x2cc   : > { %v15289_v30 = vrot.slane %v6818_v51, 5  ;;  %v6828_v48 = vshll.u32 %v15270_v11, 16  ;;  %v6842_v7 = vshll.u32 %v15282_v36, 16  ;;  %v17538_v22 = vcombine.low %v14718_v63, %v14731_v50  ;;  %v10537_v15 = vld [vmem:[%s12206_s12 + $0x48] sm:$0xf] }
 0x2cd   : > { %v6835_v14 = vrot.slane %v6833_v24, 4  ;;  %v6838_v34 = vrot.slane %v6836_v21, 5  ;;  %v6852_v51 = vshll.u32 %v15292_v23, 16  ;;  %v6857_v47 = vshrl.u32 %v10534_v41, 16 }
 0x2ce   : > { %11584 = vmatmul.mubr.msk.bf16.gmra.mxu0 %vm5390_vm11, %v10434_v31  ;;  %v15300_v31 = vsel %vm5439_vm8, %v15050_v0, 0  ;;  %v6846_v0 = vshrl.u32 %v15282_v36, 16  ;;  %v6825_v40 = vor.u32 %v6824_v39, %v15289_v30  ;;  %v15320_v37 = vrot.slane %v6842_v7, 5 }
 0x2cf   : > { %11587 = vmatprep.mubr.msk.bf16.mxu0 %vm5390_vm11, %v10435_v54  ;;  %v6815_v54 = vor.u32 %v6814_v29, %v6811_v52  ;;  %v17539_v26 = vcombine.low %v14762_v35, %v14771_v2  ;;  %v6783_v52 = vsel %vm14701_vm12, %v6778_v3, %v15277_v13  ;;  %v6802_v63 = vrot.slane %v6801_v61, 4  ;;  %v15332_v29 = vld [vmem:[%s12206_s12 + $0x44] sm:$0x1] }
 0x2d0   : > { %v6848_v58 = vrot.slane %v6846_v0, 4  ;;  %v6839_v50 = vor.u32 %v6838_v34, %v6835_v14  ;;  %v6860_v39 = vshll.u32 %v10534_v41, 16  ;;  %v6830_v24 = vrot.slane %v6828_v48, 5 }
 0x2d1   : > { %v6859_v7 = vrot.slane %v6857_v47, 4  ;;  %v6866_v0 = vshll.u32 %v15314_v5, 16  ;;  %v17540_v35 = vcombine.low %v15138_v6, %v15149_v42  ;;  %v6816_v2 = vrot.slane %v6815_v54, 4  ;;  %v10540_v47 = vld [vmem:[%s12206_s12 + $0x54] sm:$0xf] }
 0x2d2   : > { %11550 = vmatmul.mubr.msk.bf16.gmra.mxu1 %vm5390_vm11, %v17538_v22  ;;  %v6849_v21 = vor.u32 %v6848_v58, %v15320_v37  ;;  %v15337_v22 = vld [vmem:[%s12206_s12 + $0x4c] sm:$0xf]  ;;  %v6826_v13 = vrot.slane %v6825_v40, 4  ;;  %v6862_v3 = vrot.slane %v6860_v39, 5  ;;  %v6870_v41 = vshrl.u32 %v15314_v5, 16 }
 0x2d3   : > { %11553 = vmatprep.mubr.msk.bf16.mxu1 %vm5390_vm11, %v17539_v26  ;;  %v17541_v61 = vcombine.low %v15159_v25, %v15175_v43  ;;  %v6840_v48 = vrot.slane %v6839_v50, 4  ;;  %v6854_v14 = vrot.slane %v6852_v51, 5  ;;  %v15348_v34 = vrot.slane %v6866_v0, 5  ;;  %v15357_v50 = vld [vmem:[%s12206_s12 + $0x50] sm:$0x1] }
 0x2d4   : > { %v6881_v58 = vshrl.u32 %v10537_v15, 16  ;;  %v10439_v6 = vcombine.low %v15246_v17, %v15250_v59  ;;  %v10440_v42 = vcombine.low %v15254_v32, %v15275_v12  ;;  %v6872_v54 = vrot.slane %v6870_v41, 4  ;;  %v11968_v12 = vld [vmem:[%s12206_s12 + $0xc] sm:$0xff]  }
 0x2d5   : > { %v6884_v40 = vshll.u32 %v10537_v15, 16  ;;  %v6850_v26 = vrot.slane %v6849_v21, 4  ;;  %v6863_v25 = vor.u32 %v6862_v3, %v6859_v7  ;;  %v6876_v43 = vshll.u32 %v15332_v29, 16  ;;  %v15376_v21 = vld [vmem:[%s12206_s12 + $0x58] sm:$0xf] }
 0x2d6   : > { %11588 = vmatmul.mubr.msk.bf16.gmra.mxu0 %vm5390_vm11, %v17540_v35  ;;  %v6883_v51 = vrot.slane %v6881_v58, 4  ;;  %v15359_v39 = vcombine.low %v6773_v1, %v6783_v52  ;;  %v6873_v0 = vor.u32 %v6872_v54, %v15348_v34  ;;  %v6890_v17 = vshll.u32 %v15337_v22, 16  ;;  %v10543_v3 = vld [vmem:[%s12206_s12 + $0x60] sm:$0xf]  ;;  %v15392_v54 = vld [vmem:[%s12206_s12 + $0x5c] sm:$0x1] }
 0x2d7   : > { %11591 = vmatprep.mubr.msk.bf16.mxu0 %vm5390_vm11, %v17541_v61  ;;  %v6886_v35 = vrot.slane %v6884_v40, 5  ;;  %v17542_v59 = vcombine.low %v14798_v46, %v14806_v56  ;;  %v6797_v15 = vsel %vm14701_vm12, %v15307_v27, %v15267_v18  ;;  %v6807_v1 = vsel %vm14701_vm12, %v6802_v63, %v15296_v57 }
 0x2d8   : > { %v6894_v52 = vshrl.u32 %v15337_v22, 16  ;;  %v6905_v7 = vshrl.u32 %v10540_v47, 16  ;;  %v17543_v46 = vcombine.low %v17529_v9, %v17528_v55  ;;  %v6821_v56 = vsel %vm14701_vm12, %v6816_v2, %v15289_v30  ;;  %v15395_v55 = vld [vmem:[%s12206_s12 + $0x64] sm:$0xf] }
 0x2d9   : > { %v6831_v18 = vsel %vm14701_vm12, %v6826_v13, %v6830_v24  ;;  %v6887_v27 = vor.u32 %v6886_v35, %v6883_v51  ;;  %v6908_v57 = vshll.u32 %v10540_v47, 16  ;;  %v6845_v63 = vsel %vm14701_vm12, %v6840_v48, %v15320_v37 }
 0x2da   : > { %11554 = vmatmul.mubr.msk.bf16.gmra.mxu1 %vm5390_vm11, %v17542_v59  ;;  %v6864_v41 = vrot.slane %v6863_v25, 4  ;;  %v6874_v61 = vrot.slane %v6873_v0, 4  ;;  %v6878_v58 = vrot.slane %v6876_v43, 5  ;;  %v17544_v9 = vcombine.low %v15191_v49, %v15203_v53 }
 0x2db   : > { %11557 = vmatprep.mubr.msk.bf16.mxu1 %vm5390_vm11, %v17543_v46  ;;  %v6855_v30 = vsel %vm14701_vm12, %v6850_v26, %v6854_v14  ;;  %v15403_v24 = vrot.slane %v6890_v17, 5  ;;  %v6896_v2 = vrot.slane %v6894_v52, 4  ;;  %v6900_v37 = vshll.u32 %v15357_v50, 16 }
 0x2dc   : > { %v6907_v13 = vrot.slane %v6905_v7, 4  ;;  %v6910_v48 = vrot.slane %v6908_v57, 5  ;;  %v6914_v47 = vshll.u32 %v15376_v21, 16  ;;  %v6918_v49 = vshrl.u32 %v15376_v21, 16 }
 0x2dd   : > { %v15409_v53 = vcombine.low %v6797_v15, %v6807_v1  ;;  %v15411_v40 = vcombine.low %v6821_v56, %v6831_v18  ;;  %v15413_v14 = vrot.slane %v6887_v27, 4  ;;  %v6929_v26 = vshrl.u32 %v10543_v3, 16  ;;  %v10546_v15 = vld [vmem:[%s12206_s12 + $0x6c] sm:$0xf]  ;;  %v15428_v1 = vld [vmem:[%s12206_s12 + $0x70] sm:$0xf] }
 0x2de   : > { %11592 = vmatmul.mubr.msk.bf16.gmra.mxu0 %vm5390_vm11, %v17544_v9  ;;  %v6879_v25 = vsel %vm14701_vm12, %v6874_v61, %v6878_v58  ;;  %v6932_v43 = vshll.u32 %v10543_v3, 16  ;;  %v6938_v51 = vshll.u32 %v15395_v55, 16  ;;  %v15421_v0 = vcombine.low %v6845_v63, %v6855_v30  ;;  %v15439_v56 = vld [vmem:[%s12206_s12 + $0x68] sm:$0x1]  ;;  %v15452_v63 = vld [vmem:[%s12206_s12 + $0x74] sm:$0x1] }
 0x2df   : > { %11595 = vmatprep.mubr.msk.bf16.mxu0 %vm5390_vm11, %v10439_v6  ;;  %v6869_v6 = vsel %vm14701_vm12, %v6864_v41, %v15348_v34  ;;  %v6897_v35 = vor.u32 %v6896_v2, %v15403_v24  ;;  %v6924_v17 = vshll.u32 %v15392_v54, 16  ;;  %v6942_v59 = vshrl.u32 %v15395_v55, 16  ;;  %v10549_v41 = vld [vmem:[%s12206_s12 + $0x78] sm:$0xf] }
 0x2e0   : > { %v17545_v34 = vcombine.low %v17532_v44, %v17531_v19  ;;  %v15434_v52 = vrot.slane %v6900_v37, 5  ;;  %v6911_v7 = vor.u32 %v6910_v48, %v6907_v13  ;;  %v15436_v3 = vrot.slane %v6914_v47, 5 }
 0x2e1   : > { %v6920_v46 = vrot.slane %v6918_v49, 4  ;;  %v17546_v18 = vcombine.low %v17535_v38, %v17534_v62  ;;  %v15445_v27 = vcombine.low %v6869_v6, %v6879_v25  ;;  %v6893_v19 = vsel %vm14701_vm12, %v15413_v14, %v15403_v24  ;;  %v15458_v38 = vld [vmem:[%s12206_s12 + $0x7c] sm:$0xf] }
 0x2e2   : > { %11558 = vmatmul.mubr.msk.bf16.gmra.mxu1 %vm5390_vm11, %v17545_v34  ;;  %v6931_v44 = vrot.slane %v6929_v26, 4  ;;  %v6934_v57 = vrot.slane %v6932_v43, 5  ;;  %v15455_v61 = vrot.slane %v6938_v51, 5  ;;  %v6944_v58 = vrot.slane %v6942_v59, 4 }
 0x2e3   : > { %11561 = vmatprep.mubr.msk.bf16.mxu1 %vm5390_vm11, %v17546_v18  ;;  %v6953_v9 = vshrl.u32 %v10546_v15, 16  ;;  %v6956_v62 = vshll.u32 %v10546_v15, 16  ;;  %v15464_v30 = vrot.slane %v6897_v35, 4  ;;  %v15466_v2 = vrot.slane %v6924_v17, 5  ;;  %v15527_v18 = vld [vmem:[%s12206_s12 + $0x94] sm:$0xf] }
 0x2e4   : > { %v6962_v37 = vshll.u32 %v15428_v1, 16  ;;  %v6966_v13 = vshrl.u32 %v15428_v1, 16  ;;  %v15472_v48 = vrot.slane %v6911_v7, 4  ;;  %v6921_v47 = vor.u32 %v6920_v46, %v15436_v3  ;;  %v10552_v7 = vld [vmem:[%s12206_s12 + $0x84] sm:$0xf]  ;;  %17549 = vst [vmem:[#allocation30_spill] sm:$0xff] %v15527_v18 }
 0x2e5   : > { %v6955_v49 = vrot.slane %v6953_v9, 4  ;;  %v6958_v32 = vrot.slane %v6956_v62, 5  ;;  %v6948_v26 = vshll.u32 %v15439_v56, 16  ;;  %v6945_v43 = vor.u32 %v6944_v58, %v15455_v61  ;;  %v15499_v58 = vld [vmem:[%s12206_s12 + $0x88] sm:$0xf] }
 0x2e6   : > { %11596 = vmatmul.mubr.msk.bf16.gmra.mxu0 %vm5390_vm11, %v10440_v42  ;;  %v6935_v42 = vor.u32 %v6934_v57, %v6931_v44  ;;  %v15477_v6 = vrot.slane %v6962_v37, 5  ;;  %v6968_v25 = vrot.slane %v6966_v13, 4  ;;  %v6972_v51 = vshll.u32 %v15452_v63, 16 }
 0x2e7   : > { %11635 = vmatprep.mubr.msk.bf16.mxu0 %vm5390_vm11, %v15359_v39  ;;  %v6977_v39 = vshrl.u32 %v10549_v41, 16  ;;  %v6980_v35 = vshll.u32 %v10549_v41, 16  ;;  %v6903_v17 = vsel %vm14701_vm12, %v15464_v30, %v15434_v52  ;;  %v6959_v59 = vor.u32 %v6958_v32, %v6955_v49 }
 0x2e8   : > { %v6969_v15 = vor.u32 %v6968_v25, %v15477_v6  ;;  %v6986_v34 = vshll.u32 %v15458_v38, 16  ;;  %v17547_v46 = vcombine.low %v14970_v28, %v14973_v45  ;;  %v15496_v44 = vrot.slane %v6921_v47, 4  ;;  %v15507_v45 = vld [vmem:[%s12206_s12 + $0x80] sm:$0x1] }
 0x2e9   : > { %v6979_v57 = vrot.slane %v6977_v39, 4  ;;  %v6982_v41 = vrot.slane %v6980_v35, 5  ;;  %v15502_v9 = vrot.slane %v6935_v42, 4  ;;  %v15504_v28 = vrot.slane %v6948_v26, 5 }
 0x2ea   : > { %11562 = vmatmul.mubr.msk.bf16.gmra.mxu1 %vm5390_vm11, %v17547_v46  ;;  %v15509_v62 = vrot.slane %v6986_v34, 5  ;;  %v6990_v37 = vshrl.u32 %v15458_v38, 16  ;;  %v6946_v13 = vrot.slane %v6945_v43, 4  ;;  %v6974_v47 = vrot.slane %v6972_v51, 5  ;;  %v10555_v43 = vld [vmem:[%s12206_s12 + $0x90] sm:$0xf] }
 0x2eb   : > { %11601 = vmatprep.mubr.msk.bf16.mxu1 %vm5390_vm11, %v11968_v12  ;;  %v7001_v49 = vshrl.u32 %v10552_v7, 16  ;;  %v7004_v32 = vshll.u32 %v10552_v7, 16  ;;  %v15515_v12 = vld [vmem:[%s17290_s1 + $0x10] sm:$0x3]  ;;  %v6960_v42 = vrot.slane %v6959_v59, 4  ;;  %v6970_v26 = vrot.slane %v6969_v15, 4 }
 0x2ec   : > { %17548 = vst [vmem:[#allocation31_spill] sm:$0xff] %v15515_v12  ;;  %v6992_v25 = vrot.slane %v6990_v37, 4  ;;  %v7010_v39 = vshll.u32 %v15499_v58, 16  ;;  %v11969_v51 = vld [vmem:[%s12206_s12 + $0x18] sm:$0xff]   ;;  %v6983_v35 = vor.u32 %v6982_v41, %v6979_v57  ;;  %v6996_v34 = vshll.u32 %v15507_v45, 16 }
 0x2ed   : > { %v7003_v7 = vrot.slane %v7001_v49, 4  ;;  %v7006_v46 = vrot.slane %v7004_v32, 5  ;;  %v6927_v59 = vsel %vm14701_vm12, %v15496_v44, %v15466_v2  ;;  %v7014_v15 = vshrl.u32 %v15499_v58, 16  ;;  %v15543_v57 = vld [vmem:[%s12206_s12 + $0x8c] sm:$0x1] }
 0x2ee   : > { %11636 = vmatmul.mubr.msk.bf16.vlgmr.msra.gmra.mxu0 %vm5390_vm11, %v15409_v53  ;;  %v11970_v53 = vld [vmem:[%s12206_s12 + $0x24] sm:$0xff]   ;;  %17550 = vst [vmem:[#allocation32_spill] sm:$0xff] %v15543_v57  ;;  %v15545_v37 = vrot.slane %v7010_v39, 5  ;;  %v7025_v49 = vshrl.u32 %v10555_v43, 16  ;;  %v7028_v2 = vshll.u32 %v10555_v43, 16  ;;  %v6951_v44 = vsel %vm14701_vm12, %v6946_v13, %v15504_v28 }
 0x2ef   : > { %11702 = vmatpush3.bf16.msra.mxu0 %v15300_v31  ;;  %11639 = vmatprep.mubr.msk.bf16.mxu0 %vm5390_vm11, %v15411_v40  ;;  %v6941_v31 = vsel %vm14701_vm12, %v15502_v9, %v15455_v61  ;;  %v6993_v40 = vor.u32 %v6992_v25, %v15509_v62  ;;  %v7007_v41 = vor.u32 %v7006_v46, %v7003_v7  ;;  %v7016_v9 = vrot.slane %v7014_v15, 4  ;;  %v15557_v25 = vld [vmem:[%s17290_s1 + $0xe] sm:$0x3]  ;;  %v15574_v15 = vld [vmem:[%s12206_s12 + $0xa0] sm:$0xf] }
 0x2f0   : > { %11826 = vmatprep.subr.msk.bf16.mxu0 %vm5439_vm8, %v15515_v12  ;;  %v6965_v61 = vsel %vm14701_vm12, %v6960_v42, %v15477_v6  ;;  %v7034_v32 = vshll.u32 %v15527_v18, 16  ;;  %17551 = vst [vmem:[#allocation34_spill] sm:$0xff] %v15557_v25  ;;  %v6975_v39 = vsel %vm14701_vm12, %v6970_v26, %v6974_v47  ;;  %v15562_v28 = vrot.slane %v6983_v35, 4  ;;  %v10558_v42 = vld [vmem:[%s12206_s12 + $0x9c] sm:$0xf]  ;;  %17552 = vst [vmem:[#allocation33_spill] sm:$0xff] %v15574_v15 }
 0x2f1   : > { %v15564_v13 = vrot.slane %v6996_v34, 5  ;;  %v7038_v6 = vshrl.u32 %v15527_v18, 16  ;;  %v15570_v43 = vrot.slane %v6993_v40, 4  ;;  %v7020_v7 = vshll.u32 %v15543_v57, 16  ;;  %v15580_v35 = vld [vmem:[%s12206_s12 + $0x98] sm:$0x1] }
 0x2f2   : > { %11602 = vmatmul.mubr.msk.bf16.vlgmr.msra.gmra.mxu1 %vm5390_vm11, %v11969_v51  ;;  %v7027_v51 = vrot.slane %v7025_v49, 4  ;;  %v7030_v46 = vrot.slane %v7028_v2, 5  ;;  %v15576_v47 = vrot.slane %v7007_v41, 4  ;;  %v7017_v26 = vor.u32 %v7016_v9, %v15545_v37  ;;  %17553 = vst [vmem:[#allocation35_spill] sm:$0xff] %v15580_v35  ;;  %v11971_v2 = vld [vmem:[%s12206_s12 + $0x30] sm:$0xff]  }
 0x2f3   : > { %11668 = vmatpush3.bf16.msra.mxu1 %v15287_v10  ;;  %11605 = vmatprep.mubr.msk.bf16.mxu1 %vm5390_vm11, %v11970_v53  ;;  %v15582_v10 = vrot.slane %v7034_v32, 5  ;;  %v7040_v34 = vrot.slane %v7038_v6, 4  ;;  %v10576_v53 = vcombine.low %v6893_v19, %v6903_v17  ;;  %v17554_v40 = vsel %vm14701_vm12, %v15472_v48, %v15436_v3  ;;  %v10561_v19 = vld [vmem:[%s12206_s12 + $0xa8] sm:$0xf]  ;;  %v11972_v3 = vld [vmem:[%s12206_s12 + $0x3c] sm:$0xff]  }
 0x2f4   : > { %11825 = vmatprep.subr.msk.bf16.mxu1 %vm5439_vm8, %v15557_v25  ;;  %v10577_v41 = vcombine.low %v17554_v40, %v6927_v59  ;;  %v7049_v49 = vshrl.u32 %v10558_v42, 16  ;;  %v15606_v52 = vcombine.low %v6941_v31, %v6951_v44  ;;  %v15608_v30 = vcombine.low %v6965_v61, %v6975_v39  ;;  %v15622_v31 = vld [vmem:[%s12206_s12 + $0xac] sm:$0xf]  ;;  %v15636_v39 = vld [vmem:[%s12206_s12 + $0xa4] sm:$0x1] }
 0x2f5   : > { %v7058_v24 = vshll.u32 %v15574_v15, 16  ;;  %v7062_v14 = vshrl.u32 %v15574_v15, 16  ;;  %v15618_v17 = vrot.slane %v7020_v7, 5  ;;  %v7044_v59 = vshll.u32 %v15580_v35, 16  ;;  %17555 = vst [vmem:[#allocation37_spill] sm:$0xff] %v15622_v31  ;;  %17556 = vst [vmem:[#allocation36_spill] sm:$0xff] %v15636_v39 }
 0x2f6   : > { %11640 = vmatmul.mubr.msk.bf16.gmra.mxu0 %vm5390_vm11, %v15421_v0  ;;  %v7052_v0 = vshll.u32 %v10558_v42, 16  ;;  %v15632_v9 = vrot.slane %v7017_v26, 4  ;;  %v7041_v32 = vor.u32 %v7040_v34, %v15582_v10  ;;  %v7051_v6 = vrot.slane %v7049_v49, 4  ;;  %v10564_v34 = vld [vmem:[%s12206_s12 + $0xb4] sm:$0xf] }
 0x2f7   : > { %11643 = vmatprep.mubr.msk.bf16.mxu0 %vm5390_vm11, %v15445_v27  ;;  %v7031_v27 = vor.u32 %v7030_v46, %v7027_v51  ;;  %v15638_v7 = vrot.slane %v7058_v24, 5  ;;  %v15641_v51 = vld [vmem:[%s12206_s12 + $0xb0] sm:$0x1]  ;;  %v7073_v46 = vshrl.u32 %v10561_v19, 16  ;;  %v7064_v40 = vrot.slane %v7062_v14, 4  ;;  %v11974_v15 = vld [vmem:[%s12206_s12 + $0x54] sm:$0xff]  }
 0x2f8   : > { %v7054_v42 = vrot.slane %v7052_v0, 5  ;;  %17557 = vst [vmem:[#allocation29_spill] sm:$0xff] %v15641_v51  ;;  %v7076_v48 = vshll.u32 %v10561_v19, 16  ;;  %v7082_v26 = vshll.u32 %v15622_v31, 16  ;;  %v7086_v61 = vshrl.u32 %v15622_v31, 16  ;;  %v11973_v31 = vld [vmem:[%s12206_s12 + $0x48] sm:$0xff]  }
 0x2f9   : > { %v15648_v49 = vrot.slane %v7031_v27, 4  ;;  %v15650_v0 = vrot.slane %v7044_v59, 5  ;;  %v7068_v24 = vshll.u32 %v15636_v39, 16  ;;  %v7075_v44 = vrot.slane %v7073_v46, 4  ;;  %v15654_v25 = vld [vmem:[%s12206_s12 + $0xb8] sm:$0xf] }
 0x2fa   : > { %11606 = vmatmul.mubr.msk.bf16.gmra.mxu1 %vm5390_vm11, %v11971_v2  ;;  %17558 = vst [vmem:[#allocation38_spill] sm:$0xff] %v15654_v25  ;;  %v15656_v2 = vrot.slane %v7041_v32, 4  ;;  %v7078_v14 = vrot.slane %v7076_v48, 5  ;;  %v15658_v19 = vrot.slane %v7082_v26, 5  ;;  %v7088_v12 = vrot.slane %v7086_v61, 4 }
 0x2fb   : > { %11609 = vmatprep.mubr.msk.bf16.mxu1 %vm5390_vm11, %v11972_v3  ;;  %v7023_v3 = vsel %vm14701_vm12, %v15632_v9, %v15618_v17  ;;  %v7055_v27 = vor.u32 %v7054_v42, %v7051_v6  ;;  %v7097_v59 = vshrl.u32 %v10564_v34, 16  ;;  %v7100_v46 = vshll.u32 %v10564_v34, 16  ;;  %v15670_v61 = vld [vmem:[%s12206_s12 + $0xbc] sm:$0x1]  ;;  %v10567_v39 = vld [vmem:[%s12206_s12 + $0xc0] sm:$0xf] }
 0x2fc   : > { %v7065_v48 = vor.u32 %v7064_v40, %v15638_v7  ;;  %v7079_v32 = vor.u32 %v7078_v14, %v7075_v44  ;;  %v7092_v26 = vshll.u32 %v15641_v51, 16  ;;  %v7089_v35 = vor.u32 %v7088_v12, %v15658_v19  ;;  %v15678_v42 = vld [vmem:[%s12206_s12 + $0xc4] sm:$0xf]  ;;  %v15691_v18 = vld [vmem:[%s12206_s12 + $0xc8] sm:$0x1] }
 0x2fd   : > { %v7099_v17 = vrot.slane %v7097_v59, 4  ;;  %v7102_v9 = vrot.slane %v7100_v46, 5  ;;  %v7110_v6 = vshrl.u32 %v15654_v25, 16  ;;  %v7047_v44 = vsel %vm14701_vm12, %v15656_v2, %v15650_v0 }
 0x2fe   : > { %11644 = vmatmul.mubr.msk.bf16.gmra.mxu0 %vm5390_vm11, %v10576_v53  ;;  %v7106_v53 = vshll.u32 %v15654_v25, 16  ;;  %v7070_v40 = vrot.slane %v7068_v24, 5  ;;  %v7116_v59 = vshll.u32 %v15670_v61, 16  ;;  %v7121_v46 = vshrl.u32 %v10567_v39, 16 }
 0x2ff   : > { %11647 = vmatprep.mubr.msk.bf16.mxu0 %vm5390_vm11, %v10577_v41  ;;  %v7037_v41 = vsel %vm14701_vm12, %v15648_v49, %v15582_v10  ;;  %v7103_v12 = vor.u32 %v7102_v9, %v7099_v17  ;;  %v7112_v14 = vrot.slane %v7110_v6, 4  ;;  %v7056_v25 = vrot.slane %v7055_v27, 4 }
 0x300   : > { %v7108_v34 = vrot.slane %v7106_v53, 5  ;;  %v7066_v51 = vrot.slane %v7065_v48, 4  ;;  %v7124_v57 = vshll.u32 %v10567_v39, 16  ;;  %v7130_v10 = vshll.u32 %v15678_v42, 16 }
 0x301   : > { %v7080_v49 = vrot.slane %v7079_v32, 4  ;;  %v7090_v0 = vrot.slane %v7089_v35, 4  ;;  %v7094_v24 = vrot.slane %v7092_v26, 5  ;;  %v7123_v53 = vrot.slane %v7121_v46, 4  ;;  %v11976_v26 = vld [vmem:[%s12206_s12 + $0x6c] sm:$0xff]  }
 0x302   : > { %11610 = vmatmul.mubr.msk.bf16.gmra.mxu1 %vm5390_vm11, %v11973_v31  ;;  %v7113_v2 = vor.u32 %v7112_v14, %v7108_v34  ;;  %v7126_v17 = vrot.slane %v7124_v57, 5  ;;  %v7132_v9 = vrot.slane %v7130_v10, 5  ;;  %v7134_v31 = vshrl.u32 %v15678_v42, 16  ;;  %v10605_v46 = vld [vmem:[%s12206_s12 + $0x24] sm:$0xe] }
 0x303   : > { %11613 = vmatprep.mubr.msk.bf16.mxu1 %vm5390_vm11, %v11974_v15  ;;  %v7104_v39 = vrot.slane %v7103_v12, 4  ;;  %v7118_v48 = vrot.slane %v7116_v59, 5  ;;  %v7140_v6 = vshll.u32 %v15691_v18, 16  ;;  %v11975_v15 = vld [vmem:[%s12206_s12 + $0x60] sm:$0xff]   ;;  %v7061_v57 = vsel %vm14701_vm12, %v7056_v25, %v15638_v7 }
 0x304   : > { %v7114_v27 = vrot.slane %v7113_v2, 4  ;;  %v7071_v35 = vsel %vm14701_vm12, %v7066_v51, %v7070_v40  ;;  %v7127_v32 = vor.u32 %v7126_v17, %v7123_v53  ;;  %v17559_v12 = vsel %vm14701_vm12, %v15570_v43, %v15564_v13  ;;  %v15729_v13 = vld [vmem:[%s12206_s12 + $0xc] sm:$0xe]  ;;  %v10607_v17 = vld [vmem:[%s12206_s12 + $0x3c] sm:$0xe] }
 0x305   : > { %v17561_v25 = vsel %vm14701_vm12, %v15576_v47, %v15545_v37  ;;  %v7085_v51 = vsel %vm14701_vm12, %v7080_v49, %v15658_v19  ;;  %v7095_v40 = vsel %vm14701_vm12, %v7090_v0, %v7094_v24  ;;  %v15733_v10 = vcombine.low %v7037_v41, %v7047_v44  ;;  %v10606_v44 = vld [vmem:[%s12206_s12 + $0x30] sm:$0xe] }
 0x306   : > { %11648 = vmatmul.mubr.msk.bf16.gmra.mxu0 %vm5390_vm11, %v15606_v52  ;;  %v7136_v52 = vrot.slane %v7134_v31, 4  ;;  %v10581_v7 = vcombine.low %v17561_v25, %v7023_v3  ;;  %v7128_v43 = vrot.slane %v7127_v32, 4  ;;  %v15735_v37 = vcombine.low %v7061_v57, %v7071_v35  ;;  %v11977_v35 = vld [vmem:[%s12206_s12 + $0x78] sm:$0xff]  }
 0x307   : > { %11651 = vmatprep.mubr.msk.bf16.mxu0 %vm5390_vm11, %v15608_v30  ;;  %v17560_v30 = vsel %vm14701_vm12, %v15562_v28, %v15509_v62  ;;  %v7142_v62 = vrot.slane %v7140_v6, 5  ;;  %v7504_v28 = vrot.slane %v15181_v16, 5  ;;  %v7109_v47 = vsel %vm14701_vm12, %v7104_v39, %v7108_v34 }
 0x308   : > { %v10580_v14 = vcombine.low %v17560_v30, %v17559_v12  ;;  %v7137_v59 = vor.u32 %v7136_v52, %v7132_v9  ;;  %v7119_v19 = vsel %vm14701_vm12, %v7114_v27, %v7118_v48  ;;  %v15742_v3 = vcombine.low %v7085_v51, %v7095_v40  ;;  %v10608_v48 = vld [vmem:[%s12206_s12 + $0x48] sm:$0xe]  ;;  %v10609_v40 = vld [vmem:[%s12206_s12 + $0x54] sm:$0xe] }
 0x309   : > { %v7133_v49 = vsel %vm14701_vm12, %v7128_v43, %v7132_v9  ;;  %v10619_v41 = vrot.slane %v15729_v13, 9  ;;  %v7507_v34 = vrot.slane %v15218_v33, 5  ;;  %v7511_v24 = vrot.slane %v15221_v8, 5  ;;  %v11978_v12 = vld [vmem:[%s12206_s12 + $0x84] sm:$0xff]   ;;  %v10610_v43 = vld [vmem:[%s12206_s12 + $0x60] sm:$0xe] }
 0x30a   : > { %11614 = vmatmul.mubr.msk.bf16.gmra.mxu1 %vm5390_vm11, %v11975_v15  ;;  %v7138_v0 = vrot.slane %v7137_v59, 4  ;;  %v10621_v2 = vrot.slane %v10605_v46, 9  ;;  %v7518_v53 = vrot.slane %v15238_v4, 5  ;;  %v15753_v31 = vcombine.low %v7109_v47, %v7119_v19 }
 0x30b   : > { %11617 = vmatprep.mubr.msk.bf16.mxu1 %vm5390_vm11, %v11976_v26  ;;  %v15759_v39 = vrot.slane %v7504_v28, 4  ;;  %v7521_v27 = vrot.slane %v15270_v11, 5  ;;  %v10622_v57 = vrot.slane %v10606_v44, 9  ;;  %v7525_v32 = vrot.slane %v15282_v36, 5 }
 0x30c   : > { %v7143_v9 = vsel %vm14701_vm12, %v7138_v0, %v7142_v62  ;;  %v15768_v4 = vsel %vm14996_vm15, %v10621_v2, %v7518_v53  ;;  %v7520_v15 = vrot.slane %v7518_v53, 4  ;;  %v7528_v11 = vrot.slane %v15292_v23, 5  ;;  %v10611_v0 = vld [vmem:[%s12206_s12 + $0x6c] sm:$0xe] }
 0x30d   : > { %v15764_v6 = vcombine.low %v7133_v49, %v7143_v9  ;;  %v10623_v52 = vrot.slane %v10607_v17, 9  ;;  %v7532_v26 = vrot.slane %v15314_v5, 5  ;;  %v10624_v25 = vrot.slane %v10608_v48, 9  ;;  %v10612_v17 = vld [vmem:[%s12206_s12 + $0x78] sm:$0xe] }
 0x30e   : > { %11652 = vmatmul.mubr.msk.bf16.gmra.mxu0 %vm5390_vm11, %v10580_v14  ;;  %v15778_v30 = vsel %vm14996_vm15, %v7520_v15, %v7521_v27  ;;  %v7535_v14 = vrot.slane %v15332_v29, 5  ;;  %v7539_v51 = vrot.slane %v15337_v22, 5  ;;  %v15787_v23 = vsel %vm14996_vm15, %v10622_v57, %v7525_v32 }
 0x30f   : > { %11655 = vmatprep.mubr.msk.bf16.mxu0 %vm5390_vm11, %v10581_v7  ;;  %v10638_v36 = vcombine.low %v15768_v4, %v15778_v30  ;;  %v7527_v5 = vrot.slane %v7525_v32, 4  ;;  %v15791_v7 = vsel %vm14996_vm15, %v10623_v52, %v7532_v26  ;;  %v7534_v29 = vrot.slane %v7532_v26, 4  ;;  %v11979_v32 = vld [vmem:[%s12206_s12 + $0x90] sm:$0xff]  }
 0x310   : > { %v15796_v22 = vsel %vm14996_vm15, %v10624_v25, %v7539_v51  ;;  %v7541_v59 = vrot.slane %v7539_v51, 4  ;;  %v7542_v62 = vrot.slane %v15357_v50, 5  ;;  %v10625_v47 = vrot.slane %v10609_v40, 9 }
 0x311   : > { %v15802_v46 = vsel %vm14996_vm15, %v7527_v5, %v7528_v11  ;;  %v7546_v19 = vrot.slane %v15376_v21, 5  ;;  %v7549_v49 = vrot.slane %v15392_v54, 5  ;;  %v15812_v50 = vsel %vm14996_vm15, %v7534_v29, %v7535_v14 }
 0x312   : > { %11618 = vmatmul.mubr.msk.bf16.gmra.mxu1 %vm5390_vm11, %v11977_v35  ;;  %v10639_v44 = vcombine.low %v15787_v23, %v15802_v46  ;;  %v15816_v2 = vsel %vm14996_vm15, %v7541_v59, %v7542_v62  ;;  %v10626_v53 = vrot.slane %v10610_v43, 9  ;;  %v10640_v21 = vcombine.low %v15791_v7, %v15812_v50  ;;  %v17562_v59 = vld [vmem:[#allocation32_spill] sm:$0xff]  ;;  %v10815_v46 = vld [vmem:[%s12206_s12 + $0x24] sm:$0xe] }
 0x313   : > { %11621 = vmatprep.mubr.msk.bf16.mxu1 %vm5390_vm11, %v11978_v12  ;;  %v10641_v54 = vcombine.low %v15796_v22, %v15816_v2  ;;  %v15825_v9 = vsel %vm14996_vm15, %v10625_v47, %v7546_v19  ;;  %v7548_v27 = vrot.slane %v7546_v19, 4  ;;  %v7553_v48 = vrot.slane %v15395_v55, 5  ;;  %v10613_v55 = vld [vmem:[%s12206_s12 + $0x84] sm:$0xe]  ;;  %v11980_v12 = vld [vmem:[%s12206_s12 + $0x9c] sm:$0xff]  }
 0x314   : > { %v7556_v15 = vrot.slane %v15439_v56, 5  ;;  %v10627_v57 = vrot.slane %v10611_v0, 9  ;;  %v7560_v35 = vrot.slane %v15428_v1, 5  ;;  %v7563_v52 = vrot.slane %v15452_v63, 5  ;;  %v10614_v63 = vld [vmem:[%s12206_s12 + $0x90] sm:$0xe] }
 0x315   : > { %v15837_v11 = vsel %vm14996_vm15, %v7548_v27, %v7549_v49  ;;  %v10628_v26 = vrot.slane %v10612_v17, 9  ;;  %v15847_v1 = vsel %vm14996_vm15, %v10626_v53, %v7553_v48  ;;  %v7570_v40 = vrot.slane %v15507_v45, 5  ;;  %v10615_v47 = vld [vmem:[%s12206_s12 + $0x9c] sm:$0xe]  ;;  %v10616_v53 = vld [vmem:[%s12206_s12 + $0xa8] sm:$0xe] }
 0x316   : > { %11656 = vmatmul.mubr.msk.bf16.gmra.mxu0 %vm5390_vm11, %v15733_v10  ;;  %v7567_v10 = vrot.slane %v15458_v38, 5  ;;  %v10642_v56 = vcombine.low %v15825_v9, %v15837_v11  ;;  %v15851_v14 = vsel %vm14996_vm15, %v10627_v57, %v7560_v35  ;;  %v7562_v25 = vrot.slane %v7560_v35, 4  ;;  %v17564_v35 = vld [vmem:[#allocation35_spill] sm:$0xff] }
 0x317   : > { %11659 = vmatprep.mubr.msk.bf16.mxu0 %vm5390_vm11, %v15735_v37  ;;  %v7555_v37 = vrot.slane %v7553_v48, 4  ;;  %v10629_v43 = vrot.slane %v10613_v55, 9  ;;  %v7574_v29 = vrot.slane %v15499_v58, 5  ;;  %v7577_v62 = vrot.slane %v17562_v59, 5 }
 0x318   : > { %v15856_v38 = vsel %vm14996_vm15, %v10628_v26, %v7567_v10  ;;  %v7569_v51 = vrot.slane %v7567_v10, 4  ;;  %v15871_v49 = vsel %vm14996_vm15, %v7562_v25, %v7563_v52  ;;  %v10630_v0 = vrot.slane %v10614_v63, 9  ;;  %v17565_v26 = vld [vmem:[#allocation33_spill] sm:$0xff] }
 0x319   : > { %v15861_v5 = vsel %vm14996_vm15, %v7555_v37, %v7556_v15  ;;  %v15885_v27 = vsel %vm14996_vm15, %v10629_v43, %v7574_v29  ;;  %v7576_v48 = vrot.slane %v7574_v29, 4  ;;  %v17563_v15 = vld [vmem:[#allocation30_spill] sm:$0xff]  ;;  %v10631_v52 = vrot.slane %v10615_v47, 9  ;;  %v17567_v25 = vld [vmem:[#allocation37_spill] sm:$0xff] }
 0x31a   : > { %11622 = vmatmul.mubr.msk.bf16.gmra.mxu1 %vm5390_vm11, %v11979_v32  ;;  %v15875_v45 = vsel %vm14996_vm15, %v7569_v51, %v7570_v40  ;;  %v7581_v57 = vrot.slane %v17563_v15, 5  ;;  %v7584_v32 = vrot.slane %v17564_v35, 5  ;;  %v7588_v10 = vrot.slane %v17565_v26, 5  ;;  %v10617_v40 = vld [vmem:[%s12206_s12 + $0xb4] sm:$0xe]  ;;  %v11981_v43 = vld [vmem:[%s12206_s12 + $0xa8] sm:$0xff]  }
 0x31b   : > { %11625 = vmatprep.mubr.msk.bf16.mxu1 %vm5390_vm11, %v11980_v12  ;;  %v15894_v55 = vsel %vm14996_vm15, %v7576_v48, %v7577_v62  ;;  %v17566_v12 = vld [vmem:[#allocation36_spill] sm:$0xff]  ;;  %v10632_v63 = vrot.slane %v10616_v53, 9  ;;  %v7595_v51 = vrot.slane %v17567_v25, 5  ;;  %v17568_v35 = vld [vmem:[#allocation29_spill] sm:$0xff]  ;;  %v7605_v25 = vrot.slane %v15670_v61, 5 }
 0x31c   : > { %v7591_v37 = vrot.slane %v17566_v12, 5  ;;  %v7583_v59 = vrot.slane %v7581_v57, 4  ;;  %v15910_v62 = vsel %vm14996_vm15, %v10631_v52, %v7588_v10  ;;  %v10618_v47 = vld [vmem:[%s12206_s12 + $0xc0] sm:$0xe]  ;;  %v11982_v53 = vld [vmem:[%s12206_s12 + $0xb4] sm:$0xff]   ;;  %v7590_v48 = vrot.slane %v7588_v10, 4 }
 0x31d   : > { %v15916_v15 = vsel %vm14996_vm15, %v10632_v63, %v7595_v51  ;;  %v7598_v26 = vrot.slane %v17568_v35, 5  ;;  %v17569_v12 = vld [vmem:[#allocation38_spill] sm:$0xff]  ;;  %v10634_v35 = vrot.slane %v10618_v47, 9  ;;  %v7609_v47 = vrot.slane %v15678_v42, 5  ;;  %v11983_v42 = vld [vmem:[%s12206_s12 + $0xc0] sm:$0xff]  }
 0x31e   : > { %11660 = vmatmul.mubr.msk.bf16.gmra.mxu0 %vm5390_vm11, %v15742_v3  ;;  %v15906_v3 = vsel %vm14996_vm15, %v10630_v0, %v7581_v57  ;;  %v15921_v0 = vsel %vm14996_vm15, %v7583_v59, %v7584_v32  ;;  %v10633_v57 = vrot.slane %v10617_v40, 9  ;;  %v7602_v52 = vrot.slane %v17569_v12, 5  ;;  %v11984_v32 = vld [vmem:[%s12206_s12 + $0x18] sm:$0xff]   ;;  %v11985_v12 = vld [vmem:[%s12206_s12 + $0x24] sm:$0xff]  }
 0x31f   : > { %11663 = vmatprep.mubr.msk.bf16.mxu0 %vm5390_vm11, %v15753_v31  ;;  %v7597_v31 = vrot.slane %v7595_v51, 4  ;;  %v15929_v63 = vsel %vm14996_vm15, %v7590_v48, %v7591_v37  ;;  %v10604_v48 = vld [vmem:[%s12206_s12 + $0x18] sm:$0xe]  ;;  %v7611_v33 = vrot.slane %v7609_v47, 4 }
 0x320   : > { %v15943_v59 = vsel %vm14996_vm15, %v10633_v57, %v7602_v52  ;;  %v7604_v37 = vrot.slane %v7602_v52, 4  ;;  %v10620_v13 = vrot.slane %v10604_v48, 9  ;;  %v10733_v48 = vld [vmem:[%s12206_s12 + $0x18] sm:$0xf] }
 0x321   : > { %v15933_v51 = vsel %vm14996_vm15, %v7597_v31, %v7598_v26  ;;  %v7505_v31 = vsel %vm14996_vm15, %v10619_v41, %v7504_v28  ;;  %v7508_v26 = vsel %vm14996_vm15, %v15759_v39, %v7507_v34  ;;  %v7513_v28 = vrot.slane %v7511_v24, 4  ;;  %v12002_v41 = vld [vmem:[%s12206_s12 + $0x20] sm:$0x1] }
 0x322   : > { %11626 = vmatmul.mubr.msk.bf16.gmra.mxu1 %vm5390_vm11, %v11981_v43  ;;  %v7612_v43 = vrot.slane %v15691_v18, 5  ;;  %v15970_v18 = vsel %vm14996_vm15, %v10634_v35, %v7609_v47  ;;  %v7514_v34 = vrot.slane %v12002_v41, 5  ;;  %v10636_v39 = vcombine.low %v7505_v31, %v7508_v26  ;;  %v11986_v35 = vld [vmem:[%s12206_s12 + $0x30] sm:$0xff]   ;;  %v15997_v47 = vld [vmem:[%s12206_s12 + $0x1c] sm:$0xf] }
 0x323   : > { %11629 = vmatprep.mubr.msk.bf16.mxu1 %vm5390_vm11, %v11982_v53  ;;  %v15962_v53 = vsel %vm14996_vm15, %v7604_v37, %v7605_v25  ;;  %v7512_v52 = vsel %vm14996_vm15, %v10620_v13, %v7511_v24  ;;  %v8316_v24 = vshrl.u32 %v10733_v48, 16  ;;  %v8325_v31 = vshll.u32 %v15997_v47, 16  ;;  %v10736_v13 = vld [vmem:[%s12206_s12 + $0x24] sm:$0xf]  ;;  %v11987_v41 = vld [vmem:[%s12206_s12 + $0x3c] sm:$0xff]  }
 0x324   : > { %v7515_v25 = vsel %vm14996_vm15, %v7513_v28, %v7514_v34  ;;  %v8329_v26 = vshrl.u32 %v15997_v47, 16  ;;  %v16007_v28 = vld [vmem:[%s12206_s12 + $0x28] sm:$0xf] }
 0x325   : > { %v10637_v8 = vcombine.low %v7512_v52, %v7515_v25  ;;  %v11988_v34 = vld [vmem:[%s12206_s12 + $0x48] sm:$0xff]   ;;  %v16012_v52 = vrot.slane %v8325_v31, 5  ;;  %v10739_v31 = vld [vmem:[%s12206_s12 + $0x30] sm:$0xf] }
 0x326   : > { %11664 = vmatmul.mubr.msk.bf16.gmra.mxu0 %vm5390_vm11, %v15764_v6  ;;  %v15979_v6 = vsel %vm14996_vm15, %v7611_v33, %v7612_v43  ;;  %v8319_v43 = vshll.u32 %v10733_v48, 16  ;;  %v17571_v33 = vld [vmem:[#allocation34_spill] sm:$0xff]  ;;  %v8331_v25 = vrot.slane %v8329_v26, 4  ;;  %v8349_v48 = vshll.u32 %v16007_v28, 16 }
 0x327   : > { %11703 = vmatprep.mubr.msk.bf16.mxu0 %vm5390_vm11, %v11984_v32  ;;  %v17570_v32 = vld [vmem:[#allocation31_spill] sm:$0xff]  ;;  %v8364_v61 = vshrl.u32 %v10739_v31, 16  ;;  %v8367_v40 = vshll.u32 %v10739_v31, 16 }
 0x328   : > { %v9268_v37 = vsel %vm5439_vm8, %v17570_v32, 0  ;;  %v8340_v32 = vshrl.u32 %v10736_v13, 16  ;;  %v16035_v57 = vrot.slane %v8349_v48, 5 }
 0x329   : > { %v8366_v17 = vrot.slane %v8364_v61, 4  ;;  %v8369_v58 = vrot.slane %v8367_v40, 5 }
 0x32a   : > { %11630 = vmatmul.mubr.msk.bf16.gmra.mxu1 %vm5390_vm11, %v11983_v42  ;;  %v8798_v42 = vsel %vm5439_vm8, %v17571_v33, 0  ;;  %v16030_v33 = vld [vmem:[%s12206_s12 + $0x34] sm:$0xf] }
 0x32b   : > { %11669 = vmatprep.mubr.msk.bf16.mxu1 %vm5390_vm11, %v10636_v39  ;;  %v8318_v39 = vrot.slane %v8316_v24, 4  ;;  %v10814_v24 = vld [vmem:[%s12206_s12 + $0x18] sm:$0xe] }
 0x32c   : > { %v10830_v16 = vrot.slane %v10814_v24, 9 }
 0x32e   : > { %11704 = vmatmul.mubr.msk.bf16.vlgmr.msra.gmra.mxu0 %vm5390_vm11, %v11985_v12  ;;  %v8321_v12 = vrot.slane %v8319_v43, 5  ;;  %v9059_v43 = vrot.slane %v15997_v47, 5 }
 0x32f   : > { %11770 = vmatpush3.bf16.msra.mxu0 %v9268_v37  ;;  %11707 = vmatprep.mubr.msk.bf16.mxu0 %vm5390_vm11, %v11986_v35  ;;  %v10735_v35 = vld [vmem:[%s12206_s12 + $0x20] sm:$0x1]  ;;  %v8343_v37 = vshll.u32 %v10736_v13, 16  ;;  %v8342_v13 = vrot.slane %v8340_v32, 4 }
 0x330   : > { %v8322_v30 = vor.u32 %v8321_v12, %v8318_v39  ;;  %v8335_v26 = vshll.u32 %v10735_v35, 16  ;;  %v9061_v10 = vrot.slane %v9059_v43, 4  ;;  %v9062_v39 = vrot.slane %v10735_v35, 5  ;;  %v11990_v32 = vld [vmem:[%s12206_s12 + $0x60] sm:$0xff]  }
 0x331   : > { %v8373_v12 = vshll.u32 %v16030_v33, 16 }
 0x332   : > { %11670 = vmatmul.mubr.msk.bf16.vlgmr.msra.gmra.mxu1 %vm5390_vm11, %v10637_v8  ;;  %v8353_v8 = vshrl.u32 %v16007_v28, 16  ;;  %v16026_v4 = vpop.f32.mrf.mxu0  ;;  %v8337_v31 = vrot.slane %v8335_v26, 5  ;;  %v16064_v7 = vsel %vm14996_vm15, %v9061_v10, %v9062_v39  ;;  %v10742_v26 = vld [vmem:[%s12206_s12 + $0x3c] sm:$0xf]  ;;  %v16082_v39 = vld [vmem:[%s12206_s12 + $0x40] sm:$0xf] }
 0x333   : > { %11736 = vmatpush3.bf16.msra.mxu1 %v8798_v42  ;;  %11673 = vmatprep.mubr.msk.bf16.mxu1 %vm5390_vm11, %v10638_v36  ;;  %v8332_v36 = vor.u32 %v8331_v25, %v16012_v52  ;;  %v16033_v42 = vld [vmem:[%s12206_s12 + $0x2c] sm:$0x1]  ;;  %v8377_v25 = vshrl.u32 %v16030_v33, 16  ;;  %v16066_v50 = vrot.slane %v8373_v12, 5  ;;  %v8370_v12 = vor.u32 %v8369_v58, %v8366_v17 }
 0x334   : > { %v8355_v47 = vrot.slane %v8353_v8, 4  ;;  %v16047_v48 = vpop.f32.mrf.mxu0  ;;  %v8323_v8 = vrot.slane %v8322_v30, 4  ;;  %v8359_v29 = vshll.u32 %v16033_v42, 16  ;;  %v16060_v30 = vsel %vm14996_vm15, %v10830_v16, %v9059_v43 }
 0x335   : > { %v8333_v24 = vrot.slane %v8332_v36, 4  ;;  %v10831_v43 = vrot.slane %v10815_v46, 9  ;;  %v10741_v36 = vld [vmem:[%s12206_s12 + $0x38] sm:$0x1]  ;;  %v8401_v46 = vshrl.u32 %v16082_v39, 16 }
 0x336   : > { %11708 = vmatmul.mubr.msk.bf16.gmra.mxu0 %vm5390_vm11, %v11987_v41  ;;  %v8345_v41 = vrot.slane %v8343_v37, 5  ;;  %v8356_v23 = vor.u32 %v8355_v47, %v16035_v57  ;;  %v16071_v40 = vpop.f32.mrf.mxu0  ;;  %v8328_v61 = vsel %vm14701_vm12, %v8323_v8, %v16012_v52  ;;  %v8361_v16 = vrot.slane %v8359_v29, 5  ;;  %v11991_v52 = vld [vmem:[%s12206_s12 + $0x6c] sm:$0xff]  }
 0x337   : > { %11711 = vmatprep.mubr.msk.bf16.mxu0 %vm5390_vm11, %v11988_v34  ;;  %v11989_v34 = vld [vmem:[%s12206_s12 + $0x54] sm:$0xff]   ;;  %v16045_v37 = vpop.f32.mrf.mxu1  ;;  %17574 = vst [vmem:[#allocation35_spill] sm:$0xff] %v16071_v40  ;;  %v8338_v10 = vsel %vm14701_vm12, %v8333_v24, %v8337_v31  ;;  %v8383_v8 = vshll.u32 %v10741_v36, 16  ;;  %v10816_v24 = vld [vmem:[%s12206_s12 + $0x30] sm:$0xe]  ;;  %v8388_v29 = vshrl.u32 %v10742_v26, 16 }
 0x338   : > { %17572 = vst [vmem:[#allocation32_spill] sm:$0xff] %v16045_v37  ;;  %v8346_v35 = vor.u32 %v8345_v41, %v8342_v13  ;;  %v8357_v41 = vrot.slane %v8356_v23, 4  ;;  %v8391_v31 = vshll.u32 %v10742_v26, 16  ;;  %v16095_v58 = vpop.f32.mrf.mxu0  ;;  %v16097_v17 = vcombine.low %v8328_v61, %v8338_v10  ;;  %v10745_v61 = vld [vmem:[%s12206_s12 + $0x48] sm:$0xf] }
 0x339   : > { %17576 = vst [vmem:[#allocation36_spill] sm:$0xff] %v16095_v58  ;;  %v8397_v23 = vshll.u32 %v16082_v39, 16  ;;  %v8371_v10 = vrot.slane %v8370_v12, 4  ;;  %v10832_v9 = vrot.slane %v10816_v24, 9  ;;  %v16122_v26 = vld [vmem:[%s12206_s12 + $0x4c] sm:$0xf] }
 0x33a   : > { %11674 = vmatmul.mubr.msk.bf16.gmra.mxu1 %vm5390_vm11, %v10639_v44  ;;  %v9066_v44 = vrot.slane %v16007_v28, 5  ;;  %v16069_v28 = vpop.f32.mrf.mxu1  ;;  %v8347_v13 = vrot.slane %v8346_v35, 4  ;;  %v11992_v35 = vld [vmem:[%s12206_s12 + $0x78] sm:$0xff]   ;;  %v8362_v2 = vsel %vm14701_vm12, %v8357_v41, %v8361_v16  ;;  %v8385_v16 = vrot.slane %v8383_v8, 5  ;;  %v10748_v8 = vld [vmem:[%s12206_s12 + $0x54] sm:$0xf] }
 0x33b   : > { %11677 = vmatprep.mubr.msk.bf16.mxu1 %vm5390_vm11, %v10640_v21  ;;  %v8379_v21 = vrot.slane %v8377_v25, 4  ;;  %17573 = vst [vmem:[#allocation30_spill] sm:$0xff] %v16069_v28  ;;  %v9073_v25 = vrot.slane %v16030_v33, 5  ;;  %v16137_v12 = vrot.slane %v8397_v23, 5  ;;  %v8412_v24 = vshrl.u32 %v10745_v61, 16 }
 0x33c   : > { %v9068_v47 = vrot.slane %v9066_v44, 4  ;;  %v8352_v22 = vsel %vm14701_vm12, %v8347_v13, %v16035_v57  ;;  %v16126_v13 = vld [vmem:[%s12206_s12 + $0x44] sm:$0x1]  ;;  %v16144_v33 = vld [vmem:[%s12206_s12 + $0x58] sm:$0xf] }
 0x33d   : > { %v9075_v11 = vrot.slane %v9073_v25, 4  ;;  %v16151_v23 = vsel %vm14996_vm15, %v10832_v9, %v9073_v25  ;;  %v11994_v25 = vld [vmem:[%s12206_s12 + $0x90] sm:$0xff]   ;;  %v8445_v28 = vshll.u32 %v16144_v33, 16 }
 0x33e   : > { %11712 = vmatmul.mubr.msk.bf16.gmra.mxu0 %vm5390_vm11, %v11989_v34  ;;  %v9069_v34 = vrot.slane %v16033_v42, 5  ;;  %v16093_v42 = vpop.f32.mrf.mxu1 }
 0x33f   : > { %11715 = vmatprep.mubr.msk.bf16.mxu0 %vm5390_vm11, %v11990_v32  ;;  %v8380_v32 = vor.u32 %v8379_v21, %v16066_v50  ;;  %17575 = vst [vmem:[#allocation33_spill] sm:$0xff] %v16093_v42  ;;  %v8439_v42 = vshll.u32 %v10748_v8, 16 }
 0x340   : > { %v16118_v21 = vsel %vm14996_vm15, %v9068_v47, %v9069_v34  ;;  %v16129_v41 = vpop.f32.mrf.mxu1 }
 0x341   : > { %v8381_v57 = vrot.slane %v8380_v32, 4  ;;  %17577 = vst [vmem:[#allocation37_spill] sm:$0xff] %v16129_v41  ;;  %v10817_v32 = vld [vmem:[%s12206_s12 + $0x3c] sm:$0xe]  ;;  %v8436_v41 = vshrl.u32 %v10748_v8, 16 }
 0x342   : > { %11678 = vmatmul.mubr.msk.bf16.gmra.mxu1 %vm5390_vm11, %v10641_v54  ;;  %v16114_v54 = vsel %vm14996_vm15, %v10831_v43, %v9066_v44  ;;  %v8390_v44 = vrot.slane %v8388_v29, 4  ;;  %v8393_v43 = vrot.slane %v8391_v31, 5  ;;  %v8415_v29 = vshll.u32 %v10745_v61, 16  ;;  %v11993_v61 = vld [vmem:[%s12206_s12 + $0x84] sm:$0xff]  }
 0x343   : > { %11681 = vmatprep.mubr.msk.bf16.mxu1 %vm5390_vm11, %v10642_v56  ;;  %v9076_v56 = vrot.slane %v10741_v36, 5  ;;  %v16133_v36 = vcombine.low %v8352_v22, %v8362_v2  ;;  %v8421_v31 = vshll.u32 %v16122_v26, 16  ;;  %v8376_v22 = vsel %vm14701_vm12, %v8371_v10, %v16066_v50 }
 0x344   : > { %v8407_v2 = vshll.u32 %v16126_v13, 16  ;;  %v8386_v34 = vsel %vm14701_vm12, %v8381_v57, %v8385_v16  ;;  %v8394_v19 = vor.u32 %v8393_v43, %v8390_v44  ;;  %v17579_v50 = vcombine.low %v15847_v1, %v15861_v5  ;;  %v16178_v1 = vld [vmem:[%s12206_s12 + $0x50] sm:$0x1] }
 0x345   : > { %v16131_v47 = vpop.f32.mrf.mxu0  ;;  %v8449_v57 = vshrl.u32 %v16144_v33, 16  ;;  %v17582_v16 = vcombine.low %v15851_v14, %v15871_v49  ;;  %v8414_v5 = vrot.slane %v8412_v24, 4  ;;  %v8417_v44 = vrot.slane %v8415_v29, 5  ;;  %v10751_v14 = vld [vmem:[%s12206_s12 + $0x60] sm:$0xf] }
 0x346   : > { %11716 = vmatmul.mubr.msk.bf16.gmra.mxu0 %vm5390_vm11, %v11991_v52  ;;  %17578 = vst [vmem:[#allocation29_spill] sm:$0xff] %v16131_v47  ;;  %v8403_v52 = vrot.slane %v8401_v46, 4  ;;  %v16155_v46 = vsel %vm14996_vm15, %v9075_v11, %v9076_v56  ;;  %v10833_v56 = vrot.slane %v10817_v32, 9  ;;  %v16180_v43 = vrot.slane %v8421_v31, 5 }
 0x347   : > { %11719 = vmatprep.mubr.msk.bf16.mxu0 %vm5390_vm11, %v11992_v35  ;;  %v8425_v35 = vshrl.u32 %v16122_v26, 16  ;;  %v16168_v9 = vpop.f32.mrf.mxu0  ;;  %v16186_v32 = vrot.slane %v8407_v2, 5  ;;  %v16191_v49 = vrot.slane %v8394_v19, 4  ;;  %v9083_v24 = vrot.slane %v16126_v13, 5 }
 0x348   : > { %v16166_v10 = vpop.f32.mrf.mxu1  ;;  %17581 = vst [vmem:[#allocation31_spill] sm:$0xff] %v16168_v9  ;;  %v8404_v11 = vor.u32 %v8403_v52, %v16137_v12  ;;  %v8438_v29 = vrot.slane %v8436_v41, 4  ;;  %v8441_v31 = vrot.slane %v8439_v42, 5  ;;  %v8431_v2 = vshll.u32 %v16178_v1, 16  ;;  %v10750_v52 = vld [vmem:[%s12206_s12 + $0x5c] sm:$0x1] }
 0x349   : > { %17580 = vst [vmem:[#allocation38_spill] sm:$0xff] %v16166_v10  ;;  %v8427_v8 = vrot.slane %v8425_v35, 4  ;;  %v9080_v10 = vrot.slane %v16082_v39, 5  ;;  %v16205_v19 = vrot.slane %v8445_v28, 5  ;;  %v8418_v42 = vor.u32 %v8417_v44, %v8414_v5  ;;  %v11996_v9 = vld [vmem:[%s12206_s12 + $0xa8] sm:$0xff]  }
 0x34a   : > { %11682 = vmatmul.mubr.msk.bf16.gmra.mxu1 %vm5390_vm11, %v17579_v50  ;;  %v16182_v50 = vcombine.low %v8376_v22, %v8386_v34  ;;  %v16195_v34 = vld [vmem:[%s12206_s12 + $0x64] sm:$0xf]  ;;  %v16198_v35 = vpop.f32.mrf.mxu1  ;;  %v16200_v22 = vpop.f32.mrf.mxu0  ;;  %v16202_v39 = vrot.slane %v8404_v11, 4  ;;  %v8463_v11 = vshll.u32 %v10751_v14, 16  ;;  %v8442_v44 = vor.u32 %v8441_v31, %v8438_v29 }
 0x34b   : > { %11685 = vmatprep.mubr.msk.bf16.mxu1 %vm5390_vm11, %v17582_v16  ;;  %17583 = vst [vmem:[#allocation34_spill] sm:$0xff] %v16198_v35  ;;  %17584 = vst [vmem:[#allocation39_spill] sm:$0xff] %v16200_v22  ;;  %v16209_v13 = vsel %vm14996_vm15, %v10833_v56, %v9080_v10  ;;  %v8428_v41 = vor.u32 %v8427_v8, %v16180_v43  ;;  %v9087_v16 = vrot.slane %v16122_v26, 5  ;;  %v8460_v35 = vshrl.u32 %v10751_v14, 16 }
 0x34c   : > { %v8469_v37 = vshll.u32 %v16195_v34, 16  ;;  %v8473_v28 = vshrl.u32 %v16195_v34, 16  ;;  %v8400_v56 = vsel %vm14701_vm12, %v16191_v49, %v16137_v12  ;;  %v9082_v5 = vrot.slane %v9080_v10, 4  ;;  %v16227_v14 = vpop.f32.mrf.mxu1  ;;  %v16229_v22 = vpop.f32.mrf.mxu0  ;;  %v10819_v49 = vld [vmem:[%s12206_s12 + $0x54] sm:$0xe] }
 0x34d   : > { %v9094_v8 = vrot.slane %v16144_v33, 5  ;;  %v17585_v26 = vcombine.low %v15856_v38, %v15875_v45  ;;  %17586 = vst [vmem:[#allocation40_spill] sm:$0xff] %v16227_v14  ;;  %17587 = vst [vmem:[#allocation41_spill] sm:$0xff] %v16229_v22  ;;  %v16232_v47 = vrot.slane %v8431_v2, 5  ;;  %v8455_v10 = vshll.u32 %v10750_v52, 16 }
 0x34e   : > { %11720 = vmatmul.mubr.msk.bf16.gmra.mxu0 %vm5390_vm11, %v11993_v61  ;;  %v8451_v61 = vrot.slane %v8449_v57, 4  ;;  %v11995_v57 = vld [vmem:[%s12206_s12 + $0x9c] sm:$0xff]   ;;  %v17588_v33 = vcombine.low %v15885_v27, %v15894_v55  ;;  %v8419_v38 = vrot.slane %v8418_v42, 4  ;;  %v8429_v45 = vrot.slane %v8428_v41, 4  ;;  %v10754_v42 = vld [vmem:[%s12206_s12 + $0x6c] sm:$0xf]  ;;  %v16248_v41 = vpop.f32.mrf.mxu1 }
 0x34f   : > { %11723 = vmatprep.mubr.msk.bf16.mxu0 %vm5390_vm11, %v11994_v25  ;;  %v10818_v25 = vld [vmem:[%s12206_s12 + $0x48] sm:$0xe]  ;;  %v9089_v29 = vrot.slane %v9087_v16, 4  ;;  %v9090_v31 = vrot.slane %v16178_v1, 5  ;;  %v8462_v2 = vrot.slane %v8460_v35, 4  ;;  %v8465_v14 = vrot.slane %v8463_v11, 5 }
 0x350   : > { %v10834_v58 = vrot.slane %v10818_v25, 9  ;;  %v8452_v12 = vor.u32 %v8451_v61, %v16205_v19  ;;  %v16244_v25 = vrot.slane %v8469_v37, 5  ;;  %v8475_v61 = vrot.slane %v8473_v28, 4  ;;  %17589 = vst [vmem:[#allocation42_spill] sm:$0xff] %v16248_v41 }
 0x351   : > { %v8443_v22 = vrot.slane %v8442_v44, 4  ;;  %v10835_v27 = vrot.slane %v10819_v49, 9  ;;  %v9096_v55 = vrot.slane %v9094_v8, 4  ;;  %v9097_v40 = vrot.slane %v10750_v52, 5  ;;  %v10820_v44 = vld [vmem:[%s12206_s12 + $0x60] sm:$0xe] }
 0x352   : > { %11686 = vmatmul.mubr.msk.bf16.gmra.mxu1 %vm5390_vm11, %v17585_v26  ;;  %v16242_v26 = vld [vmem:[%s12206_s12 + $0x68] sm:$0x1]  ;;  %v8410_v37 = vsel %vm14701_vm12, %v16202_v39, %v16186_v32  ;;  %v16259_v35 = vsel %vm14996_vm15, %v9082_v5, %v9083_v24  ;;  %v8453_v11 = vrot.slane %v8452_v12, 4  ;;  %v8457_v52 = vrot.slane %v8455_v10, 5  ;;  %v16273_v39 = vld [vmem:[%s12206_s12 + $0x70] sm:$0xf] }
 0x353   : > { %11689 = vmatprep.mubr.msk.bf16.mxu1 %vm5390_vm11, %v17588_v33  ;;  %v8424_v28 = vsel %vm14701_vm12, %v8419_v38, %v16180_v43  ;;  %v8479_v32 = vshll.u32 %v16242_v26, 16  ;;  %v8466_v24 = vor.u32 %v8465_v14, %v8462_v2  ;;  %v8476_v5 = vor.u32 %v8475_v61, %v16244_v25  ;;  %v11997_v43 = vld [vmem:[%s12206_s12 + $0xb4] sm:$0xff]  }
 0x354   : > { %v8484_v12 = vshrl.u32 %v10754_v42, 16  ;;  %v8487_v10 = vshll.u32 %v10754_v42, 16  ;;  %v16293_v14 = vsel %vm14996_vm15, %v9096_v55, %v9097_v40  ;;  %v17590_v33 = vcombine.low %v15906_v3, %v15921_v0  ;;  %v10757_v61 = vld [vmem:[%s12206_s12 + $0x78] sm:$0xf] }
 0x355   : > { %v17592_v40 = vcombine.low %v15910_v62, %v15929_v63  ;;  %v16311_v3 = vcombine.low %v8400_v56, %v8410_v37  ;;  %v10836_v2 = vrot.slane %v10820_v44, 9 }
 0x356   : > { %11724 = vmatmul.mubr.msk.bf16.gmra.mxu0 %vm5390_vm11, %v11995_v57  ;;  %v16251_v1 = vpop.f32.mrf.mxu0  ;;  %v16269_v57 = vsel %vm14996_vm15, %v10834_v58, %v9087_v16  ;;  %v8448_v58 = vsel %vm14701_vm12, %v8443_v22, %v16205_v19  ;;  %v16289_v16 = vsel %vm14996_vm15, %v10835_v27, %v9094_v8  ;;  %v8458_v22 = vsel %vm14701_vm12, %v8453_v11, %v8457_v52  ;;  %v16317_v11 = vld [vmem:[%s12206_s12 + $0x7c] sm:$0xf] }
 0x357   : > { %11727 = vmatprep.mubr.msk.bf16.mxu0 %vm5390_vm11, %v11996_v9  ;;  %v8434_v9 = vsel %vm14701_vm12, %v8429_v45, %v16232_v47  ;;  %v16282_v47 = vsel %vm14996_vm15, %v9089_v29, %v9090_v31  ;;  %v11998_v45 = vld [vmem:[%s12206_s12 + $0xc0] sm:$0xff]   ;;  %v9101_v19 = vrot.slane %v16195_v34, 5  ;;  %v8493_v8 = vshll.u32 %v16273_v39, 16 }
 0x358   : > { %v16278_v49 = vpop.f32.mrf.mxu0  ;;  %v8497_v29 = vshrl.u32 %v16273_v39, 16  ;;  %v8481_v31 = vrot.slane %v8479_v32, 5  ;;  %v8467_v34 = vrot.slane %v8466_v24, 4  ;;  %v8477_v27 = vrot.slane %v8476_v5, 4  ;;  %v16331_v32 = vld [vmem:[%s12206_s12 + $0x74] sm:$0x1] }
 0x359   : > { %v8486_v55 = vrot.slane %v8484_v12, 4  ;;  %v8489_v42 = vrot.slane %v8487_v10, 5  ;;  %v16322_v63 = vcombine.low %v8424_v28, %v8434_v9  ;;  %v16326_v37 = vcombine.low %v8448_v58, %v8458_v22  ;;  %v10760_v24 = vld [vmem:[%s12206_s12 + $0x84] sm:$0xf]  ;;  %v16341_v10 = vld [vmem:[%s12206_s12 + $0x88] sm:$0xf] }
 0x35a   : > { %11690 = vmatmul.mubr.msk.bf16.gmra.mxu1 %vm5390_vm11, %v17590_v33  ;;  %v16299_v38 = vpop.f32.mrf.mxu1  ;;  %v16320_v62 = vpop.f32.mrf.mxu0  ;;  %v9103_v44 = vrot.slane %v9101_v19, 4  ;;  %v9104_v28 = vrot.slane %v16242_v26, 5  ;;  %v16338_v9 = vrot.slane %v8493_v8, 5  ;;  %v8499_v12 = vrot.slane %v8497_v29, 4 }
 0x35b   : > { %17591 = vst [vmem:[#allocation43_spill] sm:$0xff] %v16299_v38  ;;  %11693 = vmatprep.mubr.msk.bf16.mxu1 %vm5390_vm11, %v17592_v40  ;;  %v8508_v58 = vshrl.u32 %v10757_v61, 16  ;;  %v8511_v33 = vshll.u32 %v10757_v61, 16  ;;  %v8517_v22 = vshll.u32 %v16317_v11, 16  ;;  %v8521_v40 = vshrl.u32 %v16317_v11, 16  ;;  %v11999_v61 = vld [vmem:[%s12206_s12 + $0xcc] sm:$0xff]  }
 0x35c   : > { %v16334_v5 = vpop.f32.mrf.mxu1  ;;  %v8482_v52 = vsel %vm14701_vm12, %v8477_v27, %v8481_v31  ;;  %v16353_v26 = vsel %vm14996_vm15, %v10836_v2, %v9101_v19  ;;  %v8490_v8 = vor.u32 %v8489_v42, %v8486_v55  ;;  %v16355_v29 = vpop.f32.mrf.mxu0  ;;  %v8532_v56 = vshrl.u32 %v10760_v24, 16 }
 0x35d   : > { %17593 = vst [vmem:[#allocation44_spill] sm:$0xff] %v16334_v5  ;;  %v8535_v0 = vshll.u32 %v10760_v24, 16  ;;  %v8541_v5 = vshll.u32 %v16341_v10, 16  ;;  %v8545_v38 = vshrl.u32 %v16341_v10, 16  ;;  %v16368_v19 = vsel %vm14996_vm15, %v9103_v44, %v9104_v28 }
 0x35e   : > { %11728 = vmatmul.mubr.msk.bf16.gmra.mxu0 %vm5390_vm11, %v11997_v43  ;;  %v10821_v43 = vld [vmem:[%s12206_s12 + $0x6c] sm:$0xe]  ;;  %v16364_v31 = vpop.f32.mrf.mxu1  ;;  %v8500_v2 = vor.u32 %v8499_v12, %v16338_v9  ;;  %v17596_v55 = vcombine.low %v15943_v59, %v15962_v53  ;;  %v8513_v42 = vrot.slane %v8511_v33, 5  ;;  %v16377_v24 = vrot.slane %v8517_v22, 5  ;;  %v10822_v59 = vld [vmem:[%s12206_s12 + $0x78] sm:$0xe] }
 0x35f   : > { %11731 = vmatprep.mubr.msk.bf16.mxu0 %vm5390_vm11, %v11998_v45  ;;  %v8472_v45 = vsel %vm14701_vm12, %v8467_v34, %v16244_v25  ;;  %v17594_v25 = vcombine.low %v15916_v15, %v15933_v51  ;;  %17595 = vst [vmem:[#allocation45_spill] sm:$0xff] %v16364_v31  ;;  %v8503_v34 = vshll.u32 %v16331_v32, 16  ;;  %v10837_v27 = vrot.slane %v10821_v43, 9  ;;  %v10759_v15 = vld [vmem:[%s12206_s12 + $0x80] sm:$0x1] }
 0x360   : > { %v8510_v51 = vrot.slane %v8508_v58, 4  ;;  %v16379_v31 = vcombine.low %v8472_v45, %v8482_v52  ;;  %v16381_v44 = vrot.slane %v8490_v8, 4  ;;  %v9108_v28 = vrot.slane %v16273_v39, 5  ;;  %v16391_v52 = vpop.f32.mrf.mxu1  ;;  %v16401_v8 = vld [vmem:[%s12206_s12 + $0x8c] sm:$0x1] }
 0x361   : > { %v9115_v12 = vrot.slane %v16317_v11, 5  ;;  %v8534_v53 = vrot.slane %v8532_v56, 4  ;;  %v8537_v58 = vrot.slane %v8535_v0, 5  ;;  %v16389_v33 = vrot.slane %v8541_v5, 5  ;;  %17598 = vst [vmem:[#allocation47_spill] sm:$0xff] %v16391_v52 }
 0x362   : > { %11694 = vmatmul.mubr.msk.bf16.gmra.mxu1 %vm5390_vm11, %v17594_v25  ;;  %v8523_v25 = vrot.slane %v8521_v40, 4  ;;  %v8547_v22 = vrot.slane %v8545_v38, 4  ;;  %v17599_v40 = vcombine.low %v16060_v30, %v16064_v7  ;;  %v8505_v11 = vrot.slane %v8503_v34, 5  ;;  %v17629_v60 = vld [vmem:[#allocation43_spill] sm:$0xff] }
 0x363   : > { %11697 = vmatprep.mubr.msk.bf16.mxu1 %vm5390_vm11, %v17596_v55  ;;  %v9111_v45 = vrot.slane %v16331_v32, 5  ;;  %v8527_v56 = vshll.u32 %v10759_v15, 16  ;;  %v8501_v38 = vrot.slane %v8500_v2, 4  ;;  %v16407_v5 = vsel %vm14996_vm15, %v10837_v27, %v9108_v28  ;;  %v16412_v32 = vld [vmem:[%s12206_s12 + $0x94] sm:$0xf] }
 0x364   : > { %v8514_v30 = vor.u32 %v8513_v42, %v8510_v51  ;;  %v8524_v7 = vor.u32 %v8523_v25, %v16377_v24  ;;  %v9110_v55 = vrot.slane %v9108_v28, 4  ;;  %v9117_v34 = vrot.slane %v9115_v12, 4 }
 0x365   : > { %v9118_v39 = vrot.slane %v10759_v15, 5  ;;  %v8496_v2 = vsel %vm14701_vm12, %v16381_v44, %v16338_v9  ;;  %v8538_v27 = vor.u32 %v8537_v58, %v8534_v53  ;;  %v8548_v51 = vor.u32 %v8547_v22, %v16389_v33 }
 0x366   : > { %v16385_v43 = vpop.f32.mrf.mxu0  ;;  %11732 = vmatmul.mubr.msk.bf16.gmra.mxu0 %vm5390_vm11, %v11999_v61  ;;  %v10763_v61 = vld [vmem:[%s12206_s12 + $0x90] sm:$0xf]  ;;  %v8551_v42 = vshll.u32 %v16401_v8, 16  ;;  %v17602_v28 = vcombine.low %v15970_v18, %v15979_v6  ;;  %v8529_v15 = vrot.slane %v8527_v56, 5  ;;  %v9122_v41 = vrot.slane %v16341_v10, 5 }
 0x367   : > { %17597 = vst [vmem:[#allocation46_spill] sm:$0xff] %v16385_v43  ;;  %11771 = vmatprep.mubr.msk.bf16.mxu0 %vm5390_vm11, %v17599_v40  ;;  %v10838_v40 = vrot.slane %v10822_v59, 9  ;;  %v10823_v59 = vld [vmem:[%s12206_s12 + $0x84] sm:$0xe]  ;;  %v8515_v9 = vrot.slane %v8514_v30, 4  ;;  %v8525_v44 = vrot.slane %v8524_v7, 4  ;;  %v8506_v58 = vsel %vm14701_vm12, %v8501_v38, %v8505_v11 }
 0x368   : > { %v16403_v0 = vpop.f32.mrf.mxu0  ;;  %v8565_v53 = vshll.u32 %v16412_v32, 16  ;;  %v8569_v18 = vshrl.u32 %v16412_v32, 16  ;;  %v16442_v10 = vsel %vm14996_vm15, %v9110_v55, %v9111_v45  ;;  %v16450_v22 = vsel %vm14996_vm15, %v9117_v34, %v9118_v39  ;;  %v10766_v34 = vld [vmem:[%s12206_s12 + $0x9c] sm:$0xf]  ;;  %v17632_v20 = vld [vmem:[#allocation47_spill] sm:$0xff] }
 0x369   : > { %17600 = vst [vmem:[#allocation48_spill] sm:$0xff] %v16403_v0  ;;  %v8559_v0 = vshll.u32 %v10763_v61, 16  ;;  %v17603_v30 = vcombine.low %v16114_v54, %v16118_v21  ;;  %v8539_v11 = vrot.slane %v8538_v27, 4  ;;  %v8549_v38 = vrot.slane %v8548_v51, 4 }
 0x36a   : > { %v16414_v52 = vpop.f32.mrf.mxu0  ;;  %v16422_v25 = vpop.f32.mrf.mxu1  ;;  %11698 = vmatmul.mubr.msk.bf16.gmra.mxu1 %vm5390_vm11, %v17602_v28  ;;  %v8553_v7 = vrot.slane %v8551_v42, 5  ;;  %v10839_v45 = vrot.slane %v10823_v59, 9  ;;  %v9124_v39 = vrot.slane %v9122_v41, 4  ;;  %v8520_v51 = vsel %vm14701_vm12, %v8515_v9, %v16377_v24 }
 0x36b   : > { %17601 = vst [vmem:[#allocation49_spill] sm:$0xff] %v16414_v52  ;;  %v8556_v52 = vshrl.u32 %v10763_v61, 16  ;;  %11737 = vmatprep.mubr.msk.bf16.mxu1 %vm5390_vm11, %v16097_v17  ;;  %v16446_v17 = vsel %vm14996_vm15, %v10838_v40, %v9115_v12  ;;  %v16457_v61 = vld [vmem:[%s12206_s12 + $0x98] sm:$0x1]  ;;  %v17604_v12 = vcombine.low %v16151_v23, %v16155_v46  ;;  %v9125_v40 = vrot.slane %v16401_v8, 5 }
 0x36c   : > { %v16430_v43 = vpop.f32.mrf.mxu0  ;;  %v16436_v6 = vpop.f32.mrf.mxu1  ;;  %v8561_v21 = vrot.slane %v8559_v0, 5  ;;  %v8530_v42 = vsel %vm14701_vm12, %v8525_v44, %v8529_v15  ;;  %v16472_v28 = vrot.slane %v8565_v53, 5  ;;  %v8571_v23 = vrot.slane %v8569_v18, 4 }
 0x36d   : > { %v8558_v54 = vrot.slane %v8556_v52, 4  ;;  %v16476_v59 = vcombine.low %v8496_v2, %v8506_v58  ;;  %v8575_v0 = vshll.u32 %v16457_v61, 16  ;;  %v8544_v15 = vsel %vm14701_vm12, %v8539_v11, %v16389_v33  ;;  %v16490_v2 = vld [vmem:[%s12206_s12 + $0xa0] sm:$0xf] }
 0x36e   : > { %v11569_v56 = vpop.f32.mrf.mxu0  ;;  %11772 = vmatmul.mubr.msk.bf16.vlgmr.msra.gmra.mxu0 %vm5390_vm11, %v17603_v30  ;;  %v16459_v55 = vpop.f32.mrf.mxu1  ;;  %v10824_v30 = vld [vmem:[%s12206_s12 + $0x90] sm:$0xe]  ;;  %v8554_v9 = vsel %vm14701_vm12, %v8549_v38, %v8553_v7  ;;  %v8580_v44 = vshrl.u32 %v10766_v34, 16  ;;  %v8583_v53 = vshll.u32 %v10766_v34, 16  ;;  %v16494_v58 = vcombine.low %v8520_v51, %v8530_v42  ;;  %v10769_v42 = vld [vmem:[%s12206_s12 + $0xa8] sm:$0xf] }
 0x36f   : > { %11775 = vmatprep.mubr.msk.bf16.mxu0 %vm5390_vm11, %v17604_v12  ;;  %v16498_v12 = vsel %vm14996_vm15, %v10839_v45, %v9122_v41  ;;  %v16502_v33 = vsel %vm14996_vm15, %v9124_v39, %v9125_v40  ;;  %v8562_v11 = vor.u32 %v8561_v21, %v8558_v54  ;;  %v10840_v34 = vrot.slane %v10824_v30, 9  ;;  %v16524_v30 = vld [vmem:[%s12206_s12 + $0xac] sm:$0xf] }
 0x370   : > { %v6194_v27 = vpop.f32.mrf.mxu0  ;;  %v16474_v46 = vpop.f32.mrf.mxu1  ;;  %v9129_v51 = vrot.slane %v16412_v32, 5  ;;  %v16510_v45 = vcombine.low %v8544_v15, %v8554_v9  ;;  %v16512_v8 = vrot.slane %v8575_v0, 5  ;;  %v8589_v39 = vshll.u32 %v16490_v2, 16 }
 0x371   : > { %v17605_v21 = vcombine.low %v16209_v13, %v16259_v35  ;;  %v8582_v32 = vrot.slane %v8580_v44, 4  ;;  %v17606_v15 = vcombine.low %v16269_v57, %v16282_v47  ;;  %v9132_v9 = vrot.slane %v16457_v61, 5  ;;  %v17607_v13 = vld [vmem:[#allocation35_spill] sm:$0xff] }
 0x372   : > { %v11570_v24 = vpop.f32.mrf.mxu0  ;;  %v11535_v18 = vpop.f32.mrf.mxu1  ;;  %11738 = vmatmul.mubr.msk.bf16.vlgmr.msra.gmra.mxu1 %vm5390_vm11, %v16133_v36  ;;  %v8572_v36 = vor.u32 %v8571_v23, %v16472_v28  ;;  %v8585_v23 = vrot.slane %v8583_v53, 5  ;;  %v16534_v52 = vrot.slane %v8589_v39, 5  ;;  %v8613_v47 = vshll.u32 %v16524_v30, 16 }
 0x373   : > { %v5778_v38 = vadd.f32 %v11535_v18, %v16026_v4  ;;  %11741 = vmatprep.mubr.msk.bf16.mxu1 %vm5390_vm11, %v16182_v50  ;;  %v8593_v4 = vshrl.u32 %v16490_v2, 16  ;;  %v8607_v18 = vshll.u32 %v10769_v42, 16 }
 0x374   : > { %v6197_v7 = vpop.f32.mrf.mxu0  ;;  %v5769_v41 = vpop.f32.mrf.mxu1  ;;  %v8573_v53 = vrot.slane %v8572_v36, 4  ;;  %v10768_v36 = vld [vmem:[%s12206_s12 + $0xa4] sm:$0x1] }
 0x375   : > { %v16516_v40 = vadd.f32 %v11569_v56, %v5778_v38  ;;  %v5770_v50 = vadd.f32 %v5769_v41, %v16047_v48  ;;  %v8563_v56 = vrot.slane %v8562_v11, 4  ;;  %v8604_v48 = vshrl.u32 %v10769_v42, 16 }
 0x376   : > { %v11573_v54 = vpop.f32.mrf.mxu0  ;;  %11776 = vmatmul.mubr.msk.bf16.gmra.mxu0 %vm5390_vm11, %v17605_v21  ;;  %v11536_v0 = vpop.f32.mrf.mxu1  ;;  %v9131_v41 = vrot.slane %v9129_v51, 4  ;;  %v8595_v57 = vrot.slane %v8593_v4, 4  ;;  %v8617_v11 = vshrl.u32 %v16524_v30, 16  ;;  %v10825_v4 = vld [vmem:[%s12206_s12 + $0x9c] sm:$0xe] }
 0x377   : > { %11779 = vmatprep.mubr.msk.bf16.mxu0 %vm5390_vm11, %v17606_v15  ;;  %v16531_v38 = vadd.f32 %v6194_v27, %v5770_v50  ;;  %v5781_v35 = vadd.f32 %v11536_v0, %v17607_v13  ;;  %v17609_v15 = vld [vmem:[#allocation36_spill] sm:$0xff]  ;;  %v16543_v50 = vsel %vm14996_vm15, %v10840_v34, %v9129_v51  ;;  %v8586_v0 = vor.u32 %v8585_v23, %v8582_v32 }
 0x378   : > { %v6210_v44 = vpop.f32.mrf.mxu0  ;;  %v5772_v21 = vpop.f32.mrf.mxu1  ;;  %v8568_v39 = vsel %vm14701_vm12, %v8563_v56, %v16472_v28  ;;  %v16563_v28 = vsel %vm14996_vm15, %v9131_v41, %v9132_v9  ;;  %v8596_v32 = vor.u32 %v8595_v57, %v16534_v52  ;;  %v16566_v23 = vrot.slane %v8613_v47, 5 }
 0x379   : > { %v16538_v61 = vadd.f32 %v11570_v24, %v5781_v35  ;;  %v5773_v42 = vadd.f32 %v5772_v21, %v17609_v15  ;;  %v9136_v24 = vrot.slane %v16490_v2, 5  ;;  %v8606_v35 = vrot.slane %v8604_v48, 4 }
 0x37a   : > { %v11574_v27 = vpop.f32.mrf.mxu0  ;;  %v11539_v13 = vpop.f32.mrf.mxu1  ;;  %11742 = vmatmul.mubr.msk.bf16.gmra.mxu1 %vm5390_vm11, %v16311_v3  ;;  %v8609_v21 = vrot.slane %v8607_v18, 5  ;;  %v8578_v3 = vsel %vm14701_vm12, %v8573_v53, %v16512_v8  ;;  %v8619_v56 = vrot.slane %v8617_v11, 4  ;;  %v17611_v18 = vld [vmem:[#allocation31_spill] sm:$0xff]  ;;  %v16575_v8 = vrot.slane %v8586_v0, 4  ;;  %v16578_v53 = vld [vmem:[%s12206_s12 + $0xb0] sm:$0x1] }
 0x37b   : > { %17608 = vst [vmem:[#allocation35_spill] sm:$0xff] %v16538_v61  ;;  %v16553_v15 = vadd.f32 %v6197_v7, %v5773_v42  ;;  %v17610_v61 = vld [vmem:[#allocation29_spill] sm:$0xff]  ;;  %11745 = vmatprep.mubr.msk.bf16.mxu1 %vm5390_vm11, %v16322_v63  ;;  %v8599_v7 = vshll.u32 %v10768_v36, 16  ;;  %v17612_v42 = vcombine.low %v16289_v16, %v16293_v14  ;;  %v10841_v9 = vrot.slane %v10825_v4, 9  ;;  %v17614_v0 = vld [vmem:[#allocation39_spill] sm:$0xff] }
 0x37c   : > { %v5794_v34 = vadd.f32 %v11539_v13, %v17610_v61  ;;  %v6213_v51 = vpop.f32.mrf.mxu0  ;;  %v5785_v2 = vpop.f32.mrf.mxu1  ;;  %v17613_v57 = vcombine.low %v16353_v26, %v16368_v19  ;;  %v9138_v47 = vrot.slane %v9136_v24, 4  ;;  %v9139_v16 = vrot.slane %v10768_v36, 5  ;;  %v10772_v26 = vld [vmem:[%s12206_s12 + $0xb4] sm:$0xf] }
 0x37d   : > { %v5786_v61 = vadd.f32 %v5785_v2, %v17611_v18  ;;  %v8610_v14 = vor.u32 %v8609_v21, %v8606_v35  ;;  %v10857_v2 = vcombine.low %v16543_v50, %v16563_v28  ;;  %v8597_v18 = vrot.slane %v8596_v32, 4  ;;  %v16597_v35 = vld [vmem:[%s12206_s12 + $0xb8] sm:$0xf]  ;;  %v17615_v21 = vld [vmem:[#allocation41_spill] sm:$0xff]  ;;  %v10778_v28 = vld [vmem:[%s12206_s12 + $0xcc] sm:$0xf] }
 0x37e   : > { %v16568_v48 = vadd.f32 %v11573_v54, %v5794_v34  ;;  %v11577_v63 = vpop.f32.mrf.mxu0  ;;  %11780 = vmatmul.mubr.msk.bf16.gmra.mxu0 %vm5390_vm11, %v17612_v42  ;;  %v11540_v41 = vpop.f32.mrf.mxu1  ;;  %v10856_v54 = vcombine.low %v16498_v12, %v16502_v33  ;;  %v16589_v34 = vcombine.low %v8568_v39, %v8578_v3  ;;  %v8601_v42 = vrot.slane %v8599_v7, 5  ;;  %v10828_v33 = vld [vmem:[%s12206_s12 + $0xc0] sm:$0xe] }
 0x37f   : > { %11783 = vmatprep.mubr.msk.bf16.mxu0 %vm5390_vm11, %v17613_v57  ;;  %v16586_v11 = vadd.f32 %v6210_v44, %v5786_v61  ;;  %v5797_v13 = vadd.f32 %v11540_v41, %v17614_v0  ;;  %v8620_v57 = vor.u32 %v8619_v56, %v16566_v23  ;;  %v8623_v36 = vshll.u32 %v16578_v53, 16  ;;  %v10826_v41 = vld [vmem:[%s12206_s12 + $0xa8] sm:$0xe] }
 0x380   : > { %v6226_v4 = vpop.f32.mrf.mxu0  ;;  %v5788_v19 = vpop.f32.mrf.mxu1  ;;  %v8592_v3 = vsel %vm14701_vm12, %v16575_v8, %v16534_v52  ;;  %v16608_v32 = vsel %vm14996_vm15, %v10841_v9, %v9136_v24  ;;  %v8611_v56 = vrot.slane %v8610_v14, 4  ;;  %v9143_v0 = vrot.slane %v16524_v30, 5 }
 0x381   : > { %v16599_v44 = vadd.f32 %v11574_v27, %v5797_v13  ;;  %v5789_v61 = vadd.f32 %v5788_v19, %v17615_v21  ;;  %v16614_v27 = vsel %vm14996_vm15, %v9138_v47, %v9139_v16  ;;  %v8628_v13 = vshrl.u32 %v10772_v26, 16 }
 0x382   : > { %v11578_v39 = vpop.f32.mrf.mxu0  ;;  %v11543_v7 = vpop.f32.mrf.mxu1  ;;  %11746 = vmatmul.mubr.msk.bf16.gmra.mxu1 %vm5390_vm11, %v16326_v37  ;;  %v8631_v8 = vshll.u32 %v10772_v26, 16  ;;  %v8637_v37 = vshll.u32 %v16597_v35, 16  ;;  %v8602_v47 = vsel %vm14701_vm12, %v8597_v18, %v8601_v42  ;;  %v8621_v16 = vrot.slane %v8620_v57, 4  ;;  %v10775_v42 = vld [vmem:[%s12206_s12 + $0xc0] sm:$0xf] }
 0x383   : > { %v16618_v19 = vadd.f32 %v6213_v51, %v5789_v61  ;;  %v5810_v52 = vadd.f32 %v11543_v7, %v16251_v1  ;;  %11749 = vmatprep.mubr.msk.bf16.mxu1 %vm5390_vm11, %v16379_v31  ;;  %v8625_v30 = vrot.slane %v8623_v36, 5  ;;  %v8641_v51 = vshrl.u32 %v16597_v35, 16  ;;  %v16646_v61 = vld [vmem:[%s12206_s12 + $0xc4] sm:$0xf] }
 0x384   : > { %v6229_v24 = vpop.f32.mrf.mxu0  ;;  %v5801_v9 = vpop.f32.mrf.mxu1  ;;  %v17616_v31 = vcombine.low %v16407_v5, %v16442_v10  ;;  %v10858_v26 = vcombine.low %v16608_v32, %v16614_v27  ;;  %v10842_v18 = vrot.slane %v10826_v41, 9  ;;  %v17617_v36 = vcombine.low %v16446_v17, %v16450_v22  ;;  %v17623_v32 = vld [vmem:[#allocation33_spill] sm:$0xff] }
 0x385   : > { %v16627_v14 = vadd.f32 %v11577_v63, %v5810_v52  ;;  %v5802_v1 = vadd.f32 %v5801_v9, %v16278_v49  ;;  %v8616_v49 = vsel %vm14701_vm12, %v8611_v56, %v16566_v23  ;;  %v9145_v63 = vrot.slane %v9143_v0, 4  ;;  %v16652_v9 = vld [vmem:[%s12206_s12 + $0xbc] sm:$0x1] }
 0x386   : > { %v11581_v21 = vpop.f32.mrf.mxu0  ;;  %11784 = vmatmul.mubr.msk.bf16.gmra.mxu0 %vm5390_vm11, %v17616_v31  ;;  %v11544_v57 = vpop.f32.mrf.mxu1  ;;  %v9146_v5 = vrot.slane %v16578_v53, 5  ;;  %v8630_v10 = vrot.slane %v8628_v13, 4  ;;  %v8633_v17 = vrot.slane %v8631_v8, 5  ;;  %v16654_v22 = vrot.slane %v8637_v37, 5 }
 0x387   : > { %11787 = vmatprep.mubr.msk.bf16.mxu0 %vm5390_vm11, %v17617_v36  ;;  %v16648_v7 = vadd.f32 %v6226_v4, %v5802_v1  ;;  %v5813_v41 = vadd.f32 %v11544_v57, %v16320_v62  ;;  %v8626_v23 = vsel %vm14701_vm12, %v8621_v16, %v8625_v30  ;;  %v8643_v56 = vrot.slane %v8641_v51, 4  ;;  %v17618_v51 = vld [vmem:[#allocation46_spill] sm:$0xff] }
 0x388   : > { %v6242_v52 = vpop.f32.mrf.mxu0  ;;  %v5804_v31 = vpop.f32.mrf.mxu1  ;;  %v8652_v36 = vshrl.u32 %v10775_v42, 16  ;;  %v8655_v53 = vshll.u32 %v10775_v42, 16  ;;  %v8661_v62 = vshll.u32 %v16646_v61, 16  ;;  %v8665_v57 = vshrl.u32 %v16646_v61, 16 }
 0x389   : > { %v16658_v13 = vadd.f32 %v11578_v39, %v5813_v41  ;;  %v5805_v4 = vadd.f32 %v5804_v31, %v16355_v29  ;;  %v16665_v37 = vcombine.low %v8592_v3, %v8602_v47  ;;  %v16669_v16 = vsel %vm14996_vm15, %v10842_v18, %v9143_v0  ;;  %v10827_v0 = vld [vmem:[%s12206_s12 + $0xb4] sm:$0xe] }
 0x38a   : > { %v11582_v1 = vpop.f32.mrf.mxu0  ;;  %v11547_v8 = vpop.f32.mrf.mxu1  ;;  %11750 = vmatmul.mubr.msk.bf16.gmra.mxu1 %vm5390_vm11, %v16476_v59  ;;  %v16673_v39 = vsel %vm14996_vm15, %v9145_v63, %v9146_v5  ;;  %v8647_v29 = vshll.u32 %v16652_v9, 16  ;;  %v16681_v59 = vcombine.low %v8616_v49, %v8626_v23  ;;  %v8634_v3 = vor.u32 %v8633_v17, %v8630_v10 }
 0x38b   : > { %v16676_v30 = vadd.f32 %v6229_v24, %v5805_v4  ;;  %v5826_v42 = vadd.f32 %v11547_v8, %v17618_v51  ;;  %11753 = vmatprep.mubr.msk.bf16.mxu1 %vm5390_vm11, %v16494_v58  ;;  %v8644_v18 = vor.u32 %v8643_v56, %v16654_v22  ;;  %v9150_v63 = vrot.slane %v16597_v35, 5  ;;  %v17619_v4 = vld [vmem:[#allocation48_spill] sm:$0xff]  ;;  %v10777_v58 = vld [vmem:[%s12206_s12 + $0xc8] sm:$0x1] }
 0x38c   : > { %v6245_v41 = vpop.f32.mrf.mxu0  ;;  %v5817_v47 = vpop.f32.mrf.mxu1  ;;  %v8654_v5 = vrot.slane %v8652_v36, 4  ;;  %v8657_v24 = vrot.slane %v8655_v53, 5  ;;  %v16694_v49 = vrot.slane %v8661_v62, 5  ;;  %v8667_v10 = vrot.slane %v8665_v57, 4  ;;  %v17620_v56 = vld [vmem:[#allocation49_spill] sm:$0xff] }
 0x38d   : > { %v16686_v31 = vadd.f32 %v11581_v21, %v5826_v42  ;;  %v5818_v8 = vadd.f32 %v5817_v47, %v17619_v4  ;;  %v10859_v35 = vcombine.low %v16669_v16, %v16673_v39  ;;  %v16702_v21 = vrot.slane %v8647_v29, 5  ;;  %v16716_v42 = vld [vmem:[%s12206_s12 + $0xd0] sm:$0xf] }
 0x38e   : > { %v11585_v51 = vpop.f32.mrf.mxu0  ;;  %11788 = vmatmul.mubr.msk.bf16.gmra.mxu0 %vm5390_vm11, %v10856_v54  ;;  %v11548_v17 = vpop.f32.mrf.mxu1  ;;  %v10843_v12 = vrot.slane %v10827_v0, 9  ;;  %v9157_v54 = vrot.slane %v16646_v61, 5  ;;  %v16709_v62 = vrot.slane %v8634_v3, 4  ;;  %v9153_v50 = vrot.slane %v16652_v9, 5 }
 0x38f   : > { %11791 = vmatprep.mubr.msk.bf16.mxu0 %vm5390_vm11, %v10857_v2  ;;  %v16706_v23 = vadd.f32 %v6242_v52, %v5818_v8  ;;  %v5829_v36 = vadd.f32 %v11548_v17, %v17620_v56  ;;  %v16713_v57 = vrot.slane %v8644_v18, 4  ;;  %v9152_v16 = vrot.slane %v9150_v63, 4 }
 0x390   : > { %v6258_v53 = vpop.f32.mrf.mxu0  ;;  %v5820_v2 = vpop.f32.mrf.mxu1  ;;  %v8658_v39 = vor.u32 %v8657_v24, %v8654_v5  ;;  %v8671_v29 = vshll.u32 %v10777_v58, 16  ;;  %v8668_v47 = vor.u32 %v8667_v10, %v16694_v49  ;;  %v10844_v3 = vrot.slane %v10828_v33, 9  ;;  %v17621_v24 = vld [vmem:[#allocation32_spill] sm:$0xff] }
 0x391   : > { %v16718_v0 = vadd.f32 %v11582_v1, %v5829_v36  ;;  %v5821_v61 = vadd.f32 %v5820_v2, %v16430_v43  ;;  %v9159_v9 = vrot.slane %v9157_v54, 4  ;;  %v9160_v18 = vrot.slane %v10777_v58, 5  ;;  %v17622_v2 = vld [vmem:[#allocation30_spill] sm:$0xff] }
 0x392   : > { %v11586_v52 = vpop.f32.mrf.mxu0  ;;  %v11551_v4 = vpop.f32.mrf.mxu1  ;;  %11754 = vmatmul.mubr.msk.bf16.gmra.mxu1 %vm5390_vm11, %v16510_v45  ;;  %v8676_v8 = vshrl.u32 %v10778_v28, 16  ;;  %v8679_v17 = vshll.u32 %v10778_v28, 16  ;;  %v8685_v43 = vshll.u32 %v16716_v42, 16  ;;  %v8689_v10 = vshrl.u32 %v16716_v42, 16 }
 0x393   : > { %v16724_v5 = vadd.f32 %v6245_v41, %v5821_v61  ;;  %v5842_v56 = vadd.f32 %v11551_v4, %v17621_v24  ;;  %11757 = vmatprep.mubr.msk.bf16.mxu1 %vm5390_vm11, %v16589_v34  ;;  %v9151_v45 = vsel %vm14996_vm15, %v10843_v12, %v9150_v63  ;;  %v9154_v58 = vsel %vm14996_vm15, %v9152_v16, %v9153_v50 }
 0x394   : > { %v6261_v1 = vpop.f32.mrf.mxu0  ;;  %v5833_v33 = vpop.f32.mrf.mxu1  ;;  %v8659_v36 = vrot.slane %v8658_v39, 4  ;;  %v8673_v41 = vrot.slane %v8671_v29, 5  ;;  %v8669_v34 = vrot.slane %v8668_v47, 4  ;;  %v9158_v63 = vsel %vm14996_vm15, %v10844_v3, %v9157_v54 }
 0x395   : > { %v16735_v28 = vadd.f32 %v11585_v51, %v5842_v56  ;;  %v5834_v61 = vadd.f32 %v5833_v33, %v17622_v2  ;;  %v9161_v51 = vsel %vm14996_vm15, %v9159_v9, %v9160_v18  ;;  %v8678_v50 = vrot.slane %v8676_v8, 4  ;;  %v10829_v33 = vld [vmem:[%s12206_s12 + $0xcc] sm:$0xe]  ;;  %v17624_v18 = vld [vmem:[#allocation37_spill] sm:$0xff] }
 0x396   : > { %v11589_v4 = vpop.f32.mrf.mxu0  ;;  %11792 = vmatmul.mubr.msk.bf16.gmra.mxu0 %vm5390_vm11, %v10858_v26  ;;  %v11552_v12 = vpop.f32.mrf.mxu1  ;;  %v8681_v16 = vrot.slane %v8679_v17, 5  ;;  %v9164_v39 = vrot.slane %v16716_v42, 5  ;;  %v10780_v26 = vld [vmem:[%s12206_s12 + $0xd4] sm:$0x1]  ;;  %v8687_v47 = vrot.slane %v8685_v43, 5  ;;  %v8691_v56 = vrot.slane %v8689_v10, 4 }
 0x397   : > { %11795 = vmatprep.mubr.msk.bf16.mxu0 %vm5390_vm11, %v10859_v35  ;;  %v16748_v29 = vadd.f32 %v6258_v53, %v5834_v61  ;;  %v5845_v27 = vadd.f32 %v11552_v12, %v17623_v32  ;;  %v8640_v35 = vsel %vm14701_vm12, %v16709_v62, %v16654_v22  ;;  %v8650_v42 = vsel %vm14701_vm12, %v16713_v57, %v16702_v21 }
 0x398   : > { %v6274_v24 = vpop.f32.mrf.mxu0  ;;  %v5836_v54 = vpop.f32.mrf.mxu1  ;;  %v10860_v53 = vcombine.low %v9151_v45, %v9154_v58  ;;  %v8664_v3 = vsel %vm14701_vm12, %v8659_v36, %v16694_v49  ;;  %v8674_v43 = vsel %vm14701_vm12, %v8669_v34, %v8673_v41  ;;  %v10861_v10 = vcombine.low %v9158_v63, %v9161_v51  ;;  %v17625_v49 = vld [vmem:[#allocation38_spill] sm:$0xff] }
 0x399   : > { %v16764_v9 = vadd.f32 %v11586_v52, %v5845_v27  ;;  %v5837_v8 = vadd.f32 %v5836_v54, %v17624_v18  ;;  %v8695_v62 = vshll.u32 %v10780_v26, 16  ;;  %v10845_v21 = vrot.slane %v10829_v33, 9  ;;  %v17626_v63 = vld [vmem:[#allocation34_spill] sm:$0xff] }
 0x39a   : > { %v11590_v17 = vpop.f32.mrf.mxu0  ;;  %v11555_v22 = vpop.f32.mrf.mxu1  ;;  %11758 = vmatmul.mubr.msk.bf16.gmra.mxu1 %vm5390_vm11, %v16665_v37  ;;  %v9166_v57 = vrot.slane %v9164_v39, 4  ;;  %v9167_v45 = vrot.slane %v10780_v26, 5  ;;  %v8682_v2 = vor.u32 %v8681_v16, %v8678_v50  ;;  %v8692_v61 = vor.u32 %v8691_v56, %v8687_v47 }
 0x39b   : > { %v16771_v58 = vadd.f32 %v6261_v1, %v5837_v8  ;;  %v5858_v52 = vadd.f32 %v11555_v22, %v17625_v49  ;;  %11761 = vmatprep.mubr.msk.bf16.mxu1 %vm5390_vm11, %v16681_v59  ;;  %v10795_v51 = vcombine.low %v8640_v35, %v8650_v42  ;;  %v10796_v1 = vcombine.low %v8664_v3, %v8674_v43 }
 0x39c   : > { %v6277_v36 = vpop.f32.mrf.mxu0  ;;  %v5849_v41 = vpop.f32.mrf.mxu1  ;;  %v8697_v27 = vrot.slane %v8695_v62, 5  ;;  %v9165_v26 = vsel %vm14996_vm15, %v10845_v21, %v9164_v39  ;;  %v9168_v59 = vsel %vm14996_vm15, %v9166_v57, %v9167_v45  ;;  %v8683_v33 = vrot.slane %v8682_v2, 4  ;;  %v17630_v57 = vld [vmem:[#allocation44_spill] sm:$0xff] }
 0x39d   : > { %v16776_v34 = vadd.f32 %v11589_v4, %v5858_v52  ;;  %v5850_v12 = vadd.f32 %v5849_v41, %v17626_v63  ;;  %v17627_v4 = vld [vmem:[#allocation40_spill] sm:$0xff]  ;;  %v8693_v54 = vrot.slane %v8692_v61, 4  ;;  %v10862_v8 = vcombine.low %v9165_v26, %v9168_v59  ;;  %v17631_v61 = vld [vmem:[#allocation45_spill] sm:$0xff] }
 0x39e   : > { %v11593_v37 = vpop.f32.mrf.mxu0  ;;  %11796 = vmatmul.mubr.msk.bf16.gmra.mxu0 %vm5390_vm11, %v10860_v53  ;;  %v11556_v32 = vpop.f32.mrf.mxu1  ;;  %v17628_v53 = vld [vmem:[#allocation42_spill] sm:$0xff]  ;;  %v8688_v22 = vsel %vm14701_vm12, %v8683_v33, %v8687_v47 }
 0x39f   : > { %11799 = vmatprep.mubr.msk.bf16.mxu0 %vm5390_vm11, %v10861_v10  ;;  %v16785_v50 = vadd.f32 %v6274_v24, %v5850_v12  ;;  %v5861_v16 = vadd.f32 %v11556_v32, %v17627_v4 }
 0x3a0   : > { %v6290_v56 = vpop.f32.mrf.mxu0  ;;  %v5852_v35 = vpop.f32.mrf.mxu1 }
 0x3a1   : > { %v16788_v42 = vadd.f32 %v11590_v17, %v5861_v16  ;;  %v5853_v3 = vadd.f32 %v5852_v35, %v17628_v53  ;;  %v8698_v17 = vsel %vm14701_vm12, %v8693_v54, %v8697_v27 }
 0x3a2   : > { %v11594_v18 = vpop.f32.mrf.mxu0  ;;  %v11559_v43 = vpop.f32.mrf.mxu1  ;;  %11762 = vmatmul.mubr.msk.bf16.gmra.mxu1 %vm5390_vm11, %v10795_v51 }
 0x3a3   : > { %v16792_v39 = vadd.f32 %v6277_v36, %v5853_v3  ;;  %v5874_v24 = vadd.f32 %v11559_v43, %v17629_v60  ;;  %11765 = vmatprep.mubr.msk.bf16.mxu1 %vm5390_vm11, %v10796_v1  ;;  %v10797_v36 = vcombine.low %v8688_v22, %v8698_v17 }
 0x3a4   : > { %v6293_v10 = vpop.f32.mrf.mxu0  ;;  %v5865_v62 = vpop.f32.mrf.mxu1 }
 0x3a5   : > { %v16800_v21 = vadd.f32 %v11593_v37, %v5874_v24  ;;  %v5866_v45 = vadd.f32 %v5865_v62, %v17630_v57 }
 0x3a6   : > { %v11597_v49 = vpop.f32.mrf.mxu0  ;;  %11800 = vmatmul.mubr.msk.bf16.gmra.mxu0 %vm5390_vm11, %v10862_v8  ;;  %v11560_v52 = vpop.f32.mrf.mxu1 }
 0x3a7   : > { %v16804_v2 = vadd.f32 %v6290_v56, %v5866_v45  ;;  %v5877_v41 = vadd.f32 %v11560_v52, %v17631_v61  ;;  %v17633_v45 = vld [vmem:[#allocation35_spill] sm:$0xff] }
 0x3a8   : > { %v6306_v63 = vpop.f32.mrf.mxu0  ;;  %v5868_v12 = vpop.f32.mrf.mxu1 }
 0x3a9   : > { %v16807_v47 = vadd.f32 %v11594_v18, %v5877_v41  ;;  %v5869_v51 = vadd.f32 %v5868_v12, %v17632_v20 }
 0x3aa   : > { %v11598_v32 = vpop.f32.mrf.mxu0  ;;  %v11563_v37 = vpop.f32.mrf.mxu1  ;;  %11766 = vmatmul.mubr.msk.bf16.gmra.mxu1 %vm5390_vm11, %v10797_v36 }
 0x3ab   : > { %v16811_v1 = vadd.f32 %v6293_v10, %v5869_v51  ;;  %v5890_v27 = vadd.f32 %v11563_v37, %v16422_v25 }
 0x3ac   : > { %v6309_v26 = vpop.f32.mrf.mxu0  ;;  %v5881_v59 = vpop.f32.mrf.mxu1 }
 0x3ad   : > { %v16814_v4 = vadd.f32 %v11597_v49, %v5890_v27  ;;  %v5882_v16 = vadd.f32 %v5881_v59, %v16436_v6 }
 0x3ae   : > { %v11637_v56 = vpop.f32.mrf.mxu0  ;;  %v11564_v33 = vpop.f32.mrf.mxu1 }
 0x3af   : > { %v16817_v54 = vadd.f32 %v6306_v63, %v5882_v16  ;;  %v5893_v35 = vadd.f32 %v11564_v33, %v16459_v55 }
 0x3b0   : > { %v7279_v53 = vpop.f32.mrf.mxu0  ;;  %v5884_v3 = vpop.f32.mrf.mxu1 }
 0x3b1   : > { %v16820_v18 = vadd.f32 %v11598_v32, %v5893_v35  ;;  %v5885_v8 = vadd.f32 %v5884_v3, %v16474_v46 }
 0x3b2   : > { %v11638_v43 = vpop.f32.mrf.mxu0  ;;  %v11603_v25 = vpop.f32.mrf.mxu1 }
 0x3b3   : > { %v16823_v60 = vadd.f32 %v6309_v26, %v5885_v8  ;;  %v6682_v24 = vadd.f32 %v11603_v25, %v16516_v40 }
 0x3b4   : > { %v7282_v10 = vpop.f32.mrf.mxu0  ;;  %v6553_v6 = vpop.f32.mrf.mxu1 }
 0x3b5   : > { %v16826_v22 = vadd.f32 %v11637_v56, %v6682_v24  ;;  %v6680_v17 = vadd.f32 %v6553_v6, %v16531_v38 }
 0x3b6   : > { %v11641_v62 = vpop.f32.mrf.mxu0  ;;  %v11604_v55 = vpop.f32.mrf.mxu1 }
 0x3b7   : > { %v16829_v57 = vadd.f32 %v7279_v53, %v6680_v17  ;;  %v6683_v49 = vadd.f32 %v11604_v55, %v17633_v45 }
 0x3b8   : > { %v7295_v52 = vpop.f32.mrf.mxu0  ;;  %v6556_v46 = vpop.f32.mrf.mxu1 }
 0x3b9   : > { %v16832_v36 = vadd.f32 %v11638_v43, %v6683_v49  ;;  %v6681_v61 = vadd.f32 %v6556_v46, %v16553_v15 }
 0x3ba   : > { %v11642_v41 = vpop.f32.mrf.mxu0  ;;  %v11607_v40 = vpop.f32.mrf.mxu1 }
 0x3bb   : > { %v16835_v63 = vadd.f32 %v7282_v10, %v6681_v61  ;;  %v6686_v12 = vadd.f32 %v11607_v40, %v16568_v48 }
 0x3bc   : > { %v7298_v20 = vpop.f32.mrf.mxu0  ;;  %v6569_v38 = vpop.f32.mrf.mxu1 }
 0x3bd   : > { %v16838_v51 = vadd.f32 %v11641_v62, %v6686_v12  ;;  %v6684_v32 = vadd.f32 %v6569_v38, %v16586_v11 }
 0x3be   : > { %v11645_v37 = vpop.f32.mrf.mxu0  ;;  %v11608_v27 = vpop.f32.mrf.mxu1 }
 0x3bf   : > { %v16841_v26 = vadd.f32 %v7295_v52, %v6684_v32  ;;  %v6687_v59 = vadd.f32 %v11608_v27, %v16599_v44 }
 0x3c0   : > { %v7311_v16 = vpop.f32.mrf.mxu0  ;;  %v6572_v15 = vpop.f32.mrf.mxu1 }
 0x3c1   : > { %v16844_v56 = vadd.f32 %v11642_v41, %v6687_v59  ;;  %v6685_v33 = vadd.f32 %v6572_v15, %v16618_v19 }
 0x3c2   : > { %v11646_v35 = vpop.f32.mrf.mxu0  ;;  %v11611_v48 = vpop.f32.mrf.mxu1 }
 0x3c3   : > { %v16847_v53 = vadd.f32 %v7298_v20, %v6685_v33  ;;  %v6690_v3 = vadd.f32 %v11611_v48, %v16627_v14 }
 0x3c4   : > { %v7314_v8 = vpop.f32.mrf.mxu0  ;;  %v6585_v11 = vpop.f32.mrf.mxu1 }
 0x3c5   : > { %v16850_v43 = vadd.f32 %v11645_v37, %v6690_v3  ;;  %v6688_v25 = vadd.f32 %v6585_v11, %v16648_v7 }
 0x3c6   : > { %v11649_v24 = vpop.f32.mrf.mxu0  ;;  %v11612_v44 = vpop.f32.mrf.mxu1 }
 0x3c7   : > { %v16853_v10 = vadd.f32 %v7311_v16, %v6688_v25  ;;  %v6691_v6 = vadd.f32 %v11612_v44, %v16658_v13 }
 0x3c8   : > { %v7327_v17 = vpop.f32.mrf.mxu0  ;;  %v6588_v19 = vpop.f32.mrf.mxu1 }
 0x3c9   : > { %v16856_v62 = vadd.f32 %v11646_v35, %v6691_v6  ;;  %v6689_v55 = vadd.f32 %v6588_v19, %v16676_v30 }
 0x3ca   : > { %v11650_v45 = vpop.f32.mrf.mxu0  ;;  %v11615_v14 = vpop.f32.mrf.mxu1 }
 0x3cb   : > { %v16859_v49 = vadd.f32 %v7314_v8, %v6689_v55  ;;  %v6694_v52 = vadd.f32 %v11615_v14, %v16686_v31 }
 0x3cc   : > { %v7330_v46 = vpop.f32.mrf.mxu0  ;;  %v6601_v7 = vpop.f32.mrf.mxu1 }
 0x3cd   : > { %v16862_v61 = vadd.f32 %v11649_v24, %v6694_v52  ;;  %v6692_v41 = vadd.f32 %v6601_v7, %v16706_v23 }
 0x3ce   : > { %v11653_v40 = vpop.f32.mrf.mxu0  ;;  %v11616_v13 = vpop.f32.mrf.mxu1 }
 0x3cf   : > { %v16865_v12 = vadd.f32 %v7327_v17, %v6692_v41  ;;  %v6695_v20 = vadd.f32 %v11616_v13, %v16718_v0 }
 0x3d0   : > { %v7343_v38 = vpop.f32.mrf.mxu0  ;;  %v6604_v30 = vpop.f32.mrf.mxu1 }
 0x3d1   : > { %v16868_v32 = vadd.f32 %v11650_v45, %v6695_v20  ;;  %v6693_v37 = vadd.f32 %v6604_v30, %v16724_v5 }
 0x3d2   : > { %v11654_v27 = vpop.f32.mrf.mxu0  ;;  %v11619_v31 = vpop.f32.mrf.mxu1 }
 0x3d3   : > { %v16871_v59 = vadd.f32 %v7330_v46, %v6693_v37  ;;  %v6698_v16 = vadd.f32 %v11619_v31, %v16735_v28 }
 0x3d4   : > { %v7346_v15 = vpop.f32.mrf.mxu0  ;;  %v6617_v23 = vpop.f32.mrf.mxu1 }
 0x3d5   : > { %v16874_v33 = vadd.f32 %v11653_v40, %v6698_v16  ;;  %v6696_v35 = vadd.f32 %v6617_v23, %v16748_v29 }
 0x3d6   : > { %v11657_v48 = vpop.f32.mrf.mxu0  ;;  %v11620_v0 = vpop.f32.mrf.mxu1 }
 0x3d7   : > { %17634 = vst [vmem:[#allocation36_spill] sm:$0xff] %v16874_v33  ;;  %v16877_v3 = vadd.f32 %v7343_v38, %v6696_v35  ;;  %v6699_v8 = vadd.f32 %v11620_v0, %v16764_v9 }
 0x3d8   : > { %v7359_v11 = vpop.f32.mrf.mxu0  ;;  %v6620_v5 = vpop.f32.mrf.mxu1 }
 0x3d9   : > { %17635 = vst [vmem:[#allocation29_spill] sm:$0xff] %v16877_v3  ;;  %v16880_v25 = vadd.f32 %v11654_v27, %v6699_v8  ;;  %v6697_v24 = vadd.f32 %v6620_v5, %v16771_v58 }
 0x3da   : > { %v11658_v44 = vpop.f32.mrf.mxu0  ;;  %v11623_v28 = vpop.f32.mrf.mxu1 }
 0x3db   : > { %17636 = vst [vmem:[#allocation31_spill] sm:$0xff] %v16880_v25  ;;  %v16883_v6 = vadd.f32 %v7346_v15, %v6697_v24  ;;  %v6702_v17 = vadd.f32 %v11623_v28, %v16776_v34 }
 0x3dc   : > { %v7362_v19 = vpop.f32.mrf.mxu0  ;;  %v6633_v29 = vpop.f32.mrf.mxu1 }
 0x3dd   : > { %17637 = vst [vmem:[#allocation39_spill] sm:$0xff] %v16883_v6  ;;  %v16886_v55 = vadd.f32 %v11657_v48, %v6702_v17  ;;  %v6700_v45 = vadd.f32 %v6633_v29, %v16785_v50 }
 0x3de   : > { %v11661_v14 = vpop.f32.mrf.mxu0  ;;  %v11624_v9 = vpop.f32.mrf.mxu1 }
 0x3df   : > { %17638 = vst [vmem:[#allocation41_spill] sm:$0xff] %v16886_v55  ;;  %v16889_v52 = vadd.f32 %v7359_v11, %v6700_v45  ;;  %v6703_v46 = vadd.f32 %v11624_v9, %v16788_v42 }
 0x3e0   : > { %v7375_v7 = vpop.f32.mrf.mxu0  ;;  %v6636_v58 = vpop.f32.mrf.mxu1 }
 0x3e1   : > { %17639 = vst [vmem:[#allocation46_spill] sm:$0xff] %v16889_v52  ;;  %v16892_v41 = vadd.f32 %v11658_v44, %v6703_v46  ;;  %v6701_v40 = vadd.f32 %v6636_v58, %v16792_v39 }
 0x3e2   : > { %v11662_v13 = vpop.f32.mrf.mxu0  ;;  %v11627_v34 = vpop.f32.mrf.mxu1 }
 0x3e3   : > { %17640 = vst [vmem:[#allocation48_spill] sm:$0xff] %v16892_v41  ;;  %v16895_v20 = vadd.f32 %v7362_v19, %v6701_v40  ;;  %v6706_v38 = vadd.f32 %v11627_v34, %v16800_v21 }
 0x3e4   : > { %v7378_v30 = vpop.f32.mrf.mxu0  ;;  %v6649_v50 = vpop.f32.mrf.mxu1 }
 0x3e5   : > { %17641 = vst [vmem:[#allocation49_spill] sm:$0xff] %v16895_v20  ;;  %v16898_v37 = vadd.f32 %v11661_v14, %v6706_v38  ;;  %v6704_v27 = vadd.f32 %v6649_v50, %v16804_v2 }
 0x3e6   : > { %v11665_v31 = vpop.f32.mrf.mxu0  ;;  %v11628_v42 = vpop.f32.mrf.mxu1 }
 0x3e7   : > { %17642 = vst [vmem:[#allocation32_spill] sm:$0xff] %v16898_v37  ;;  %v16901_v16 = vadd.f32 %v7375_v7, %v6704_v27  ;;  %v6707_v15 = vadd.f32 %v11628_v42, %v16807_v47 }
 0x3e8   : > { %v7391_v23 = vpop.f32.mrf.mxu0  ;;  %v6652_v39 = vpop.f32.mrf.mxu1 }
 0x3e9   : > { %17643 = vst [vmem:[#allocation30_spill] sm:$0xff] %v16901_v16  ;;  %v16904_v35 = vadd.f32 %v11662_v13, %v6707_v15  ;;  %v6705_v48 = vadd.f32 %v6652_v39, %v16811_v1 }
 0x3ea   : > { %v11666_v0 = vpop.f32.mrf.mxu0  ;;  %v11631_v21 = vpop.f32.mrf.mxu1 }
 0x3eb   : > { %17644 = vst [vmem:[#allocation33_spill] sm:$0xff] %v16904_v35  ;;  %v16907_v8 = vadd.f32 %v7378_v30, %v6705_v48  ;;  %v6710_v11 = vadd.f32 %v11631_v21, %v16814_v4 }
 0x3ec   : > { %v7394_v5 = vpop.f32.mrf.mxu0  ;;  %v6665_v2 = vpop.f32.mrf.mxu1 }
 0x3ed   : > { %17645 = vst [vmem:[#allocation37_spill] sm:$0xff] %v16907_v8  ;;  %v16910_v24 = vadd.f32 %v11665_v31, %v6710_v11  ;;  %v6708_v44 = vadd.f32 %v6665_v2, %v16817_v54  ;;  %v9463_v11 = vld [vmem:[#allocation2] sm:$0x1] }
 0x3ee   : > { %v16913_v28 = vpop.f32.mrf.mxu0  ;;  %v11632_v47 = vpop.f32.mrf.mxu1 }
 0x3ef   : > { %17646 = vst [vmem:[#allocation38_spill] sm:$0xff] %v16910_v24  ;;  %v16915_v17 = vadd.f32 %v7391_v23, %v6708_v44  ;;  %v6711_v19 = vadd.f32 %v11632_v47, %v16820_v18  ;;  %v9464_v47 = vmul.f32 0.001953125, %v9463_v11 }
 0x3f0   : > { %v16918_v1 = vpop.f32.mrf.mxu0  ;;  %v6668_v29 = vpop.f32.mrf.mxu1 }
 0x3f1   : > { %17647 = vst [vmem:[#allocation34_spill] sm:$0xff] %v16915_v17  ;;  %v16920_v45 = vadd.f32 %v11666_v0, %v6711_v19  ;;  %v6709_v4 = vadd.f32 %v6668_v29, %v16823_v60  ;;  %v9465_v29 = vld [vmem:[#allocation3] sm:$0x1]  ;;  %v9467_v24 = vmul.f32 %v9464_v47, %v9464_v47 }
 0x3f2   : > { %v16923_v14 = vpop.f32.mrf.mxu0  ;;  %v16925_v9 = vpop.f32.mrf.mxu1  ;;  %v9466_v17 = vmul.f32 0.001953125, %v9465_v29 }
 0x3f3   : > { %17648 = vst [vmem:[#allocation40_spill] sm:$0xff] %v16920_v45  ;;  %v16927_v46 = vadd.f32 %v7394_v5, %v6709_v4 }
 0x3f4   : > { %v16929_v54 = vpop.f32.mrf.mxu0  ;;  %v16931_v7 = vpop.f32.mrf.mxu1  ;;  %v9468_v11 = vsub.f32 %v9466_v17, %v9467_v24 }
 0x3f5   : > { %17649 = vst [vmem:[#allocation42_spill] sm:$0xff] %v16927_v46 }
 0x3f6   : > { %v16933_v58 = vpop.f32.mrf.mxu0  ;;  %v16935_v18 = vpop.f32.mrf.mxu1  ;;  %v9470_v6 = vadd.f32 1e-05, %v9468_v11 }
 0x3f8   : > { %v16937_v40 = vpop.f32.mrf.mxu0  ;;  %v16939_v13 = vpop.f32.mrf.mxu1  ;;  %12000 = vrsqrt.f32 %v9470_v6 }
 0x3fa   : > { %v16941_v34 = vpop.f32.mrf.mxu0  ;;  %v16943_v60 = vpop.f32.mrf.mxu1 }
 0x3fc   : > { %v16945_v38 = vpop.f32.mrf.mxu0  ;;  %v16947_v30 = vpop.f32.mrf.mxu1 }
 0x3fe   : > { %v16949_v50 = vpop.f32.mrf.mxu0  ;;  %v16951_v27 = vpop.f32.mrf.mxu1 }
 0x400   : > { %v16953_v31 = vpop.f32.mrf.mxu0  ;;  %v16955_v42 = vpop.f32.mrf.mxu1 }
 0x402   : > { %v16957_v15 = vpop.f32.mrf.mxu0  ;;  %v16959_v23 = vpop.f32.mrf.mxu1 }
 0x404   : > { %v16961_v39 = vpop.f32.mrf.mxu0  ;;  %v16963_v48 = vpop.f32.mrf.mxu1 }
 0x406   : > { %v16965_v0 = vpop.f32.mrf.mxu0  ;;  %v16967_v21 = vpop.f32.mrf.mxu1 }
 0x408   : > { %v16969_v5 = vpop.f32.mrf.mxu0  ;;  %v16971_v2 = vpop.f32.mrf.mxu1 }
 0x40a   : > { %v16973_v44 = vpop.f32.mrf.mxu0  ;;  %v16975_v19 = vpop.f32.mrf.mxu1 }
 0x40c   : > { %v16977_v4 = vpop.f32.mrf.mxu0  ;;  %v16979_v46 = vpop.f32.mrf.mxu1 }
 0x40d   : > { %17650 = vst [vmem:[#allocation43_spill] sm:$0xff] %v16977_v4 }
 0x40e   : > { %v16981_v45 = vpop.f32.mrf.mxu0  ;;  %v16983_v8 = vpop.f32.mrf.mxu1 }
 0x40f   : > { %17651 = vst [vmem:[#allocation44_spill] sm:$0xff] %v16981_v45 }
 0x410   : > { %v16985_v35 = vpop.f32.mrf.mxu0  ;;  %v16987_v16 = vpop.f32.mrf.mxu1 }
 0x411   : > { %17652 = vst [vmem:[#allocation45_spill] sm:$0xff] %v16985_v35 }
 0x412   : > { %v16989_v37 = vpop.f32.mrf.mxu0  ;;  %v16991_v20 = vpop.f32.mrf.mxu1 }
 0x413   : > { %17653 = vst [vmem:[#allocation47_spill] sm:$0xff] %v16989_v37  ;;  %17654 = vst [vmem:[#allocation35_spill] sm:$0xff] %v16991_v20 }
 0x414   : > { %v16993_v41 = vpop.f32.mrf.mxu0  ;;  %v16995_v52 = vpop.f32.mrf.mxu1 }
 0x415   : > { %17655 = vst [vmem:[#allocation50_spill] sm:$0xff] %v16993_v41  ;;  %17656 = vst [vmem:[#allocation51_spill] sm:$0xff] %v16995_v52 }
 0x416   : > { %v16997_v55 = vpop.f32.mrf.mxu0  ;;  %v16999_v29 = vpop.f32.mrf.mxu1 }
 0x417   : > { %17657 = vst [vmem:[#allocation52_spill] sm:$0xff] %v16997_v55  ;;  %17658 = vst [vmem:[#allocation53_spill] sm:$0xff] %v16999_v29 }
 0x418   : > { %v17001_v45 = vpop.f32.mrf.mxu0  ;;  %v17003_v4 = vpop.f32.mrf.mxu1 }
 0x419   : > { %17659 = vst [vmem:[#allocation54_spill] sm:$0xff] %v17001_v45  ;;  %17660 = vst [vmem:[#allocation55_spill] sm:$0xff] %v17003_v4 }
 0x41a   : > { %v17005_v35 = vpop.f32.mrf.mxu0  ;;  %v17007_v37 = vpop.f32.mrf.mxu1 }
 0x41b   : > { %17661 = vst [vmem:[#allocation56_spill] sm:$0xff] %v17005_v35  ;;  %17662 = vst [vmem:[#allocation57_spill] sm:$0xff] %v17007_v37 }
 0x41c   : > { %v17009_v24 = vpop.f32.mrf.mxu0  ;;  %v17011_v17 = vpop.f32.mrf.mxu1 }
 0x41d   : > { %17663 = vst [vmem:[#allocation58_spill] sm:$0xff] %v17009_v24  ;;  %17664 = vst [vmem:[#allocation59_spill] sm:$0xff] %v17011_v17  ;;  %v12001_v24 = vpop.eup %12000 }
 0x41e   : > { %v17013_v41 = vpop.f32.mrf.mxu0  ;;  %v17015_v25 = vpop.f32.mrf.mxu1 }
 0x41f   : > { %17665 = vst [vmem:[#allocation60_spill] sm:$0xff] %v17013_v41  ;;  %17666 = vst [vmem:[#allocation61_spill] sm:$0xff] %v17015_v25  ;;  %v9469_v41 = vld [vmem:[%s17291_s2] sm:$0x1] }
 0x420   : > { %v17017_v11 = vpop.f32.mrf.mxu0  ;;  %v17019_v55 = vpop.f32.mrf.mxu1 }
 0x421   : > { %17667 = vst [vmem:[#allocation62_spill] sm:$0xff] %v17017_v11  ;;  %17668 = vst [vmem:[#allocation63_spill] sm:$0xff] %v17019_v55  ;;  %v9477_v55 = vlaneseq }
 0x422   : > { %v17021_v45 = vpop.f32.mrf.mxu0  ;;  %v17023_v4 = vpop.f32.mrf.mxu1 }
 0x423   : > { %17669 = vst [vmem:[#allocation64_spill] sm:$0xff] %v17021_v45  ;;  %17670 = vst [vmem:[#allocation65_spill] sm:$0xff] %v17023_v4  ;;  %v9472_v4 = vmul.f32 %v12001_v24, %v9469_v41  ;;  %v7876_v41 = vadd.f32 %v16931_v7, %v16829_v57 }
 0x424   : > { %v17025_v35 = vpop.f32.mrf.mxu0  ;;  %v17027_v6 = vpop.f32.mrf.mxu1 }
 0x425   : > { %17671 = vst [vmem:[#allocation66_spill] sm:$0xff] %v17025_v35  ;;  %17672 = vst [vmem:[#allocation67_spill] sm:$0xff] %v17027_v6  ;;  %v9474_v3 = vmul.f32 %v9472_v4, %v9464_v47 }
 0x426   : > { %v17029_v37 = vpop.f32.mrf.mxu0  ;;  %v17031_v17 = vpop.f32.mrf.mxu1 }
 0x427   : > { %17673 = vst [vmem:[#allocation68_spill] sm:$0xff] %v17029_v37  ;;  %17674 = vst [vmem:[#allocation69_spill] sm:$0xff] %v17031_v17  ;;  %v9478_v37 = vshrl.u32 %v9477_v55, 7  ;;  %v7878_v17 = vadd.f32 %v16925_v9, %v16826_v22  ;;  %v7879_v22 = vadd.f32 %v16935_v18, %v16832_v36 }
 0x428   : > { %v17036_v11 = vpop.f32.mrf.mxu0  ;;  %v17038_v25 = vpop.f32.mrf.mxu1 }
 0x429   : > { %17675 = vst [vmem:[#allocation70_spill] sm:$0xff] %v17036_v11  ;;  %17676 = vst [vmem:[#allocation71_spill] sm:$0xff] %v17038_v25  ;;  %v9473_v11 = vld [vmem:[%s17292_s3] sm:$0x1]  ;;  %v9479_v24 = vsub.s32 0, %v9478_v37  ;;  %v8237_v55 = vadd.f32 %v16913_v28, %v7878_v17  ;;  %v8238_v7 = vadd.f32 %v16923_v14, %v7879_v22  ;;  %v7886_v22 = vadd.f32 %v16959_v23, %v16850_v43 }
 0x42a   : > { %v17040_v45 = vpop.f32.mrf.mxu0  ;;  %v17042_v35 = vpop.f32.mrf.mxu1  ;;  %v9475_v9 = vsub.f32 %v9473_v11, %v9474_v3  ;;  %v7882_v3 = vadd.f32 %v16943_v60, %v16838_v51 }
 0x42b   : > { %17677 = vst [vmem:[#allocation72_spill] sm:$0xff] %v17040_v45  ;;  %17678 = vst [vmem:[#allocation73_spill] sm:$0xff] %v17042_v35  ;;  %v7877_v35 = vadd.f32 %v16939_v13, %v16835_v63  ;;  %v17065_v33 = vrot.slane %v9472_v4, %v9479_v24 }
 0x42c   : > { %v17044_v6 = vpop.f32.mrf.mxu0  ;;  %v17046_v29 = vpop.f32.mrf.mxu1  ;;  %v17068_v28 = vrot.slane %v9475_v9, %v9479_v24 }
 0x42d   : > { %17679 = vst [vmem:[#allocation74_spill] sm:$0xff] %v17044_v6  ;;  %17680 = vst [vmem:[#allocation75_spill] sm:$0xff] %v17046_v29  ;;  %v8236_v63 = vadd.f32 %v16929_v54, %v7877_v35 }
 0x42e   : > { %v11773_v52 = vpop.f32.mrf.mxu0  ;;  %v17050_v20 = vpop.f32.mrf.mxu1 }
 0x42f   : > { %17681 = vst [vmem:[#allocation76_spill] sm:$0xff] %v17050_v20  ;;  %v8235_v20 = vadd.f32 %v16918_v1, %v7876_v41  ;;  %v7880_v1 = vadd.f32 %v16947_v30, %v16841_v26  ;;  %v8241_v26 = vadd.f32 %v16933_v58, %v7882_v3 }
 0x430   : > { %v9304_v45 = vpop.f32.mrf.mxu0  ;;  %v17057_v6 = vpop.f32.mrf.mxu1 }
 0x431   : > { %17682 = vst [vmem:[#allocation77_spill] sm:$0xff] %v17057_v6  ;;  %v8239_v35 = vadd.f32 %v16937_v40, %v7880_v1 }
 0x432   : > { %v11774_v47 = vpop.f32.mrf.mxu0  ;;  %v11739_v29 = vpop.f32.mrf.mxu1 }
 0x433   : > { %v8963_v25 = vadd.f32 %v11739_v29, %v8237_v55 }
 0x434   : > { %v9307_v57 = vpop.f32.mrf.mxu0  ;;  %v8834_v37 = vpop.f32.mrf.mxu1 }
 0x435   : > { %v9433_v6 = vadd.f32 %v11773_v52, %v8963_v25  ;;  %v8961_v17 = vadd.f32 %v8834_v37, %v8235_v20  ;;  %v7883_v25 = vadd.f32 %v16951_v27, %v16844_v56 }
 0x436   : > { %v11777_v36 = vpop.f32.mrf.mxu0  ;;  %v11740_v18 = vpop.f32.mrf.mxu1 }
 0x437   : > { %v9484_v13 = vmul.f32 %v17065_v33, %v9433_v6  ;;  %v9431_v4 = vadd.f32 %v9304_v45, %v8961_v17  ;;  %v8964_v29 = vadd.f32 %v11740_v18, %v8238_v7  ;;  %v7881_v45 = vadd.f32 %v16955_v42, %v16847_v53 }
 0x438   : > { %v9320_v11 = vpop.f32.mrf.mxu0  ;;  %v8837_v52 = vpop.f32.mrf.mxu1  ;;  %v8242_v55 = vadd.f32 %v16941_v34, %v7883_v25  ;;  %v7887_v34 = vadd.f32 %v16967_v21, %v16856_v62 }
 0x439   : > { %v9522_v20 = vadd.f32 %v17068_v28, %v9484_v13  ;;  %v9482_v14 = vmul.f32 %v17065_v33, %v9431_v4  ;;  %v9434_v51 = vadd.f32 %v11774_v47, %v8964_v29  ;;  %v8962_v60 = vadd.f32 %v8837_v52, %v8236_v63 }
 0x43a   : > { %v11778_v41 = vpop.f32.mrf.mxu0  ;;  %v11743_v54 = vpop.f32.mrf.mxu1  ;;  %v8240_v7 = vadd.f32 %v16945_v38, %v7881_v45  ;;  %v8245_v13 = vadd.f32 %v16949_v50, %v7886_v22  ;;  %v8246_v25 = vadd.f32 %v16957_v15, %v7887_v34  ;;  %v17684_v34 = vld [vmem:[#allocation35_spill] sm:$0xff] }
 0x43b   : > { %v9554_v30 = vmax.f32 %v9522_v20, 0.0  ;;  %v9520_v6 = vadd.f32 %v17068_v28, %v9482_v14  ;;  %v9485_v56 = vmul.f32 %v17065_v33, %v9434_v51  ;;  %v9432_v27 = vadd.f32 %v9307_v57, %v8962_v60 }
 0x43c   : > { %v9323_v24 = vpop.f32.mrf.mxu0  ;;  %v8967_v9 = vadd.f32 %v11743_v54, %v8241_v26  ;;  %v8850_v58 = vpop.f32.mrf.mxu1  ;;  %v7884_v57 = vadd.f32 %v16963_v48, %v16853_v10  ;;  %v7890_v26 = vadd.f32 %v16975_v19, %v16862_v61 }
 0x43d   : > { %9586 = vst [vmem:[#allocation4 + $0x10] sm:$0xff] %v9554_v30  ;;  %v9552_v40 = vmax.f32 %v9520_v6, 0.0  ;;  %v9523_v47 = vadd.f32 %v17068_v28, %v9485_v56  ;;  %v9483_v53 = vmul.f32 %v17065_v33, %v9432_v27  ;;  %v8965_v42 = vadd.f32 %v8850_v58, %v8239_v35 }
 0x43e   : > { %v11781_v37 = vpop.f32.mrf.mxu0  ;;  %v9437_v17 = vadd.f32 %v11777_v36, %v8967_v9  ;;  %v11744_v43 = vpop.f32.mrf.mxu1  ;;  %v8243_v36 = vadd.f32 %v16953_v31, %v7884_v57  ;;  %v7888_v31 = vadd.f32 %v16979_v46, %v16865_v12  ;;  %v17683_v57 = vld [vmem:[#allocation36_spill] sm:$0xff] }
 0x43f   : > { %9584 = vst [vmem:[#allocation4] sm:$0xff] %v9552_v40  ;;  %v9555_v23 = vmax.f32 %v9523_v47, 0.0  ;;  %v9521_v3 = vadd.f32 %v17068_v28, %v9483_v53  ;;  %v9435_v1 = vadd.f32 %v9320_v11, %v8965_v42  ;;  %v8968_v18 = vadd.f32 %v11744_v43, %v8242_v55 }
 0x440   : > { %v9336_v63 = vpop.f32.mrf.mxu0  ;;  %v9488_v4 = vmul.f32 %v17065_v33, %v9437_v17  ;;  %v8853_v38 = vpop.f32.mrf.mxu1  ;;  %v7885_v11 = vadd.f32 %v16971_v2, %v16859_v49  ;;  %v7891_v49 = vadd.f32 %v16983_v8, %v16868_v32  ;;  %v8247_v55 = vadd.f32 %v16969_v5, %v7888_v31 }
 0x441   : > { %9587 = vst [vmem:[#allocation4 + $0x18] sm:$0xff] %v9555_v23  ;;  %v9553_v29 = vmax.f32 %v9521_v3, 0.0  ;;  %v9486_v10 = vmul.f32 %v17065_v33, %v9435_v1  ;;  %v9438_v48 = vadd.f32 %v11778_v41, %v8968_v18  ;;  %v8966_v62 = vadd.f32 %v8853_v38, %v8240_v7 }
 0x442   : > { %v11782_v21 = vpop.f32.mrf.mxu0  ;;  %v9526_v52 = vadd.f32 %v17068_v28, %v9488_v4  ;;  %v11747_v50 = vpop.f32.mrf.mxu1  ;;  %v8244_v56 = vadd.f32 %v16961_v39, %v7885_v11  ;;  %v8250_v22 = vadd.f32 %v16973_v44, %v7891_v49  ;;  %v7889_v47 = vadd.f32 %v16987_v16, %v16871_v59  ;;  %v17686_v4 = vld [vmem:[#allocation51_spill] sm:$0xff] }
 0x443   : > { %9585 = vst [vmem:[#allocation4 + $0x8] sm:$0xff] %v9553_v29  ;;  %v9524_v20 = vadd.f32 %v17068_v28, %v9486_v10  ;;  %v9489_v14 = vmul.f32 %v17065_v33, %v9438_v48  ;;  %v9436_v51 = vadd.f32 %v9323_v24, %v8966_v62  ;;  %v8971_v60 = vadd.f32 %v11747_v50, %v8245_v13  ;;  %v17685_v13 = vld [vmem:[#allocation29_spill] sm:$0xff]  ;;  %v17687_v29 = vld [vmem:[#allocation31_spill] sm:$0xff] }
 0x444   : > { %v9339_v41 = vpop.f32.mrf.mxu0  ;;  %v9558_v15 = vmax.f32 %v9526_v52, 0.0  ;;  %v8866_v2 = vpop.f32.mrf.mxu1  ;;  %v8249_v24 = vadd.f32 %v16965_v0, %v7890_v26  ;;  %v7894_v0 = vadd.f32 %v17684_v34, %v17683_v57  ;;  %v7892_v38 = vadd.f32 %v17686_v4, %v17685_v13  ;;  %v17688_v10 = vld [vmem:[#allocation53_spill] sm:$0xff] }
 0x445   : > { %v9556_v35 = vmax.f32 %v9524_v20, 0.0  ;;  %v9527_v45 = vadd.f32 %v17068_v28, %v9489_v14  ;;  %v9487_v54 = vmul.f32 %v17065_v33, %v9436_v51  ;;  %v9441_v30 = vadd.f32 %v11781_v37, %v8971_v60  ;;  %v17689_v14 = vld [vmem:[#allocation43_spill] sm:$0xff] }
 0x446   : > { %v11785_v6 = vpop.f32.mrf.mxu0  ;;  %9590 = vst [vmem:[#allocation4 + $0x30] sm:$0xff] %v9558_v15  ;;  %v8969_v27 = vadd.f32 %v8866_v2, %v8243_v36  ;;  %v11748_v61 = vpop.f32.mrf.mxu1  ;;  %v7895_v48 = vadd.f32 %v17688_v10, %v17687_v29  ;;  %v8248_v51 = vadd.f32 %v17689_v14, %v7889_v47 }
 0x447   : > { %9588 = vst [vmem:[#allocation4 + $0x20] sm:$0xff] %v9556_v35  ;;  %v9559_v19 = vmax.f32 %v9527_v45, 0.0  ;;  %v9525_v12 = vadd.f32 %v17068_v28, %v9487_v54  ;;  %v9492_v32 = vmul.f32 %v17065_v33, %v9441_v30  ;;  %v8972_v8 = vadd.f32 %v11748_v61, %v8246_v25  ;;  %v17690_v45 = vld [vmem:[#allocation44_spill] sm:$0xff]  ;;  %v17691_v30 = vld [vmem:[#allocation45_spill] sm:$0xff] }
 0x448   : > { %v9352_v46 = vpop.f32.mrf.mxu0  ;;  %v9618_v9 = vld [vmem:[#allocation4 + $0x10] ss:$2 sm:$0xff]  ;;  %v9650_v58 = vld [vmem:[#allocation4 + $0x11] ss:$2 sm:$0xff]  ;;  %v9439_v39 = vadd.f32 %v9336_v63, %v8969_v27  ;;  %v8869_v40 = vpop.f32.mrf.mxu1  ;;  %v8253_v54 = vadd.f32 %v17690_v45, %v7894_v0 }
 0x449   : > { %9591 = vst [vmem:[#allocation4 + $0x38] sm:$0xff] %v9559_v19  ;;  %v9557_v53 = vmax.f32 %v9525_v12, 0.0  ;;  %v9530_v42 = vadd.f32 %v17068_v28, %v9492_v32  ;;  %v9442_v37 = vadd.f32 %v11782_v21, %v8972_v8  ;;  %v9680_v17 = vmax.f32 %v9618_v9, %v9650_v58  ;;  %v17693_v8 = vld [vmem:[#allocation39_spill] sm:$0xff] }
 0x44a   : > { %v11786_v7 = vpop.f32.mrf.mxu0  ;;  %v9616_v5 = vld [vmem:[#allocation4] ss:$2 sm:$0xff]  ;;  %v9648_v43 = vld [vmem:[#allocation4 + $0x1] ss:$2 sm:$0xff]  ;;  %v9490_v44 = vmul.f32 %v17065_v33, %v9439_v39  ;;  %v8970_v23 = vadd.f32 %v8869_v40, %v8244_v56  ;;  %v11751_v3 = vpop.f32.mrf.mxu1  ;;  %v8251_v56 = vadd.f32 %v17691_v30, %v7892_v38 }
 0x44b   : > { %v9679_v1 = vmax.f32 %v9616_v5, %v9648_v43  ;;  %9589 = vst [vmem:[#allocation4 + $0x28] sm:$0xff] %v9557_v53  ;;  %v9562_v18 = vmax.f32 %v9530_v42, 0.0  ;;  %v9493_v59 = vmul.f32 %v17065_v33, %v9442_v37  ;;  %v8975_v16 = vadd.f32 %v11751_v3, %v8249_v24  ;;  %v17694_v24 = vld [vmem:[#allocation55_spill] sm:$0xff]  ;;  %v17695_v39 = vld [vmem:[#allocation41_spill] sm:$0xff]  ;;  %v17697_v3 = vld [vmem:[#allocation46_spill] sm:$0xff] }
 0x44c   : > { %v9355_v63 = vpop.f32.mrf.mxu0  ;;  %v9528_v62 = vadd.f32 %v17068_v28, %v9490_v44  ;;  %v9440_v21 = vadd.f32 %v9339_v41, %v8970_v23  ;;  %v8882_v36 = vpop.f32.mrf.mxu1  ;;  %v17696_v40 = vld [vmem:[#allocation57_spill] sm:$0xff] }
 0x44d   : > { %v9695_v25 = vmax.f32 %v9679_v1, %v9680_v17  ;;  %9594 = vst [vmem:[#allocation4 + $0x50] sm:$0xff] %v9562_v18  ;;  %v9531_v11 = vadd.f32 %v17068_v28, %v9493_v59  ;;  %v9445_v52 = vadd.f32 %v11785_v6, %v8975_v16  ;;  %v8973_v50 = vadd.f32 %v8882_v36, %v8247_v55  ;;  %v17692_v6 = vld [vmem:[#allocation47_spill] sm:$0xff]  ;;  %v17699_v18 = vld [vmem:[#allocation48_spill] sm:$0xff]  ;;  %v17700_v59 = vld [vmem:[#allocation61_spill] sm:$0xff] }
 0x44e   : > { %v11789_v20 = vpop.f32.mrf.mxu0  ;;  %v9560_v60 = vmax.f32 %v9528_v62, 0.0  ;;  %v9491_v26 = vmul.f32 %v17065_v33, %v9440_v21  ;;  %v11752_v31 = vpop.f32.mrf.mxu1  ;;  %v8254_v27 = vadd.f32 %v17692_v6, %v7895_v48  ;;  %v7893_v55 = vadd.f32 %v17694_v24, %v17693_v8  ;;  %v17698_v1 = vld [vmem:[#allocation59_spill] sm:$0xff]  ;;  %v17707_v8 = vld [vmem:[#allocation32_spill] sm:$0xff]  ;;  %v17708_v24 = vld [vmem:[#allocation65_spill] sm:$0xff] }
 0x44f   : > { %9703 = vst [vmem:[%s12208_s13] sm:$0xff] %v9695_v25  ;;  %v9563_v49 = vmax.f32 %v9531_v11, 0.0  ;;  %v9496_v15 = vmul.f32 %v17065_v33, %v9445_v52  ;;  %v9443_v2 = vadd.f32 %v9352_v46, %v8973_v50  ;;  %v8976_v41 = vadd.f32 %v11752_v31, %v8250_v22  ;;  %v17701_v52 = vld [vmem:[#allocation50_spill] sm:$0xff] }
 0x450   : > { %v9368_v35 = vpop.f32.mrf.mxu0  ;;  %v9622_v61 = vld [vmem:[#allocation4 + $0x30] ss:$2 sm:$0xff]  ;;  %v9654_v19 = vld [vmem:[#allocation4 + $0x31] ss:$2 sm:$0xff]  ;;  %9592 = vst [vmem:[#allocation4 + $0x40] sm:$0xff] %v9560_v60  ;;  %v9529_v12 = vadd.f32 %v17068_v28, %v9491_v26  ;;  %v8885_v32 = vpop.f32.mrf.mxu1  ;;  %v7898_v47 = vadd.f32 %v17696_v40, %v17695_v39  ;;  %v7899_v16 = vadd.f32 %v17700_v59, %v17699_v18  ;;  %v8252_v50 = vadd.f32 %v17701_v52, %v7893_v55 }
 0x451   : > { %9595 = vst [vmem:[#allocation4 + $0x58] sm:$0xff] %v9563_v49  ;;  %v9534_v46 = vadd.f32 %v17068_v28, %v9496_v15  ;;  %v9494_v22 = vmul.f32 %v17065_v33, %v9443_v2  ;;  %v9446_v9 = vadd.f32 %v11786_v7, %v8976_v41  ;;  %v9682_v53 = vmax.f32 %v9622_v61, %v9654_v19  ;;  %v17702_v26 = vld [vmem:[#allocation52_spill] sm:$0xff]  ;;  %v17703_v49 = vld [vmem:[#allocation54_spill] sm:$0xff]  ;;  %v17705_v19 = vld [vmem:[#allocation49_spill] sm:$0xff] }
 0x452   : > { %v11790_v58 = vpop.f32.mrf.mxu0  ;;  %v9620_v42 = vld [vmem:[#allocation4 + $0x20] ss:$2 sm:$0xff]  ;;  %v9652_v37 = vld [vmem:[#allocation4 + $0x21] ss:$2 sm:$0xff]  ;;  %v9561_v57 = vmax.f32 %v9529_v12, 0.0  ;;  %v8974_v34 = vadd.f32 %v8885_v32, %v8248_v51  ;;  %v11755_v0 = vpop.f32.mrf.mxu1  ;;  %v7896_v7 = vadd.f32 %v17698_v1, %v17697_v3  ;;  %v8257_v31 = vadd.f32 %v17702_v26, %v7898_v47  ;;  %v17706_v12 = vld [vmem:[#allocation63_spill] sm:$0xff] }
 0x453   : > { %v9681_v17 = vmax.f32 %v9620_v42, %v9652_v37  ;;  %v9566_v5 = vmax.f32 %v9534_v46, 0.0  ;;  %v9532_v43 = vadd.f32 %v17068_v28, %v9494_v22  ;;  %v9497_v44 = vmul.f32 %v17065_v33, %v9446_v9 }
 0x454   : > { %v9371_v23 = vpop.f32.mrf.mxu0  ;;  %9593 = vst [vmem:[#allocation4 + $0x48] sm:$0xff] %v9561_v57  ;;  %v9444_v13 = vadd.f32 %v9355_v63, %v8974_v34  ;;  %v8979_v4 = vadd.f32 %v11755_v0, %v8253_v54  ;;  %v8898_v38 = vpop.f32.mrf.mxu1  ;;  %v8255_v15 = vadd.f32 %v17703_v49, %v7896_v7  ;;  %v17704_v54 = vld [vmem:[#allocation56_spill] sm:$0xff]  ;;  %v7897_v32 = vadd.f32 %v17706_v12, %v17705_v19  ;;  %v17709_v57 = vld [vmem:[#allocation30_spill] sm:$0xff]  ;;  %v17710_v34 = vld [vmem:[#allocation67_spill] sm:$0xff] }
 0x455   : > { %v9696_v29 = vmax.f32 %v9681_v17, %v9682_v53  ;;  %9598 = vst [vmem:[#allocation4 + $0x70] sm:$0xff] %v9566_v5  ;;  %v9564_v10 = vmax.f32 %v9532_v43, 0.0  ;;  %v9535_v48 = vadd.f32 %v17068_v28, %v9497_v44  ;;  %v8977_v62 = vadd.f32 %v8898_v38, %v8251_v56  ;;  %v17719_v19 = vld [vmem:[#allocation38_spill] sm:$0xff]  ;;  %v17720_v12 = vld [vmem:[#allocation73_spill] sm:$0xff] }
 0x456   : > { %v11793_v21 = vpop.f32.mrf.mxu0  ;;  %v9495_v36 = vmul.f32 %v17065_v33, %v9444_v13  ;;  %v9449_v25 = vadd.f32 %v11789_v20, %v8979_v4  ;;  %v11756_v11 = vpop.f32.mrf.mxu1  ;;  %v8258_v20 = vadd.f32 %v17704_v54, %v7899_v16  ;;  %v7902_v55 = vadd.f32 %v17708_v24, %v17707_v8  ;;  %v17711_v16 = vld [vmem:[#allocation33_spill] sm:$0xff]  ;;  %v17716_v54 = vld [vmem:[#allocation64_spill] sm:$0xff] }
 0x457   : > { %9704 = vst [vmem:[%s12208_s13 + $0x8] sm:$0xff] %v9696_v29  ;;  %9596 = vst [vmem:[#allocation4 + $0x60] sm:$0xff] %v9564_v10  ;;  %v9567_v14 = vmax.f32 %v9535_v48, 0.0  ;;  %v9447_v51 = vadd.f32 %v9368_v35, %v8977_v62  ;;  %v8980_v63 = vadd.f32 %v11756_v11, %v8254_v27  ;;  %v7900_v0 = vadd.f32 %v17710_v34, %v17709_v57  ;;  %v17713_v11 = vld [vmem:[#allocation58_spill] sm:$0xff] }
 0x458   : > { %v9384_v60 = vpop.f32.mrf.mxu0  ;;  %v9533_v2 = vadd.f32 %v17068_v28, %v9495_v36  ;;  %v9500_v41 = vmul.f32 %v17065_v33, %v9449_v25  ;;  %v8901_v45 = vpop.f32.mrf.mxu1  ;;  %v9626_v30 = vld [vmem:[#allocation4 + $0x50] ss:$2 sm:$0xff]  ;;  %v9658_v56 = vld [vmem:[#allocation4 + $0x51] ss:$2 sm:$0xff]  ;;  %v8256_v52 = vadd.f32 %v17713_v11, %v7897_v32  ;;  %v7906_v32 = vadd.f32 %v17720_v12, %v17719_v19 }
 0x459   : > { %9599 = vst [vmem:[#allocation4 + $0x78] sm:$0xff] %v9567_v14  ;;  %v9498_v6 = vmul.f32 %v17065_v33, %v9447_v51  ;;  %v9450_v61 = vadd.f32 %v11790_v58, %v8980_v63  ;;  %v8978_v35 = vadd.f32 %v8901_v45, %v8252_v50  ;;  %v9684_v17 = vmax.f32 %v9626_v30, %v9658_v56  ;;  %v17714_v50 = vld [vmem:[#allocation60_spill] sm:$0xff]  ;;  %v17715_v63 = vld [vmem:[#allocation62_spill] sm:$0xff]  ;;  %v17717_v30 = vld [vmem:[#allocation37_spill] sm:$0xff] }
 0x45a   : > { %v11794_v27 = vpop.f32.mrf.mxu0  ;;  %v9565_v46 = vmax.f32 %v9533_v2, 0.0  ;;  %v9538_v22 = vadd.f32 %v17068_v28, %v9500_v41  ;;  %v11759_v9 = vpop.f32.mrf.mxu1  ;;  %v8259_v26 = vadd.f32 %v17715_v63, %v7900_v0  ;;  %v17718_v56 = vld [vmem:[#allocation71_spill] sm:$0xff]  ;;  %v17729_v63 = vld [vmem:[#allocation77_spill] sm:$0xff] }
 0x45b   : > { %v9624_v39 = vld [vmem:[#allocation4 + $0x40] ss:$2 sm:$0xff]  ;;  %v9656_v40 = vld [vmem:[#allocation4 + $0x41] ss:$2 sm:$0xff]  ;;  %v9536_v47 = vadd.f32 %v17068_v28, %v9498_v6  ;;  %v9501_v53 = vmul.f32 %v17065_v33, %v9450_v61  ;;  %v9448_v42 = vadd.f32 %v9371_v23, %v8978_v35  ;;  %v8983_v58 = vadd.f32 %v11759_v9, %v8257_v31 }
 0x45c   : > { %v9387_v37 = vpop.f32.mrf.mxu0  ;;  %v9683_v5 = vmax.f32 %v9624_v39, %v9656_v40  ;;  %9597 = vst [vmem:[#allocation4 + $0x68] sm:$0xff] %v9565_v46  ;;  %v9570_v43 = vmax.f32 %v9538_v22, 0.0  ;;  %v8914_v44 = vpop.f32.mrf.mxu1  ;;  %v17712_v23 = vld [vmem:[#allocation69_spill] sm:$0xff]  ;;  %v7901_v6 = vadd.f32 %v17718_v56, %v17717_v30 }
 0x45d   : > { %v9568_v3 = vmax.f32 %v9536_v47, 0.0  ;;  %v9539_v1 = vadd.f32 %v17068_v28, %v9501_v53  ;;  %v9499_v7 = vmul.f32 %v17065_v33, %v9448_v42  ;;  %v9453_v18 = vadd.f32 %v11793_v21, %v8983_v58  ;;  %v17721_v42 = vld [vmem:[#allocation34_spill] sm:$0xff]  ;;  %v17722_v58 = vld [vmem:[#allocation75_spill] sm:$0xff] }
 0x45e   : > { %v11797_v59 = vpop.f32.mrf.mxu0  ;;  %v7903_v13 = vadd.f32 %v17712_v23, %v17711_v16  ;;  %v9697_v4 = vmax.f32 %v9683_v5, %v9684_v17  ;;  %9602 = vst [vmem:[#allocation4 + $0x90] sm:$0xff] %v9570_v43  ;;  %v8981_v38 = vadd.f32 %v8914_v44, %v8255_v15  ;;  %v11760_v29 = vpop.f32.mrf.mxu1  ;;  %v8261_v21 = vadd.f32 %v17714_v50, %v7902_v55  ;;  %v17723_v23 = vld [vmem:[#allocation66_spill] sm:$0xff] }
 0x45f   : > { %9600 = vst [vmem:[#allocation4 + $0x80] sm:$0xff] %v9568_v3  ;;  %v9571_v10 = vmax.f32 %v9539_v1, 0.0  ;;  %v9537_v48 = vadd.f32 %v17068_v28, %v9499_v7  ;;  %v9504_v62 = vmul.f32 %v17065_v33, %v9453_v18  ;;  %v8984_v36 = vadd.f32 %v11760_v29, %v8258_v20  ;;  %v17725_v29 = vld [vmem:[#allocation40_spill] sm:$0xff] }
 0x460   : > { %v9400_v25 = vpop.f32.mrf.mxu0  ;;  %9705 = vst [vmem:[%s12208_s13 + $0x10] sm:$0xff] %v9697_v4  ;;  %v9451_v14 = vadd.f32 %v9384_v60, %v8981_v38  ;;  %v8917_v51 = vpop.f32.mrf.mxu1  ;;  %v9630_v31 = vld [vmem:[#allocation4 + $0x70] ss:$2 sm:$0xff]  ;;  %v9662_v49 = vld [vmem:[#allocation4 + $0x71] ss:$2 sm:$0xff]  ;;  %v8262_v20 = vadd.f32 %v17716_v54, %v7903_v13  ;;  %v7904_v57 = vadd.f32 %v17722_v58, %v17721_v42  ;;  %v8260_v13 = vadd.f32 %v17723_v23, %v7901_v6 }
 0x461   : > { %9603 = vst [vmem:[#allocation4 + $0x98] sm:$0xff] %v9571_v10  ;;  %v9569_v15 = vmax.f32 %v9537_v48, 0.0  ;;  %v9542_v2 = vadd.f32 %v17068_v28, %v9504_v62  ;;  %v9454_v41 = vadd.f32 %v11794_v27, %v8984_v36  ;;  %v8982_v35 = vadd.f32 %v8917_v51, %v8256_v52  ;;  %v17724_v4 = vld [vmem:[#allocation68_spill] sm:$0xff]  ;;  %v17727_v52 = vld [vmem:[#allocation70_spill] sm:$0xff] }
 0x462   : > { %v11798_v45 = vpop.f32.mrf.mxu0  ;;  %v9502_v61 = vmul.f32 %v17065_v33, %v9451_v14  ;;  %v11763_v60 = vpop.f32.mrf.mxu1  ;;  %v9686_v9 = vmax.f32 %v9630_v31, %v9662_v49  ;;  %v8265_v38 = vadd.f32 %v17724_v4, %v7906_v32  ;;  %v17726_v10 = vld [vmem:[#allocation76_spill] sm:$0xff]  ;;  %v8263_v50 = vadd.f32 %v17727_v52, %v7904_v57  ;;  %v17728_v51 = vld [vmem:[#allocation42_spill] sm:$0xff] }
 0x463   : > { %v9628_v8 = vld [vmem:[#allocation4 + $0x60] ss:$2 sm:$0xff]  ;;  %v9660_v24 = vld [vmem:[#allocation4 + $0x61] ss:$2 sm:$0xff]  ;;  %9601 = vst [vmem:[#allocation4 + $0x88] sm:$0xff] %v9569_v15  ;;  %v9574_v55 = vmax.f32 %v9542_v2, 0.0  ;;  %v9505_v46 = vmul.f32 %v17065_v33, %v9454_v41  ;;  %v8987_v27 = vadd.f32 %v11763_v60, %v8261_v21  ;;  %v9452_v47 = vadd.f32 %v9387_v37, %v8982_v35 }
 0x464   : > { %v9403_v22 = vpop.f32.mrf.mxu0  ;;  %v9685_v39 = vmax.f32 %v9628_v8, %v9660_v24  ;;  %v9540_v40 = vadd.f32 %v17068_v28, %v9502_v61  ;;  %v8930_v53 = vpop.f32.mrf.mxu1  ;;  %v7907_v48 = vadd.f32 %v17726_v10, %v17725_v29  ;;  %v17730_v35 = vld [vmem:[#allocation72_spill] sm:$0xff] }
 0x465   : > { %9606 = vst [vmem:[#allocation4 + $0xb0] sm:$0xff] %v9574_v55  ;;  %v9543_v34 = vadd.f32 %v17068_v28, %v9505_v46  ;;  %v9457_v0 = vadd.f32 %v11797_v59, %v8987_v27  ;;  %v8985_v17 = vadd.f32 %v8930_v53, %v8259_v26  ;;  %v9503_v44 = vmul.f32 %v17065_v33, %v9452_v47 }
 0x466   : > { %v9698_v5 = vmax.f32 %v9685_v39, %v9686_v9  ;;  %v9572_v43 = vmax.f32 %v9540_v40, 0.0  ;;  %v11764_v3 = vpop.f32.mrf.mxu1  ;;  %v11801_v1 = vpop.f32.mrf.mxu0  ;;  %v7905_v26 = vadd.f32 %v17729_v63, %v17728_v51  ;;  %v8266_v60 = vadd.f32 %v17730_v35, %v7907_v48  ;;  %v17731_v40 = vld [vmem:[#allocation74_spill] sm:$0xff] }
 0x467   : > { %v9575_v7 = vmax.f32 %v9543_v34, 0.0  ;;  %v9508_v18 = vmul.f32 %v17065_v33, %v9457_v0  ;;  %v9455_v37 = vadd.f32 %v9400_v25, %v8985_v17  ;;  %v8988_v16 = vadd.f32 %v11764_v3, %v8262_v20 }
 0x468   : > { %9706 = vst [vmem:[%s12208_s13 + $0x18] sm:$0xff] %v9698_v5  ;;  %v9634_v59 = vld [vmem:[#allocation4 + $0x90] ss:$2 sm:$0xff]  ;;  %v9666_v62 = vld [vmem:[#allocation4 + $0x91] ss:$2 sm:$0xff]  ;;  %9604 = vst [vmem:[#allocation4 + $0xa0] sm:$0xff] %v9572_v43  ;;  %v9541_v36 = vadd.f32 %v17068_v28, %v9503_v44  ;;  %v8933_v11 = vpop.f32.mrf.mxu1  ;;  %v9416_v20 = vpop.f32.mrf.mxu0  ;;  %v8264_v47 = vadd.f32 %v17731_v40, %v7905_v26 }
 0x469   : > { %9607 = vst [vmem:[#allocation4 + $0xb8] sm:$0xff] %v9575_v7  ;;  %v9546_v25 = vadd.f32 %v17068_v28, %v9508_v18  ;;  %v9506_v21 = vmul.f32 %v17065_v33, %v9455_v37  ;;  %v9458_v14 = vadd.f32 %v11798_v45, %v8988_v16  ;;  %v9688_v31 = vmax.f32 %v9634_v59, %v9666_v62 }
 0x46a   : > { %v9632_v49 = vld [vmem:[#allocation4 + $0x80] ss:$2 sm:$0xff]  ;;  %v9664_v15 = vld [vmem:[#allocation4 + $0x81] ss:$2 sm:$0xff]  ;;  %v9573_v2 = vmax.f32 %v9541_v36, 0.0  ;;  %v8986_v41 = vadd.f32 %v8933_v11, %v8260_v13  ;;  %v11767_v54 = vpop.f32.mrf.mxu1  ;;  %v11802_v39 = vpop.f32.mrf.mxu0 }
 0x46b   : > { %v9687_v30 = vmax.f32 %v9632_v49, %v9664_v15  ;;  %v9578_v56 = vmax.f32 %v9546_v25, 0.0  ;;  %v9544_v6 = vadd.f32 %v17068_v28, %v9506_v21  ;;  %v9509_v61 = vmul.f32 %v17065_v33, %v9458_v14 }
 0x46c   : > { %9605 = vst [vmem:[#allocation4 + $0xa8] sm:$0xff] %v9573_v2  ;;  %v9456_v45 = vadd.f32 %v9403_v22, %v8986_v41  ;;  %v8991_v19 = vadd.f32 %v11767_v54, %v8265_v38  ;;  %v8946_v12 = vpop.f32.mrf.mxu1  ;;  %v9419_v7 = vpop.f32.mrf.mxu0 }
 0x46d   : > { %v9699_v32 = vmax.f32 %v9687_v30, %v9688_v31  ;;  %9610 = vst [vmem:[#allocation4 + $0xd0] sm:$0xff] %v9578_v56  ;;  %v9576_v8 = vmax.f32 %v9544_v6, 0.0  ;;  %v9547_v24 = vadd.f32 %v17068_v28, %v9509_v61  ;;  %v8989_v55 = vadd.f32 %v8946_v12, %v8263_v50 }
 0x46e   : > { %v9507_v46 = vmul.f32 %v17065_v33, %v9456_v45  ;;  %v9461_v27 = vadd.f32 %v11801_v1, %v8991_v19  ;;  %v11768_v9 = vpop.f32.mrf.mxu1 }
 0x46f   : > { %9707 = vst [vmem:[%s12208_s13 + $0x20] sm:$0xff] %v9699_v32  ;;  %9608 = vst [vmem:[#allocation4 + $0xc0] sm:$0xff] %v9576_v8  ;;  %v9579_v53 = vmax.f32 %v9547_v24, 0.0  ;;  %v9459_v42 = vadd.f32 %v9416_v20, %v8989_v55  ;;  %v8992_v22 = vadd.f32 %v11768_v9, %v8266_v60 }
 0x470   : > { %v9545_v58 = vadd.f32 %v17068_v28, %v9507_v46  ;;  %v9512_v57 = vmul.f32 %v17065_v33, %v9461_v27  ;;  %v8949_v34 = vpop.f32.mrf.mxu1  ;;  %v9638_v0 = vld [vmem:[#allocation4 + $0xb0] ss:$2 sm:$0xff]  ;;  %v9670_v17 = vld [vmem:[#allocation4 + $0xb1] ss:$2 sm:$0xff] }
 0x471   : > { %9611 = vst [vmem:[#allocation4 + $0xd8] sm:$0xff] %v9579_v53  ;;  %v9510_v5 = vmul.f32 %v17065_v33, %v9459_v42  ;;  %v9462_v43 = vadd.f32 %v11802_v39, %v8992_v22  ;;  %v8990_v44 = vadd.f32 %v8949_v34, %v8264_v47  ;;  %v9690_v4 = vmax.f32 %v9638_v0, %v9670_v17 }
 0x472   : > { %v9577_v3 = vmax.f32 %v9545_v58, 0.0  ;;  %v9550_v1 = vadd.f32 %v17068_v28, %v9512_v57 }
 0x473   : > { %v9636_v18 = vld [vmem:[#allocation4 + $0xa0] ss:$2 sm:$0xff]  ;;  %v9668_v37 = vld [vmem:[#allocation4 + $0xa1] ss:$2 sm:$0xff]  ;;  %v9548_v16 = vadd.f32 %v17068_v28, %v9510_v5  ;;  %v9513_v23 = vmul.f32 %v17065_v33, %v9462_v43  ;;  %v9460_v13 = vadd.f32 %v9419_v7, %v8990_v44 }
 0x474   : > { %v9689_v38 = vmax.f32 %v9636_v18, %v9668_v37  ;;  %9609 = vst [vmem:[#allocation4 + $0xc8] sm:$0xff] %v9577_v3  ;;  %v9582_v29 = vmax.f32 %v9550_v1, 0.0 }
 0x475   : > { %v9580_v10 = vmax.f32 %v9548_v16, 0.0  ;;  %v9551_v48 = vadd.f32 %v17068_v28, %v9513_v23  ;;  %v9511_v59 = vmul.f32 %v17065_v33, %v9460_v13 }
 0x476   : > { %v9700_v62 = vmax.f32 %v9689_v38, %v9690_v4  ;;  %9614 = vst [vmem:[#allocation4 + $0xf0] sm:$0xff] %v9582_v29 }
 0x477   : > { %9612 = vst [vmem:[#allocation4 + $0xe0] sm:$0xff] %v9580_v10  ;;  %v9583_v36 = vmax.f32 %v9551_v48, 0.0  ;;  %v9549_v11 = vadd.f32 %v17068_v28, %v9511_v59 }
 0x478   : > { %9708 = vst [vmem:[%s12208_s13 + $0x28] sm:$0xff] %v9700_v62  ;;  %v9642_v52 = vld [vmem:[#allocation4 + $0xd0] ss:$2 sm:$0xff]  ;;  %v9674_v50 = vld [vmem:[#allocation4 + $0xd1] ss:$2 sm:$0xff] }
 0x479   : > { %9615 = vst [vmem:[#allocation4 + $0xf8] sm:$0xff] %v9583_v36  ;;  %v9581_v25 = vmax.f32 %v9549_v11, 0.0  ;;  %v9692_v51 = vmax.f32 %v9642_v52, %v9674_v50 }
 0x47b   : > { %v9640_v21 = vld [vmem:[#allocation4 + $0xc0] ss:$2 sm:$0xff]  ;;  %v9672_v14 = vld [vmem:[#allocation4 + $0xc1] ss:$2 sm:$0xff]  ;;  %9613 = vst [vmem:[#allocation4 + $0xe8] sm:$0xff] %v9581_v25 }
 0x47c   : > { %v9691_v63 = vmax.f32 %v9640_v21, %v9672_v14 }
 0x47e   : > { %v9701_v26 = vmax.f32 %v9691_v63, %v9692_v51 }
 0x480   : > { %9709 = vst [vmem:[%s12208_s13 + $0x30] sm:$0xff] %v9701_v26  ;;  %v9646_v33 = vld [vmem:[#allocation4 + $0xf0] ss:$2 sm:$0xff]  ;;  %v9678_v31 = vld [vmem:[#allocation4 + $0xf1] ss:$2 sm:$0xff] }
 0x481   : > { %v9694_v2 = vmax.f32 %v9646_v33, %v9678_v31 }
 0x482   : > { %v9644_v49 = vld [vmem:[#allocation4 + $0xe0] ss:$2 sm:$0xff]  ;;  %v9676_v15 = vld [vmem:[#allocation4 + $0xe1] ss:$2 sm:$0xff] }
 0x483   : > { %v9693_v41 = vmax.f32 %v9644_v49, %v9676_v15 }
 0x485   : > { %v9702_v28 = vmax.f32 %v9693_v41, %v9694_v2 }
 0x487   : > { %9710 = vst [vmem:[%s12208_s13 + $0x38] sm:$0xff] %v9702_v28 }
 0x488 PF: > { %s10884_s9 = sshll.u32 %s12079_s18, 10  ;;  %s9725_s14 = sshll.u32 %s12208_s13, 4  ;;  %s17234_s14 = int_to_ptr.vmem [resolvable:$true] %s9725_s14 }
 0x489   : > { %s17231_s19 = scalar_lea.hbm %s17293_s4, %s10884_s9  ;;  %s17238_s23 = scalar_lea.sflag [#allocation6], %s200_s6 }
 0x48a   : > { %s12003_s24 = scalar_lea.vmem %s17234_s14, 1024  ;;  %s12099_s18 = smov [#allocation5]  }
 0x48b   : > { %p12004_p5 = scmp.ne.s32.totalorder %s17234_s14, %s12003_s24  ;;  %s12007_s27 = sshll.u32 %s12099_s18, 4  ;;  %s12008_s27 = int_to_ptr.vmem [resolvable:$false] %s12007_s27 }
 0x48c   : > { %s12009_s12 = scalar_lea.vmem %s12008_s27, 2048  ;;  %p12010_p9 = scmp.lt.s32.totalorder %s17234_s14, %s12008_s27 }
 0x48d   : > { %p12005_p6 = pnand %p12004_p5, %p12179_p3  ;;  %p12011_p10 = scmp.lt.s32.totalorder %s12009_s12, %s12003_s24 }
 0x48f   : > { %p12006_p7 = pneg %p12005_p6  ;;  %p12012_p11 = por %p12011_p10, %p12010_p9 }
 0x491   : > { %p12013_p12 = pnand %p12012_p11, %p12006_p7 }
 0x493   : > { %12016 = shalt.err (!%p12013_p12)
}
 0x494   : > { %s12017_s6 = scalar_lea.hbm %s17231_s19, 1024  ;;  %s12021_s7 = scalar_lea.hbm %s17293_s4, 2048 }
 0x495   : > { %p12018_p13 = scmp.ne.s32.totalorder %s17231_s19, %s12017_s6  ;;  %p12022_p2 = scmp.lt.s32.totalorder %s17231_s19, %s17293_s4 }
 0x496   : > { %p12023_p4 = scmp.lt.s32.totalorder %s12021_s7, %s12017_s6 }
 0x497   : > { %p12019_p0 = pnand %p12018_p13, %p12179_p3 }
 0x498   : > { %p12024_p5 = por %p12023_p4, %p12022_p2 }
 0x499   : > { %p12020_p1 = pneg %p12019_p0 }
 0x49b   : > { %p12025_p6 = pnand %p12024_p5, %p12020_p1 }
 0x49d   : > { %12028 = shalt.err (!%p12025_p6)
}
 0x49e   : > { %s12100_s10 = smov 128   ;;  %s12101_s11 = smov 8  }
 0x49f   : > { %11828 = dma.vmem_to_hbm [thread:$0]  (%p12179_p3), %s17234_s14, 1024, %s17231_s19, %s17238_s23, %s12100_s10, %s12100_s10, %s12101_s11  }
 0x4a0 PF: > { %p11834_p7 = scmp.ge.s32.totalorder %s12095_s22, 2  ;;  %s9740_s24 = sand.u32 1, %s12067_s15  }
 0x4a1   : > { %s9741_s18 = scalar_lea.sflag [#allocation6], %s9740_s24 }
 0x4a2   : > { %p11831_p9 = pnand %p11834_p7, %p12190_p8 }
 0x4a4   : > { %p11832_p10 = pneg %p11831_p9 }
 0x4a6   : > { %12062 = dma.done.wait (%p11832_p10), %s9741_s18, 1024  }
 0x4a7   : > { %12064 = vsyncadd (%p11832_p10), %s9741_s18, 4294966272  ;;  %s17_s22 = sadd.s32 1, %s12095_s22   ;;  %s17732_s15 = smov %s12071_s16 }
 0x4a8   : > { %p14_p11 = scmp.ge.s32.totalorder %s17_s22, 6   ;;  %s17733_s16 = smov %s12075_s17 }
 0x4a9   : > { %s17734_s17 = smov %s12188_s30  ;;  %s17735_s18 = smov %s12087_s20 }
 0x4aa   : > { %s17736_s19 = smov %s12091_s21  ;;  %s17737_s20 = smov %s17740_s25 }
 0x4ab   : > { %s17738_s21 = smov %s17744_s26  ;;  %16 = sbr.rel (!%p14_p11) target bundleno = 5 (0x5), region = 134 }
 0x4b0   :  { %9746 = vsyncpa [#allocation6], 1 }
 0x4b1   :  { %9748 = vsyncpa [#allocation6 + $0x1], 1 }

</bundles_post_ra>
